<compile_context>
chip_gen: v6e
topology: v6e:2x2x1
jax: 0.10.0
libtpu: 0.0.40
codegen_flags: <defaults>
</compile_context>

<pallas_src>
import functools

import jax
import jax.numpy as jnp
from jax import lax
from jax.experimental import pallas as pl
from jax.experimental.pallas import tpu as pltpu


# ----------------------------- shared small math ------------------------------
def _gelu(x):
    # tanh-approx GELU (see TODO(synk) above).
    return 0.5 * x * (1.0 + jnp.tanh(0.7978845608028654 * (x + 0.044715 * x * x * x)))


# Tap offsets into a (+1,+1)-padded feature map: the union of the (3,1) and (1,3)
# conv windows -> one shared 5-tap im2col for both ResMultiConv branches.
TAPS_CROSS = ((0, 1), (1, 1), (2, 1), (1, 0), (1, 2))
TAPS_5X5 = tuple((i, j) for i in range(5) for j in range(5))


def _im2col(x_nhwc, taps, ph, pw, dtype):
    """Cheap XLA glue: (B,H,W,C) -> (B*H*W, len(taps)*C) patch matrix."""
    b, h, w, c = x_nhwc.shape
    xp = jnp.pad(x_nhwc, ((0, 0), (ph, ph), (pw, pw), (0, 0)))
    cols = [xp[:, i:i + h, j:j + w, :] for (i, j) in taps]
    return jnp.concatenate(cols, axis=-1).reshape(b * h * w, len(taps) * c).astype(dtype)


def _maxpool2x2(x_nhwc):
    b, h, w, c = x_nhwc.shape
    return x_nhwc.reshape(b, h // 2, 2, w // 2, 2, c).max(axis=(2, 4))


# -------------------------------- Pallas kernels -------------------------------
def _stage1_kernel(a_ref, w_ref, b_ref, g_ref, be_ref, o_ref, *, n_batch, hw):
    """conv1a(3x1)+bn1a+relu || conv1b(1x3)+bn1b+relu, concatenated along H.

    a_ref: (B*H*W, 5) f32 five-tap im2col of the cin=1 input (VPU FMA path, no MXU).
    w_ref: (5, 32) merged weights [cols 0:16 -> conv1a, cols 16:32 -> conv1b].
    """
    a = a_ref[...]
    wm = w_ref[...]
    m, kk = a.shape
    n = wm.shape[1]
    acc = jnp.zeros((m, n), jnp.float32)
    for t in range(kk):                               # K = 5 broadcast-FMAs on the VPU
        acc = acc + a[:, t:t + 1] * wm[t:t + 1, :]
    y = acc + b_ref[...]
    # per-branch training-mode BatchNorm2d (+ReLU) fused as epilogue
    inv_m = 1.0 / m
    mu = jnp.sum(y, axis=0, keepdims=True) * inv_m
    d = y - mu
    var = jnp.sum(d * d, axis=0, keepdims=True) * inv_m
    y = jnp.maximum(d * lax.rsqrt(var + 1e-5) * g_ref[...] + be_ref[...], 0.0)
    # write torch.cat((xa, xb), dim=H) directly as NHWC(B, 2H, W, 16) flattened rows
    half = n // 2
    for b in range(n_batch):
        o_ref[2 * b * hw:(2 * b + 1) * hw, :] = y[b * hw:(b + 1) * hw, :half]
        o_ref[(2 * b + 1) * hw:(2 * b + 2) * hw, :] = y[b * hw:(b + 1) * hw, half:]


def _conv_bn_relu_kernel(a_ref, w_ref, b_ref, g_ref, be_ref, o_ref):
    """Fused conv stage: bf16 MXU matmul + bias (+ folded residual/concat via the
    packed weight) + training-mode BatchNorm + ReLU epilogue (all stats in f32)."""
    y = jnp.dot(a_ref[...], w_ref[...], preferred_element_type=jnp.float32) + b_ref[...]
    inv_m = 1.0 / y.shape[0]
    mu = jnp.sum(y, axis=0, keepdims=True) * inv_m
    d = y - mu
    var = jnp.sum(d * d, axis=0, keepdims=True) * inv_m
    o_ref[...] = jnp.maximum(d * lax.rsqrt(var + 1e-5) * g_ref[...] + be_ref[...], 0.0)


def _gmlp_kernel(x_ref, g0_ref, b0_ref, win_ref, bin_ref, wqkv_ref, wao_ref, bao_ref,
                 sgg_ref, sgb_ref, sw_ref, sb_ref, wout_ref, bout_ref, o_ref,
                 *, d, d_gate, attn_dim):
    """One whole Residual(PreNorm(gMLPBlock+tiny attention)) + trailing ReLU.

    Block = one batch element: x_ref (seq=128, 128).  All feature widths are padded
    to 128 lanes with exact zeros (packed weights + masked LayerNorms), so every MXU
    contraction is 128-aligned.
    """
    f32, bf16 = jnp.float32, jnp.bfloat16
    x = x_ref[...]                                        # (128, 128); lanes >= d are 0
    lane = lax.broadcasted_iota(jnp.int32, x.shape, 1)

    def masked_ln(z, width, gamma, beta):
        msk = (lane < width).astype(f32)
        mu = jnp.sum(z * msk, axis=-1, keepdims=True) * (1.0 / width)
        dz = (z - mu) * msk
        var = jnp.sum(dz * dz, axis=-1, keepdims=True) * (1.0 / width)
        return dz * lax.rsqrt(var + 1e-5) * gamma + beta  # padded lanes stay exactly 0

    xn = masked_ln(x, d, g0_ref[...], b0_ref[...])        # PreNorm
    xnb = xn.astype(bf16)
    dp = x.shape[1]

    # proj_in + GELU; packed weight gives [res | gate], each 128 lanes wide
    h = _gelu(jnp.dot(xnb, win_ref[...].astype(bf16), preferred_element_type=f32)
              + bin_ref[...])
    res_h, gate_h = h[:, :dp], h[:, dp:]

    # tiny self-attention (aMLP, attn_dim=64) on the pre-norm'd input -> gate_res
    qkv = jnp.dot(xnb, wqkv_ref[...].astype(bf16), preferred_element_type=f32)
    q, k, v = qkv[:, :dp], qkv[:, dp:2 * dp], qkv[:, 2 * dp:]
    sim = lax.dot_general(q.astype(bf16), k.astype(bf16),
                          (((1,), (1,)), ((), ())),
                          preferred_element_type=f32) * (attn_dim ** -0.5)
    sim = sim - jnp.max(sim, axis=-1, keepdims=True)
    pexp = jnp.exp(sim)
    attn = pexp * pl.reciprocal(jnp.sum(pexp, axis=-1, keepdims=True), approx=True)
    att_o = jnp.dot(attn.astype(bf16), v.astype(bf16), preferred_element_type=f32)
    gate_res = jnp.dot(att_o.astype(bf16), wao_ref[...].astype(bf16),
                       preferred_element_type=f32) + bao_ref[...]

    # SpatialGatingUnit: LN -> conv1d over the token axis (seq x seq matmul) -> Tanh gate
    gate_n = masked_ln(gate_h, d_gate, sgg_ref[...], sgb_ref[...])
    spat = jnp.dot(sw_ref[...].astype(bf16), gate_n.astype(bf16),
                   preferred_element_type=f32) + sb_ref[...]
    gated = jnp.tanh(spat + gate_res) * res_h

    # proj_out + Residual + trailing F.relu (fused epilogue)
    y = jnp.dot(gated.astype(bf16), wout_ref[...].astype(bf16),
                preferred_element_type=f32) + bout_ref[...] + x
    o_ref[...] = jnp.maximum(y, 0.0)


def _matmul_bias_kernel(a_ref, w_ref, b_ref, o_ref):
    o_ref[...] = (
        jnp.dot(a_ref[...].astype(jnp.bfloat16), w_ref[...].astype(jnp.bfloat16),
                preferred_element_type=jnp.float32)
        + b_ref[...]
    )


# ------------------------------- kernel wrappers -------------------------------
def _full_specs(arrs):
    # Full-array VMEM blocks, no HBM pre-padding (Mosaic pads in VMEM).
    return [pl.BlockSpec(a.shape, lambda i: (0, 0)) for a in arrs]


def _stage1(a, sp, *, n_batch, hw):
    m_out = n_batch * 2 * hw
    args = (a, sp["w"], sp["b"], sp["g"], sp["beta"])
    return pl.pallas_call(
        functools.partial(_stage1_kernel, n_batch=n_batch, hw=hw),
        out_shape=jax.ShapeDtypeStruct((m_out, 16), jnp.float32),
        grid=(1,),
        in_specs=_full_specs(args),
        out_specs=pl.BlockSpec((m_out, 16), lambda i: (0, 0)),
    )(*args)


def _conv_bn_relu(a, sp):
    m, n = a.shape[0], sp["w"].shape[1]
    args = (a, sp["w"], sp["b"], sp["g"], sp["beta"])
    return pl.pallas_call(
        _conv_bn_relu_kernel,
        out_shape=jax.ShapeDtypeStruct((m, n), jnp.float32),
        grid=(1,),
        in_specs=_full_specs(args),
        out_specs=pl.BlockSpec((m, n), lambda i: (0, 0)),
    )(*args)


def _gmlp(xs, gp, *, d, d_gate, attn_dim, seq):
    bs, dp = xs.shape
    weights = (gp["g0"], gp["b0"], gp["win"], gp["bin"], gp["wqkv"], gp["wao"],
               gp["bao"], gp["sgg"], gp["sgb"], gp["sw"], gp["sb"], gp["wout"],
               gp["bout"])
    return pl.pallas_call(
        functools.partial(_gmlp_kernel, d=d, d_gate=d_gate, attn_dim=attn_dim),
        out_shape=jax.ShapeDtypeStruct((bs, dp), jnp.float32),
        grid=(bs // seq,),                                    # one program per batch element
        in_specs=[pl.BlockSpec((seq, dp), lambda i: (i, 0))] + _full_specs(weights),
        out_specs=pl.BlockSpec((seq, dp), lambda i: (i, 0)),
        compiler_params=pltpu.CompilerParams(dimension_semantics=("parallel",)),
    )(xs, *weights)


def _fc(a, fp):
    m, n = a.shape[0], fp["w"].shape[1]
    args = (a, fp["w"], fp["b"])
    return pl.pallas_call(
        _matmul_bias_kernel,
        out_shape=jax.ShapeDtypeStruct((m, n), jnp.float32),
        grid=(1,),
        in_specs=_full_specs(args),
        out_specs=pl.BlockSpec((m, n), lambda i: (0, 0)),
    )(*args)


# --------------------------------- forward pass --------------------------------
def glam_forward(x_nchw, pp):
    f32, bf16 = jnp.float32, jnp.bfloat16
    x = jnp.transpose(x_nchw, (0, 2, 3, 1)).astype(f32)       # NCHW -> NHWC, cin = 1
    n, hh, ww, _ = x.shape

    # stage 1: conv1a + conv1b (+ per-branch BN + ReLU), concatenated along H
    a = _im2col(x, TAPS_CROSS, 1, 1, f32)                     # (N*H*W, 5)
    x = _stage1(a, pp["s1"], n_batch=n, hw=hh * ww)           # NHWC(N, 2H, W, 16) flat
    hh, c = 2 * hh, 16

    # ResMultiConv stages (2x2 maxpool after the first two)
    for name, pool in (("s2", True), ("s3", True), ("s4", False)):
        a = _im2col(x.reshape(n, hh, ww, c), TAPS_CROSS, 1, 1, bf16)
        x = _conv_bn_relu(a, pp[name])                        # (N*H*W, 2c)
        c *= 2
        if pool:
            pooled = _maxpool2x2(x.reshape(n, hh, ww, c))
            hh, ww = hh // 2, ww // 2
            x = pooled.reshape(n * hh * ww, c)

    # conv5 (5x5, 128->128) + bn5 + relu
    a = _im2col(x.reshape(n, hh, ww, c), TAPS_5X5, 2, 2, bf16)
    x = _conv_bn_relu(a, pp["s5"])                            # (N*H*W, 128)

    # to gMLP sequence: tokens = 128 channels, features = H*W, zero-pad features to 128
    dim = hh * ww
    seq = c                                                   # 128
    xs = jnp.transpose(x.reshape(n, dim, seq), (0, 2, 1))     # (N, 128, dim)
    xs = jnp.pad(xs, ((0, 0), (0, 0), (0, 128 - dim))).reshape(n * seq, 128)
    y = _gmlp(xs, pp["gmlp"], d=dim, d_gate=2 * dim, attn_dim=64, seq=seq)

    # flatten the true features + final fc (trailing ReLU already fused in the gMLP kernel)
    yf = y.reshape(n, seq, 128)[:, :, :dim].reshape(n, seq * dim)
    return _fc(yf, pp["fc"])


# ------------------------------- parameter packing -----------------------------
def pack_params(p):
    """One-time repack of the natural (PyTorch-like) params into the fused/padded
    layouts the kernels consume (residuals folded into weights, bf16 MXU operands,
    128-lane padded gMLP weights)."""
    f32, bf16 = jnp.float32, jnp.bfloat16
    row = lambda v: v.reshape(1, -1).astype(f32)
    out = {}

    # stage 1: merge conv1a(3x1) and conv1b(1x3) into one 5-tap weight (cols 0:16 / 16:32)
    w1a, w1b = p["conv1a"]["w"], p["conv1b"]["w"]             # HWIO (3,1,1,16) / (1,3,1,16)
    w = jnp.zeros((5, 32), f32)
    w = w.at[0, :16].set(w1a[0, 0, 0]).at[1, :16].set(w1a[1, 0, 0]).at[2, :16].set(w1a[2, 0, 0])
    w = w.at[1, 16:].set(w1b[0, 1, 0]).at[3, 16:].set(w1b[0, 0, 0]).at[4, 16:].set(w1b[0, 2, 0])
    out["s1"] = dict(
        w=w,
        b=row(jnp.concatenate([p["conv1a"]["b"], p["conv1b"]["b"]])),
        g=row(jnp.concatenate([p["bn1a"]["g"], p["bn1b"]["g"]])),
        beta=row(jnp.concatenate([p["bn1a"]["b"], p["bn1b"]["b"]])),
    )

    def pack_resmulti(q, c):
        # ResMultiConv(c): conv3 = (3,1) pad(1,0), conv5 = (1,3) pad(0,1); residuals
        # "+x" are folded into the centre-tap block as identity matrices.
        w3, w5 = q["conv3"]["w"], q["conv5"]["w"]
        eye = jnp.eye(c, dtype=f32)
        wm = jnp.zeros((5 * c, 2 * c), f32)
        wm = wm.at[0 * c:1 * c, :c].set(w3[0, 0])
        wm = wm.at[1 * c:2 * c, :c].set(w3[1, 0] + eye)
        wm = wm.at[2 * c:3 * c, :c].set(w3[2, 0])
        wm = wm.at[1 * c:2 * c, c:].set(w5[0, 1] + eye)
        wm = wm.at[3 * c:4 * c, c:].set(w5[0, 0])
        wm = wm.at[4 * c:5 * c, c:].set(w5[0, 2])
        return dict(w=wm.astype(bf16),
                    b=row(jnp.concatenate([q["conv3"]["b"], q["conv5"]["b"]])),
                    g=row(q["bn"]["g"]), beta=row(q["bn"]["b"]))

    out["s2"] = pack_resmulti(p["conv2"], 16)
    out["s3"] = pack_resmulti(p["conv3"], 32)
    out["s4"] = pack_resmulti(p["conv4"], 64)
    out["s5"] = dict(w=p["conv5"]["w"].reshape(25 * 128, 128).astype(bf16),
                     b=row(p["conv5"]["b"]), g=row(p["bn5"]["g"]), beta=row(p["bn5"]["b"]))

    # gMLP / aMLP block: every width zero-padded to 128 lanes.
    g = p["gmlp"]
    d = g["ln0_g"].shape[0]
    hf, att, dp = 2 * d, 64, 128
    # TODO(synk): generalize padded widths for the full GLAM shape (26,63) where dim > 64.
    assert hf <= dp, "fused gMLP kernel assumes gMLP dim <= 64"

    def lane_pad(v, width):
        return jnp.zeros((1, width), f32).at[0, :v.shape[0]].set(v)

    win = jnp.zeros((dp, 2 * dp), f32)
    win = win.at[:d, :hf].set(g["w_in"][:, :hf]).at[:d, dp:dp + hf].set(g["w_in"][:, hf:])
    binp = jnp.zeros((1, 2 * dp), f32)
    binp = binp.at[0, :hf].set(g["b_in"][:hf]).at[0, dp:dp + hf].set(g["b_in"][hf:])
    wqkv = jnp.zeros((dp, 3 * dp), f32)
    wqkv = wqkv.at[:d, :att].set(g["w_qkv"][:, :att])
    wqkv = wqkv.at[:d, dp:dp + att].set(g["w_qkv"][:, att:2 * att])
    wqkv = wqkv.at[:d, 2 * dp:2 * dp + att].set(g["w_qkv"][:, 2 * att:])
    wao = jnp.zeros((dp, dp), f32).at[:att, :hf].set(g["w_ao"])
    wout = jnp.zeros((dp, dp), f32).at[:hf, :d].set(g["w_out"])
    out["gmlp"] = dict(
        g0=lane_pad(g["ln0_g"], dp), b0=lane_pad(g["ln0_b"], dp),
        win=win, bin=binp, wqkv=wqkv,
        wao=wao, bao=lane_pad(g["b_ao"], dp),
        sgg=lane_pad(g["sgu_ln_g"], dp), sgb=lane_pad(g["sgu_ln_b"], dp),
        sw=g["sgu_w"].astype(f32), sb=g["sgu_b"].reshape(-1, 1).astype(f32),
        wout=wout, bout=lane_pad(g["b_out"], dp),
    )
    out["fc"] = dict(w=p["fc"]["w"].astype(f32), b=row(p["fc"]["b"]))
    return out


# ------------------------------ pure-JAX reference ------------------------------
def reference_forward(x_nchw, p):
    f32 = jnp.float32

    def conv(z, w, b, ph, pw):
        y = lax.conv_general_dilated(z, w, (1, 1), [(ph, ph), (pw, pw)],
                                     dimension_numbers=("NHWC", "HWIO", "NHWC"))
        return y + b

    def bn_relu(z, g, b):
        mu = jnp.mean(z, axis=(0, 1, 2))
        var = jnp.var(z, axis=(0, 1, 2))
        return jnp.maximum((z - mu) * lax.rsqrt(var + 1e-5) * g + b, 0.0)

    def ln(z, g, b):
        mu = jnp.mean(z, axis=-1, keepdims=True)
        var = jnp.var(z, axis=-1, keepdims=True)
        return (z - mu) * lax.rsqrt(var + 1e-5) * g + b

    def resmulti(z, q):
        x3 = conv(z, q["conv3"]["w"], q["conv3"]["b"], 1, 0) + z
        x5 = conv(z, q["conv5"]["w"], q["conv5"]["b"], 0, 1) + z
        return bn_relu(jnp.concatenate([x3, x5], axis=-1), q["bn"]["g"], q["bn"]["b"])

    x = jnp.transpose(x_nchw, (0, 2, 3, 1)).astype(f32)
    xa = bn_relu(conv(x, p["conv1a"]["w"], p["conv1a"]["b"], 1, 0), p["bn1a"]["g"], p["bn1a"]["b"])
    xb = bn_relu(conv(x, p["conv1b"]["w"], p["conv1b"]["b"], 0, 1), p["bn1b"]["g"], p["bn1b"]["b"])
    x = jnp.concatenate([xa, xb], axis=1)
    x = _maxpool2x2(resmulti(x, p["conv2"]))
    x = _maxpool2x2(resmulti(x, p["conv3"]))
    x = resmulti(x, p["conv4"])
    x = bn_relu(conv(x, p["conv5"]["w"], p["conv5"]["b"], 2, 2), p["bn5"]["g"], p["bn5"]["b"])
    n, hh, ww, c = x.shape
    xs = jnp.transpose(x, (0, 3, 1, 2)).reshape(n, c, hh * ww)

    g = p["gmlp"]
    xn = ln(xs, g["ln0_g"], g["ln0_b"])
    att = 64
    qkv = xn @ g["w_qkv"]
    q, k, v = qkv[..., :att], qkv[..., att:2 * att], qkv[..., 2 * att:]
    sim = jnp.einsum("bid,bjd->bij", q, k) * (att ** -0.5)
    attn = jax.nn.softmax(sim, axis=-1)
    gate_res = jnp.einsum("bij,bjd->bid", attn, v) @ g["w_ao"] + g["b_ao"]
    h = _gelu(xn @ g["w_in"] + g["b_in"])
    half = h.shape[-1] // 2
    res, gate = h[..., :half], h[..., half:]
    gate = ln(gate, g["sgu_ln_g"], g["sgu_ln_b"])
    gate = jnp.einsum("ij,bjd->bid", g["sgu_w"], gate) + g["sgu_b"][None, :, None]
    y = jnp.tanh(gate + gate_res) * res
    y = y @ g["w_out"] + g["b_out"] + xs
    y = jnp.maximum(y, 0.0).reshape(n, -1)
    return y @ p["fc"]["w"] + p["fc"]["b"]


# -------------------------------- parameter init --------------------------------
def init_params(key, shape=(8, 16), seq_len=128, n_classes=4):
    dim = (shape[0] // 2) * (shape[1] // 4)
    ks = iter(jax.random.split(key, 64))

    def nrm(shp, fan_in):
        return jax.random.normal(next(ks), shp, jnp.float32) / jnp.sqrt(float(fan_in))

    def conv_p(kh, kw, cin, cout):
        return {"w": nrm((kh, kw, cin, cout), kh * kw * cin),        # HWIO
                "b": 0.05 * jax.random.normal(next(ks), (cout,), jnp.float32)}

    def bn_p(c):
        return {"g": 1.0 + 0.1 * jax.random.normal(next(ks), (c,), jnp.float32),
                "b": 0.1 * jax.random.normal(next(ks), (c,), jnp.float32)}

    def resmulti_p(c):
        return {"conv3": conv_p(3, 1, c, c), "conv5": conv_p(1, 3, c, c), "bn": bn_p(2 * c)}

    return {
        "conv1a": conv_p(3, 1, 1, 16), "conv1b": conv_p(1, 3, 1, 16),
        "bn1a": bn_p(16), "bn1b": bn_p(16),
        "conv2": resmulti_p(16), "conv3": resmulti_p(32), "conv4": resmulti_p(64),
        "conv5": conv_p(5, 5, 128, 128), "bn5": bn_p(128),
        "gmlp": {
            "ln0_g": jnp.ones((dim,), jnp.float32), "ln0_b": jnp.zeros((dim,), jnp.float32),
            "w_in": nrm((dim, 4 * dim), dim), "b_in": jnp.zeros((4 * dim,), jnp.float32),
            "w_qkv": nrm((dim, 3 * 64), dim),                        # aMLP tiny attention
            "w_ao": nrm((64, 2 * dim), 64), "b_ao": jnp.zeros((2 * dim,), jnp.float32),
            "sgu_ln_g": jnp.ones((2 * dim,), jnp.float32),
            "sgu_ln_b": jnp.zeros((2 * dim,), jnp.float32),
            "sgu_w": jax.random.uniform(next(ks), (seq_len, seq_len), jnp.float32,
                                        -1e-3 / seq_len, 1e-3 / seq_len),
            "sgu_b": jnp.ones((seq_len,), jnp.float32),
            "w_out": nrm((2 * dim, dim), 2 * dim), "b_out": jnp.zeros((dim,), jnp.float32),
        },
        "fc": {"w": nrm((seq_len * dim, n_classes), seq_len * dim),
               "b": jnp.zeros((n_classes,), jnp.float32)},
    }


# ------------------------------------- main --------------------------------------
if __name__ == "__main__":
    shape = (8, 16)                       # small GLAM shape -> gMLP dim = 16, seq_len = 128
    key = jax.random.PRNGKey(0)
    k_x, k_p = jax.random.split(key)
    x = jax.random.normal(k_x, (2, 1, shape[0], shape[1]), jnp.float32)   # NCHW input
    params = init_params(k_p, shape=shape)
    packed = pack_params(params)          # one-time repack (outside the forward pass)

    out = jax.block_until_ready(jax.jit(glam_forward)(x, packed))
    assert out.shape == (2, 4)
    assert bool(jnp.all(jnp.isfinite(out)))

    # Numerical sanity check against a pure-JAX f32 reference (kernel uses bf16 MXU feeds).
    with jax.default_matmul_precision("float32"):
        ref = jax.block_until_ready(jax.jit(reference_forward)(x, params))
    err = float(jnp.max(jnp.abs(out - ref)))
    assert err < 0.3, f"kernel/reference mismatch: max abs err {err}"

    print("KERNEL_OK")
</pallas_src>

<mosaic_0001>
module attributes {stable_mosaic.version = 11 : i64} {
  func.func @_stage1_kernel(%arg0: i32, %arg1: memref<256x5xf32, #tpu.memory_space<vmem>>, %arg2: memref<5x32xf32, #tpu.memory_space<vmem>>, %arg3: memref<1x32xf32, #tpu.memory_space<vmem>>, %arg4: memref<1x32xf32, #tpu.memory_space<vmem>>, %arg5: memref<1x32xf32, #tpu.memory_space<vmem>>, %arg6: memref<512x16xf32, #tpu.memory_space<vmem>>) attributes {dimension_semantics = [#tpu.dimension_semantics<arbitrary>], iteration_bounds = array<i64: 1>, scalar_prefetch = 0 : i64, scratch_operands = 0 : i64, tpu.core_type = #tpu.core_type<tc>, window_params = [{pipeline_mode = #tpu.pipeline_mode<synchronous>, transform_indices = @transform_0, window_bounds = array<i64: 256, 5>}, {pipeline_mode = #tpu.pipeline_mode<synchronous>, transform_indices = @transform_1, window_bounds = array<i64: 5, 32>}, {pipeline_mode = #tpu.pipeline_mode<synchronous>, transform_indices = @transform_2, window_bounds = array<i64: 1, 32>}, {pipeline_mode = #tpu.pipeline_mode<synchronous>, transform_indices = @transform_3, window_bounds = array<i64: 1, 32>}, {pipeline_mode = #tpu.pipeline_mode<synchronous>, transform_indices = @transform_4, window_bounds = array<i64: 1, 32>}, {pipeline_mode = #tpu.pipeline_mode<synchronous>, transform_indices = @transform_5, window_bounds = array<i64: 512, 16>}]} {
    %c0 = arith.constant 0 : index
    %c0_0 = arith.constant 0 : index
    %0 = vector.load %arg1[%c0, %c0_0] : memref<256x5xf32, #tpu.memory_space<vmem>>, vector<256x5xf32>
    %c0_1 = arith.constant 0 : index
    %c0_2 = arith.constant 0 : index
    %1 = vector.load %arg2[%c0_1, %c0_2] : memref<5x32xf32, #tpu.memory_space<vmem>>, vector<5x32xf32>
    %cst = arith.constant 0.000000e+00 : f32
    %2 = vector.broadcast %cst : f32 to vector<256x32xf32>
    %3 = vector.extract_strided_slice %0 {offsets = [0, 0], sizes = [256, 1], strides = [1, 1]} : vector<256x5xf32> to vector<256x1xf32>
    %4 = vector.extract_strided_slice %1 {offsets = [0, 0], sizes = [1, 32], strides = [1, 1]} : vector<5x32xf32> to vector<1x32xf32>
    %5 = vector.broadcast %3 : vector<256x1xf32> to vector<256x32xf32>
    %6 = vector.broadcast %4 : vector<1x32xf32> to vector<256x32xf32>
    %7 = arith.mulf %5, %6 : vector<256x32xf32>
    %8 = arith.addf %2, %7 : vector<256x32xf32>
    %9 = vector.extract_strided_slice %0 {offsets = [0, 1], sizes = [256, 1], strides = [1, 1]} : vector<256x5xf32> to vector<256x1xf32>
    %10 = vector.extract_strided_slice %1 {offsets = [1, 0], sizes = [1, 32], strides = [1, 1]} : vector<5x32xf32> to vector<1x32xf32>
    %11 = vector.broadcast %9 : vector<256x1xf32> to vector<256x32xf32>
    %12 = vector.broadcast %10 : vector<1x32xf32> to vector<256x32xf32>
    %13 = arith.mulf %11, %12 : vector<256x32xf32>
    %14 = arith.addf %8, %13 : vector<256x32xf32>
    %15 = vector.extract_strided_slice %0 {offsets = [0, 2], sizes = [256, 1], strides = [1, 1]} : vector<256x5xf32> to vector<256x1xf32>
    %16 = vector.extract_strided_slice %1 {offsets = [2, 0], sizes = [1, 32], strides = [1, 1]} : vector<5x32xf32> to vector<1x32xf32>
    %17 = vector.broadcast %15 : vector<256x1xf32> to vector<256x32xf32>
    %18 = vector.broadcast %16 : vector<1x32xf32> to vector<256x32xf32>
    %19 = arith.mulf %17, %18 : vector<256x32xf32>
    %20 = arith.addf %14, %19 : vector<256x32xf32>
    %21 = vector.extract_strided_slice %0 {offsets = [0, 3], sizes = [256, 1], strides = [1, 1]} : vector<256x5xf32> to vector<256x1xf32>
    %22 = vector.extract_strided_slice %1 {offsets = [3, 0], sizes = [1, 32], strides = [1, 1]} : vector<5x32xf32> to vector<1x32xf32>
    %23 = vector.broadcast %21 : vector<256x1xf32> to vector<256x32xf32>
    %24 = vector.broadcast %22 : vector<1x32xf32> to vector<256x32xf32>
    %25 = arith.mulf %23, %24 : vector<256x32xf32>
    %26 = arith.addf %20, %25 : vector<256x32xf32>
    %27 = vector.extract_strided_slice %0 {offsets = [0, 4], sizes = [256, 1], strides = [1, 1]} : vector<256x5xf32> to vector<256x1xf32>
    %28 = vector.extract_strided_slice %1 {offsets = [4, 0], sizes = [1, 32], strides = [1, 1]} : vector<5x32xf32> to vector<1x32xf32>
    %29 = vector.broadcast %27 : vector<256x1xf32> to vector<256x32xf32>
    %30 = vector.broadcast %28 : vector<1x32xf32> to vector<256x32xf32>
    %31 = arith.mulf %29, %30 : vector<256x32xf32>
    %32 = arith.addf %26, %31 : vector<256x32xf32>
    %c0_3 = arith.constant 0 : index
    %c0_4 = arith.constant 0 : index
    %33 = vector.load %arg3[%c0_3, %c0_4] : memref<1x32xf32, #tpu.memory_space<vmem>>, vector<1x32xf32>
    %34 = vector.broadcast %33 : vector<1x32xf32> to vector<256x32xf32>
    %35 = arith.addf %32, %34 : vector<256x32xf32>
    %cst_5 = arith.constant dense<0.000000e+00> : vector<32xf32>
    %36 = vector.multi_reduction <add>, %35, %cst_5 [0] : vector<256x32xf32> to vector<32xf32>
    %37 = vector.shape_cast %36 : vector<32xf32> to vector<1x32xf32>
    %cst_6 = arith.constant 3.906250e-03 : f32
    %38 = vector.broadcast %cst_6 : f32 to vector<1x32xf32>
    %39 = arith.mulf %37, %38 : vector<1x32xf32>
    %40 = vector.broadcast %39 : vector<1x32xf32> to vector<256x32xf32>
    %41 = arith.subf %35, %40 : vector<256x32xf32>
    %42 = arith.mulf %41, %41 : vector<256x32xf32>
    %cst_7 = arith.constant dense<0.000000e+00> : vector<32xf32>
    %43 = vector.multi_reduction <add>, %42, %cst_7 [0] : vector<256x32xf32> to vector<32xf32>
    %44 = vector.shape_cast %43 : vector<32xf32> to vector<1x32xf32>
    %cst_8 = arith.constant 3.906250e-03 : f32
    %45 = vector.broadcast %cst_8 : f32 to vector<1x32xf32>
    %46 = arith.mulf %44, %45 : vector<1x32xf32>
    %cst_9 = arith.constant 9.99999974E-6 : f32
    %47 = vector.broadcast %cst_9 : f32 to vector<1x32xf32>
    %48 = arith.addf %46, %47 : vector<1x32xf32>
    %49 = math.rsqrt %48 : vector<1x32xf32>
    %50 = vector.broadcast %49 : vector<1x32xf32> to vector<256x32xf32>
    %51 = arith.mulf %41, %50 : vector<256x32xf32>
    %c0_10 = arith.constant 0 : index
    %c0_11 = arith.constant 0 : index
    %52 = vector.load %arg4[%c0_10, %c0_11] : memref<1x32xf32, #tpu.memory_space<vmem>>, vector<1x32xf32>
    %53 = vector.broadcast %52 : vector<1x32xf32> to vector<256x32xf32>
    %54 = arith.mulf %51, %53 : vector<256x32xf32>
    %c0_12 = arith.constant 0 : index
    %c0_13 = arith.constant 0 : index
    %55 = vector.load %arg5[%c0_12, %c0_13] : memref<1x32xf32, #tpu.memory_space<vmem>>, vector<1x32xf32>
    %56 = vector.broadcast %55 : vector<1x32xf32> to vector<256x32xf32>
    %57 = arith.addf %54, %56 : vector<256x32xf32>
    %cst_14 = arith.constant 0.000000e+00 : f32
    %58 = vector.broadcast %cst_14 : f32 to vector<256x32xf32>
    %59 = arith.maximumf %57, %58 : vector<256x32xf32>
    %60 = vector.extract_strided_slice %59 {offsets = [0, 0], sizes = [128, 16], strides = [1, 1]} : vector<256x32xf32> to vector<128x16xf32>
    %c0_15 = arith.constant 0 : index
    %c0_16 = arith.constant 0 : index
    %61 = vector.load %arg6[%c0_15, %c0_16] : memref<512x16xf32, #tpu.memory_space<vmem>>, vector<128x16xf32>
    tpu.vector_store %arg6[%c0_15, %c0_16], %60 {strides = array<i32>} : memref<512x16xf32, #tpu.memory_space<vmem>>, vector<128x16xf32>,
    %62 = vector.extract_strided_slice %59 {offsets = [0, 16], sizes = [128, 16], strides = [1, 1]} : vector<256x32xf32> to vector<128x16xf32>
    %c128 = arith.constant 128 : index
    %c0_17 = arith.constant 0 : index
    %63 = vector.load %arg6[%c128, %c0_17] : memref<512x16xf32, #tpu.memory_space<vmem>>, vector<128x16xf32>
    tpu.vector_store %arg6[%c128, %c0_17], %62 {strides = array<i32>} : memref<512x16xf32, #tpu.memory_space<vmem>>, vector<128x16xf32>,
    %64 = vector.extract_strided_slice %59 {offsets = [128, 0], sizes = [128, 16], strides = [1, 1]} : vector<256x32xf32> to vector<128x16xf32>
    %c256 = arith.constant 256 : index
    %c0_18 = arith.constant 0 : index
    %65 = vector.load %arg6[%c256, %c0_18] : memref<512x16xf32, #tpu.memory_space<vmem>>, vector<128x16xf32>
    tpu.vector_store %arg6[%c256, %c0_18], %64 {strides = array<i32>} : memref<512x16xf32, #tpu.memory_space<vmem>>, vector<128x16xf32>,
    %66 = vector.extract_strided_slice %59 {offsets = [128, 16], sizes = [128, 16], strides = [1, 1]} : vector<256x32xf32> to vector<128x16xf32>
    %c384 = arith.constant 384 : index
    %c0_19 = arith.constant 0 : index
    %67 = vector.load %arg6[%c384, %c0_19] : memref<512x16xf32, #tpu.memory_space<vmem>>, vector<128x16xf32>
    tpu.vector_store %arg6[%c384, %c0_19], %66 {strides = array<i32>} : memref<512x16xf32, #tpu.memory_space<vmem>>, vector<128x16xf32>,
    return
  }
  func.func @transform_0(%arg0: i32) -> (i32, i32) {
    %c0_i32 = arith.constant 0 : i32
    %c0_i32_0 = arith.constant 0 : i32
    %c0_i32_1 = arith.constant 0 : i32
    return %c0_i32, %c0_i32_0 : i32, i32
  }
  func.func @transform_1(%arg0: i32) -> (i32, i32) {
    %c0_i32 = arith.constant 0 : i32
    %c0_i32_0 = arith.constant 0 : i32
    %c0_i32_1 = arith.constant 0 : i32
    return %c0_i32, %c0_i32_0 : i32, i32
  }
  func.func @transform_2(%arg0: i32) -> (i32, i32) {
    %c0_i32 = arith.constant 0 : i32
    %c0_i32_0 = arith.constant 0 : i32
    %c0_i32_1 = arith.constant 0 : i32
    return %c0_i32, %c0_i32_0 : i32, i32
  }
  func.func @transform_3(%arg0: i32) -> (i32, i32) {
    %c0_i32 = arith.constant 0 : i32
    %c0_i32_0 = arith.constant 0 : i32
    %c0_i32_1 = arith.constant 0 : i32
    return %c0_i32, %c0_i32_0 : i32, i32
  }
  func.func @transform_4(%arg0: i32) -> (i32, i32) {
    %c0_i32 = arith.constant 0 : i32
    %c0_i32_0 = arith.constant 0 : i32
    %c0_i32_1 = arith.constant 0 : i32
    return %c0_i32, %c0_i32_0 : i32, i32
  }
  func.func @transform_5(%arg0: i32) -> (i32, i32) {
    %c0_i32 = arith.constant 0 : i32
    %c0_i32_0 = arith.constant 0 : i32
    %c0_i32_1 = arith.constant 0 : i32
    return %c0_i32, %c0_i32_0 : i32, i32
  }
}

module attributes {stable_mosaic.version = 11 : i64} {
  func.func @_conv_bn_relu_kernel(%arg0: i32, %arg1: memref<512x80xbf16, #tpu.memory_space<vmem>>, %arg2: memref<80x32xbf16, #tpu.memory_space<vmem>>, %arg3: memref<1x32xf32, #tpu.memory_space<vmem>>, %arg4: memref<1x32xf32, #tpu.memory_space<vmem>>, %arg5: memref<1x32xf32, #tpu.memory_space<vmem>>, %arg6: memref<512x32xf32, #tpu.memory_space<vmem>>) attributes {dimension_semantics = [#tpu.dimension_semantics<arbitrary>], iteration_bounds = array<i64: 1>, scalar_prefetch = 0 : i64, scratch_operands = 0 : i64, tpu.core_type = #tpu.core_type<tc>, window_params = [{pipeline_mode = #tpu.pipeline_mode<synchronous>, transform_indices = @transform_0, window_bounds = array<i64: 512, 80>}, {pipeline_mode = #tpu.pipeline_mode<synchronous>, transform_indices = @transform_1, window_bounds = array<i64: 80, 32>}, {pipeline_mode = #tpu.pipeline_mode<synchronous>, transform_indices = @transform_2, window_bounds = array<i64: 1, 32>}, {pipeline_mode = #tpu.pipeline_mode<synchronous>, transform_indices = @transform_3, window_bounds = array<i64: 1, 32>}, {pipeline_mode = #tpu.pipeline_mode<synchronous>, transform_indices = @transform_4, window_bounds = array<i64: 1, 32>}, {pipeline_mode = #tpu.pipeline_mode<synchronous>, transform_indices = @transform_5, window_bounds = array<i64: 512, 32>}]} {
    %c0 = arith.constant 0 : index
    %c0_0 = arith.constant 0 : index
    %0 = vector.load %arg1[%c0, %c0_0] : memref<512x80xbf16, #tpu.memory_space<vmem>>, vector<512x80xbf16>
    %c0_1 = arith.constant 0 : index
    %c0_2 = arith.constant 0 : index
    %1 = vector.load %arg2[%c0_1, %c0_2] : memref<80x32xbf16, #tpu.memory_space<vmem>>, vector<80x32xbf16>
    %cst = arith.constant dense<0.000000e+00> : vector<512x32xf32>
    %2 = tpu.matmul %0, %1, %cst {dimension_numbers = #tpu.dot_dimension_numbers<[1], [0], [0], [1], [0, 0, 1, 1], [], []>} : vector<512x80xbf16>, vector<80x32xbf16>, vector<512x32xf32> -> vector<512x32xf32>
    %c0_3 = arith.constant 0 : index
    %c0_4 = arith.constant 0 : index
    %3 = vector.load %arg3[%c0_3, %c0_4] : memref<1x32xf32, #tpu.memory_space<vmem>>, vector<1x32xf32>
    %4 = vector.broadcast %3 : vector<1x32xf32> to vector<512x32xf32>
    %5 = arith.addf %2, %4 : vector<512x32xf32>
    %cst_5 = arith.constant dense<0.000000e+00> : vector<32xf32>
    %6 = vector.multi_reduction <add>, %5, %cst_5 [0] : vector<512x32xf32> to vector<32xf32>
    %7 = vector.shape_cast %6 : vector<32xf32> to vector<1x32xf32>
    %cst_6 = arith.constant 0.001953125 : f32
    %8 = vector.broadcast %cst_6 : f32 to vector<1x32xf32>
    %9 = arith.mulf %7, %8 : vector<1x32xf32>
    %10 = vector.broadcast %9 : vector<1x32xf32> to vector<512x32xf32>
    %11 = arith.subf %5, %10 : vector<512x32xf32>
    %12 = arith.mulf %11, %11 : vector<512x32xf32>
    %cst_7 = arith.constant dense<0.000000e+00> : vector<32xf32>
    %13 = vector.multi_reduction <add>, %12, %cst_7 [0] : vector<512x32xf32> to vector<32xf32>
    %14 = vector.shape_cast %13 : vector<32xf32> to vector<1x32xf32>
    %cst_8 = arith.constant 0.001953125 : f32
    %15 = vector.broadcast %cst_8 : f32 to vector<1x32xf32>
    %16 = arith.mulf %14, %15 : vector<1x32xf32>
    %cst_9 = arith.constant 9.99999974E-6 : f32
    %17 = vector.broadcast %cst_9 : f32 to vector<1x32xf32>
    %18 = arith.addf %16, %17 : vector<1x32xf32>
    %19 = math.rsqrt %18 : vector<1x32xf32>
    %20 = vector.broadcast %19 : vector<1x32xf32> to vector<512x32xf32>
    %21 = arith.mulf %11, %20 : vector<512x32xf32>
    %c0_10 = arith.constant 0 : index
    %c0_11 = arith.constant 0 : index
    %22 = vector.load %arg4[%c0_10, %c0_11] : memref<1x32xf32, #tpu.memory_space<vmem>>, vector<1x32xf32>
    %23 = vector.broadcast %22 : vector<1x32xf32> to vector<512x32xf32>
    %24 = arith.mulf %21, %23 : vector<512x32xf32>
    %c0_12 = arith.constant 0 : index
    %c0_13 = arith.constant 0 : index
    %25 = vector.load %arg5[%c0_12, %c0_13] : memref<1x32xf32, #tpu.memory_space<vmem>>, vector<1x32xf32>
    %26 = vector.broadcast %25 : vector<1x32xf32> to vector<512x32xf32>
    %27 = arith.addf %24, %26 : vector<512x32xf32>
    %cst_14 = arith.constant 0.000000e+00 : f32
    %28 = vector.broadcast %cst_14 : f32 to vector<512x32xf32>
    %29 = arith.maximumf %27, %28 : vector<512x32xf32>
    %c0_15 = arith.constant 0 : index
    %c0_16 = arith.constant 0 : index
    %30 = vector.load %arg6[%c0_15, %c0_16] : memref<512x32xf32, #tpu.memory_space<vmem>>, vector<512x32xf32>
    tpu.vector_store %arg6[%c0_15, %c0_16], %29 {strides = array<i32>} : memref<512x32xf32, #tpu.memory_space<vmem>>, vector<512x32xf32>,
    return
  }
  func.func @transform_0(%arg0: i32) -> (i32, i32) {
    %c0_i32 = arith.constant 0 : i32
    %c0_i32_0 = arith.constant 0 : i32
    %c0_i32_1 = arith.constant 0 : i32
    return %c0_i32, %c0_i32_0 : i32, i32
  }
  func.func @transform_1(%arg0: i32) -> (i32, i32) {
    %c0_i32 = arith.constant 0 : i32
    %c0_i32_0 = arith.constant 0 : i32
    %c0_i32_1 = arith.constant 0 : i32
    return %c0_i32, %c0_i32_0 : i32, i32
  }
  func.func @transform_2(%arg0: i32) -> (i32, i32) {
    %c0_i32 = arith.constant 0 : i32
    %c0_i32_0 = arith.constant 0 : i32
    %c0_i32_1 = arith.constant 0 : i32
    return %c0_i32, %c0_i32_0 : i32, i32
  }
  func.func @transform_3(%arg0: i32) -> (i32, i32) {
    %c0_i32 = arith.constant 0 : i32
    %c0_i32_0 = arith.constant 0 : i32
    %c0_i32_1 = arith.constant 0 : i32
    return %c0_i32, %c0_i32_0 : i32, i32
  }
  func.func @transform_4(%arg0: i32) -> (i32, i32) {
    %c0_i32 = arith.constant 0 : i32
    %c0_i32_0 = arith.constant 0 : i32
    %c0_i32_1 = arith.constant 0 : i32
    return %c0_i32, %c0_i32_0 : i32, i32
  }
  func.func @transform_5(%arg0: i32) -> (i32, i32) {
    %c0_i32 = arith.constant 0 : i32
    %c0_i32_0 = arith.constant 0 : i32
    %c0_i32_1 = arith.constant 0 : i32
    return %c0_i32, %c0_i32_0 : i32, i32
  }
}

module attributes {stable_mosaic.version = 11 : i64} {
  func.func @_conv_bn_relu_kernel(%arg0: i32, %arg1: memref<128x160xbf16, #tpu.memory_space<vmem>>, %arg2: memref<160x64xbf16, #tpu.memory_space<vmem>>, %arg3: memref<1x64xf32, #tpu.memory_space<vmem>>, %arg4: memref<1x64xf32, #tpu.memory_space<vmem>>, %arg5: memref<1x64xf32, #tpu.memory_space<vmem>>, %arg6: memref<128x64xf32, #tpu.memory_space<vmem>>) attributes {dimension_semantics = [#tpu.dimension_semantics<arbitrary>], iteration_bounds = array<i64: 1>, scalar_prefetch = 0 : i64, scratch_operands = 0 : i64, tpu.core_type = #tpu.core_type<tc>, window_params = [{pipeline_mode = #tpu.pipeline_mode<synchronous>, transform_indices = @transform_0, window_bounds = array<i64: 128, 160>}, {pipeline_mode = #tpu.pipeline_mode<synchronous>, transform_indices = @transform_1, window_bounds = array<i64: 160, 64>}, {pipeline_mode = #tpu.pipeline_mode<synchronous>, transform_indices = @transform_2, window_bounds = array<i64: 1, 64>}, {pipeline_mode = #tpu.pipeline_mode<synchronous>, transform_indices = @transform_3, window_bounds = array<i64: 1, 64>}, {pipeline_mode = #tpu.pipeline_mode<synchronous>, transform_indices = @transform_4, window_bounds = array<i64: 1, 64>}, {pipeline_mode = #tpu.pipeline_mode<synchronous>, transform_indices = @transform_5, window_bounds = array<i64: 128, 64>}]} {
    %c0 = arith.constant 0 : index
    %c0_0 = arith.constant 0 : index
    %0 = vector.load %arg1[%c0, %c0_0] : memref<128x160xbf16, #tpu.memory_space<vmem>>, vector<128x160xbf16>
    %c0_1 = arith.constant 0 : index
    %c0_2 = arith.constant 0 : index
    %1 = vector.load %arg2[%c0_1, %c0_2] : memref<160x64xbf16, #tpu.memory_space<vmem>>, vector<160x64xbf16>
    %cst = arith.constant dense<0.000000e+00> : vector<128x64xf32>
    %2 = tpu.matmul %0, %1, %cst {dimension_numbers = #tpu.dot_dimension_numbers<[1], [0], [0], [1], [0, 0, 1, 1], [], []>} : vector<128x160xbf16>, vector<160x64xbf16>, vector<128x64xf32> -> vector<128x64xf32>
    %c0_3 = arith.constant 0 : index
    %c0_4 = arith.constant 0 : index
    %3 = vector.load %arg3[%c0_3, %c0_4] : memref<1x64xf32, #tpu.memory_space<vmem>>, vector<1x64xf32>
    %4 = vector.broadcast %3 : vector<1x64xf32> to vector<128x64xf32>
    %5 = arith.addf %2, %4 : vector<128x64xf32>
    %cst_5 = arith.constant dense<0.000000e+00> : vector<64xf32>
    %6 = vector.multi_reduction <add>, %5, %cst_5 [0] : vector<128x64xf32> to vector<64xf32>
    %7 = vector.shape_cast %6 : vector<64xf32> to vector<1x64xf32>
    %cst_6 = arith.constant 7.812500e-03 : f32
    %8 = vector.broadcast %cst_6 : f32 to vector<1x64xf32>
    %9 = arith.mulf %7, %8 : vector<1x64xf32>
    %10 = vector.broadcast %9 : vector<1x64xf32> to vector<128x64xf32>
    %11 = arith.subf %5, %10 : vector<128x64xf32>
    %12 = arith.mulf %11, %11 : vector<128x64xf32>
    %cst_7 = arith.constant dense<0.000000e+00> : vector<64xf32>
    %13 = vector.multi_reduction <add>, %12, %cst_7 [0] : vector<128x64xf32> to vector<64xf32>
    %14 = vector.shape_cast %13 : vector<64xf32> to vector<1x64xf32>
    %cst_8 = arith.constant 7.812500e-03 : f32
    %15 = vector.broadcast %cst_8 : f32 to vector<1x64xf32>
    %16 = arith.mulf %14, %15 : vector<1x64xf32>
    %cst_9 = arith.constant 9.99999974E-6 : f32
    %17 = vector.broadcast %cst_9 : f32 to vector<1x64xf32>
    %18 = arith.addf %16, %17 : vector<1x64xf32>
    %19 = math.rsqrt %18 : vector<1x64xf32>
    %20 = vector.broadcast %19 : vector<1x64xf32> to vector<128x64xf32>
    %21 = arith.mulf %11, %20 : vector<128x64xf32>
    %c0_10 = arith.constant 0 : index
    %c0_11 = arith.constant 0 : index
    %22 = vector.load %arg4[%c0_10, %c0_11] : memref<1x64xf32, #tpu.memory_space<vmem>>, vector<1x64xf32>
    %23 = vector.broadcast %22 : vector<1x64xf32> to vector<128x64xf32>
    %24 = arith.mulf %21, %23 : vector<128x64xf32>
    %c0_12 = arith.constant 0 : index
    %c0_13 = arith.constant 0 : index
    %25 = vector.load %arg5[%c0_12, %c0_13] : memref<1x64xf32, #tpu.memory_space<vmem>>, vector<1x64xf32>
    %26 = vector.broadcast %25 : vector<1x64xf32> to vector<128x64xf32>
    %27 = arith.addf %24, %26 : vector<128x64xf32>
    %cst_14 = arith.constant 0.000000e+00 : f32
    %28 = vector.broadcast %cst_14 : f32 to vector<128x64xf32>
    %29 = arith.maximumf %27, %28 : vector<128x64xf32>
    %c0_15 = arith.constant 0 : index
    %c0_16 = arith.constant 0 : index
    %30 = vector.load %arg6[%c0_15, %c0_16] : memref<128x64xf32, #tpu.memory_space<vmem>>, vector<128x64xf32>
    tpu.vector_store %arg6[%c0_15, %c0_16], %29 {strides = array<i32>} : memref<128x64xf32, #tpu.memory_space<vmem>>, vector<128x64xf32>,
    return
  }
  func.func @transform_0(%arg0: i32) -> (i32, i32) {
    %c0_i32 = arith.constant 0 : i32
    %c0_i32_0 = arith.constant 0 : i32
    %c0_i32_1 = arith.constant 0 : i32
    return %c0_i32, %c0_i32_0 : i32, i32
  }
  func.func @transform_1(%arg0: i32) -> (i32, i32) {
    %c0_i32 = arith.constant 0 : i32
    %c0_i32_0 = arith.constant 0 : i32
    %c0_i32_1 = arith.constant 0 : i32
    return %c0_i32, %c0_i32_0 : i32, i32
  }
  func.func @transform_2(%arg0: i32) -> (i32, i32) {
    %c0_i32 = arith.constant 0 : i32
    %c0_i32_0 = arith.constant 0 : i32
    %c0_i32_1 = arith.constant 0 : i32
    return %c0_i32, %c0_i32_0 : i32, i32
  }
  func.func @transform_3(%arg0: i32) -> (i32, i32) {
    %c0_i32 = arith.constant 0 : i32
    %c0_i32_0 = arith.constant 0 : i32
    %c0_i32_1 = arith.constant 0 : i32
    return %c0_i32, %c0_i32_0 : i32, i32
  }
  func.func @transform_4(%arg0: i32) -> (i32, i32) {
    %c0_i32 = arith.constant 0 : i32
    %c0_i32_0 = arith.constant 0 : i32
    %c0_i32_1 = arith.constant 0 : i32
    return %c0_i32, %c0_i32_0 : i32, i32
  }
  func.func @transform_5(%arg0: i32) -> (i32, i32) {
    %c0_i32 = arith.constant 0 : i32
    %c0_i32_0 = arith.constant 0 : i32
    %c0_i32_1 = arith.constant 0 : i32
    return %c0_i32, %c0_i32_0 : i32, i32
  }
}

module attributes {stable_mosaic.version = 11 : i64} {
  func.func @_conv_bn_relu_kernel(%arg0: i32, %arg1: memref<32x320xbf16, #tpu.memory_space<vmem>>, %arg2: memref<320x128xbf16, #tpu.memory_space<vmem>>, %arg3: memref<1x128xf32, #tpu.memory_space<vmem>>, %arg4: memref<1x128xf32, #tpu.memory_space<vmem>>, %arg5: memref<1x128xf32, #tpu.memory_space<vmem>>, %arg6: memref<32x128xf32, #tpu.memory_space<vmem>>) attributes {dimension_semantics = [#tpu.dimension_semantics<arbitrary>], iteration_bounds = array<i64: 1>, scalar_prefetch = 0 : i64, scratch_operands = 0 : i64, tpu.core_type = #tpu.core_type<tc>, window_params = [{pipeline_mode = #tpu.pipeline_mode<synchronous>, transform_indices = @transform_0, window_bounds = array<i64: 32, 320>}, {pipeline_mode = #tpu.pipeline_mode<synchronous>, transform_indices = @transform_1, window_bounds = array<i64: 320, 128>}, {pipeline_mode = #tpu.pipeline_mode<synchronous>, transform_indices = @transform_2, window_bounds = array<i64: 1, 128>}, {pipeline_mode = #tpu.pipeline_mode<synchronous>, transform_indices = @transform_3, window_bounds = array<i64: 1, 128>}, {pipeline_mode = #tpu.pipeline_mode<synchronous>, transform_indices = @transform_4, window_bounds = array<i64: 1, 128>}, {pipeline_mode = #tpu.pipeline_mode<synchronous>, transform_indices = @transform_5, window_bounds = array<i64: 32, 128>}]} {
    %c0 = arith.constant 0 : index
    %c0_0 = arith.constant 0 : index
    %0 = vector.load %arg1[%c0, %c0_0] : memref<32x320xbf16, #tpu.memory_space<vmem>>, vector<32x320xbf16>
    %c0_1 = arith.constant 0 : index
    %c0_2 = arith.constant 0 : index
    %1 = vector.load %arg2[%c0_1, %c0_2] : memref<320x128xbf16, #tpu.memory_space<vmem>>, vector<320x128xbf16>
    %cst = arith.constant dense<0.000000e+00> : vector<32x128xf32>
    %2 = tpu.matmul %0, %1, %cst {dimension_numbers = #tpu.dot_dimension_numbers<[1], [0], [0], [1], [0, 0, 1, 1], [], []>} : vector<32x320xbf16>, vector<320x128xbf16>, vector<32x128xf32> -> vector<32x128xf32>
    %c0_3 = arith.constant 0 : index
    %c0_4 = arith.constant 0 : index
    %3 = vector.load %arg3[%c0_3, %c0_4] : memref<1x128xf32, #tpu.memory_space<vmem>>, vector<1x128xf32>
    %4 = vector.broadcast %3 : vector<1x128xf32> to vector<32x128xf32>
    %5 = arith.addf %2, %4 : vector<32x128xf32>
    %cst_5 = arith.constant dense<0.000000e+00> : vector<128xf32>
    %6 = vector.multi_reduction <add>, %5, %cst_5 [0] : vector<32x128xf32> to vector<128xf32>
    %7 = vector.shape_cast %6 : vector<128xf32> to vector<1x128xf32>
    %cst_6 = arith.constant 3.125000e-02 : f32
    %8 = vector.broadcast %cst_6 : f32 to vector<1x128xf32>
    %9 = arith.mulf %7, %8 : vector<1x128xf32>
    %10 = vector.broadcast %9 : vector<1x128xf32> to vector<32x128xf32>
    %11 = arith.subf %5, %10 : vector<32x128xf32>
    %12 = arith.mulf %11, %11 : vector<32x128xf32>
    %cst_7 = arith.constant dense<0.000000e+00> : vector<128xf32>
    %13 = vector.multi_reduction <add>, %12, %cst_7 [0] : vector<32x128xf32> to vector<128xf32>
    %14 = vector.shape_cast %13 : vector<128xf32> to vector<1x128xf32>
    %cst_8 = arith.constant 3.125000e-02 : f32
    %15 = vector.broadcast %cst_8 : f32 to vector<1x128xf32>
    %16 = arith.mulf %14, %15 : vector<1x128xf32>
    %cst_9 = arith.constant 9.99999974E-6 : f32
    %17 = vector.broadcast %cst_9 : f32 to vector<1x128xf32>
    %18 = arith.addf %16, %17 : vector<1x128xf32>
    %19 = math.rsqrt %18 : vector<1x128xf32>
    %20 = vector.broadcast %19 : vector<1x128xf32> to vector<32x128xf32>
    %21 = arith.mulf %11, %20 : vector<32x128xf32>
    %c0_10 = arith.constant 0 : index
    %c0_11 = arith.constant 0 : index
    %22 = vector.load %arg4[%c0_10, %c0_11] : memref<1x128xf32, #tpu.memory_space<vmem>>, vector<1x128xf32>
    %23 = vector.broadcast %22 : vector<1x128xf32> to vector<32x128xf32>
    %24 = arith.mulf %21, %23 : vector<32x128xf32>
    %c0_12 = arith.constant 0 : index
    %c0_13 = arith.constant 0 : index
    %25 = vector.load %arg5[%c0_12, %c0_13] : memref<1x128xf32, #tpu.memory_space<vmem>>, vector<1x128xf32>
    %26 = vector.broadcast %25 : vector<1x128xf32> to vector<32x128xf32>
    %27 = arith.addf %24, %26 : vector<32x128xf32>
    %cst_14 = arith.constant 0.000000e+00 : f32
    %28 = vector.broadcast %cst_14 : f32 to vector<32x128xf32>
    %29 = arith.maximumf %27, %28 : vector<32x128xf32>
    %c0_15 = arith.constant 0 : index
    %c0_16 = arith.constant 0 : index
    %30 = vector.load %arg6[%c0_15, %c0_16] : memref<32x128xf32, #tpu.memory_space<vmem>>, vector<32x128xf32>
    tpu.vector_store %arg6[%c0_15, %c0_16], %29 {strides = array<i32>} : memref<32x128xf32, #tpu.memory_space<vmem>>, vector<32x128xf32>,
    return
  }
  func.func @transform_0(%arg0: i32) -> (i32, i32) {
    %c0_i32 = arith.constant 0 : i32
    %c0_i32_0 = arith.constant 0 : i32
    %c0_i32_1 = arith.constant 0 : i32
    return %c0_i32, %c0_i32_0 : i32, i32
  }
  func.func @transform_1(%arg0: i32) -> (i32, i32) {
    %c0_i32 = arith.constant 0 : i32
    %c0_i32_0 = arith.constant 0 : i32
    %c0_i32_1 = arith.constant 0 : i32
    return %c0_i32, %c0_i32_0 : i32, i32
  }
  func.func @transform_2(%arg0: i32) -> (i32, i32) {
    %c0_i32 = arith.constant 0 : i32
    %c0_i32_0 = arith.constant 0 : i32
    %c0_i32_1 = arith.constant 0 : i32
    return %c0_i32, %c0_i32_0 : i32, i32
  }
  func.func @transform_3(%arg0: i32) -> (i32, i32) {
    %c0_i32 = arith.constant 0 : i32
    %c0_i32_0 = arith.constant 0 : i32
    %c0_i32_1 = arith.constant 0 : i32
    return %c0_i32, %c0_i32_0 : i32, i32
  }
  func.func @transform_4(%arg0: i32) -> (i32, i32) {
    %c0_i32 = arith.constant 0 : i32
    %c0_i32_0 = arith.constant 0 : i32
    %c0_i32_1 = arith.constant 0 : i32
    return %c0_i32, %c0_i32_0 : i32, i32
  }
  func.func @transform_5(%arg0: i32) -> (i32, i32) {
    %c0_i32 = arith.constant 0 : i32
    %c0_i32_0 = arith.constant 0 : i32
    %c0_i32_1 = arith.constant 0 : i32
    return %c0_i32, %c0_i32_0 : i32, i32
  }
}

module attributes {stable_mosaic.version = 11 : i64} {
  func.func @_conv_bn_relu_kernel(%arg0: i32, %arg1: memref<32x3200xbf16, #tpu.memory_space<vmem>>, %arg2: memref<3200x128xbf16, #tpu.memory_space<vmem>>, %arg3: memref<1x128xf32, #tpu.memory_space<vmem>>, %arg4: memref<1x128xf32, #tpu.memory_space<vmem>>, %arg5: memref<1x128xf32, #tpu.memory_space<vmem>>, %arg6: memref<32x128xf32, #tpu.memory_space<vmem>>) attributes {dimension_semantics = [#tpu.dimension_semantics<arbitrary>], iteration_bounds = array<i64: 1>, scalar_prefetch = 0 : i64, scratch_operands = 0 : i64, tpu.core_type = #tpu.core_type<tc>, window_params = [{pipeline_mode = #tpu.pipeline_mode<synchronous>, transform_indices = @transform_0, window_bounds = array<i64: 32, 3200>}, {pipeline_mode = #tpu.pipeline_mode<synchronous>, transform_indices = @transform_1, window_bounds = array<i64: 3200, 128>}, {pipeline_mode = #tpu.pipeline_mode<synchronous>, transform_indices = @transform_2, window_bounds = array<i64: 1, 128>}, {pipeline_mode = #tpu.pipeline_mode<synchronous>, transform_indices = @transform_3, window_bounds = array<i64: 1, 128>}, {pipeline_mode = #tpu.pipeline_mode<synchronous>, transform_indices = @transform_4, window_bounds = array<i64: 1, 128>}, {pipeline_mode = #tpu.pipeline_mode<synchronous>, transform_indices = @transform_5, window_bounds = array<i64: 32, 128>}]} {
    %c0 = arith.constant 0 : index
    %c0_0 = arith.constant 0 : index
    %0 = vector.load %arg1[%c0, %c0_0] : memref<32x3200xbf16, #tpu.memory_space<vmem>>, vector<32x3200xbf16>
    %c0_1 = arith.constant 0 : index
    %c0_2 = arith.constant 0 : index
    %1 = vector.load %arg2[%c0_1, %c0_2] : memref<3200x128xbf16, #tpu.memory_space<vmem>>, vector<3200x128xbf16>
    %cst = arith.constant dense<0.000000e+00> : vector<32x128xf32>
    %2 = tpu.matmul %0, %1, %cst {dimension_numbers = #tpu.dot_dimension_numbers<[1], [0], [0], [1], [0, 0, 1, 1], [], []>} : vector<32x3200xbf16>, vector<3200x128xbf16>, vector<32x128xf32> -> vector<32x128xf32>
    %c0_3 = arith.constant 0 : index
    %c0_4 = arith.constant 0 : index
    %3 = vector.load %arg3[%c0_3, %c0_4] : memref<1x128xf32, #tpu.memory_space<vmem>>, vector<1x128xf32>
    %4 = vector.broadcast %3 : vector<1x128xf32> to vector<32x128xf32>
    %5 = arith.addf %2, %4 : vector<32x128xf32>
    %cst_5 = arith.constant dense<0.000000e+00> : vector<128xf32>
    %6 = vector.multi_reduction <add>, %5, %cst_5 [0] : vector<32x128xf32> to vector<128xf32>
    %7 = vector.shape_cast %6 : vector<128xf32> to vector<1x128xf32>
    %cst_6 = arith.constant 3.125000e-02 : f32
    %8 = vector.broadcast %cst_6 : f32 to vector<1x128xf32>
    %9 = arith.mulf %7, %8 : vector<1x128xf32>
    %10 = vector.broadcast %9 : vector<1x128xf32> to vector<32x128xf32>
    %11 = arith.subf %5, %10 : vector<32x128xf32>
    %12 = arith.mulf %11, %11 : vector<32x128xf32>
    %cst_7 = arith.constant dense<0.000000e+00> : vector<128xf32>
    %13 = vector.multi_reduction <add>, %12, %cst_7 [0] : vector<32x128xf32> to vector<128xf32>
    %14 = vector.shape_cast %13 : vector<128xf32> to vector<1x128xf32>
    %cst_8 = arith.constant 3.125000e-02 : f32
    %15 = vector.broadcast %cst_8 : f32 to vector<1x128xf32>
    %16 = arith.mulf %14, %15 : vector<1x128xf32>
    %cst_9 = arith.constant 9.99999974E-6 : f32
    %17 = vector.broadcast %cst_9 : f32 to vector<1x128xf32>
    %18 = arith.addf %16, %17 : vector<1x128xf32>
    %19 = math.rsqrt %18 : vector<1x128xf32>
    %20 = vector.broadcast %19 : vector<1x128xf32> to vector<32x128xf32>
    %21 = arith.mulf %11, %20 : vector<32x128xf32>
    %c0_10 = arith.constant 0 : index
    %c0_11 = arith.constant 0 : index
    %22 = vector.load %arg4[%c0_10, %c0_11] : memref<1x128xf32, #tpu.memory_space<vmem>>, vector<1x128xf32>
    %23 = vector.broadcast %22 : vector<1x128xf32> to vector<32x128xf32>
    %24 = arith.mulf %21, %23 : vector<32x128xf32>
    %c0_12 = arith.constant 0 : index
    %c0_13 = arith.constant 0 : index
    %25 = vector.load %arg5[%c0_12, %c0_13] : memref<1x128xf32, #tpu.memory_space<vmem>>, vector<1x128xf32>
    %26 = vector.broadcast %25 : vector<1x128xf32> to vector<32x128xf32>
    %27 = arith.addf %24, %26 : vector<32x128xf32>
    %cst_14 = arith.constant 0.000000e+00 : f32
    %28 = vector.broadcast %cst_14 : f32 to vector<32x128xf32>
    %29 = arith.maximumf %27, %28 : vector<32x128xf32>
    %c0_15 = arith.constant 0 : index
    %c0_16 = arith.constant 0 : index
    %30 = vector.load %arg6[%c0_15, %c0_16] : memref<32x128xf32, #tpu.memory_space<vmem>>, vector<32x128xf32>
    tpu.vector_store %arg6[%c0_15, %c0_16], %29 {strides = array<i32>} : memref<32x128xf32, #tpu.memory_space<vmem>>, vector<32x128xf32>,
    return
  }
  func.func @transform_0(%arg0: i32) -> (i32, i32) {
    %c0_i32 = arith.constant 0 : i32
    %c0_i32_0 = arith.constant 0 : i32
    %c0_i32_1 = arith.constant 0 : i32
    return %c0_i32, %c0_i32_0 : i32, i32
  }
  func.func @transform_1(%arg0: i32) -> (i32, i32) {
    %c0_i32 = arith.constant 0 : i32
    %c0_i32_0 = arith.constant 0 : i32
    %c0_i32_1 = arith.constant 0 : i32
    return %c0_i32, %c0_i32_0 : i32, i32
  }
  func.func @transform_2(%arg0: i32) -> (i32, i32) {
    %c0_i32 = arith.constant 0 : i32
    %c0_i32_0 = arith.constant 0 : i32
    %c0_i32_1 = arith.constant 0 : i32
    return %c0_i32, %c0_i32_0 : i32, i32
  }
  func.func @transform_3(%arg0: i32) -> (i32, i32) {
    %c0_i32 = arith.constant 0 : i32
    %c0_i32_0 = arith.constant 0 : i32
    %c0_i32_1 = arith.constant 0 : i32
    return %c0_i32, %c0_i32_0 : i32, i32
  }
  func.func @transform_4(%arg0: i32) -> (i32, i32) {
    %c0_i32 = arith.constant 0 : i32
    %c0_i32_0 = arith.constant 0 : i32
    %c0_i32_1 = arith.constant 0 : i32
    return %c0_i32, %c0_i32_0 : i32, i32
  }
  func.func @transform_5(%arg0: i32) -> (i32, i32) {
    %c0_i32 = arith.constant 0 : i32
    %c0_i32_0 = arith.constant 0 : i32
    %c0_i32_1 = arith.constant 0 : i32
    return %c0_i32, %c0_i32_0 : i32, i32
  }
}

module attributes {stable_mosaic.version = 11 : i64} {
  func.func @_gmlp_kernel(%arg0: i32, %arg1: memref<128x128xf32, #tpu.memory_space<vmem>>, %arg2: memref<1x128xf32, #tpu.memory_space<vmem>>, %arg3: memref<1x128xf32, #tpu.memory_space<vmem>>, %arg4: memref<128x256xf32, #tpu.memory_space<vmem>>, %arg5: memref<1x256xf32, #tpu.memory_space<vmem>>, %arg6: memref<128x384xf32, #tpu.memory_space<vmem>>, %arg7: memref<128x128xf32, #tpu.memory_space<vmem>>, %arg8: memref<1x128xf32, #tpu.memory_space<vmem>>, %arg9: memref<1x128xf32, #tpu.memory_space<vmem>>, %arg10: memref<1x128xf32, #tpu.memory_space<vmem>>, %arg11: memref<128x128xf32, #tpu.memory_space<vmem>>, %arg12: memref<128x1xf32, #tpu.memory_space<vmem>>, %arg13: memref<128x128xf32, #tpu.memory_space<vmem>>, %arg14: memref<1x128xf32, #tpu.memory_space<vmem>>, %arg15: memref<128x128xf32, #tpu.memory_space<vmem>>) attributes {dimension_semantics = [#tpu.dimension_semantics<parallel>], iteration_bounds = array<i64: 2>, scalar_prefetch = 0 : i64, scratch_operands = 0 : i64, tpu.core_type = #tpu.core_type<tc>, window_params = [{transform_indices = @transform_0, window_bounds = array<i64: 128, 128>}, {pipeline_mode = #tpu.pipeline_mode<synchronous>, transform_indices = @transform_1, window_bounds = array<i64: 1, 128>}, {pipeline_mode = #tpu.pipeline_mode<synchronous>, transform_indices = @transform_2, window_bounds = array<i64: 1, 128>}, {pipeline_mode = #tpu.pipeline_mode<synchronous>, transform_indices = @transform_3, window_bounds = array<i64: 128, 256>}, {pipeline_mode = #tpu.pipeline_mode<synchronous>, transform_indices = @transform_4, window_bounds = array<i64: 1, 256>}, {pipeline_mode = #tpu.pipeline_mode<synchronous>, transform_indices = @transform_5, window_bounds = array<i64: 128, 384>}, {pipeline_mode = #tpu.pipeline_mode<synchronous>, transform_indices = @transform_6, window_bounds = array<i64: 128, 128>}, {pipeline_mode = #tpu.pipeline_mode<synchronous>, transform_indices = @transform_7, window_bounds = array<i64: 1, 128>}, {pipeline_mode = #tpu.pipeline_mode<synchronous>, transform_indices = @transform_8, window_bounds = array<i64: 1, 128>}, {pipeline_mode = #tpu.pipeline_mode<synchronous>, transform_indices = @transform_9, window_bounds = array<i64: 1, 128>}, {pipeline_mode = #tpu.pipeline_mode<synchronous>, transform_indices = @transform_10, window_bounds = array<i64: 128, 128>}, {pipeline_mode = #tpu.pipeline_mode<synchronous>, transform_indices = @transform_11, window_bounds = array<i64: 128, 1>}, {pipeline_mode = #tpu.pipeline_mode<synchronous>, transform_indices = @transform_12, window_bounds = array<i64: 128, 128>}, {pipeline_mode = #tpu.pipeline_mode<synchronous>, transform_indices = @transform_13, window_bounds = array<i64: 1, 128>}, {transform_indices = @transform_14, window_bounds = array<i64: 128, 128>}]} {
    %c0 = arith.constant 0 : index
    %c0_0 = arith.constant 0 : index
    %0 = vector.load %arg1[%c0, %c0_0] : memref<128x128xf32, #tpu.memory_space<vmem>>, vector<128x128xf32>
    %1 = tpu.iota {dimensions = array<i32: 1>} : vector<128x128xi32>
    %c0_1 = arith.constant 0 : index
    %c0_2 = arith.constant 0 : index
    %2 = vector.load %arg2[%c0_1, %c0_2] : memref<1x128xf32, #tpu.memory_space<vmem>>, vector<1x128xf32>
    %c0_3 = arith.constant 0 : index
    %c0_4 = arith.constant 0 : index
    %3 = vector.load %arg3[%c0_3, %c0_4] : memref<1x128xf32, #tpu.memory_space<vmem>>, vector<1x128xf32>
    %c16_i32 = arith.constant 16 : i32
    %4 = vector.broadcast %c16_i32 : i32 to vector<128x128xi32>
    %5 = arith.cmpi slt, %1, %4 : vector<128x128xi32>
    %6 = arith.extui %5 : vector<128x128xi1> to vector<128x128xi32>
    %7 = arith.sitofp %6 : vector<128x128xi32> to vector<128x128xf32>
    %8 = arith.mulf %0, %7 : vector<128x128xf32>
    %cst = arith.constant dense<0.000000e+00> : vector<128xf32>
    %9 = vector.multi_reduction <add>, %8, %cst [1] : vector<128x128xf32> to vector<128xf32>
    %10 = vector.shape_cast %9 : vector<128xf32> to vector<128x1xf32>
    %cst_5 = arith.constant 6.250000e-02 : f32
    %11 = vector.broadcast %cst_5 : f32 to vector<128x1xf32>
    %12 = arith.mulf %10, %11 : vector<128x1xf32>
    %13 = vector.broadcast %12 : vector<128x1xf32> to vector<128x128xf32>
    %14 = arith.subf %0, %13 : vector<128x128xf32>
    %15 = arith.mulf %14, %7 : vector<128x128xf32>
    %16 = arith.mulf %15, %15 : vector<128x128xf32>
    %cst_6 = arith.constant dense<0.000000e+00> : vector<128xf32>
    %17 = vector.multi_reduction <add>, %16, %cst_6 [1] : vector<128x128xf32> to vector<128xf32>
    %18 = vector.shape_cast %17 : vector<128xf32> to vector<128x1xf32>
    %cst_7 = arith.constant 6.250000e-02 : f32
    %19 = vector.broadcast %cst_7 : f32 to vector<128x1xf32>
    %20 = arith.mulf %18, %19 : vector<128x1xf32>
    %cst_8 = arith.constant 9.99999974E-6 : f32
    %21 = vector.broadcast %cst_8 : f32 to vector<128x1xf32>
    %22 = arith.addf %20, %21 : vector<128x1xf32>
    %23 = math.rsqrt %22 : vector<128x1xf32>
    %24 = vector.broadcast %23 : vector<128x1xf32> to vector<128x128xf32>
    %25 = arith.mulf %15, %24 : vector<128x128xf32>
    %26 = vector.broadcast %2 : vector<1x128xf32> to vector<128x128xf32>
    %27 = arith.mulf %25, %26 : vector<128x128xf32>
    %28 = vector.broadcast %3 : vector<1x128xf32> to vector<128x128xf32>
    %29 = arith.addf %27, %28 : vector<128x128xf32>
    %30 = arith.truncf %29 : vector<128x128xf32> to vector<128x128xbf16>
    %c0_9 = arith.constant 0 : index
    %c0_10 = arith.constant 0 : index
    %31 = vector.load %arg4[%c0_9, %c0_10] : memref<128x256xf32, #tpu.memory_space<vmem>>, vector<128x256xf32>
    %32 = arith.truncf %31 : vector<128x256xf32> to vector<128x256xbf16>
    %cst_11 = arith.constant dense<0.000000e+00> : vector<128x256xf32>
    %33 = tpu.matmul %30, %32, %cst_11 {dimension_numbers = #tpu.dot_dimension_numbers<[1], [0], [0], [1], [0, 0, 1, 1], [], []>} : vector<128x128xbf16>, vector<128x256xbf16>, vector<128x256xf32> -> vector<128x256xf32>
    %c0_12 = arith.constant 0 : index
    %c0_13 = arith.constant 0 : index
    %34 = vector.load %arg5[%c0_12, %c0_13] : memref<1x256xf32, #tpu.memory_space<vmem>>, vector<1x256xf32>
    %35 = vector.broadcast %34 : vector<1x256xf32> to vector<128x256xf32>
    %36 = arith.addf %33, %35 : vector<128x256xf32>
    %cst_14 = arith.constant 5.000000e-01 : f32
    %37 = vector.broadcast %cst_14 : f32 to vector<128x256xf32>
    %38 = arith.mulf %37, %36 : vector<128x256xf32>
    %cst_15 = arith.constant 4.471500e-02 : f32
    %39 = vector.broadcast %cst_15 : f32 to vector<128x256xf32>
    %40 = arith.mulf %39, %36 : vector<128x256xf32>
    %41 = arith.mulf %40, %36 : vector<128x256xf32>
    %42 = arith.mulf %41, %36 : vector<128x256xf32>
    %43 = arith.addf %36, %42 : vector<128x256xf32>
    %cst_16 = arith.constant 0.797884583 : f32
    %44 = vector.broadcast %cst_16 : f32 to vector<128x256xf32>
    %45 = arith.mulf %44, %43 : vector<128x256xf32>
    %46 = math.tanh %45 : vector<128x256xf32>
    %cst_17 = arith.constant 1.000000e+00 : f32
    %47 = vector.broadcast %cst_17 : f32 to vector<128x256xf32>
    %48 = arith.addf %47, %46 : vector<128x256xf32>
    %49 = arith.mulf %38, %48 : vector<128x256xf32>
    %50 = vector.extract_strided_slice %49 {offsets = [0, 0], sizes = [128, 128], strides = [1, 1]} : vector<128x256xf32> to vector<128x128xf32>
    %51 = vector.extract_strided_slice %49 {offsets = [0, 128], sizes = [128, 128], strides = [1, 1]} : vector<128x256xf32> to vector<128x128xf32>
    %c0_18 = arith.constant 0 : index
    %c0_19 = arith.constant 0 : index
    %52 = vector.load %arg6[%c0_18, %c0_19] : memref<128x384xf32, #tpu.memory_space<vmem>>, vector<128x384xf32>
    %53 = arith.truncf %52 : vector<128x384xf32> to vector<128x384xbf16>
    %cst_20 = arith.constant dense<0.000000e+00> : vector<128x384xf32>
    %54 = tpu.matmul %30, %53, %cst_20 {dimension_numbers = #tpu.dot_dimension_numbers<[1], [0], [0], [1], [0, 0, 1, 1], [], []>} : vector<128x128xbf16>, vector<128x384xbf16>, vector<128x384xf32> -> vector<128x384xf32>
    %55 = vector.extract_strided_slice %54 {offsets = [0, 0], sizes = [128, 128], strides = [1, 1]} : vector<128x384xf32> to vector<128x128xf32>
    %56 = vector.extract_strided_slice %54 {offsets = [0, 128], sizes = [128, 128], strides = [1, 1]} : vector<128x384xf32> to vector<128x128xf32>
    %57 = vector.extract_strided_slice %54 {offsets = [0, 256], sizes = [128, 128], strides = [1, 1]} : vector<128x384xf32> to vector<128x128xf32>
    %58 = arith.truncf %55 : vector<128x128xf32> to vector<128x128xbf16>
    %59 = arith.truncf %56 : vector<128x128xf32> to vector<128x128xbf16>
    %cst_21 = arith.constant dense<0.000000e+00> : vector<128x128xf32>
    %60 = tpu.matmul %58, %59, %cst_21 {dimension_numbers = #tpu.dot_dimension_numbers<[1], [1], [0], [0], [0, 0, 1, 0], [], []>} : vector<128x128xbf16>, vector<128x128xbf16>, vector<128x128xf32> -> vector<128x128xf32>
    %cst_22 = arith.constant 1.250000e-01 : f32
    %61 = vector.broadcast %cst_22 : f32 to vector<128x128xf32>
    %62 = arith.mulf %60, %61 : vector<128x128xf32>
    %cst_23 = arith.constant dense<0xFF800000> : vector<128xf32>
    %63 = vector.multi_reduction <maximumf>, %62, %cst_23 [1] : vector<128x128xf32> to vector<128xf32>
    %64 = vector.shape_cast %63 : vector<128xf32> to vector<128x1xf32>
    %65 = vector.broadcast %64 : vector<128x1xf32> to vector<128x128xf32>
    %66 = arith.subf %62, %65 : vector<128x128xf32>
    %67 = math.exp %66 : vector<128x128xf32>
    %cst_24 = arith.constant dense<0.000000e+00> : vector<128xf32>
    %68 = vector.multi_reduction <add>, %67, %cst_24 [1] : vector<128x128xf32> to vector<128xf32>
    %69 = vector.shape_cast %68 : vector<128xf32> to vector<128x1xf32>
    %70 = tpu.reciprocal %69 {approx = true} : vector<128x1xf32> -> vector<128x1xf32>
    %71 = vector.broadcast %70 : vector<128x1xf32> to vector<128x128xf32>
    %72 = arith.mulf %67, %71 : vector<128x128xf32>
    %73 = arith.truncf %72 : vector<128x128xf32> to vector<128x128xbf16>
    %74 = arith.truncf %57 : vector<128x128xf32> to vector<128x128xbf16>
    %cst_25 = arith.constant dense<0.000000e+00> : vector<128x128xf32>
    %75 = tpu.matmul %73, %74, %cst_25 {dimension_numbers = #tpu.dot_dimension_numbers<[1], [0], [0], [1], [0, 0, 1, 1], [], []>} : vector<128x128xbf16>, vector<128x128xbf16>, vector<128x128xf32> -> vector<128x128xf32>
    %76 = arith.truncf %75 : vector<128x128xf32> to vector<128x128xbf16>
    %c0_26 = arith.constant 0 : index
    %c0_27 = arith.constant 0 : index
    %77 = vector.load %arg7[%c0_26, %c0_27] : memref<128x128xf32, #tpu.memory_space<vmem>>, vector<128x128xf32>
    %78 = arith.truncf %77 : vector<128x128xf32> to vector<128x128xbf16>
    %cst_28 = arith.constant dense<0.000000e+00> : vector<128x128xf32>
    %79 = tpu.matmul %76, %78, %cst_28 {dimension_numbers = #tpu.dot_dimension_numbers<[1], [0], [0], [1], [0, 0, 1, 1], [], []>} : vector<128x128xbf16>, vector<128x128xbf16>, vector<128x128xf32> -> vector<128x128xf32>
    %c0_29 = arith.constant 0 : index
    %c0_30 = arith.constant 0 : index
    %80 = vector.load %arg8[%c0_29, %c0_30] : memref<1x128xf32, #tpu.memory_space<vmem>>, vector<1x128xf32>
    %81 = vector.broadcast %80 : vector<1x128xf32> to vector<128x128xf32>
    %82 = arith.addf %79, %81 : vector<128x128xf32>
    %c0_31 = arith.constant 0 : index
    %c0_32 = arith.constant 0 : index
    %83 = vector.load %arg9[%c0_31, %c0_32] : memref<1x128xf32, #tpu.memory_space<vmem>>, vector<1x128xf32>
    %c0_33 = arith.constant 0 : index
    %c0_34 = arith.constant 0 : index
    %84 = vector.load %arg10[%c0_33, %c0_34] : memref<1x128xf32, #tpu.memory_space<vmem>>, vector<1x128xf32>
    %c32_i32 = arith.constant 32 : i32
    %85 = vector.broadcast %c32_i32 : i32 to vector<128x128xi32>
    %86 = arith.cmpi slt, %1, %85 : vector<128x128xi32>
    %87 = arith.extui %86 : vector<128x128xi1> to vector<128x128xi32>
    %88 = arith.sitofp %87 : vector<128x128xi32> to vector<128x128xf32>
    %89 = arith.mulf %51, %88 : vector<128x128xf32>
    %cst_35 = arith.constant dense<0.000000e+00> : vector<128xf32>
    %90 = vector.multi_reduction <add>, %89, %cst_35 [1] : vector<128x128xf32> to vector<128xf32>
    %91 = vector.shape_cast %90 : vector<128xf32> to vector<128x1xf32>
    %cst_36 = arith.constant 3.125000e-02 : f32
    %92 = vector.broadcast %cst_36 : f32 to vector<128x1xf32>
    %93 = arith.mulf %91, %92 : vector<128x1xf32>
    %94 = vector.broadcast %93 : vector<128x1xf32> to vector<128x128xf32>
    %95 = arith.subf %51, %94 : vector<128x128xf32>
    %96 = arith.mulf %95, %88 : vector<128x128xf32>
    %97 = arith.mulf %96, %96 : vector<128x128xf32>
    %cst_37 = arith.constant dense<0.000000e+00> : vector<128xf32>
    %98 = vector.multi_reduction <add>, %97, %cst_37 [1] : vector<128x128xf32> to vector<128xf32>
    %99 = vector.shape_cast %98 : vector<128xf32> to vector<128x1xf32>
    %cst_38 = arith.constant 3.125000e-02 : f32
    %100 = vector.broadcast %cst_38 : f32 to vector<128x1xf32>
    %101 = arith.mulf %99, %100 : vector<128x1xf32>
    %cst_39 = arith.constant 9.99999974E-6 : f32
    %102 = vector.broadcast %cst_39 : f32 to vector<128x1xf32>
    %103 = arith.addf %101, %102 : vector<128x1xf32>
    %104 = math.rsqrt %103 : vector<128x1xf32>
    %105 = vector.broadcast %104 : vector<128x1xf32> to vector<128x128xf32>
    %106 = arith.mulf %96, %105 : vector<128x128xf32>
    %107 = vector.broadcast %83 : vector<1x128xf32> to vector<128x128xf32>
    %108 = arith.mulf %106, %107 : vector<128x128xf32>
    %109 = vector.broadcast %84 : vector<1x128xf32> to vector<128x128xf32>
    %110 = arith.addf %108, %109 : vector<128x128xf32>
    %c0_40 = arith.constant 0 : index
    %c0_41 = arith.constant 0 : index
    %111 = vector.load %arg11[%c0_40, %c0_41] : memref<128x128xf32, #tpu.memory_space<vmem>>, vector<128x128xf32>
    %112 = arith.truncf %111 : vector<128x128xf32> to vector<128x128xbf16>
    %113 = arith.truncf %110 : vector<128x128xf32> to vector<128x128xbf16>
    %cst_42 = arith.constant dense<0.000000e+00> : vector<128x128xf32>
    %114 = tpu.matmul %112, %113, %cst_42 {dimension_numbers = #tpu.dot_dimension_numbers<[1], [0], [0], [1], [0, 0, 1, 1], [], []>} : vector<128x128xbf16>, vector<128x128xbf16>, vector<128x128xf32> -> vector<128x128xf32>
    %c0_43 = arith.constant 0 : index
    %c0_44 = arith.constant 0 : index
    %115 = vector.load %arg12[%c0_43, %c0_44] : memref<128x1xf32, #tpu.memory_space<vmem>>, vector<128x1xf32>
    %116 = vector.broadcast %115 : vector<128x1xf32> to vector<128x128xf32>
    %117 = arith.addf %114, %116 : vector<128x128xf32>
    %118 = arith.addf %117, %82 : vector<128x128xf32>
    %119 = math.tanh %118 : vector<128x128xf32>
    %120 = arith.mulf %119, %50 : vector<128x128xf32>
    %121 = arith.truncf %120 : vector<128x128xf32> to vector<128x128xbf16>
    %c0_45 = arith.constant 0 : index
    %c0_46 = arith.constant 0 : index
    %122 = vector.load %arg13[%c0_45, %c0_46] : memref<128x128xf32, #tpu.memory_space<vmem>>, vector<128x128xf32>
    %123 = arith.truncf %122 : vector<128x128xf32> to vector<128x128xbf16>
    %cst_47 = arith.constant dense<0.000000e+00> : vector<128x128xf32>
    %124 = tpu.matmul %121, %123, %cst_47 {dimension_numbers = #tpu.dot_dimension_numbers<[1], [0], [0], [1], [0, 0, 1, 1], [], []>} : vector<128x128xbf16>, vector<128x128xbf16>, vector<128x128xf32> -> vector<128x128xf32>
    %c0_48 = arith.constant 0 : index
    %c0_49 = arith.constant 0 : index
    %125 = vector.load %arg14[%c0_48, %c0_49] : memref<1x128xf32, #tpu.memory_space<vmem>>, vector<1x128xf32>
    %126 = vector.broadcast %125 : vector<1x128xf32> to vector<128x128xf32>
    %127 = arith.addf %124, %126 : vector<128x128xf32>
    %128 = arith.addf %127, %0 : vector<128x128xf32>
    %cst_50 = arith.constant 0.000000e+00 : f32
    %129 = vector.broadcast %cst_50 : f32 to vector<128x128xf32>
    %130 = arith.maximumf %128, %129 : vector<128x128xf32>
    %c0_51 = arith.constant 0 : index
    %c0_52 = arith.constant 0 : index
    %131 = vector.load %arg15[%c0_51, %c0_52] : memref<128x128xf32, #tpu.memory_space<vmem>>, vector<128x128xf32>
    tpu.vector_store %arg15[%c0_51, %c0_52], %130 {strides = array<i32>} : memref<128x128xf32, #tpu.memory_space<vmem>>, vector<128x128xf32>,
    return
  }
  func.func @transform_0(%arg0: i32) -> (i32, i32) {
    %c0_i32 = arith.constant 0 : i32
    %c0_i32_0 = arith.constant 0 : i32
    return %arg0, %c0_i32 : i32, i32
  }
  func.func @transform_1(%arg0: i32) -> (i32, i32) {
    %c0_i32 = arith.constant 0 : i32
    %c0_i32_0 = arith.constant 0 : i32
    %c0_i32_1 = arith.constant 0 : i32
    return %c0_i32, %c0_i32_0 : i32, i32
  }
  func.func @transform_2(%arg0: i32) -> (i32, i32) {
    %c0_i32 = arith.constant 0 : i32
    %c0_i32_0 = arith.constant 0 : i32
    %c0_i32_1 = arith.constant 0 : i32
    return %c0_i32, %c0_i32_0 : i32, i32
  }
  func.func @transform_3(%arg0: i32) -> (i32, i32) {
    %c0_i32 = arith.constant 0 : i32
    %c0_i32_0 = arith.constant 0 : i32
    %c0_i32_1 = arith.constant 0 : i32
    return %c0_i32, %c0_i32_0 : i32, i32
  }
  func.func @transform_4(%arg0: i32) -> (i32, i32) {
    %c0_i32 = arith.constant 0 : i32
    %c0_i32_0 = arith.constant 0 : i32
    %c0_i32_1 = arith.constant 0 : i32
    return %c0_i32, %c0_i32_0 : i32, i32
  }
  func.func @transform_5(%arg0: i32) -> (i32, i32) {
    %c0_i32 = arith.constant 0 : i32
    %c0_i32_0 = arith.constant 0 : i32
    %c0_i32_1 = arith.constant 0 : i32
    return %c0_i32, %c0_i32_0 : i32, i32
  }
  func.func @transform_6(%arg0: i32) -> (i32, i32) {
    %c0_i32 = arith.constant 0 : i32
    %c0_i32_0 = arith.constant 0 : i32
    %c0_i32_1 = arith.constant 0 : i32
    return %c0_i32, %c0_i32_0 : i32, i32
  }
  func.func @transform_7(%arg0: i32) -> (i32, i32) {
    %c0_i32 = arith.constant 0 : i32
    %c0_i32_0 = arith.constant 0 : i32
    %c0_i32_1 = arith.constant 0 : i32
    return %c0_i32, %c0_i32_0 : i32, i32
  }
  func.func @transform_8(%arg0: i32) -> (i32, i32) {
    %c0_i32 = arith.constant 0 : i32
    %c0_i32_0 = arith.constant 0 : i32
    %c0_i32_1 = arith.constant 0 : i32
    return %c0_i32, %c0_i32_0 : i32, i32
  }
  func.func @transform_9(%arg0: i32) -> (i32, i32) {
    %c0_i32 = arith.constant 0 : i32
    %c0_i32_0 = arith.constant 0 : i32
    %c0_i32_1 = arith.constant 0 : i32
    return %c0_i32, %c0_i32_0 : i32, i32
  }
  func.func @transform_10(%arg0: i32) -> (i32, i32) {
    %c0_i32 = arith.constant 0 : i32
    %c0_i32_0 = arith.constant 0 : i32
    %c0_i32_1 = arith.constant 0 : i32
    return %c0_i32, %c0_i32_0 : i32, i32
  }
  func.func @transform_11(%arg0: i32) -> (i32, i32) {
    %c0_i32 = arith.constant 0 : i32
    %c0_i32_0 = arith.constant 0 : i32
    %c0_i32_1 = arith.constant 0 : i32
    return %c0_i32, %c0_i32_0 : i32, i32
  }
  func.func @transform_12(%arg0: i32) -> (i32, i32) {
    %c0_i32 = arith.constant 0 : i32
    %c0_i32_0 = arith.constant 0 : i32
    %c0_i32_1 = arith.constant 0 : i32
    return %c0_i32, %c0_i32_0 : i32, i32
  }
  func.func @transform_13(%arg0: i32) -> (i32, i32) {
    %c0_i32 = arith.constant 0 : i32
    %c0_i32_0 = arith.constant 0 : i32
    %c0_i32_1 = arith.constant 0 : i32
    return %c0_i32, %c0_i32_0 : i32, i32
  }
  func.func @transform_14(%arg0: i32) -> (i32, i32) {
    %c0_i32 = arith.constant 0 : i32
    %c0_i32_0 = arith.constant 0 : i32
    return %arg0, %c0_i32 : i32, i32
  }
}

module attributes {stable_mosaic.version = 11 : i64} {
  func.func @_matmul_bias_kernel(%arg0: i32, %arg1: memref<2x2048xf32, #tpu.memory_space<vmem>>, %arg2: memref<2048x4xf32, #tpu.memory_space<vmem>>, %arg3: memref<1x4xf32, #tpu.memory_space<vmem>>, %arg4: memref<2x4xf32, #tpu.memory_space<vmem>>) attributes {dimension_semantics = [#tpu.dimension_semantics<arbitrary>], iteration_bounds = array<i64: 1>, scalar_prefetch = 0 : i64, scratch_operands = 0 : i64, tpu.core_type = #tpu.core_type<tc>, window_params = [{pipeline_mode = #tpu.pipeline_mode<synchronous>, transform_indices = @transform_0, window_bounds = array<i64: 2, 2048>}, {pipeline_mode = #tpu.pipeline_mode<synchronous>, transform_indices = @transform_1, window_bounds = array<i64: 2048, 4>}, {pipeline_mode = #tpu.pipeline_mode<synchronous>, transform_indices = @transform_2, window_bounds = array<i64: 1, 4>}, {pipeline_mode = #tpu.pipeline_mode<synchronous>, transform_indices = @transform_3, window_bounds = array<i64: 2, 4>}]} {
    %c0 = arith.constant 0 : index
    %c0_0 = arith.constant 0 : index
    %0 = vector.load %arg1[%c0, %c0_0] : memref<2x2048xf32, #tpu.memory_space<vmem>>, vector<2x2048xf32>
    %1 = arith.truncf %0 : vector<2x2048xf32> to vector<2x2048xbf16>
    %c0_1 = arith.constant 0 : index
    %c0_2 = arith.constant 0 : index
    %2 = vector.load %arg2[%c0_1, %c0_2] : memref<2048x4xf32, #tpu.memory_space<vmem>>, vector<2048x4xf32>
    %3 = arith.truncf %2 : vector<2048x4xf32> to vector<2048x4xbf16>
    %cst = arith.constant dense<0.000000e+00> : vector<2x4xf32>
    %4 = tpu.matmul %1, %3, %cst {dimension_numbers = #tpu.dot_dimension_numbers<[1], [0], [0], [1], [0, 0, 1, 1], [], []>} : vector<2x2048xbf16>, vector<2048x4xbf16>, vector<2x4xf32> -> vector<2x4xf32>
    %c0_3 = arith.constant 0 : index
    %c0_4 = arith.constant 0 : index
    %5 = vector.load %arg3[%c0_3, %c0_4] : memref<1x4xf32, #tpu.memory_space<vmem>>, vector<1x4xf32>
    %6 = vector.broadcast %5 : vector<1x4xf32> to vector<2x4xf32>
    %7 = arith.addf %4, %6 : vector<2x4xf32>
    %c0_5 = arith.constant 0 : index
    %c0_6 = arith.constant 0 : index
    %8 = vector.load %arg4[%c0_5, %c0_6] : memref<2x4xf32, #tpu.memory_space<vmem>>, vector<2x4xf32>
    tpu.vector_store %arg4[%c0_5, %c0_6], %7 {strides = array<i32>} : memref<2x4xf32, #tpu.memory_space<vmem>>, vector<2x4xf32>,
    return
  }
  func.func @transform_0(%arg0: i32) -> (i32, i32) {
    %c0_i32 = arith.constant 0 : i32
    %c0_i32_0 = arith.constant 0 : i32
    %c0_i32_1 = arith.constant 0 : i32
    return %c0_i32, %c0_i32_0 : i32, i32
  }
  func.func @transform_1(%arg0: i32) -> (i32, i32) {
    %c0_i32 = arith.constant 0 : i32
    %c0_i32_0 = arith.constant 0 : i32
    %c0_i32_1 = arith.constant 0 : i32
    return %c0_i32, %c0_i32_0 : i32, i32
  }
  func.func @transform_2(%arg0: i32) -> (i32, i32) {
    %c0_i32 = arith.constant 0 : i32
    %c0_i32_0 = arith.constant 0 : i32
    %c0_i32_1 = arith.constant 0 : i32
    return %c0_i32, %c0_i32_0 : i32, i32
  }
  func.func @transform_3(%arg0: i32) -> (i32, i32) {
    %c0_i32 = arith.constant 0 : i32
    %c0_i32_0 = arith.constant 0 : i32
    %c0_i32_1 = arith.constant 0 : i32
    return %c0_i32, %c0_i32_0 : i32, i32
  }
}

</mosaic_0001>

<bundles_post_ra>
// kernel: glam_forward.7
= control target key start
LH: loop header
LB: loop body
LE: loop exit
PB: predicated region body
PF: predicated region fallthrough
CT: control target
= control target key end

     0   :  { %v1673_v0 = vmov 0   ;;  %v1674_v33 = vmov 1   ;;  %v1675_v38 = vmov 2   ;;  %vm1104_vm0 = vcmask 261120   ;;  %s3694_s0 = inlined_call_operand.vmem [shape: f32[256,5], index: 0, kind: input, shape index: {}]   ;;  %s3695_s1 = inlined_call_operand.vmem [shape: f32[5,32], index: 1, kind: input, shape index: {}]   ;;  %s3696_s2 = inlined_call_operand.vmem [shape: f32[1,32], index: 2, kind: input, shape index: {}]   ;;  %s3697_s3 = inlined_call_operand.vmem [shape: f32[1,32], index: 3, kind: input, shape index: {}]   ;;  %s3698_s4 = inlined_call_operand.vmem [shape: f32[1,32], index: 4, kind: input, shape index: {}]   ;;  %s3699_s5 = inlined_call_operand.vmem [shape: f32[512,16], index: 5, kind: output, shape index: {}]  }
   0x1   :  { %1660 = vset.pattern.permute.xlu1 %v1673_v0  ;;  %1659 = vset.pattern.permute.xlu0 %v1673_v0  ;;  %v1712_v1 = vld [vmem:[%s3694_s0 + $0x10] sm:$0xff]  ;;  %v1717_v2 = vld [vmem:[%s3694_s0] sm:$0xff]  ;;  %v1724_v3 = vld [vmem:[%s3694_s0 + $0x18] sm:$0xff]  ;;  %vm1453_vm1 = vcmask 130048  }
   0x2   :  { %65 = vperm.xlu1 %1660, %v1712_v1   ;;  %55 = vperm.xlu0 %1659, %v1717_v2   ;;  %v1729_v4 = vld [vmem:[%s3694_s0 + $0x8] sm:$0xff]  ;;  %v1741_v6 = vld [vmem:[%s3694_s0 + $0x20] sm:$0xff]  ;;  %v1748_v7 = vld [vmem:[%s3694_s0 + $0x38] sm:$0xff] }
   0x3   :  { %v1736_v5 = vld [vmem:[%s3694_s0 + $0x28] sm:$0xff]  ;;  %v1753_v8 = vld [vmem:[%s3694_s0 + $0x30] sm:$0xff]  ;;  %v1765_v10 = vld [vmem:[%s3694_s0 + $0x40] sm:$0xff] }
   0x4   :  { %v1760_v9 = vld [vmem:[%s3694_s0 + $0x48] sm:$0xff]  ;;  %v1772_v11 = vld [vmem:[%s3694_s0 + $0x58] sm:$0xff]  ;;  %v1777_v12 = vld [vmem:[%s3694_s0 + $0x50] sm:$0xff] }
   0x5   :  { %v1784_v13 = vld [vmem:[%s3694_s0 + $0x68] sm:$0xff]  ;;  %v1789_v14 = vld [vmem:[%s3694_s0 + $0x60] sm:$0xff]  ;;  %v1796_v15 = vld [vmem:[%s3694_s0 + $0x78] sm:$0xff] }
   0x6   :  { %70 = vperm.xlu1 %1660, %v1724_v3   ;;  %60 = vperm.xlu0 %1659, %v1729_v4   ;;  %v1801_v16 = vld [vmem:[%s3694_s0 + $0x70] sm:$0xff]  ;;  %v1808_v17 = vld [vmem:[%s3694_s0 + $0x88] sm:$0xff]  ;;  %v1813_v18 = vld [vmem:[%s3694_s0 + $0x80] sm:$0xff] }
   0x7   :  { %v1820_v19 = vld [vmem:[%s3694_s0 + $0x98] sm:$0xff]  ;;  %v1825_v20 = vld [vmem:[%s3694_s0 + $0x90] sm:$0xff]  ;;  %v1832_v21 = vld [vmem:[%s3694_s0 + $0xa8] sm:$0xff] }
   0x8   :  { %v1837_v22 = vld [vmem:[%s3694_s0 + $0xa0] sm:$0xff]  ;;  %v1844_v23 = vld [vmem:[%s3694_s0 + $0xb8] sm:$0xff]  ;;  %v1849_v24 = vld [vmem:[%s3694_s0 + $0xb0] sm:$0xff] }
   0x9   :  { %v1856_v25 = vld [vmem:[%s3694_s0 + $0xc8] sm:$0xff]  ;;  %v1861_v26 = vld [vmem:[%s3694_s0 + $0xc0] sm:$0xff]  ;;  %v1868_v27 = vld [vmem:[%s3694_s0 + $0xd8] sm:$0xff] }
   0xa   :  { %80 = vperm.xlu1 %1660, %v1736_v5   ;;  %75 = vperm.xlu0 %1659, %v1741_v6   ;;  %v1873_v28 = vld [vmem:[%s3694_s0 + $0xd0] sm:$0xff]  ;;  %v1880_v29 = vld [vmem:[%s3694_s0 + $0xe8] sm:$0xff]  ;;  %v1885_v30 = vld [vmem:[%s3694_s0 + $0xe0] sm:$0xff] }
   0xb   :  { %v1892_v31 = vld [vmem:[%s3694_s0 + $0xf8] sm:$0xff]  ;;  %v1897_v32 = vld [vmem:[%s3694_s0 + $0xf0] sm:$0xff] }
   0xe   :  { %90 = vperm.xlu1 %1660, %v1748_v7   ;;  %85 = vperm.xlu0 %1659, %v1753_v8  }
  0x12   :  { %100 = vperm.xlu1 %1660, %v1760_v9   ;;  %95 = vperm.xlu0 %1659, %v1765_v10  }
  0x16   :  { %110 = vperm.xlu1 %1660, %v1772_v11   ;;  %105 = vperm.xlu0 %1659, %v1777_v12  }
  0x1a   :  { %120 = vperm.xlu1 %1660, %v1784_v13   ;;  %115 = vperm.xlu0 %1659, %v1789_v14  }
  0x1e   :  { %130 = vperm.xlu1 %1660, %v1796_v15   ;;  %125 = vperm.xlu0 %1659, %v1801_v16  }
  0x22   :  { %140 = vperm.xlu1 %1660, %v1808_v17   ;;  %135 = vperm.xlu0 %1659, %v1813_v18  }
  0x26   :  { %150 = vperm.xlu1 %1660, %v1820_v19   ;;  %145 = vperm.xlu0 %1659, %v1825_v20  }
  0x2a   :  { %160 = vperm.xlu1 %1660, %v1832_v21   ;;  %155 = vperm.xlu0 %1659, %v1837_v22  }
  0x2e   :  { %170 = vperm.xlu1 %1660, %v1844_v23   ;;  %165 = vperm.xlu0 %1659, %v1849_v24  }
  0x32   :  { %180 = vperm.xlu1 %1660, %v1856_v25   ;;  %175 = vperm.xlu0 %1659, %v1861_v26  }
  0x36   :  { %190 = vperm.xlu1 %1660, %v1868_v27   ;;  %185 = vperm.xlu0 %1659, %v1873_v28  }
  0x3a   :  { %200 = vperm.xlu1 %1660, %v1880_v29   ;;  %195 = vperm.xlu0 %1659, %v1885_v30  }
  0x3e   :  { %210 = vperm.xlu1 %1660, %v1892_v31   ;;  %205 = vperm.xlu0 %1659, %v1897_v32  }
  0x42   :  { %1662 = vset.pattern.permute.xlu1 %v1674_v33  ;;  %1661 = vset.pattern.permute.xlu0 %v1674_v33 }
  0x43   :  { %286 = vperm.xlu1 %1662, %v1729_v4   ;;  %282 = vperm.xlu0 %1661, %v1717_v2  }
  0x47   :  { %290 = vperm.xlu1 %1662, %v1712_v1   ;;  %294 = vperm.xlu0 %1661, %v1724_v3  }
  0x4b   :  { %298 = vperm.xlu1 %1662, %v1741_v6   ;;  %302 = vperm.xlu0 %1661, %v1736_v5  }
  0x4f   :  { %306 = vperm.xlu1 %1662, %v1753_v8   ;;  %310 = vperm.xlu0 %1661, %v1748_v7  }
  0x53   :  { %314 = vperm.xlu1 %1662, %v1765_v10   ;;  %318 = vperm.xlu0 %1661, %v1760_v9  }
  0x57   :  { %322 = vperm.xlu1 %1662, %v1777_v12   ;;  %326 = vperm.xlu0 %1661, %v1772_v11  }
  0x5b   :  { %330 = vperm.xlu1 %1662, %v1789_v14   ;;  %334 = vperm.xlu0 %1661, %v1784_v13  }
  0x5f   :  { %338 = vperm.xlu1 %1662, %v1801_v16   ;;  %342 = vperm.xlu0 %1661, %v1796_v15  }
  0x63   :  { %346 = vperm.xlu1 %1662, %v1813_v18   ;;  %350 = vperm.xlu0 %1661, %v1808_v17  }
  0x67   :  { %354 = vperm.xlu1 %1662, %v1825_v20   ;;  %358 = vperm.xlu0 %1661, %v1820_v19  }
  0x6b   :  { %362 = vperm.xlu1 %1662, %v1837_v22   ;;  %366 = vperm.xlu0 %1661, %v1832_v21  }
  0x6f   :  { %370 = vperm.xlu1 %1662, %v1849_v24   ;;  %374 = vperm.xlu0 %1661, %v1844_v23  }
  0x73   :  { %378 = vperm.xlu1 %1662, %v1861_v26   ;;  %382 = vperm.xlu0 %1661, %v1856_v25  }
  0x77   :  { %386 = vperm.xlu1 %1662, %v1873_v28   ;;  %390 = vperm.xlu0 %1661, %v1868_v27  }
  0x7b   :  { %394 = vperm.xlu1 %1662, %v1885_v30   ;;  %398 = vperm.xlu0 %1661, %v1880_v29  }
  0x7d   :  { %v1931_v34 = vpop.permute.xlu1 %65  ;;  %v1933_v35 = vpop.permute.xlu0 %55 }
  0x7f   :  { %402 = vperm.xlu1 %1662, %v1897_v32   ;;  %406 = vperm.xlu0 %1661, %v1892_v31  }
  0x81   :  { %v1937_v36 = vpop.permute.xlu1 %70  ;;  %v1939_v37 = vpop.permute.xlu0 %60 }
  0x83   :  { %1663 = vset.pattern.permute.xlu1 %v1675_v38  ;;  %1664 = vset.pattern.permute.xlu0 %v1675_v38 }
  0x84   :  { %478 = vperm.xlu1 %1663, %v1717_v2   ;;  %482 = vperm.xlu0 %1664, %v1729_v4  }
  0x85   :  { %v1943_v39 = vpop.permute.xlu1 %80  ;;  %v1945_v40 = vpop.permute.xlu0 %75 }
  0x88   :  { %486 = vperm.xlu1 %1663, %v1712_v1   ;;  %494 = vperm.xlu0 %1664, %v1741_v6  }
  0x89   :  { %v1949_v41 = vpop.permute.xlu1 %90  ;;  %v1951_v42 = vpop.permute.xlu0 %85 }
  0x8c   :  { %490 = vperm.xlu1 %1663, %v1724_v3   ;;  %502 = vperm.xlu0 %1664, %v1753_v8  }
  0x8d   :  { %v1955_v43 = vpop.permute.xlu1 %100  ;;  %v1957_v44 = vpop.permute.xlu0 %95 }
  0x90   :  { %498 = vperm.xlu1 %1663, %v1736_v5   ;;  %510 = vperm.xlu0 %1664, %v1765_v10  }
  0x91   :  { %v1961_v45 = vpop.permute.xlu1 %110  ;;  %v1963_v46 = vpop.permute.xlu0 %105 }
  0x94   :  { %506 = vperm.xlu1 %1663, %v1748_v7   ;;  %518 = vperm.xlu0 %1664, %v1777_v12  }
  0x95   :  { %v1967_v47 = vpop.permute.xlu1 %120  ;;  %v1969_v48 = vpop.permute.xlu0 %115 }
  0x98   :  { %514 = vperm.xlu1 %1663, %v1760_v9   ;;  %526 = vperm.xlu0 %1664, %v1789_v14  }
  0x99   :  { %v1973_v49 = vpop.permute.xlu1 %130  ;;  %v1975_v50 = vpop.permute.xlu0 %125 }
  0x9c   :  { %522 = vperm.xlu1 %1663, %v1772_v11   ;;  %534 = vperm.xlu0 %1664, %v1801_v16  }
  0x9d   :  { %v1979_v51 = vpop.permute.xlu1 %140  ;;  %v1981_v52 = vpop.permute.xlu0 %135 }
  0xa0   :  { %530 = vperm.xlu1 %1663, %v1784_v13   ;;  %542 = vperm.xlu0 %1664, %v1813_v18  }
  0xa1   :  { %v1985_v53 = vpop.permute.xlu1 %150  ;;  %v1987_v54 = vpop.permute.xlu0 %145 }
  0xa4   :  { %538 = vperm.xlu1 %1663, %v1796_v15   ;;  %550 = vperm.xlu0 %1664, %v1825_v20  }
  0xa5   :  { %v1991_v55 = vpop.permute.xlu1 %160  ;;  %v1993_v56 = vpop.permute.xlu0 %155 }
  0xa8   :  { %546 = vperm.xlu1 %1663, %v1808_v17   ;;  %558 = vperm.xlu0 %1664, %v1837_v22  }
  0xa9   :  { %v1997_v57 = vpop.permute.xlu1 %170  ;;  %v1999_v58 = vpop.permute.xlu0 %165 }
  0xac   :  { %554 = vperm.xlu1 %1663, %v1820_v19   ;;  %566 = vperm.xlu0 %1664, %v1849_v24  }
  0xad   :  { %v2003_v59 = vpop.permute.xlu1 %180  ;;  %v2005_v60 = vpop.permute.xlu0 %175 }
  0xae   :  { %3708 = vst [vmem:[#allocation2_spill] sm:$0xff] %v2005_v60 }
  0xb0   :  { %562 = vperm.xlu1 %1663, %v1832_v21   ;;  %574 = vperm.xlu0 %1664, %v1861_v26  }
  0xb1   :  { %v2009_v61 = vpop.permute.xlu1 %190  ;;  %v2011_v62 = vpop.permute.xlu0 %185 }
  0xb2   :  { %3709 = vst [vmem:[#allocation3_spill] sm:$0xff] %v2009_v61  ;;  %3710 = vst [vmem:[#allocation4_spill] sm:$0xff] %v2011_v62 }
  0xb4   :  { %570 = vperm.xlu1 %1663, %v1844_v23   ;;  %582 = vperm.xlu0 %1664, %v1873_v28  }
  0xb5   :  { %v2015_v63 = vpop.permute.xlu1 %200  ;;  %v2017_v0 = vpop.permute.xlu0 %195 }
  0xb6   :  { %3711 = vst [vmem:[#allocation5_spill] sm:$0xff] %v2015_v63  ;;  %3712 = vst [vmem:[#allocation6_spill] sm:$0xff] %v2017_v0  ;;  %v1676_v63 = vmov 3  }
  0xb8   :  { %578 = vperm.xlu1 %1663, %v1856_v25   ;;  %590 = vperm.xlu0 %1664, %v1885_v30  }
  0xb9   :  { %v2021_v33 = vpop.permute.xlu1 %210  ;;  %v2023_v38 = vpop.permute.xlu0 %205 }
  0xba   :  { %3713 = vst [vmem:[#allocation7_spill] sm:$0xff] %v2021_v33  ;;  %3714 = vst [vmem:[#allocation8_spill] sm:$0xff] %v2023_v38  ;;  %v3700_v33 = vmov 4  }
  0xbc   :  { %586 = vperm.xlu1 %1663, %v1868_v27   ;;  %598 = vperm.xlu0 %1664, %v1897_v32  }
  0xbe   :  { %v2027_v62 = vpop.permute.xlu1 %286  ;;  %v2029_v61 = vpop.permute.xlu0 %282 }
  0xbf   :  { %3715 = vst [vmem:[#allocation9_spill] sm:$0xff] %v2027_v62  ;;  %3716 = vst [vmem:[#allocation10_spill] sm:$0xff] %v2029_v61 }
  0xc0   :  { %594 = vperm.xlu1 %1663, %v1880_v29   ;;  %1665 = vset.pattern.permute.xlu0 %v1676_v63 }
  0xc1   :  { %674 = vperm.xlu0 %1665, %v1717_v2  }
  0xc2   :  { %v2033_v0 = vpop.permute.xlu1 %290  ;;  %v2035_v60 = vpop.permute.xlu0 %294 }
  0xc3   :  { %3717 = vst [vmem:[#allocation11_spill] sm:$0xff] %v2033_v0  ;;  %3718 = vst [vmem:[#allocation12_spill] sm:$0xff] %v2035_v60 }
  0xc4   :  { %602 = vperm.xlu1 %1663, %v1892_v31  }
  0xc5   :  { %1667 = vset.pattern.permute.xlu0 %v3700_v33 }
  0xc6   :  { %v2039_v38 = vpop.permute.xlu1 %298  ;;  %870 = vperm.xlu0 %1667, %v1717_v2   ;;  %v2042_v61 = vpop.permute.xlu0 %302  ;;  %v3723_v2 = vmov 4  }
  0xc7   :  { %3719 = vst [vmem:[#allocation13_spill] sm:$0xff] %v2039_v38  ;;  %3720 = vst [vmem:[#allocation14_spill] sm:$0xff] %v2042_v61 }
  0xc8   :  { %1666 = vset.pattern.permute.xlu1 %v1676_v63 }
  0xc9   :  { %678 = vperm.xlu1 %1666, %v1729_v4  }
  0xca   :  { %v2045_v62 = vpop.permute.xlu1 %306  ;;  %878 = vperm.xlu0 %1667, %v1712_v1   ;;  %v2048_v0 = vpop.permute.xlu0 %310 }
  0xcb   :  { %3721 = vst [vmem:[#allocation15_spill] sm:$0xff] %v2045_v62 }
  0xcd   :  { %682 = vperm.xlu1 %1666, %v1712_v1  }
  0xce   :  { %v2051_v60 = vpop.permute.xlu1 %314  ;;  %882 = vperm.xlu0 %1667, %v1724_v3   ;;  %v2054_v33 = vpop.permute.xlu0 %318 }
  0xcf   :  { %3722 = vst [vmem:[#allocation16_spill] sm:$0xff] %v2054_v33 }
  0xd1   :  { %1668 = vset.pattern.permute.xlu1 %v3723_v2 }
  0xd2   :  { %v2057_v61 = vpop.permute.xlu1 %322  ;;  %874 = vperm.xlu1 %1668, %v1729_v4   ;;  %886 = vperm.xlu0 %1667, %v1741_v6   ;;  %v2061_v62 = vpop.permute.xlu0 %326 }
  0xd3   :  { %3724 = vst [vmem:[#allocation17_spill] sm:$0xff] %v2057_v61 }
  0xd6   :  { %v2063_v38 = vpop.permute.xlu1 %330  ;;  %1669 = vset.pattern.permute.xlu1 %v1676_v63  ;;  %890 = vperm.xlu0 %1667, %v1736_v5   ;;  %v2066_v1 = vpop.permute.xlu0 %334 }
  0xd7   :  { %3725 = vst [vmem:[#allocation18_spill] sm:$0xff] %v2063_v38  ;;  %686 = vperm.xlu1 %1669, %v1724_v3  }
  0xda   :  { %v2069_v33 = vpop.permute.xlu1 %338  ;;  %894 = vperm.xlu0 %1667, %v1753_v8   ;;  %v2072_v61 = vpop.permute.xlu0 %342 }
  0xdb   :  { %3726 = vst [vmem:[#allocation19_spill] sm:$0xff] %v2069_v33  ;;  %690 = vperm.xlu1 %1669, %v1741_v6  }
  0xde   :  { %v2075_v4 = vpop.permute.xlu1 %346  ;;  %898 = vperm.xlu0 %1667, %v1748_v7   ;;  %v2078_v38 = vpop.permute.xlu0 %350 }
  0xdf   :  { %3727 = vst [vmem:[#allocation20_spill] sm:$0xff] %v2075_v4  ;;  %694 = vperm.xlu1 %1669, %v1736_v5  }
  0xe2   :  { %v2081_v63 = vpop.permute.xlu1 %354  ;;  %902 = vperm.xlu0 %1667, %v1765_v10   ;;  %v2084_v3 = vpop.permute.xlu0 %358 }
  0xe3   :  { %3728 = vst [vmem:[#allocation21_spill] sm:$0xff] %v2081_v63  ;;  %698 = vperm.xlu1 %1669, %v1753_v8  }
  0xe6   :  { %v2087_v33 = vpop.permute.xlu1 %362  ;;  %906 = vperm.xlu0 %1667, %v1760_v9   ;;  %v2090_v6 = vpop.permute.xlu0 %366 }
  0xe7   :  { %3729 = vst [vmem:[#allocation22_spill] sm:$0xff] %v2087_v33  ;;  %702 = vperm.xlu1 %1669, %v1748_v7  }
  0xea   :  { %v2093_v4 = vpop.permute.xlu1 %370  ;;  %910 = vperm.xlu0 %1667, %v1777_v12   ;;  %v2096_v5 = vpop.permute.xlu0 %374 }
  0xeb   :  { %3730 = vst [vmem:[#allocation23_spill] sm:$0xff] %v2093_v4  ;;  %706 = vperm.xlu1 %1669, %v1765_v10  }
  0xee   :  { %v2099_v63 = vpop.permute.xlu1 %378  ;;  %914 = vperm.xlu0 %1667, %v1772_v11   ;;  %v2102_v8 = vpop.permute.xlu0 %382 }
  0xef   :  { %3731 = vst [vmem:[#allocation24_spill] sm:$0xff] %v2099_v63  ;;  %710 = vperm.xlu1 %1669, %v1760_v9  }
  0xf2   :  { %v2105_v33 = vpop.permute.xlu1 %386  ;;  %918 = vperm.xlu0 %1667, %v1789_v14   ;;  %v2108_v7 = vpop.permute.xlu0 %390 }
  0xf3   :  { %3732 = vst [vmem:[#allocation25_spill] sm:$0xff] %v2108_v7  ;;  %714 = vperm.xlu1 %1669, %v1777_v12  }
  0xf6   :  { %v2111_v4 = vpop.permute.xlu1 %394  ;;  %922 = vperm.xlu0 %1667, %v1784_v13   ;;  %v2114_v10 = vpop.permute.xlu0 %398 }
  0xf7   :  { %3733 = vst [vmem:[#allocation26_spill] sm:$0xff] %v2111_v4  ;;  %3734 = vst [vmem:[#allocation27_spill] sm:$0xff] %v2114_v10  ;;  %718 = vperm.xlu1 %1669, %v1772_v11  }
  0xfa   :  { %v2117_v63 = vpop.permute.xlu1 %402  ;;  %926 = vperm.xlu0 %1667, %v1801_v16   ;;  %v2120_v9 = vpop.permute.xlu0 %406 }
  0xfb   :  { %3735 = vst [vmem:[#allocation28_spill] sm:$0xff] %v2117_v63  ;;  %3736 = vst [vmem:[#allocation29_spill] sm:$0xff] %v2120_v9  ;;  %722 = vperm.xlu1 %1669, %v1789_v14  }
  0xfe   :  { %930 = vperm.xlu0 %1667, %v1796_v15  }
  0xff   :  { %726 = vperm.xlu1 %1669, %v1784_v13   ;;  %v2125_v12 = vpop.permute.xlu1 %478  ;;  %v2127_v4 = vpop.permute.xlu0 %482 }
 0x102   :  { %934 = vperm.xlu0 %1667, %v1813_v18  }
 0x103   :  { %730 = vperm.xlu1 %1669, %v1801_v16   ;;  %v2131_v11 = vpop.permute.xlu1 %486  ;;  %v2133_v63 = vpop.permute.xlu0 %494 }
 0x106   :  { %938 = vperm.xlu0 %1667, %v1808_v17  }
 0x107   :  { %734 = vperm.xlu1 %1669, %v1796_v15   ;;  %v2137_v14 = vpop.permute.xlu1 %490  ;;  %v2139_v9 = vpop.permute.xlu0 %502 }
 0x108   :  { %3737 = vst [vmem:[#allocation30_spill] sm:$0xff] %v2137_v14  ;;  %3738 = vst [vmem:[#allocation31_spill] sm:$0xff] %v2139_v9 }
 0x10a   :  { %942 = vperm.xlu0 %1667, %v1825_v20  }
 0x10b   :  { %738 = vperm.xlu1 %1669, %v1813_v18   ;;  %v2143_v13 = vpop.permute.xlu1 %498  ;;  %v2145_v10 = vpop.permute.xlu0 %510 }
 0x10c   :  { %3739 = vst [vmem:[#allocation32_spill] sm:$0xff] %v2143_v13  ;;  %3740 = vst [vmem:[#allocation33_spill] sm:$0xff] %v2145_v10  ;;  %v3803_v13 = vld [vmem:[#allocation15_spill] sm:$0xff] }
 0x10e   :  { %946 = vperm.xlu0 %1667, %v1820_v19  }
 0x10f   :  { %742 = vperm.xlu1 %1669, %v1808_v17   ;;  %v2149_v16 = vpop.permute.xlu1 %506  ;;  %v2151_v7 = vpop.permute.xlu0 %518 }
 0x110   :  { %3741 = vst [vmem:[#allocation34_spill] sm:$0xff] %v2149_v16  ;;  %3742 = vst [vmem:[#allocation35_spill] sm:$0xff] %v2151_v7 }
 0x112   :  { %950 = vperm.xlu0 %1667, %v1837_v22  }
 0x113   :  { %746 = vperm.xlu1 %1669, %v1825_v20   ;;  %v2155_v15 = vpop.permute.xlu1 %514  ;;  %v2157_v9 = vpop.permute.xlu0 %526 }
 0x114   :  { %3743 = vst [vmem:[#allocation36_spill] sm:$0xff] %v2155_v15  ;;  %3744 = vst [vmem:[#allocation37_spill] sm:$0xff] %v2157_v9 }
 0x116   :  { %954 = vperm.xlu0 %1667, %v1832_v21  }
 0x117   :  { %750 = vperm.xlu1 %1669, %v1820_v19   ;;  %v2161_v18 = vpop.permute.xlu1 %522  ;;  %v2163_v10 = vpop.permute.xlu0 %534 }
 0x118   :  { %3745 = vst [vmem:[#allocation38_spill] sm:$0xff] %v2161_v18  ;;  %3746 = vst [vmem:[#allocation39_spill] sm:$0xff] %v2163_v10 }
 0x11a   :  { %958 = vperm.xlu0 %1667, %v1849_v24  }
 0x11b   :  { %754 = vperm.xlu1 %1669, %v1837_v22   ;;  %v2167_v17 = vpop.permute.xlu1 %530  ;;  %v2169_v7 = vpop.permute.xlu0 %542 }
 0x11c   :  { %3747 = vst [vmem:[#allocation40_spill] sm:$0xff] %v2167_v17  ;;  %3748 = vst [vmem:[#allocation41_spill] sm:$0xff] %v2169_v7 }
 0x11e   :  { %962 = vperm.xlu0 %1667, %v1844_v23  }
 0x11f   :  { %758 = vperm.xlu1 %1669, %v1832_v21   ;;  %v2173_v20 = vpop.permute.xlu1 %538  ;;  %v2175_v9 = vpop.permute.xlu0 %550 }
 0x120   :  { %3749 = vst [vmem:[#allocation42_spill] sm:$0xff] %v2173_v20  ;;  %3750 = vst [vmem:[#allocation43_spill] sm:$0xff] %v2175_v9 }
 0x122   :  { %966 = vperm.xlu0 %1667, %v1861_v26  }
 0x123   :  { %762 = vperm.xlu1 %1669, %v1849_v24   ;;  %v2179_v19 = vpop.permute.xlu1 %546  ;;  %v2181_v10 = vpop.permute.xlu0 %558 }
 0x124   :  { %3751 = vst [vmem:[#allocation44_spill] sm:$0xff] %v2179_v19  ;;  %3752 = vst [vmem:[#allocation45_spill] sm:$0xff] %v2181_v10 }
 0x126   :  { %970 = vperm.xlu0 %1667, %v1856_v25  }
 0x127   :  { %766 = vperm.xlu1 %1669, %v1844_v23   ;;  %v2185_v22 = vpop.permute.xlu1 %554  ;;  %v2187_v7 = vpop.permute.xlu0 %566 }
 0x128   :  { %3753 = vst [vmem:[#allocation46_spill] sm:$0xff] %v2185_v22  ;;  %3754 = vst [vmem:[#allocation47_spill] sm:$0xff] %v2187_v7 }
 0x12a   :  { %974 = vperm.xlu0 %1667, %v1873_v28  }
 0x12b   :  { %770 = vperm.xlu1 %1669, %v1861_v26   ;;  %v2191_v21 = vpop.permute.xlu1 %562  ;;  %v2193_v9 = vpop.permute.xlu0 %574 }
 0x12c   :  { %3755 = vst [vmem:[#allocation48_spill] sm:$0xff] %v2191_v21  ;;  %3756 = vst [vmem:[#allocation49_spill] sm:$0xff] %v2193_v9 }
 0x12e   :  { %978 = vperm.xlu0 %1667, %v1868_v27  }
 0x12f   :  { %774 = vperm.xlu1 %1669, %v1856_v25   ;;  %v2197_v24 = vpop.permute.xlu1 %570  ;;  %v2199_v10 = vpop.permute.xlu0 %582 }
 0x130   :  { %3757 = vst [vmem:[#allocation50_spill] sm:$0xff] %v2197_v24  ;;  %3758 = vst [vmem:[#allocation51_spill] sm:$0xff] %v2199_v10 }
 0x132   :  { %982 = vperm.xlu0 %1667, %v1885_v30  }
 0x133   :  { %778 = vperm.xlu1 %1669, %v1873_v28   ;;  %v2203_v23 = vpop.permute.xlu1 %578  ;;  %v2205_v7 = vpop.permute.xlu0 %590 }
 0x134   :  { %3759 = vst [vmem:[#allocation52_spill] sm:$0xff] %v2203_v23  ;;  %3760 = vst [vmem:[#allocation53_spill] sm:$0xff] %v2205_v7  ;;  %v213_v23 = vlaneseq }
 0x136   :  { %986 = vperm.xlu0 %1667, %v1880_v29   ;;  %v2248_v22 = vshrl.u32 %v213_v23, 7 }
 0x137   :  { %782 = vperm.xlu1 %1669, %v1868_v27   ;;  %v2209_v26 = vpop.permute.xlu1 %586  ;;  %v2211_v9 = vpop.permute.xlu0 %598 }
 0x138   :  { %3761 = vst [vmem:[#allocation54_spill] sm:$0xff] %v2209_v26  ;;  %3762 = vst [vmem:[#allocation55_spill] sm:$0xff] %v2211_v9  ;;  %v607_v23 = vsub.s32 2, %v2248_v22 }
 0x13a   :  { %990 = vperm.xlu0 %1667, %v1897_v32  }
 0x13b   :  { %786 = vperm.xlu1 %1669, %v1885_v30   ;;  %v2215_v25 = vpop.permute.xlu1 %594 }
 0x13c   :  { %3763 = vst [vmem:[#allocation56_spill] sm:$0xff] %v2215_v25  ;;  %v2217_v10 = vpop.permute.xlu0 %674 }
 0x13d   :  { %3764 = vst [vmem:[#allocation57_spill] sm:$0xff] %v2217_v10  ;;  %v3801_v10 = vld [vmem:[#allocation13_spill] sm:$0xff] }
 0x13f   :  { %790 = vperm.xlu1 %1669, %v1880_v29   ;;  %v2220_v28 = vpop.permute.xlu1 %602 }
 0x140   :  { %3765 = vst [vmem:[#allocation58_spill] sm:$0xff] %v2220_v28 }
 0x141   :  { %v2222_v7 = vpop.permute.xlu0 %870 }
 0x142   :  { %3766 = vst [vmem:[#allocation59_spill] sm:$0xff] %v2222_v7 }
 0x143   :  { %794 = vperm.xlu1 %1669, %v1897_v32  }
 0x144   :  { %v2225_v27 = vpop.permute.xlu1 %678 }
 0x145   :  { %3767 = vst [vmem:[#allocation60_spill] sm:$0xff] %v2225_v27  ;;  %v2227_v26 = vpop.permute.xlu0 %878 }
 0x146   :  { %3768 = vst [vmem:[#allocation61_spill] sm:$0xff] %v2227_v26 }
 0x147   :  { %798 = vperm.xlu1 %1669, %v1892_v31  }
 0x148   :  { %v2230_v9 = vpop.permute.xlu1 %682 }
 0x149   :  { %3769 = vst [vmem:[#allocation62_spill] sm:$0xff] %v2230_v9  ;;  %v2232_v30 = vpop.permute.xlu0 %882 }
 0x14a   :  { %3770 = vst [vmem:[#allocation63_spill] sm:$0xff] %v2232_v30 }
 0x14b   :  { %1670 = vset.pattern.permute.xlu1 %v3723_v2 }
 0x14c   :  { %994 = vperm.xlu1 %1670, %v1892_v31   ;;  %v215_v31 = vsub.s32 0, %v2248_v22 }
 0x14d   :  { %v2236_v29 = vpop.permute.xlu1 %874  ;;  %v2238_v28 = vpop.permute.xlu0 %886 }
 0x14e   :  { %3771 = vst [vmem:[#allocation64_spill] sm:$0xff] %v2236_v29  ;;  %3772 = vst [vmem:[#allocation65_spill] sm:$0xff] %v2238_v28  ;;  %v52_v28 = vld [vmem:[%s3695_s1] sm:$0x1f]  ;;  %v3796_v29 = vld [vmem:[#allocation4_spill] sm:$0xff] }
 0x14f   :  { %v2262_v30 = vrot.slane %v52_v28, %v215_v31 }
 0x151   :  { %v2240_v25 = vpop.permute.xlu0 %890  ;;  %3781 = vst [vmem:[#allocation74_spill] sm:$0xff] %v2262_v30  ;;  %v220_v31 = vmul.f32 %v2262_v30, %v1937_v36  ;;  %v226_v36 = vmul.f32 %v2262_v30, %v1955_v43  ;;  %v2308_v43 = vmul.f32 %v2262_v30, %v1973_v49  ;;  %v2330_v49 = vmul.f32 %v2262_v30, %v1991_v55 }
 0x152   :  { %3773 = vst [vmem:[#allocation66_spill] sm:$0xff] %v2240_v25  ;;  %v2242_v32 = vpop.permute.xlu1 %686  ;;  %v2349_v55 = vmul.f32 %v2262_v30, %v2003_v59  ;;  %v3795_v59 = vld [vmem:[#allocation11_spill] sm:$0xff] }
 0x153   :  { %3774 = vst [vmem:[#allocation67_spill] sm:$0xff] %v2242_v32 }
 0x154   :  { %3788 = vst [vmem:[#allocation81_spill] sm:$0xff] %v2349_v55  ;;  %v3806_v55 = vld [vmem:[#allocation17_spill] sm:$0xff] }
 0x155   :  { %v2244_v24 = vpop.permute.xlu0 %894 }
 0x156   :  { %3775 = vst [vmem:[#allocation68_spill] sm:$0xff] %v2244_v24  ;;  %v2246_v21 = vpop.permute.xlu1 %690  ;;  %v411_v24 = vsub.s32 1, %v2248_v22 }
 0x157   :  { %3776 = vst [vmem:[#allocation69_spill] sm:$0xff] %v2246_v21  ;;  %v2280_v21 = vrot.slane %v52_v28, %v607_v23 }
 0x158   :  { %v2272_v26 = vrot.slane %v52_v28, %v411_v24 }
 0x159   :  { %v2250_v19 = vpop.permute.xlu0 %898 }
 0x15a   :  { %3777 = vst [vmem:[#allocation70_spill] sm:$0xff] %v2250_v19  ;;  %v2252_v2 = vpop.permute.xlu1 %694  ;;  %3784 = vst [vmem:[#allocation77_spill] sm:$0xff] %v2272_v26  ;;  %v415_v7 = vmul.f32 %v2272_v26, %v3795_v59  ;;  %v419_v59 = vmul.f32 %v2272_v26, %v3803_v13 }
 0x15b   :  { %3778 = vst [vmem:[#allocation71_spill] sm:$0xff] %v2252_v2  ;;  %v219_v2 = vmul.f32 %v2262_v30, %v1931_v34  ;;  %v224_v34 = vmul.f32 %v2262_v30, %v1949_v41  ;;  %v230_v41 = vmul.f32 %v2262_v30, %v1967_v47  ;;  %v2322_v47 = vmul.f32 %v2262_v30, %v1985_v53 }
 0x15d   :  { %v2258_v25 = vpop.permute.xlu0 %902  ;;  %v447_v14 = vadd.f32 %v415_v7, %v219_v2  ;;  %v3808_v7 = vld [vmem:[#allocation19_spill] sm:$0xff] }
 0x15e   :  { %3779 = vst [vmem:[#allocation72_spill] sm:$0xff] %v2258_v25  ;;  %v2260_v20 = vpop.permute.xlu1 %698  ;;  %v217_v25 = vmul.f32 %v2262_v30, %v1933_v35  ;;  %v223_v35 = vmul.f32 %v2262_v30, %v1951_v42  ;;  %v229_v42 = vmul.f32 %v2262_v30, %v1969_v48  ;;  %v2326_v48 = vmul.f32 %v2262_v30, %v1987_v54 }
 0x15f   :  { %3780 = vst [vmem:[#allocation73_spill] sm:$0xff] %v2260_v20  ;;  %v218_v20 = vmul.f32 %v2262_v30, %v1939_v37  ;;  %v225_v37 = vmul.f32 %v2262_v30, %v1957_v44  ;;  %v231_v44 = vmul.f32 %v2262_v30, %v1975_v50  ;;  %v2334_v50 = vmul.f32 %v2262_v30, %v1993_v56 }
 0x160   :  { %v2345_v54 = vmul.f32 %v2262_v30, %v1999_v58  ;;  %v3794_v58 = vld [vmem:[#allocation10_spill] sm:$0xff] }
 0x161   :  { %v2266_v17 = vpop.permute.xlu0 %906  ;;  %v413_v9 = vmul.f32 %v2272_v26, %v3794_v58 }
 0x162   :  { %3782 = vst [vmem:[#allocation75_spill] sm:$0xff] %v2266_v17  ;;  %v2268_v19 = vpop.permute.xlu1 %702  ;;  %v222_v17 = vmul.f32 %v2262_v30, %v1943_v39  ;;  %v228_v39 = vmul.f32 %v2262_v30, %v1961_v45  ;;  %v2314_v45 = vmul.f32 %v2262_v30, %v1979_v51  ;;  %v2338_v51 = vmul.f32 %v2262_v30, %v1997_v57  ;;  %v3791_v57 = vld [vmem:[#allocation2_spill] sm:$0xff] }
 0x163   :  { %3783 = vst [vmem:[#allocation76_spill] sm:$0xff] %v2268_v19  ;;  %v221_v19 = vmul.f32 %v2262_v30, %v1945_v40  ;;  %v227_v40 = vmul.f32 %v2262_v30, %v1963_v46  ;;  %v2318_v46 = vmul.f32 %v2262_v30, %v1981_v52  ;;  %v803_v52 = vsub.s32 3, %v2248_v22 }
 0x164   :  { %v2358_v32 = vmul.f32 %v2262_v30, %v3791_v57  ;;  %v3800_v57 = vld [vmem:[#allocation12_spill] sm:$0xff]  ;;  %v445_v13 = vadd.f32 %v413_v9, %v217_v25  ;;  %v427_v25 = vmul.f32 %v2272_v26, %v3808_v7 }
 0x165   :  { %v2290_v24 = vpop.permute.xlu0 %910  ;;  %v416_v16 = vmul.f32 %v2272_v26, %v3800_v57  ;;  %v2386_v27 = vrot.slane %v52_v28, %v803_v52  ;;  %v421_v57 = vmul.f32 %v2272_v26, %v2051_v60  ;;  %v424_v52 = vmul.f32 %v2272_v26, %v2061_v62 }
 0x166   :  { %3785 = vst [vmem:[#allocation78_spill] sm:$0xff] %v2290_v24  ;;  %v2300_v23 = vpop.permute.xlu1 %706  ;;  %v3789_v24 = vld [vmem:[#allocation9_spill] sm:$0xff] }
 0x167   :  { %3786 = vst [vmem:[#allocation79_spill] sm:$0xff] %v2300_v23  ;;  %v414_v56 = vmul.f32 %v2272_v26, %v3789_v24  ;;  %v999_v23 = vsub.s32 4, %v2248_v22  ;;  %v2370_v24 = vmul.f32 %v2262_v30, %v3796_v29  ;;  %v3798_v22 = vld [vmem:[#allocation6_spill] sm:$0xff]  ;;  %v420_v29 = vmul.f32 %v2272_v26, %v2048_v0 }
 0x168   :  { %v423_v0 = vmul.f32 %v2272_v26, %v3806_v55  ;;  %v2418_v62 = vadd.f32 %v421_v57, %v225_v37  ;;  %v430_v55 = vmul.f32 %v2272_v26, %v2078_v38 }
 0x169   :  { %v2341_v53 = vpop.permute.xlu0 %914  ;;  %v2412_v9 = vadd.f32 %v420_v29, %v224_v34  ;;  %v2430_v34 = vadd.f32 %v424_v52, %v228_v39  ;;  %v434_v39 = vmul.f32 %v2272_v26, %v2090_v6  ;;  %v3812_v29 = vld [vmem:[#allocation23_spill] sm:$0xff]  ;;  %v438_v6 = vmul.f32 %v2272_v26, %v2102_v8 }
 0x16a   :  { %3787 = vst [vmem:[#allocation80_spill] sm:$0xff] %v2341_v53  ;;  %v2354_v18 = vpop.permute.xlu1 %710  ;;  %v3792_v53 = vld [vmem:[#allocation3_spill] sm:$0xff]  ;;  %v435_v38 = vmul.f32 %v2272_v26, %v3812_v29  ;;  %v2467_v52 = vadd.f32 %v430_v55, %v2314_v45  ;;  %v610_v8 = vmul.f32 %v2280_v21, %v2127_v4  ;;  %v611_v45 = vmul.f32 %v2280_v21, %v2131_v11  ;;  %v3814_v4 = vld [vmem:[#allocation81_spill] sm:$0xff]  ;;  %v3815_v11 = vld [vmem:[#allocation30_spill] sm:$0xff] }
 0x16b   :  { %3790 = vst [vmem:[#allocation9_spill] sm:$0xff] %v2354_v18  ;;  %v2362_v15 = vmul.f32 %v2262_v30, %v3792_v53  ;;  %3797 = vst [vmem:[#allocation3_spill] sm:$0xff] %v2370_v24  ;;  %v2374_v18 = vmul.f32 %v2262_v30, %v3798_v22  ;;  %v417_v53 = vmul.f32 %v2272_v26, %v3801_v10  ;;  %v3805_v30 = vld [vmem:[#allocation16_spill] sm:$0xff]  ;;  %v3822_v29 = vld [vmem:[#allocation57_spill] sm:$0xff] }
 0x16c   :  { %v2390_v22 = vadd.f32 %v414_v56, %v218_v20  ;;  %v422_v10 = vmul.f32 %v2272_v26, %v3805_v30  ;;  %v2404_v20 = vadd.f32 %v416_v16, %v220_v31  ;;  %v3809_v31 = vld [vmem:[#allocation20_spill] sm:$0xff] }
 0x16d   :  { %3793 = vst [vmem:[#allocation2_spill] sm:$0xff] %v2362_v15  ;;  %3799 = vst [vmem:[#allocation10_spill] sm:$0xff] %v2374_v18  ;;  %v3802_v15 = vld [vmem:[#allocation14_spill] sm:$0xff]  ;;  %v2388_v24 = vpop.permute.xlu0 %918  ;;  %v2396_v18 = vrot.slane %v52_v28, %v999_v23  ;;  %v449_v56 = vadd.f32 %v417_v53, %v221_v19  ;;  %v426_v28 = vmul.f32 %v2272_v26, %v2066_v1 }
 0x16e   :  { %v418_v58 = vmul.f32 %v2272_v26, %v3802_v15  ;;  %3804 = vst [vmem:[#allocation11_spill] sm:$0xff] %v2388_v24  ;;  %v2398_v15 = vpop.permute.xlu1 %714  ;;  %v3807_v24 = vld [vmem:[#allocation18_spill] sm:$0xff]  ;;  %v451_v23 = vadd.f32 %v419_v59, %v223_v35  ;;  %v2420_v16 = vadd.f32 %v422_v10, %v226_v36  ;;  %v428_v19 = vmul.f32 %v2272_v26, %v2072_v61  ;;  %v3813_v10 = vld [vmem:[#allocation24_spill] sm:$0xff] }
 0x16f   :  { %v425_v60 = vmul.f32 %v2272_v26, %v3807_v24  ;;  %v429_v1 = vmul.f32 %v2272_v26, %v3809_v31  ;;  %v2428_v35 = vadd.f32 %v423_v0, %v227_v40  ;;  %v3810_v24 = vld [vmem:[#allocation21_spill] sm:$0xff]  ;;  %v2438_v53 = vadd.f32 %v426_v28, %v230_v41 }
 0x170   :  { %v2410_v30 = vadd.f32 %v418_v58, %v222_v17  ;;  %v431_v37 = vmul.f32 %v2272_v26, %v3810_v24  ;;  %v432_v61 = vmul.f32 %v2272_v26, %v2084_v3  ;;  %v3811_v58 = vld [vmem:[#allocation22_spill] sm:$0xff]  ;;  %v2444_v40 = vadd.f32 %v427_v25, %v231_v44  ;;  %v3820_v24 = vld [vmem:[#allocation60_spill] sm:$0xff] }
 0x171   :  { %v2416_v2 = vpop.permute.xlu0 %922  ;;  %v2436_v36 = vadd.f32 %v425_v60, %v229_v42  ;;  %v433_v59 = vmul.f32 %v2272_v26, %v3811_v58  ;;  %v436_v42 = vmul.f32 %v2272_v26, %v2096_v5  ;;  %v2455_v41 = vadd.f32 %v428_v19, %v2308_v43  ;;  %v3816_v19 = vld [vmem:[#allocation31_spill] sm:$0xff] }
 0x172   :  { %v2426_v17 = vpop.permute.xlu1 %718  ;;  %v2458_v3 = vadd.f32 %v429_v1, %v2318_v46  ;;  %v437_v44 = vmul.f32 %v2272_v26, %v3813_v10  ;;  %v2470_v5 = vadd.f32 %v431_v37, %v2326_v48  ;;  %v439_v43 = vmul.f32 %v2272_v26, %v2105_v33  ;;  %v3823_v10 = vld [vmem:[#allocation33_spill] sm:$0xff] }
 0x173   :  { %v609_v46 = vmul.f32 %v2280_v21, %v2125_v12  ;;  %v2477_v60 = vadd.f32 %v432_v61, %v2322_v47  ;;  %v2480_v28 = vadd.f32 %v433_v59, %v2334_v50  ;;  %v2487_v48 = vadd.f32 %v434_v39, %v2330_v49  ;;  %v3821_v59 = vld [vmem:[#allocation32_spill] sm:$0xff] }
 0x174   :  { %v2490_v33 = vadd.f32 %v435_v38, %v2345_v54  ;;  %v2493_v12 = vadd.f32 %v436_v42, %v2338_v51  ;;  %v613_v47 = vmul.f32 %v2280_v21, %v2133_v63  ;;  %v2500_v7 = vadd.f32 %v437_v44, %v2358_v32  ;;  %v3817_v51 = vld [vmem:[#allocation3_spill] sm:$0xff]  ;;  %v3818_v63 = vld [vmem:[#allocation25_spill] sm:$0xff] }
 0x175   :  { %v2452_v57 = vpop.permute.xlu0 %926  ;;  %v2503_v25 = vadd.f32 %v438_v6, %v3814_v4  ;;  %v612_v49 = vmul.f32 %v2280_v21, %v3815_v11  ;;  %v615_v54 = vmul.f32 %v2280_v21, %v3816_v19  ;;  %v2512_v1 = vadd.f32 %v439_v43, %v3817_v51  ;;  %v3824_v6 = vld [vmem:[#allocation34_spill] sm:$0xff]  ;;  %v3828_v19 = vld [vmem:[#allocation35_spill] sm:$0xff] }
 0x176   :  { %v2464_v0 = vpop.permute.xlu1 %722  ;;  %v2516_v55 = vmul.f32 %v2272_v26, %v3818_v63  ;;  %v641_v32 = vadd.f32 %v609_v46, %v445_v13  ;;  %v806_v37 = vmul.f32 %v2386_v27, %v3820_v24  ;;  %v642_v61 = vadd.f32 %v610_v8, %v2390_v22  ;;  %v3825_v13 = vld [vmem:[#allocation64_spill] sm:$0xff]  ;;  %v3826_v8 = vld [vmem:[#allocation59_spill] sm:$0xff]  ;;  %v3827_v11 = vld [vmem:[#allocation62_spill] sm:$0xff] }
 0x177   :  { %v643_v58 = vadd.f32 %v611_v45, %v447_v14  ;;  %v614_v39 = vmul.f32 %v2280_v21, %v3821_v59  ;;  %v805_v38 = vmul.f32 %v2386_v27, %v3822_v29  ;;  %v645_v42 = vadd.f32 %v613_v47, %v449_v56  ;;  %v3829_v63 = vld [vmem:[#allocation36_spill] sm:$0xff]  ;;  %v3830_v29 = vld [vmem:[#allocation67_spill] sm:$0xff]  ;;  %v3835_v26 = vld [vmem:[#allocation61_spill] sm:$0xff] }
 0x178   :  { %3819 = vst [vmem:[#allocation4_spill] sm:$0xff] %v2516_v55  ;;  %v617_v44 = vmul.f32 %v2280_v21, %v3823_v10  ;;  %v616_v43 = vmul.f32 %v2280_v21, %v3824_v6  ;;  %v1002_v46 = vmul.f32 %v2396_v18, %v3825_v13  ;;  %v644_v14 = vadd.f32 %v612_v49, %v2404_v20  ;;  %v3831_v49 = vld [vmem:[#allocation37_spill] sm:$0xff]  ;;  %v3832_v10 = vld [vmem:[#allocation38_spill] sm:$0xff] }
 0x179   :  { %v2497_v50 = vpop.permute.xlu0 %930  ;;  %v647_v22 = vadd.f32 %v615_v54, %v451_v23  ;;  %v1001_v45 = vmul.f32 %v2396_v18, %v3826_v8  ;;  %v807_v56 = vmul.f32 %v2386_v27, %v3827_v11  ;;  %v619_v51 = vmul.f32 %v2280_v21, %v3828_v19 }
 0x17a   :  { %v2509_v31 = vpop.permute.xlu1 %726  ;;  %v618_v24 = vmul.f32 %v2280_v21, %v3829_v63  ;;  %v838_v59 = vadd.f32 %v806_v37, %v642_v61  ;;  %v808_v20 = vmul.f32 %v2386_v27, %v3830_v29  ;;  %v646_v23 = vadd.f32 %v614_v39, %v2410_v30  ;;  %v3833_v63 = vld [vmem:[#allocation69_spill] sm:$0xff]  ;;  %v3834_v29 = vld [vmem:[#allocation39_spill] sm:$0xff] }
 0x17b   :  { %v621_v54 = vmul.f32 %v2280_v21, %v3831_v49  ;;  %v620_v6 = vmul.f32 %v2280_v21, %v3832_v10  ;;  %v837_v13 = vadd.f32 %v805_v38, %v641_v32  ;;  %v649_v8 = vadd.f32 %v617_v44, %v2418_v62  ;;  %v2568_v32 = vld [vmem:[%s3696_s2] ss:$0 sm:$0xff]  ;;  %v3836_v44 = vld [vmem:[#allocation71_spill] sm:$0xff] }
 0x17c   :  { %v648_v11 = vadd.f32 %v616_v43, %v2412_v9  ;;  %v1034_v19 = vadd.f32 %v1002_v46, %v838_v59  ;;  %v809_v37 = vmul.f32 %v2386_v27, %v3833_v63  ;;  %v623_v30 = vmul.f32 %v2280_v21, %v3834_v29  ;;  %v3841_v59 = vld [vmem:[#allocation73_spill] sm:$0xff] }
 0x17d   :  { %v2531_v4 = vpop.permute.xlu0 %934  ;;  %v1033_v39 = vadd.f32 %v1001_v45, %v837_v13  ;;  %v1003_v49 = vmul.f32 %v2396_v18, %v3835_v26  ;;  %v839_v55 = vadd.f32 %v807_v56, %v643_v58  ;;  %v651_v62 = vadd.f32 %v619_v51, %v2428_v35  ;;  %v3837_v58 = vld [vmem:[#allocation40_spill] sm:$0xff]  ;;  %v3838_v45 = vld [vmem:[#allocation41_spill] sm:$0xff]  ;;  %v3839_v56 = vld [vmem:[#allocation63_spill] sm:$0xff] }
 0x17e   :  { %v2538_v47 = vpop.permute.xlu1 %730  ;;  %v650_v9 = vadd.f32 %v618_v24, %v2420_v16  ;;  %v840_v38 = vadd.f32 %v808_v20, %v644_v14  ;;  %v810_v43 = vmul.f32 %v2386_v27, %v3836_v44  ;;  %v2573_v46 = vadd.f32 %v621_v54, %v2436_v36  ;;  %v3842_v54 = vld [vmem:[#allocation42_spill] sm:$0xff] }
 0x17f   :  { %v2576_v26 = vadd.f32 %v620_v6, %v2430_v34  ;;  %v622_v35 = vmul.f32 %v2280_v21, %v3837_v58  ;;  %v625_v16 = vmul.f32 %v2280_v21, %v3838_v45  ;;  %v1004_v51 = vmul.f32 %v2396_v18, %v3839_v56  ;;  %v3845_v58 = vld [vmem:[#allocation76_spill] sm:$0xff]  ;;  %v3846_v56 = vld [vmem:[#allocation43_spill] sm:$0xff] }
 0x180   :  { %v2585_v14 = vadd.f32 %v2568_v32, %v1034_v19  ;;  %v841_v24 = vadd.f32 %v809_v37, %v645_v42  ;;  %v811_v36 = vmul.f32 %v2386_v27, %v3841_v59  ;;  %v2592_v34 = vadd.f32 %v623_v30, %v2444_v40  ;;  %v3844_v19 = vld [vmem:[#allocation65_spill] sm:$0xff] }
 0x181   :  { %v2555_v61 = vpop.permute.xlu0 %938  ;;  %v624_v6 = vmul.f32 %v2280_v21, %v3842_v54  ;;  %v2597_v13 = vadd.f32 %v2568_v32, %v1033_v39  ;;  %v1035_v63 = vadd.f32 %v1003_v49, %v839_v55  ;;  %v1005_v42 = vmul.f32 %v2396_v18, %v3844_v19  ;;  %v3847_v55 = vld [vmem:[#allocation66_spill] sm:$0xff] }
 0x182   :  { %v2561_v10 = vpop.permute.xlu1 %734  ;;  %3840 = vst [vmem:[#allocation6_spill] sm:$0xff] %v2585_v14  ;;  %v1036_v37 = vadd.f32 %v1004_v51, %v840_v38  ;;  %v842_v44 = vadd.f32 %v810_v43, %v646_v23  ;;  %v812_v45 = vmul.f32 %v2386_v27, %v3845_v58  ;;  %v2606_v40 = vadd.f32 %v622_v35, %v2438_v53  ;;  %v3848_v43 = vld [vmem:[#allocation79_spill] sm:$0xff] }
 0x183   :  { %3843 = vst [vmem:[#allocation12_spill] sm:$0xff] %v2597_v13  ;;  %v2609_v30 = vadd.f32 %v625_v16, %v2458_v3  ;;  %v627_v39 = vmul.f32 %v2280_v21, %v3846_v56  ;;  %v1006_v49 = vmul.f32 %v2396_v18, %v3847_v55  ;;  %v1106_v59 = vsel %vm1104_vm0, %v2585_v14, 0.0  ;;  %v3849_v16 = vld [vmem:[#allocation9_spill] sm:$0xff]  ;;  %v3851_v56 = vld [vmem:[#allocation44_spill] sm:$0xff] }
 0x184   :  { %v1037_v38 = vadd.f32 %v1005_v42, %v841_v24  ;;  %v843_v23 = vadd.f32 %v811_v36, %v647_v22  ;;  %v813_v51 = vmul.f32 %v2386_v27, %v3848_v43  ;;  %v2622_v53 = vadd.f32 %v624_v6, %v2455_v41  ;;  %v3850_v24 = vld [vmem:[#allocation68_spill] sm:$0xff] }
 0x185   :  { %v2589_v20 = vpop.permute.xlu0 %942  ;;  %v1105_v3 = vsel %vm1104_vm0, %v2597_v13, 0.0  ;;  %v2627_v35 = vadd.f32 %v2568_v32, %v1035_v63  ;;  %v814_v19 = vmul.f32 %v2386_v27, %v3849_v16  ;;  %v2634_v22 = vadd.f32 %v2568_v32, %v1036_v37  ;;  %v3852_v37 = vld [vmem:[#allocation70_spill] sm:$0xff] }
 0x186   :  { %v2599_v29 = vpop.permute.xlu1 %738  ;;  %v1007_v36 = vmul.f32 %v2396_v18, %v3850_v24  ;;  %v1038_v42 = vadd.f32 %v1006_v49, %v842_v44  ;;  %v844_v41 = vadd.f32 %v812_v45, %v648_v11  ;;  %v2639_v6 = vadd.f32 %v627_v39, %v2470_v5  ;;  %v3853_v11 = vld [vmem:[#allocation45_spill] sm:$0xff] }
 0x187   :  { %v626_v63 = vmul.f32 %v2280_v21, %v3851_v56  ;;  %v1107_v55 = vadd.f32 %v1106_v59, %v1105_v3  ;;  %v815_v43 = vmul.f32 %v2386_v27, %v2398_v15  ;;  %v2646_v16 = vadd.f32 %v2568_v32, %v1037_v38 }
 0x188   :  { %v1008_v14 = vmul.f32 %v2396_v18, %v3852_v37  ;;  %v1039_v13 = vadd.f32 %v1007_v36, %v843_v23  ;;  %v845_v24 = vadd.f32 %v813_v51, %v649_v8  ;;  %v629_v5 = vmul.f32 %v2280_v21, %v3853_v11  ;;  %v3854_v8 = vld [vmem:[#allocation72_spill] sm:$0xff]  ;;  %v3855_v36 = vld [vmem:[#allocation75_spill] sm:$0xff] }
 0x189   :  { %v2619_v54 = vpop.permute.xlu0 %946  ;;  %v1108_v45 = vsel %vm1104_vm0, %v2627_v35, 0.0  ;;  %v846_v39 = vadd.f32 %v814_v19, %v650_v9  ;;  %v816_v15 = vmul.f32 %v2386_v27, %v2426_v17  ;;  %v1110_v59 = vsel %vm1104_vm0, %v2634_v22, 0.0 }
 0x18a   :  { %v2631_v58 = vpop.permute.xlu1 %742  ;;  %v2663_v38 = vadd.f32 %v2568_v32, %v1038_v42  ;;  %v1009_v23 = vmul.f32 %v2396_v18, %v3854_v8  ;;  %v1040_v51 = vadd.f32 %v1008_v14, %v844_v41  ;;  %v1109_v3 = vadd.f32 %v1108_v45, %v1107_v55  ;;  %v3856_v41 = vld [vmem:[#allocation78_spill] sm:$0xff] }
 0x18b   :  { %v1010_v56 = vmul.f32 %v2396_v18, %v3855_v36  ;;  %v847_v9 = vadd.f32 %v815_v43, %v651_v62  ;;  %v817_v17 = vmul.f32 %v2386_v27, %v2464_v0  ;;  %v2672_v19 = vadd.f32 %v626_v63, %v2467_v52  ;;  %v3857_v45 = vld [vmem:[#allocation46_spill] sm:$0xff] }
 0x18c   :  { %v1112_v37 = vsel %vm1104_vm0, %v2646_v16, 0.0  ;;  %v2677_v42 = vadd.f32 %v2568_v32, %v1039_v13  ;;  %v1041_v11 = vadd.f32 %v1009_v23, %v845_v24  ;;  %v1111_v14 = vadd.f32 %v1110_v59, %v1109_v3  ;;  %v3858_v23 = vld [vmem:[#allocation80_spill] sm:$0xff] }
 0x18d   :  { %v2650_v44 = vpop.permute.xlu0 %950  ;;  %v1011_v55 = vmul.f32 %v2396_v18, %v3856_v41  ;;  %v1042_v62 = vadd.f32 %v1010_v56, %v846_v39  ;;  %v848_v43 = vadd.f32 %v816_v15, %v2576_v26  ;;  %v628_v52 = vmul.f32 %v2280_v21, %v3857_v45  ;;  %v3859_v15 = vld [vmem:[#allocation47_spill] sm:$0xff] }
 0x18e   :  { %v2658_v49 = vpop.permute.xlu1 %746  ;;  %v1114_v63 = vsel %vm1104_vm0, %v2663_v38, 0.0  ;;  %v2689_v13 = vadd.f32 %v2568_v32, %v1040_v51  ;;  %v818_v24 = vmul.f32 %v2386_v27, %v2509_v31  ;;  %v1113_v59 = vadd.f32 %v1112_v37, %v1111_v14 }
 0x18f   :  { %v1012_v3 = vmul.f32 %v2396_v18, %v3858_v23  ;;  %v1043_v39 = vadd.f32 %v1011_v55, %v847_v9  ;;  %v849_v26 = vadd.f32 %v817_v17, %v2573_v46  ;;  %v631_v36 = vmul.f32 %v2280_v21, %v3859_v15  ;;  %v3860_v9 = vld [vmem:[#allocation11_spill] sm:$0xff] }
 0x190   :  { %v1116_v56 = vsel %vm1104_vm0, %v2677_v42, 0.0  ;;  %v2701_v41 = vadd.f32 %v2568_v32, %v1041_v11  ;;  %v819_v51 = vmul.f32 %v2386_v27, %v2538_v47  ;;  %v1115_v37 = vadd.f32 %v1114_v63, %v1113_v59 }
 0x191   :  { %v2679_v8 = vpop.permute.xlu0 %954  ;;  %v2708_v14 = vadd.f32 %v2568_v32, %v1042_v62  ;;  %v1013_v46 = vmul.f32 %v2396_v18, %v3860_v9  ;;  %v1044_v17 = vadd.f32 %v1012_v3, %v848_v43  ;;  %v2713_v45 = vadd.f32 %v629_v5, %v2480_v28 }
 0x192   :  { %v751_v0 = vpop.permute.xlu1 %750  ;;  %v1118_v11 = vsel %vm1104_vm0, %v2689_v13, 0.0  ;;  %v850_v23 = vadd.f32 %v818_v24, %v2606_v40  ;;  %v820_v47 = vmul.f32 %v2386_v27, %v2561_v10  ;;  %v660_v63 = vadd.f32 %v628_v52, %v2477_v60 }
 0x193   :  { %v1117_v62 = vadd.f32 %v1116_v56, %v1115_v37  ;;  %v2722_v59 = vadd.f32 %v2568_v32, %v1043_v39  ;;  %v1045_v15 = vadd.f32 %v1013_v46, %v849_v26  ;;  %v1120_v43 = vsel %vm1104_vm0, %v2701_v41, 0.0  ;;  %v3861_v56 = vld [vmem:[#allocation48_spill] sm:$0xff] }
 0x194   :  { %v1014_v28 = vmul.f32 %v2396_v18, %v2416_v2  ;;  %v851_v5 = vadd.f32 %v819_v51, %v2592_v34  ;;  %v821_v40 = vmul.f32 %v2386_v27, %v2599_v29  ;;  %v2734_v60 = vadd.f32 %v631_v36, %v2490_v33 }
 0x195   :  { %v2705_v31 = vpop.permute.xlu0 %958  ;;  %v1119_v10 = vadd.f32 %v1118_v11, %v1117_v62  ;;  %v1122_v52 = vsel %vm1104_vm0, %v2708_v14, 0.0  ;;  %v2739_v3 = vadd.f32 %v2568_v32, %v1044_v17  ;;  %v1015_v2 = vmul.f32 %v2396_v18, %v2452_v57  ;;  %v3862_v17 = vld [vmem:[#allocation49_spill] sm:$0xff] }
 0x196   :  { %v755_v55 = vpop.permute.xlu1 %754  ;;  %v1046_v34 = vadd.f32 %v1014_v28, %v850_v23  ;;  %v852_v26 = vadd.f32 %v820_v47, %v2622_v53  ;;  %v822_v29 = vmul.f32 %v2386_v27, %v2631_v58  ;;  %v630_v33 = vmul.f32 %v2280_v21, %v3861_v56 }
 0x197   :  { %v1121_v36 = vadd.f32 %v1120_v43, %v1119_v10  ;;  %v1124_v51 = vsel %vm1104_vm0, %v2722_v59, 0.0  ;;  %v2751_v37 = vadd.f32 %v2568_v32, %v1045_v15  ;;  %v1016_v9 = vmul.f32 %v2396_v18, %v2497_v50 }
 0x198   :  { %v1047_v57 = vadd.f32 %v1015_v2, %v851_v5  ;;  %v853_v46 = vadd.f32 %v821_v40, %v2609_v30  ;;  %v823_v53 = vmul.f32 %v2386_v27, %v2658_v49  ;;  %v633_v11 = vmul.f32 %v2280_v21, %v3862_v17 }
 0x199   :  { %v2731_v24 = vpop.permute.xlu0 %962  ;;  %v1123_v23 = vadd.f32 %v1122_v52, %v1121_v36  ;;  %v1126_v47 = vsel %vm1104_vm0, %v2739_v3, 0.0  ;;  %v824_v62 = vmul.f32 %v2386_v27, %v751_v0  ;;  %v2766_v50 = vadd.f32 %v2568_v32, %v1046_v34 }
 0x19a   :  { %v759_v39 = vpop.permute.xlu1 %758  ;;  %v1017_v30 = vmul.f32 %v2396_v18, %v2531_v4  ;;  %v1048_v43 = vadd.f32 %v1016_v9, %v852_v26  ;;  %v854_v49 = vadd.f32 %v822_v29, %v2672_v19  ;;  %v662_v28 = vadd.f32 %v630_v33, %v2487_v48  ;;  %v3863_v19 = vld [vmem:[#allocation50_spill] sm:$0xff] }
 0x19b   :  { %v1125_v5 = vadd.f32 %v1124_v51, %v1123_v23  ;;  %v1128_v40 = vsel %vm1104_vm0, %v2751_v37, 0.0  ;;  %v1018_v10 = vmul.f32 %v2396_v18, %v2555_v61  ;;  %v2777_v0 = vadd.f32 %v2568_v32, %v1047_v57  ;;  %v3864_v51 = vld [vmem:[#allocation51_spill] sm:$0xff] }
 0x19c   :  { %v1049_v52 = vadd.f32 %v1017_v30, %v853_v46  ;;  %v855_v2 = vadd.f32 %v823_v53, %v2639_v6  ;;  %v825_v4 = vmul.f32 %v2386_v27, %v755_v55  ;;  %v632_v48 = vmul.f32 %v2280_v21, %v3863_v19 }
 0x19d   :  { %v2758_v58 = vpop.permute.xlu0 %966  ;;  %v1127_v26 = vadd.f32 %v1126_v47, %v1125_v5  ;;  %v856_v29 = vadd.f32 %v824_v62, %v660_v63  ;;  %v826_v56 = vmul.f32 %v2386_v27, %v759_v39  ;;  %v1130_v61 = vsel %vm1104_vm0, %v2766_v50, 0.0 }
 0x19e   :  { %v763_v15 = vpop.permute.xlu1 %762  ;;  %v2789_v36 = vadd.f32 %v2568_v32, %v1048_v43  ;;  %v1019_v6 = vmul.f32 %v2396_v18, %v2589_v20  ;;  %v1050_v55 = vadd.f32 %v1018_v10, %v854_v49  ;;  %v635_v9 = vmul.f32 %v2280_v21, %v3864_v51  ;;  %v3865_v10 = vld [vmem:[#allocation52_spill] sm:$0xff] }
 0x19f   :  { %v1129_v57 = vadd.f32 %v1128_v40, %v1127_v26  ;;  %v1020_v63 = vmul.f32 %v2396_v18, %v2619_v54  ;;  %v827_v39 = vmul.f32 %v2386_v27, %v763_v15  ;;  %v1132_v46 = vsel %vm1104_vm0, %v2777_v0, 0.0 }
 0x1a0   :  { %v2801_v53 = vadd.f32 %v2568_v32, %v1049_v52  ;;  %v1051_v17 = vadd.f32 %v1019_v6, %v855_v2  ;;  %v857_v23 = vadd.f32 %v825_v4, %v2713_v45  ;;  %v664_v20 = vadd.f32 %v632_v48, %v2493_v12 }
 0x1a1   :  { %v2781_v34 = vpop.permute.xlu0 %970  ;;  %v1131_v47 = vadd.f32 %v1130_v61, %v1129_v57  ;;  %v1052_v62 = vadd.f32 %v1020_v63, %v856_v29  ;;  %v858_v30 = vadd.f32 %v826_v56, %v662_v28  ;;  %v1134_v54 = vsel %vm1104_vm0, %v2789_v36, 0.0 }
 0x1a2   :  { %v767_v33 = vpop.permute.xlu1 %766  ;;  %v2808_v15 = vadd.f32 %v2568_v32, %v1050_v55  ;;  %v1021_v5 = vmul.f32 %v2396_v18, %v2650_v44  ;;  %v634_v45 = vmul.f32 %v2280_v21, %v3865_v10  ;;  %v1022_v28 = vmul.f32 %v2396_v18, %v2679_v8  ;;  %v3870_v10 = vld [vmem:[#allocation77_spill] sm:$0xff] }
 0x1a3   :  { %v828_v40 = vmul.f32 %v2386_v27, %v767_v33  ;;  %v1133_v12 = vadd.f32 %v1132_v46, %v1131_v47  ;;  %v859_v52 = vadd.f32 %v827_v39, %v2734_v60  ;;  %v1136_v2 = vsel %vm1104_vm0, %v2801_v53, 0.0 }
 0x1a4   :  { %v2821_v4 = vadd.f32 %v2568_v32, %v1051_v17  ;;  %v1053_v19 = vadd.f32 %v1021_v5, %v857_v23  ;;  %v2825_v26 = vadd.f32 %v2568_v32, %v1052_v62  ;;  %v1023_v29 = vmul.f32 %v2396_v18, %v2705_v31  ;;  %v3866_v17 = vld [vmem:[#allocation54_spill] sm:$0xff] }
 0x1a5   :  { %v975_v43 = vpop.permute.xlu0 %974  ;;  %v1135_v48 = vadd.f32 %v1134_v54, %v1133_v12  ;;  %v1054_v56 = vadd.f32 %v1022_v28, %v858_v30  ;;  %v665_v60 = vadd.f32 %v633_v11, %v2500_v7  ;;  %v1138_v33 = vsel %vm1104_vm0, %v2808_v15, 0.0  ;;  %v3868_v54 = vld [vmem:[#allocation4_spill] sm:$0xff] }
 0x1a6   :  { %v771_v49 = vpop.permute.xlu1 %770  ;;  %v860_v61 = vadd.f32 %v828_v40, %v664_v20  ;;  %v667_v55 = vadd.f32 %v635_v9, %v2512_v1  ;;  %v666_v51 = vadd.f32 %v634_v45, %v2503_v25  ;;  %v1055_v63 = vadd.f32 %v1023_v29, %v859_v52  ;;  %v3869_v40 = vld [vmem:[#allocation26_spill] sm:$0xff] }
 0x1a7   :  { %v829_v44 = vmul.f32 %v2386_v27, %v771_v49  ;;  %v1137_v57 = vadd.f32 %v1136_v2, %v1135_v48  ;;  %v1140_v31 = vsel %vm1104_vm0, %v2821_v4, 0.0  ;;  %v2838_v46 = vadd.f32 %v2568_v32, %v1053_v19 }
 0x1a8   :  { %v1024_v7 = vmul.f32 %v2396_v18, %v2731_v24  ;;  %v636_v23 = vmul.f32 %v2280_v21, %v3866_v17  ;;  %v1142_v25 = vsel %vm1104_vm0, %v2825_v26, 0.0  ;;  %v2847_v1 = vadd.f32 %v2568_v32, %v1054_v56  ;;  %v3867_v24 = vld [vmem:[#allocation2_spill] sm:$0xff] }
 0x1a9   :  { %v979_v39 = vpop.permute.xlu0 %978  ;;  %v861_v11 = vadd.f32 %v829_v44, %v665_v60  ;;  %v1139_v20 = vadd.f32 %v1138_v33, %v1137_v57  ;;  %v1025_v47 = vmul.f32 %v2396_v18, %v2758_v58  ;;  %v472_v5 = vadd.f32 %v3868_v54, %v3867_v24  ;;  %v3871_v44 = vld [vmem:[#allocation53_spill] sm:$0xff]  ;;  %v3872_v57 = vld [vmem:[#allocation10_spill] sm:$0xff] }
 0x1aa   :  { %v775_v8 = vpop.permute.xlu1 %774  ;;  %v1056_v62 = vadd.f32 %v1024_v7, %v860_v61  ;;  %v441_v45 = vmul.f32 %v3870_v10, %v3869_v40  ;;  %v2857_v28 = vadd.f32 %v2568_v32, %v1055_v63  ;;  %v1144_v52 = vsel %vm1104_vm0, %v2838_v46, 0.0  ;;  %v3873_v63 = vld [vmem:[#allocation27_spill] sm:$0xff] }
 0x1ab   :  { %v830_v6 = vmul.f32 %v2386_v27, %v775_v8  ;;  %v1141_v12 = vadd.f32 %v1140_v31, %v1139_v20  ;;  %v1026_v58 = vmul.f32 %v2396_v18, %v2781_v34  ;;  %v1057_v2 = vadd.f32 %v1025_v47, %v861_v11 }
 0x1ac   :  { %v637_v48 = vmul.f32 %v2280_v21, %v3871_v44  ;;  %v668_v29 = vadd.f32 %v636_v23, %v472_v5  ;;  %v1146_v8 = vsel %vm1104_vm0, %v2847_v1, 0.0  ;;  %v2868_v61 = vadd.f32 %v2568_v32, %v1056_v62 }
 0x1ad   :  { %v862_v30 = vadd.f32 %v830_v6, %v666_v51  ;;  %v1143_v56 = vadd.f32 %v1142_v25, %v1141_v12  ;;  %v983_v60 = vpop.permute.xlu0 %982  ;;  %v1027_v6 = vmul.f32 %v2396_v18, %v975_v43  ;;  %v442_v31 = vmul.f32 %v3870_v10, %v3873_v63  ;;  %v3874_v43 = vld [vmem:[#allocation5_spill] sm:$0xff] }
 0x1ae   :  { %v779_v9 = vpop.permute.xlu1 %778  ;;  %v1148_v11 = vsel %vm1104_vm0, %v2857_v28, 0.0  ;;  %v2878_v17 = vadd.f32 %v2568_v32, %v1057_v2  ;;  %v1028_v23 = vmul.f32 %v2396_v18, %v979_v39  ;;  %v1150_v5 = vsel %vm1104_vm0, %v2868_v61, 0.0 }
 0x1af   :  { %v831_v49 = vmul.f32 %v2386_v27, %v779_v9  ;;  %v1058_v51 = vadd.f32 %v1026_v58, %v862_v30  ;;  %v1145_v7 = vadd.f32 %v1144_v52, %v1143_v56  ;;  %v3875_v9 = vld [vmem:[#allocation74_spill] sm:$0xff]  ;;  %v3876_v30 = vld [vmem:[#allocation56_spill] sm:$0xff] }
 0x1b0   :  { %v246_v47 = vmul.f32 %v3875_v9, %v3874_v43  ;;  %v3877_v52 = vld [vmem:[#allocation28_spill] sm:$0xff]  ;;  %v1152_v44 = vsel %vm1104_vm0, %v2878_v17, 0.0 }
 0x1b1   :  { %v863_v19 = vadd.f32 %v831_v49, %v667_v55  ;;  %v473_v55 = vadd.f32 %v441_v45, %v3872_v57  ;;  %v638_v49 = vmul.f32 %v2280_v21, %v3876_v30  ;;  %v1147_v24 = vadd.f32 %v1146_v8, %v1145_v7  ;;  %v3878_v8 = vld [vmem:[#allocation8_spill] sm:$0xff] }
 0x1b2   :  { %v783_v33 = vpop.permute.xlu1 %782  ;;  %v2888_v40 = vadd.f32 %v2568_v32, %v1058_v51  ;;  %v474_v12 = vadd.f32 %v442_v31, %v246_v47  ;;  %v443_v58 = vmul.f32 %v3870_v10, %v3877_v52 }
 0x1b3   :  { %v832_v34 = vmul.f32 %v2386_v27, %v783_v33  ;;  %v1059_v20 = vadd.f32 %v1027_v6, %v863_v19  ;;  %v669_v62 = vadd.f32 %v637_v48, %v473_v55  ;;  %v1149_v2 = vadd.f32 %v1148_v11, %v1147_v24  ;;  %v987_v19 = vpop.permute.xlu0 %986  ;;  %v3879_v6 = vld [vmem:[#allocation55_spill] sm:$0xff] }
 0x1b4   :  { %v1029_v48 = vmul.f32 %v2396_v18, %v983_v60  ;;  %v247_v33 = vmul.f32 %v3875_v9, %v3878_v8  ;;  %v639_v51 = vmul.f32 %v2280_v21, %v3879_v6  ;;  %v1154_v63 = vsel %vm1104_vm0, %v2888_v40, 0.0  ;;  %v3882_v8 = vld [vmem:[#allocation58_spill] sm:$0xff] }
 0x1b5   :  { %v864_v25 = vadd.f32 %v832_v34, %v668_v29  ;;  %v1098_v29 = vadd.f32 %v2568_v32, %v1059_v20  ;;  %v670_v34 = vadd.f32 %v638_v49, %v474_v12  ;;  %v1151_v57 = vadd.f32 %v1150_v5, %v1149_v2 }
 0x1b6   :  { %v787_v54 = vpop.permute.xlu1 %786  ;;  %v475_v11 = vadd.f32 %v443_v58, %v247_v33  ;;  %v640_v33 = vmul.f32 %v2280_v21, %v3882_v8 }
 0x1b7   :  { %v1060_v45 = vadd.f32 %v1028_v23, %v864_v25  ;;  %v833_v39 = vmul.f32 %v2386_v27, %v787_v54  ;;  %v1153_v23 = vadd.f32 %v1152_v44, %v1151_v57  ;;  %v1156_v20 = vsel %vm1104_vm0, %v1098_v29, 0.0  ;;  %v991_v30 = vpop.permute.xlu0 %990 }
 0x1b8   :  { %v1030_v25 = vmul.f32 %v2396_v18, %v987_v19  ;;  %v671_v24 = vadd.f32 %v639_v51, %v475_v11  ;;  %v1031_v58 = vmul.f32 %v2396_v18, %v991_v30 }
 0x1b9   :  { %v865_v56 = vadd.f32 %v833_v39, %v669_v62  ;;  %v1099_v31 = vadd.f32 %v2568_v32, %v1060_v45  ;;  %v1155_v62 = vadd.f32 %v1154_v63, %v1153_v23  ;;  %v3880_v39 = vld [vmem:[#allocation29_spill] sm:$0xff] }
 0x1ba   :  { %v791_v55 = vpop.permute.xlu1 %790  ;;  %v444_v12 = vmul.f32 %v3870_v10, %v3880_v39 }
 0x1bb   :  { %v1061_v7 = vadd.f32 %v1029_v48, %v865_v56  ;;  %v834_v60 = vmul.f32 %v2386_v27, %v791_v55  ;;  %v1158_v54 = vsel %vm1104_vm0, %v1099_v31, 0.0  ;;  %v1157_v52 = vadd.f32 %v1156_v20, %v1155_v62  ;;  %v3881_v48 = vld [vmem:[#allocation7_spill] sm:$0xff] }
 0x1bc   :  { %v248_v56 = vmul.f32 %v3875_v9, %v3881_v48 }
 0x1bd   :  { %v1100_v43 = vadd.f32 %v2568_v32, %v1061_v7  ;;  %v866_v47 = vadd.f32 %v834_v60, %v670_v34  ;;  %v1159_v6 = vadd.f32 %v1158_v54, %v1157_v52 }
 0x1be   :  { %v795_v49 = vpop.permute.xlu1 %794  ;;  %v476_v10 = vadd.f32 %v444_v12, %v248_v56 }
 0x1bf   :  { %v1062_v5 = vadd.f32 %v1030_v25, %v866_v47  ;;  %v835_v45 = vmul.f32 %v2386_v27, %v795_v49  ;;  %v1160_v2 = vsel %vm1104_vm0, %v1100_v43, 0.0 }
 0x1c0   :  { %v1161_v55 = vadd.f32 %v1160_v2, %v1159_v6  ;;  %v672_v60 = vadd.f32 %v640_v33, %v476_v10 }
 0x1c1   :  { %v1101_v19 = vadd.f32 %v2568_v32, %v1062_v5  ;;  %v867_v44 = vadd.f32 %v835_v45, %v671_v24 }
 0x1c2   :  { %v799_v51 = vpop.permute.xlu1 %798 }
 0x1c3   :  { %v1162_v34 = vsel %vm1104_vm0, %v1101_v19, 0.0  ;;  %v1063_v57 = vadd.f32 %v1031_v58, %v867_v44  ;;  %v836_v63 = vmul.f32 %v2386_v27, %v799_v51 }
 0x1c4   :  { %v1163_v11 = vadd.f32 %v1162_v34, %v1161_v55 }
 0x1c5   :  { %v1102_v7 = vadd.f32 %v2568_v32, %v1063_v57  ;;  %v868_v9 = vadd.f32 %v836_v63, %v672_v60 }
 0x1c7   :  { %v1164_v23 = vsel %vm1104_vm0, %v1102_v7, 0.0  ;;  %v995_v20 = vpop.permute.xlu1 %994 }
 0x1c8   :  { %v1032_v25 = vmul.f32 %v2396_v18, %v995_v20  ;;  %v1165_v21 = vadd.f32 %v1164_v23, %v1163_v11 }
 0x1ca   :  { %v1064_v47 = vadd.f32 %v1032_v25, %v868_v9 }
 0x1cc   :  { %v1103_v62 = vadd.f32 %v2568_v32, %v1064_v47 }
 0x1ce   :  { %v1166_v30 = vsel %vm1104_vm0, %v1103_v62, 0.0 }
 0x1cf   :  { %v1167_v49 = vadd.f32 %v1166_v30, %v1165_v21 }
 0x1d1   :  { %v1168_v24 = vrot.slane %v1167_v49, 4 }
 0x1d3   :  { %v1169_v54 = vadd.f32 %v1168_v24, %v1167_v49 }
 0x1d5   :  { %v1170_v27 = vrot.slane %v1169_v54, 2 }
 0x1d7   :  { %v1171_v5 = vadd.f32 %v1170_v27, %v1169_v54 }
 0x1d9   :  { %v1172_v45 = vrot.slane %v1171_v5, 1 }
 0x1db   :  { %v1173_v39 = vadd.f32 %v1172_v45, %v1171_v5 }
 0x1dd   :  { %v2926_v12 = vmul.f32 0.00390625, %v1173_v39 }
 0x1df   :  { %v2930_v52 = vsub.f32 %v2857_v28, %v2926_v12  ;;  %v2934_v18 = vsub.f32 %v2868_v61, %v2926_v12  ;;  %v2938_v32 = vsub.f32 %v2878_v17, %v2926_v12  ;;  %v2942_v58 = vsub.f32 %v2888_v40, %v2926_v12  ;;  %v3883_v40 = vld [vmem:[#allocation12_spill] sm:$0xff] }
 0x1e0   :  { %v2945_v2 = vsub.f32 %v1098_v29, %v2926_v12  ;;  %v2948_v44 = vsub.f32 %v1099_v31, %v2926_v12  ;;  %v2951_v28 = vsub.f32 %v1100_v43, %v2926_v12  ;;  %v2954_v61 = vsub.f32 %v1101_v19, %v2926_v12  ;;  %v3884_v29 = vld [vmem:[#allocation6_spill] sm:$0xff] }
 0x1e1   :  { %v2957_v48 = vsub.f32 %v1102_v7, %v2926_v12  ;;  %v2960_v17 = vsub.f32 %v1103_v62, %v2926_v12  ;;  %v2964_v56 = vsub.f32 %v3883_v40, %v2926_v12  ;;  %v2968_v31 = vsub.f32 %v3884_v29, %v2926_v12 }
 0x1e2   :  { %v2972_v43 = vsub.f32 %v2627_v35, %v2926_v12  ;;  %v2976_v19 = vsub.f32 %v2634_v22, %v2926_v12  ;;  %v2984_v6 = vsub.f32 %v2646_v16, %v2926_v12  ;;  %v2990_v35 = vsub.f32 %v2663_v38, %v2926_v12 }
 0x1e3   :  { %v1207_v8 = vmul.f32 %v2964_v56, %v2964_v56  ;;  %v1208_v33 = vmul.f32 %v2968_v31, %v2968_v31  ;;  %v2998_v55 = vsub.f32 %v2677_v42, %v2926_v12  ;;  %v3005_v38 = vsub.f32 %v2689_v13, %v2926_v12 }
 0x1e4   :  { %v1209_v51 = vmul.f32 %v2972_v43, %v2972_v43  ;;  %v1210_v22 = vmul.f32 %v2976_v19, %v2976_v19  ;;  %v1211_v16 = vmul.f32 %v2984_v6, %v2984_v6  ;;  %v1212_v60 = vmul.f32 %v2990_v35, %v2990_v35 }
 0x1e5   :  { %v1239_v34 = vsel %vm1104_vm0, %v1207_v8, 0.0  ;;  %v1240_v57 = vsel %vm1104_vm0, %v1208_v33, 0.0  ;;  %v3012_v42 = vsub.f32 %v2701_v41, %v2926_v12  ;;  %v1213_v20 = vmul.f32 %v2998_v55, %v2998_v55 }
 0x1e6   :  { %v1241_v10 = vadd.f32 %v1240_v57, %v1239_v34  ;;  %v1242_v63 = vsel %vm1104_vm0, %v1209_v51, 0.0  ;;  %v1244_v11 = vsel %vm1104_vm0, %v1210_v22, 0.0  ;;  %v1246_v9 = vsel %vm1104_vm0, %v1211_v16, 0.0 }
 0x1e7   :  { %v3019_v13 = vsub.f32 %v2708_v14, %v2926_v12  ;;  %v1214_v21 = vmul.f32 %v3005_v38, %v3005_v38  ;;  %v1248_v47 = vsel %vm1104_vm0, %v1212_v60, 0.0  ;;  %v3026_v41 = vsub.f32 %v2722_v59, %v2926_v12 }
 0x1e8   :  { %v1243_v7 = vadd.f32 %v1242_v63, %v1241_v10  ;;  %v1215_v30 = vmul.f32 %v3012_v42, %v3012_v42  ;;  %v1250_v49 = vsel %vm1104_vm0, %v1213_v20, 0.0  ;;  %v3033_v14 = vsub.f32 %v2739_v3, %v2926_v12 }
 0x1e9   :  { %v1216_v54 = vmul.f32 %v3019_v13, %v3019_v13  ;;  %v1252_v27 = vsel %vm1104_vm0, %v1214_v21, 0.0  ;;  %v3040_v59 = vsub.f32 %v2751_v37, %v2926_v12  ;;  %v1217_v45 = vmul.f32 %v3026_v41, %v3026_v41 }
 0x1ea   :  { %v1245_v23 = vadd.f32 %v1244_v11, %v1243_v7  ;;  %v1254_v39 = vsel %vm1104_vm0, %v1215_v30, 0.0  ;;  %v3047_v3 = vsub.f32 %v2766_v50, %v2926_v12  ;;  %v1218_v29 = vmul.f32 %v3033_v14, %v3033_v14 }
 0x1eb   :  { %v1256_v8 = vsel %vm1104_vm0, %v1216_v54, 0.0  ;;  %v3054_v37 = vsub.f32 %v2777_v0, %v2926_v12  ;;  %v1219_v51 = vmul.f32 %v3040_v59, %v3040_v59  ;;  %v1258_v22 = vsel %vm1104_vm0, %v1217_v45, 0.0 }
 0x1ec   :  { %v1247_v25 = vadd.f32 %v1246_v9, %v1245_v23  ;;  %v3061_v50 = vsub.f32 %v2789_v36, %v2926_v12  ;;  %v1220_v57 = vmul.f32 %v3047_v3, %v3047_v3  ;;  %v1260_v10 = vsel %vm1104_vm0, %v1218_v29, 0.0 }
 0x1ed   :  { %v3068_v0 = vsub.f32 %v2801_v53, %v2926_v12  ;;  %v1221_v63 = vmul.f32 %v3054_v37, %v3054_v37  ;;  %v1262_v7 = vsel %vm1104_vm0, %v1219_v51, 0.0  ;;  %v3075_v36 = vsub.f32 %v2808_v15, %v2926_v12 }
 0x1ee   :  { %v1249_v62 = vadd.f32 %v1248_v47, %v1247_v25  ;;  %v1222_v11 = vmul.f32 %v3061_v50, %v3061_v50  ;;  %v1264_v23 = vsel %vm1104_vm0, %v1220_v57, 0.0  ;;  %v3082_v53 = vsub.f32 %v2821_v4, %v2926_v12 }
 0x1ef   :  { %v1223_v9 = vmul.f32 %v3068_v0, %v3068_v0  ;;  %v1266_v25 = vsel %vm1104_vm0, %v1221_v63, 0.0  ;;  %v3089_v15 = vsub.f32 %v2825_v26, %v2926_v12  ;;  %v1224_v47 = vmul.f32 %v3075_v36, %v3075_v36 }
 0x1f0   :  { %v1251_v24 = vadd.f32 %v1250_v49, %v1249_v62  ;;  %v1268_v62 = vsel %vm1104_vm0, %v1222_v11, 0.0  ;;  %v3096_v4 = vsub.f32 %v2838_v46, %v2926_v12  ;;  %v1225_v49 = vmul.f32 %v3082_v53, %v3082_v53 }
 0x1f1   :  { %v3103_v26 = vsub.f32 %v2847_v1, %v2926_v12  ;;  %v1229_v1 = vmul.f32 %v2930_v52, %v2930_v52 }
 0x1f2   :  { %v1253_v5 = vadd.f32 %v1252_v27, %v1251_v24  ;;  %v1270_v24 = vsel %vm1104_vm0, %v1223_v9, 0.0  ;;  %v1226_v27 = vmul.f32 %v3089_v15, %v3089_v15  ;;  %v1227_v46 = vmul.f32 %v3096_v4, %v3096_v4 }
 0x1f3   :  { %v1228_v29 = vmul.f32 %v3103_v26, %v3103_v26 }
 0x1f4   :  { %v1255_v40 = vadd.f32 %v1254_v39, %v1253_v5  ;;  %v1272_v5 = vsel %vm1104_vm0, %v1224_v47, 0.0  ;;  %v1274_v39 = vsel %vm1104_vm0, %v1225_v49, 0.0  ;;  %v1278_v12 = vsel %vm1104_vm0, %v1227_v46, 0.0 }
 0x1f6   :  { %v1257_v33 = vadd.f32 %v1256_v8, %v1255_v40  ;;  %v1276_v8 = vsel %vm1104_vm0, %v1226_v27, 0.0 }
 0x1f8   :  { %v1259_v34 = vadd.f32 %v1258_v22, %v1257_v33  ;;  %v1230_v22 = vmul.f32 %v2934_v18, %v2934_v18 }
 0x1fa   :  { %v1261_v16 = vadd.f32 %v1260_v10, %v1259_v34  ;;  %v1280_v34 = vsel %vm1104_vm0, %v1228_v29, 0.0  ;;  %v1231_v10 = vmul.f32 %v2938_v32, %v2938_v32 }
 0x1fc   :  { %v1263_v60 = vadd.f32 %v1262_v7, %v1261_v16  ;;  %v1282_v16 = vsel %vm1104_vm0, %v1229_v1, 0.0  ;;  %v1232_v7 = vmul.f32 %v2942_v58, %v2942_v58 }
 0x1fe   :  { %v1265_v20 = vadd.f32 %v1264_v23, %v1263_v60  ;;  %v1284_v60 = vsel %vm1104_vm0, %v1230_v22, 0.0  ;;  %v1233_v23 = vmul.f32 %v2945_v2, %v2945_v2 }
 0x200   :  { %v1267_v21 = vadd.f32 %v1266_v25, %v1265_v20  ;;  %v1286_v20 = vsel %vm1104_vm0, %v1231_v10, 0.0  ;;  %v1234_v25 = vmul.f32 %v2948_v44, %v2948_v44 }
 0x202   :  { %v1269_v30 = vadd.f32 %v1268_v62, %v1267_v21  ;;  %v1288_v21 = vsel %vm1104_vm0, %v1232_v7, 0.0  ;;  %v1235_v62 = vmul.f32 %v2951_v28, %v2951_v28 }
 0x204   :  { %v1271_v54 = vadd.f32 %v1270_v24, %v1269_v30  ;;  %v1290_v30 = vsel %vm1104_vm0, %v1233_v23, 0.0  ;;  %v1236_v24 = vmul.f32 %v2954_v61, %v2954_v61 }
 0x206   :  { %v1273_v45 = vadd.f32 %v1272_v5, %v1271_v54  ;;  %v1292_v54 = vsel %vm1104_vm0, %v1234_v25, 0.0  ;;  %v1237_v5 = vmul.f32 %v2957_v48, %v2957_v48 }
 0x208   :  { %v1275_v40 = vadd.f32 %v1274_v39, %v1273_v45  ;;  %v1294_v45 = vsel %vm1104_vm0, %v1235_v62, 0.0  ;;  %v1238_v39 = vmul.f32 %v2960_v17, %v2960_v17 }
 0x20a   :  { %v1277_v33 = vadd.f32 %v1276_v8, %v1275_v40  ;;  %v1296_v40 = vsel %vm1104_vm0, %v1236_v24, 0.0  ;;  %v1298_v8 = vsel %vm1104_vm0, %v1237_v5, 0.0  ;;  %v1300_v1 = vsel %vm1104_vm0, %v1238_v39, 0.0 }
 0x20c   :  { %v1279_v51 = vadd.f32 %v1278_v12, %v1277_v33 }
 0x20e   :  { %v1281_v57 = vadd.f32 %v1280_v34, %v1279_v51 }
 0x210   :  { %v1283_v63 = vadd.f32 %v1282_v16, %v1281_v57 }
 0x212   :  { %v1285_v11 = vadd.f32 %v1284_v60, %v1283_v63 }
 0x214   :  { %v1287_v9 = vadd.f32 %v1286_v20, %v1285_v11 }
 0x216   :  { %v1289_v47 = vadd.f32 %v1288_v21, %v1287_v9 }
 0x218   :  { %v1291_v49 = vadd.f32 %v1290_v30, %v1289_v47 }
 0x21a   :  { %v1293_v27 = vadd.f32 %v1292_v54, %v1291_v49 }
 0x21c   :  { %v1295_v46 = vadd.f32 %v1294_v45, %v1293_v27 }
 0x21e   :  { %v1297_v29 = vadd.f32 %v1296_v40, %v1295_v46 }
 0x220   :  { %v1299_v33 = vadd.f32 %v1298_v8, %v1297_v29 }
 0x222   :  { %v1301_v12 = vadd.f32 %v1300_v1, %v1299_v33 }
 0x224   :  { %v1302_v51 = vrot.slane %v1301_v12, 4 }
 0x226   :  { %v1303_v22 = vadd.f32 %v1302_v51, %v1301_v12 }
 0x228   :  { %v1304_v34 = vrot.slane %v1303_v22, 2 }
 0x22a   :  { %v1305_v57 = vadd.f32 %v1304_v34, %v1303_v22 }
 0x22c   :  { %v1306_v10 = vrot.slane %v1305_v57, 1 }
 0x22e   :  { %v1307_v16 = vadd.f32 %v1306_v10, %v1305_v57 }
 0x230   :  { %v1308_v63 = vmul.f32 0.00390625, %v1307_v16 }
 0x232   :  { %v1309_v7 = vadd.f32 1e-05, %v1308_v63 }
 0x234   :  { %1671 = vrsqrt.f32 %v1309_v7 }
 0x241   :  { %v1672_v60 = vpop.eup %1671 }
 0x242   :  { %v3147_v11 = vmul.f32 %v1672_v60, %v2960_v17  ;;  %v1311_v23 = vmul.f32 %v1672_v60, %v2964_v56  ;;  %v1312_v20 = vmul.f32 %v1672_v60, %v2968_v31  ;;  %v1313_v9 = vmul.f32 %v1672_v60, %v2972_v43 }
 0x243   :  { %v1314_v25 = vmul.f32 %v1672_v60, %v2976_v19  ;;  %v1315_v21 = vmul.f32 %v1672_v60, %v2984_v6  ;;  %v1316_v47 = vmul.f32 %v1672_v60, %v2990_v35  ;;  %v1317_v62 = vmul.f32 %v1672_v60, %v2998_v55 }
 0x244   :  { %v1318_v30 = vmul.f32 %v1672_v60, %v3005_v38  ;;  %v1319_v49 = vmul.f32 %v1672_v60, %v3012_v42  ;;  %v1320_v17 = vmul.f32 %v1672_v60, %v3019_v13  ;;  %v3160_v56 = vmul.f32 %v1672_v60, %v3026_v41 }
 0x245   :  { %v1322_v31 = vmul.f32 %v1672_v60, %v3033_v14  ;;  %v3164_v43 = vmul.f32 %v1672_v60, %v3040_v59  ;;  %v1324_v19 = vmul.f32 %v1672_v60, %v3047_v3  ;;  %v3168_v6 = vmul.f32 %v1672_v60, %v3054_v37  ;;  %v3195_v3 = vld [vmem:[%s3697_s3] ss:$0 sm:$0xff] }
 0x246   :  { %v1326_v35 = vmul.f32 %v1672_v60, %v3061_v50  ;;  %v3172_v55 = vmul.f32 %v1672_v60, %v3068_v0  ;;  %v3175_v38 = vmul.f32 %v1672_v60, %v3075_v36  ;;  %v3178_v42 = vmul.f32 %v1672_v60, %v3082_v53 }
 0x247   :  { %v3181_v13 = vmul.f32 %v1672_v60, %v3089_v15  ;;  %v3184_v41 = vmul.f32 %v1672_v60, %v3096_v4  ;;  %v3187_v14 = vmul.f32 %v1672_v60, %v3103_v26  ;;  %v3190_v59 = vmul.f32 %v1672_v60, %v2930_v52 }
 0x248   :  { %v3198_v37 = vmul.f32 %v1672_v60, %v2934_v18  ;;  %v3201_v50 = vmul.f32 %v1672_v60, %v2938_v32  ;;  %v3204_v0 = vmul.f32 %v1672_v60, %v2942_v58  ;;  %v3207_v36 = vmul.f32 %v1672_v60, %v2945_v2  ;;  %v3224_v32 = vld [vmem:[%s3698_s4] ss:$0 sm:$0xff]  ;;  %s1678_s4 = smov 112  }
 0x249   :  { %v3210_v52 = vmul.f32 %v1672_v60, %v2948_v44  ;;  %v3213_v53 = vmul.f32 %v1672_v60, %v2951_v28  ;;  %v3216_v15 = vmul.f32 %v1672_v60, %v2954_v61  ;;  %v3219_v18 = vmul.f32 %v1672_v60, %v2957_v48 }
 0x24a   :  { %v1351_v58 = vmul.f32 %v3195_v3, %v1312_v20  ;;  %v1350_v2 = vmul.f32 %v3195_v3, %v1311_v23  ;;  %v1353_v44 = vmul.f32 %v3195_v3, %v1314_v25  ;;  %v1352_v28 = vmul.f32 %v3195_v3, %v1313_v9 }
 0x24b   :  { %v1355_v4 = vmul.f32 %v3195_v3, %v1316_v47  ;;  %v1354_v61 = vmul.f32 %v3195_v3, %v1315_v21  ;;  %v1357_v48 = vmul.f32 %v3195_v3, %v1318_v30  ;;  %v1356_v26 = vmul.f32 %v3195_v3, %v1317_v62 }
 0x24c   :  { %v1390_v24 = vadd.f32 %v3224_v32, %v1351_v58  ;;  %v1389_v54 = vadd.f32 %v3224_v32, %v1350_v2  ;;  %v1392_v27 = vadd.f32 %v3224_v32, %v1353_v44  ;;  %v1391_v5 = vadd.f32 %v3224_v32, %v1352_v28 }
 0x24d   :  { %v3239_v45 = vadd.f32 %v3224_v32, %v1355_v4  ;;  %v3242_v46 = vadd.f32 %v3224_v32, %v1354_v61  ;;  %v3245_v39 = vadd.f32 %v3224_v32, %v1357_v48  ;;  %v3248_v40 = vadd.f32 %v3224_v32, %v1356_v26 }
 0x24e   :  { %v1422_v29 = vmax.f32 %v1390_v24, 0.0  ;;  %v1421_v8 = vmax.f32 %v1389_v54, 0.0  ;;  %v1424_v33 = vmax.f32 %v1392_v27, 0.0  ;;  %v1423_v1 = vmax.f32 %v1391_v5, 0.0 }
 0x24f   :  { %v1426_v12 = vmax.f32 %v3239_v45, 0.0  ;;  %v1425_v51 = vmax.f32 %v3242_v46, 0.0  ;;  %v1428_v22 = vmax.f32 %v3245_v39, 0.0  ;;  %v1427_v34 = vmax.f32 %v3248_v40, 0.0 }
 0x250   :  { %1488 = vrot.lane.b32.xlu1 %v1422_v29, %s1678_s4  ;;  %1455 = vst.msk [vmem:[%s3699_s5 + $0x8] sm:$0xff] %vm1453_vm1, %v1422_v29  ;;  %1486 = vrot.lane.b32.xlu0 %v1421_v8, %s1678_s4  ;;  %1454 = vst.msk [vmem:[%s3699_s5] sm:$0xff] %vm1453_vm1, %v1421_v8  ;;  %v1359_v57 = vmul.f32 %v3195_v3, %v1320_v17  ;;  %v1358_v10 = vmul.f32 %v3195_v3, %v1319_v49 }
 0x251   :  { %1457 = vst.msk [vmem:[%s3699_s5 + $0x18] sm:$0xff] %vm1453_vm1, %v1424_v33  ;;  %1456 = vst.msk [vmem:[%s3699_s5 + $0x10] sm:$0xff] %vm1453_vm1, %v1423_v1  ;;  %v1361_v16 = vmul.f32 %v3195_v3, %v1322_v31  ;;  %v1360_v63 = vmul.f32 %v3195_v3, %v3160_v56  ;;  %v1363_v7 = vmul.f32 %v3195_v3, %v1324_v19 }
 0x252   :  { %1459 = vst.msk [vmem:[%s3699_s5 + $0x28] sm:$0xff] %vm1453_vm1, %v1426_v12  ;;  %1458 = vst.msk [vmem:[%s3699_s5 + $0x20] sm:$0xff] %vm1453_vm1, %v1425_v51  ;;  %v1362_v60 = vmul.f32 %v3195_v3, %v3164_v43  ;;  %v1365_v23 = vmul.f32 %v3195_v3, %v1326_v35  ;;  %v3302_v20 = vadd.f32 %v3224_v32, %v1359_v57 }
 0x253   :  { %1461 = vst.msk [vmem:[%s3699_s5 + $0x38] sm:$0xff] %vm1453_vm1, %v1428_v22  ;;  %1460 = vst.msk [vmem:[%s3699_s5 + $0x30] sm:$0xff] %vm1453_vm1, %v1427_v34  ;;  %v3305_v9 = vadd.f32 %v3224_v32, %v1358_v10  ;;  %v3308_v25 = vadd.f32 %v3224_v32, %v1361_v16  ;;  %v1364_v21 = vmul.f32 %v3195_v3, %v3168_v6 }
 0x254   :  { %v3313_v47 = vadd.f32 %v3224_v32, %v1360_v63  ;;  %v3316_v62 = vadd.f32 %v3224_v32, %v1363_v7  ;;  %v3319_v30 = vadd.f32 %v3224_v32, %v1362_v60  ;;  %v3322_v49 = vadd.f32 %v3224_v32, %v1365_v23  ;;  %1492 = vrot.lane.b32.xlu1 %v1424_v33, %s1678_s4 }
 0x255   :  { %1490 = vrot.lane.b32.xlu0 %v1423_v1, %s1678_s4  ;;  %v1430_v17 = vmax.f32 %v3302_v20, 0.0  ;;  %v1429_v56 = vmax.f32 %v3305_v9, 0.0  ;;  %v1432_v31 = vmax.f32 %v3308_v25, 0.0  ;;  %v3330_v43 = vadd.f32 %v3224_v32, %v1364_v21 }
 0x256   :  { %v1431_v19 = vmax.f32 %v3313_v47, 0.0  ;;  %v1434_v6 = vmax.f32 %v3316_v62, 0.0  ;;  %v1433_v35 = vmax.f32 %v3319_v30, 0.0  ;;  %v1436_v58 = vmax.f32 %v3322_v49, 0.0 }
 0x257   :  { %1463 = vst.msk [vmem:[%s3699_s5 + $0x48] sm:$0xff] %vm1453_vm1, %v1430_v17  ;;  %1462 = vst.msk [vmem:[%s3699_s5 + $0x40] sm:$0xff] %vm1453_vm1, %v1429_v56  ;;  %v1435_v2 = vmax.f32 %v3330_v43, 0.0  ;;  %v1367_v44 = vmul.f32 %v3195_v3, %v3175_v38  ;;  %v1366_v28 = vmul.f32 %v3195_v3, %v3172_v55  ;;  %v1369_v4 = vmul.f32 %v3195_v3, %v3181_v13 }
 0x258   :  { %1465 = vst.msk [vmem:[%s3699_s5 + $0x58] sm:$0xff] %vm1453_vm1, %v1432_v31  ;;  %1464 = vst.msk [vmem:[%s3699_s5 + $0x50] sm:$0xff] %vm1453_vm1, %v1431_v19  ;;  %v1368_v55 = vmul.f32 %v3195_v3, %v3178_v42  ;;  %v1371_v38 = vmul.f32 %v3195_v3, %v3187_v14  ;;  %v1370_v13 = vmul.f32 %v3195_v3, %v3184_v41  ;;  %1496 = vrot.lane.b32.xlu1 %v1426_v12, %s1678_s4 }
 0x259   :  { %1467 = vst.msk [vmem:[%s3699_s5 + $0x68] sm:$0xff] %vm1453_vm1, %v1434_v6  ;;  %1466 = vst.msk [vmem:[%s3699_s5 + $0x60] sm:$0xff] %vm1453_vm1, %v1433_v35  ;;  %v1373_v61 = vmul.f32 %v3195_v3, %v3198_v37  ;;  %1494 = vrot.lane.b32.xlu0 %v1425_v51, %s1678_s4  ;;  %v3402_v42 = vadd.f32 %v3224_v32, %v1367_v44  ;;  %v3405_v14 = vadd.f32 %v3224_v32, %v1366_v28 }
 0x25a   :  { %1469 = vst.msk [vmem:[%s3699_s5 + $0x78] sm:$0xff] %vm1453_vm1, %v1436_v58  ;;  %1468 = vst.msk [vmem:[%s3699_s5 + $0x70] sm:$0xff] %vm1453_vm1, %v1435_v2  ;;  %v3408_v41 = vadd.f32 %v3224_v32, %v1369_v4  ;;  %v3411_v37 = vadd.f32 %v3224_v32, %v1368_v55  ;;  %v3414_v48 = vadd.f32 %v3224_v32, %v1371_v38 }
 0x25b   :  { %v3417_v26 = vadd.f32 %v3224_v32, %v1370_v13  ;;  %v3420_v24 = vadd.f32 %v3224_v32, %v1373_v61  ;;  %v1438_v54 = vmax.f32 %v3402_v42, 0.0  ;;  %v1437_v27 = vmax.f32 %v3405_v14, 0.0 }
 0x25c   :  { %v1440_v5 = vmax.f32 %v3408_v41, 0.0  ;;  %v1372_v45 = vmul.f32 %v3195_v3, %v3190_v59  ;;  %v1439_v46 = vmax.f32 %v3411_v37, 0.0  ;;  %v1442_v29 = vmax.f32 %v3414_v48, 0.0  ;;  %1500 = vrot.lane.b32.xlu1 %v1428_v22, %s1678_s4 }
 0x25d   :  { %v1441_v8 = vmax.f32 %v3417_v26, 0.0  ;;  %v1444_v33 = vmax.f32 %v3420_v24, 0.0  ;;  %1498 = vrot.lane.b32.xlu0 %v1427_v34, %s1678_s4  ;;  %1551 = vst.msk [vmem:[%s3699_s5 + $0x108] sm:$0xff] %vm1453_vm1, %v1438_v54  ;;  %1550 = vst.msk [vmem:[%s3699_s5 + $0x100] sm:$0xff] %vm1453_vm1, %v1437_v27  ;;  %v1375_v39 = vmul.f32 %v3195_v3, %v3204_v0  ;;  %v1374_v40 = vmul.f32 %v3195_v3, %v3201_v50 }
 0x25e   :  { %1553 = vst.msk [vmem:[%s3699_s5 + $0x118] sm:$0xff] %vm1453_vm1, %v1440_v5  ;;  %v1411_v59 = vadd.f32 %v3224_v32, %v1372_v45  ;;  %1552 = vst.msk [vmem:[%s3699_s5 + $0x110] sm:$0xff] %vm1453_vm1, %v1439_v46  ;;  %v1377_v50 = vmul.f32 %v3195_v3, %v3210_v52  ;;  %v1376_v0 = vmul.f32 %v3195_v3, %v3207_v36 }
 0x25f   :  { %1555 = vst.msk [vmem:[%s3699_s5 + $0x128] sm:$0xff] %vm1453_vm1, %v1442_v29  ;;  %1554 = vst.msk [vmem:[%s3699_s5 + $0x120] sm:$0xff] %vm1453_vm1, %v1441_v8  ;;  %v1379_v1 = vmul.f32 %v3195_v3, %v3216_v15  ;;  %v1378_v12 = vmul.f32 %v3195_v3, %v3213_v53  ;;  %v1414_v22 = vadd.f32 %v3224_v32, %v1375_v39 }
 0x260   :  { %1557 = vst.msk [vmem:[%s3699_s5 + $0x138] sm:$0xff] %vm1453_vm1, %v1444_v33  ;;  %v1443_v51 = vmax.f32 %v1411_v59, 0.0  ;;  %v1413_v34 = vadd.f32 %v3224_v32, %v1374_v40  ;;  %v1381_v57 = vmul.f32 %v3195_v3, %v3147_v11  ;;  %v1416_v10 = vadd.f32 %v3224_v32, %v1377_v50  ;;  %1504 = vrot.lane.b32.xlu1 %v1430_v17, %s1678_s4 }
 0x261   :  { %v1415_v52 = vadd.f32 %v3224_v32, %v1376_v0  ;;  %v1418_v36 = vadd.f32 %v3224_v32, %v1379_v1  ;;  %v1417_v16 = vadd.f32 %v3224_v32, %v1378_v12  ;;  %1502 = vrot.lane.b32.xlu0 %v1429_v56, %s1678_s4  ;;  %v1446_v11 = vmax.f32 %v1414_v22, 0.0 }
 0x262   :  { %1556 = vst.msk [vmem:[%s3699_s5 + $0x130] sm:$0xff] %vm1453_vm1, %v1443_v51  ;;  %v1445_v53 = vmax.f32 %v1413_v34, 0.0  ;;  %v1420_v15 = vadd.f32 %v3224_v32, %v1381_v57  ;;  %v1380_v63 = vmul.f32 %v3195_v3, %v3219_v18  ;;  %v1448_v7 = vmax.f32 %v1416_v10, 0.0 }
 0x263   :  { %v1447_v60 = vmax.f32 %v1415_v52, 0.0  ;;  %v1450_v23 = vmax.f32 %v1418_v36, 0.0  ;;  %v1449_v20 = vmax.f32 %v1417_v16, 0.0  ;;  %1559 = vst.msk [vmem:[%s3699_s5 + $0x148] sm:$0xff] %vm1453_vm1, %v1446_v11 }
 0x264   :  { %1558 = vst.msk [vmem:[%s3699_s5 + $0x140] sm:$0xff] %vm1453_vm1, %v1445_v53  ;;  %v1452_v9 = vmax.f32 %v1420_v15, 0.0  ;;  %v1419_v21 = vadd.f32 %v3224_v32, %v1380_v63  ;;  %1561 = vst.msk [vmem:[%s3699_s5 + $0x158] sm:$0xff] %vm1453_vm1, %v1448_v7  ;;  %1508 = vrot.lane.b32.xlu1 %v1432_v31, %s1678_s4 }
 0x265   :  { %1560 = vst.msk [vmem:[%s3699_s5 + $0x150] sm:$0xff] %vm1453_vm1, %v1447_v60  ;;  %1563 = vst.msk [vmem:[%s3699_s5 + $0x168] sm:$0xff] %vm1453_vm1, %v1450_v23  ;;  %1506 = vrot.lane.b32.xlu0 %v1431_v19, %s1678_s4 }
 0x266   :  { %1562 = vst.msk [vmem:[%s3699_s5 + $0x160] sm:$0xff] %vm1453_vm1, %v1449_v20  ;;  %1565 = vst.msk [vmem:[%s3699_s5 + $0x178] sm:$0xff] %vm1453_vm1, %v1452_v9  ;;  %v1451_v3 = vmax.f32 %v1419_v21, 0.0 }
 0x268   :  { %1564 = vst.msk [vmem:[%s3699_s5 + $0x170] sm:$0xff] %vm1453_vm1, %v1451_v3  ;;  %1512 = vrot.lane.b32.xlu1 %v1434_v6, %s1678_s4 }
 0x269   :  { %1510 = vrot.lane.b32.xlu0 %v1433_v35, %s1678_s4 }
 0x26c   :  { %1516 = vrot.lane.b32.xlu1 %v1436_v58, %s1678_s4 }
 0x26d   :  { %1514 = vrot.lane.b32.xlu0 %v1435_v2, %s1678_s4 }
 0x270   :  { %1584 = vrot.lane.b32.xlu1 %v1438_v54, %s1678_s4 }
 0x271   :  { %1582 = vrot.lane.b32.xlu0 %v1437_v27, %s1678_s4 }
 0x274   :  { %1588 = vrot.lane.b32.xlu1 %v1440_v5, %s1678_s4 }
 0x275   :  { %1586 = vrot.lane.b32.xlu0 %v1439_v46, %s1678_s4 }
 0x278   :  { %1592 = vrot.lane.b32.xlu1 %v1442_v29, %s1678_s4 }
 0x279   :  { %1590 = vrot.lane.b32.xlu0 %v1441_v8, %s1678_s4 }
 0x27c   :  { %1596 = vrot.lane.b32.xlu1 %v1444_v33, %s1678_s4 }
 0x27d   :  { %1594 = vrot.lane.b32.xlu0 %v1443_v51, %s1678_s4 }
 0x280   :  { %1600 = vrot.lane.b32.xlu1 %v1446_v11, %s1678_s4 }
 0x281   :  { %1598 = vrot.lane.b32.xlu0 %v1445_v53, %s1678_s4 }
 0x284   :  { %1604 = vrot.lane.b32.xlu1 %v1448_v7, %s1678_s4 }
 0x285   :  { %1602 = vrot.lane.b32.xlu0 %v1447_v60, %s1678_s4 }
 0x288   :  { %1608 = vrot.lane.b32.xlu1 %v1450_v23, %s1678_s4 }
 0x289   :  { %1606 = vrot.lane.b32.xlu0 %v1449_v20, %s1678_s4 }
 0x28c   :  { %1612 = vrot.lane.b32.xlu1 %v1452_v9, %s1678_s4 }
 0x28d   :  { %1610 = vrot.lane.b32.xlu0 %v1451_v3, %s1678_s4 }
 0x2c2   :  { %v1489_v18 = vpop.permute.xlu1 %1488  ;;  %v1487_v32 = vpop.permute.xlu0 %1486 }
 0x2c3   :  { %1535 = vst.msk [vmem:[%s3699_s5 + $0x88] sm:$0xff] %vm1453_vm1, %v1489_v18  ;;  %1534 = vst.msk [vmem:[%s3699_s5 + $0x80] sm:$0xff] %vm1453_vm1, %v1487_v32 }
 0x2c6   :  { %v1493_v25 = vpop.permute.xlu1 %1492 }
 0x2c7   :  { %v1491_v47 = vpop.permute.xlu0 %1490  ;;  %1537 = vst.msk [vmem:[%s3699_s5 + $0x98] sm:$0xff] %vm1453_vm1, %v1493_v25 }
 0x2c8   :  { %1536 = vst.msk [vmem:[%s3699_s5 + $0x90] sm:$0xff] %vm1453_vm1, %v1491_v47 }
 0x2ca   :  { %v1497_v62 = vpop.permute.xlu1 %1496 }
 0x2cb   :  { %v1495_v30 = vpop.permute.xlu0 %1494  ;;  %1539 = vst.msk [vmem:[%s3699_s5 + $0xa8] sm:$0xff] %vm1453_vm1, %v1497_v62 }
 0x2cc   :  { %1538 = vst.msk [vmem:[%s3699_s5 + $0xa0] sm:$0xff] %vm1453_vm1, %v1495_v30 }
 0x2ce   :  { %v1501_v49 = vpop.permute.xlu1 %1500 }
 0x2cf   :  { %v1499_v17 = vpop.permute.xlu0 %1498  ;;  %1541 = vst.msk [vmem:[%s3699_s5 + $0xb8] sm:$0xff] %vm1453_vm1, %v1501_v49 }
 0x2d0   :  { %1540 = vst.msk [vmem:[%s3699_s5 + $0xb0] sm:$0xff] %vm1453_vm1, %v1499_v17 }
 0x2d2   :  { %v1505_v56 = vpop.permute.xlu1 %1504 }
 0x2d3   :  { %v1503_v31 = vpop.permute.xlu0 %1502  ;;  %1543 = vst.msk [vmem:[%s3699_s5 + $0xc8] sm:$0xff] %vm1453_vm1, %v1505_v56 }
 0x2d4   :  { %1542 = vst.msk [vmem:[%s3699_s5 + $0xc0] sm:$0xff] %vm1453_vm1, %v1503_v31 }
 0x2d6   :  { %v1509_v43 = vpop.permute.xlu1 %1508 }
 0x2d7   :  { %v1507_v19 = vpop.permute.xlu0 %1506  ;;  %1545 = vst.msk [vmem:[%s3699_s5 + $0xd8] sm:$0xff] %vm1453_vm1, %v1509_v43 }
 0x2d8   :  { %1544 = vst.msk [vmem:[%s3699_s5 + $0xd0] sm:$0xff] %vm1453_vm1, %v1507_v19 }
 0x2da   :  { %v1513_v6 = vpop.permute.xlu1 %1512 }
 0x2db   :  { %v1511_v35 = vpop.permute.xlu0 %1510  ;;  %1547 = vst.msk [vmem:[%s3699_s5 + $0xe8] sm:$0xff] %vm1453_vm1, %v1513_v6 }
 0x2dc   :  { %1546 = vst.msk [vmem:[%s3699_s5 + $0xe0] sm:$0xff] %vm1453_vm1, %v1511_v35 }
 0x2de   :  { %v1517_v58 = vpop.permute.xlu1 %1516 }
 0x2df   :  { %v1515_v2 = vpop.permute.xlu0 %1514  ;;  %1549 = vst.msk [vmem:[%s3699_s5 + $0xf8] sm:$0xff] %vm1453_vm1, %v1517_v58 }
 0x2e0   :  { %1548 = vst.msk [vmem:[%s3699_s5 + $0xf0] sm:$0xff] %vm1453_vm1, %v1515_v2 }
 0x2e2   :  { %v1585_v44 = vpop.permute.xlu1 %1584 }
 0x2e3   :  { %v1583_v28 = vpop.permute.xlu0 %1582  ;;  %1631 = vst.msk [vmem:[%s3699_s5 + $0x188] sm:$0xff] %vm1453_vm1, %v1585_v44 }
 0x2e4   :  { %1630 = vst.msk [vmem:[%s3699_s5 + $0x180] sm:$0xff] %vm1453_vm1, %v1583_v28 }
 0x2e6   :  { %v1589_v4 = vpop.permute.xlu1 %1588 }
 0x2e7   :  { %v1587_v55 = vpop.permute.xlu0 %1586  ;;  %1633 = vst.msk [vmem:[%s3699_s5 + $0x198] sm:$0xff] %vm1453_vm1, %v1589_v4 }
 0x2e8   :  { %1632 = vst.msk [vmem:[%s3699_s5 + $0x190] sm:$0xff] %vm1453_vm1, %v1587_v55 }
 0x2ea   :  { %v1593_v38 = vpop.permute.xlu1 %1592 }
 0x2eb   :  { %v1591_v13 = vpop.permute.xlu0 %1590  ;;  %1635 = vst.msk [vmem:[%s3699_s5 + $0x1a8] sm:$0xff] %vm1453_vm1, %v1593_v38 }
 0x2ec   :  { %1634 = vst.msk [vmem:[%s3699_s5 + $0x1a0] sm:$0xff] %vm1453_vm1, %v1591_v13 }
 0x2ee   :  { %v1597_v61 = vpop.permute.xlu1 %1596 }
 0x2ef   :  { %v1595_v42 = vpop.permute.xlu0 %1594  ;;  %1637 = vst.msk [vmem:[%s3699_s5 + $0x1b8] sm:$0xff] %vm1453_vm1, %v1597_v61 }
 0x2f0   :  { %1636 = vst.msk [vmem:[%s3699_s5 + $0x1b0] sm:$0xff] %vm1453_vm1, %v1595_v42 }
 0x2f2   :  { %v1601_v14 = vpop.permute.xlu1 %1600 }
 0x2f3   :  { %v1599_v41 = vpop.permute.xlu0 %1598  ;;  %1639 = vst.msk [vmem:[%s3699_s5 + $0x1c8] sm:$0xff] %vm1453_vm1, %v1601_v14 }
 0x2f4   :  { %1638 = vst.msk [vmem:[%s3699_s5 + $0x1c0] sm:$0xff] %vm1453_vm1, %v1599_v41 }
 0x2f6   :  { %v1605_v37 = vpop.permute.xlu1 %1604 }
 0x2f7   :  { %v1603_v48 = vpop.permute.xlu0 %1602  ;;  %1641 = vst.msk [vmem:[%s3699_s5 + $0x1d8] sm:$0xff] %vm1453_vm1, %v1605_v37 }
 0x2f8   :  { %1640 = vst.msk [vmem:[%s3699_s5 + $0x1d0] sm:$0xff] %vm1453_vm1, %v1603_v48 }
 0x2fa   :  { %v1609_v26 = vpop.permute.xlu1 %1608 }
 0x2fb   :  { %v1607_v24 = vpop.permute.xlu0 %1606  ;;  %1643 = vst.msk [vmem:[%s3699_s5 + $0x1e8] sm:$0xff] %vm1453_vm1, %v1609_v26 }
 0x2fc   :  { %1642 = vst.msk [vmem:[%s3699_s5 + $0x1e0] sm:$0xff] %vm1453_vm1, %v1607_v24 }
 0x2fe   :  { %v1613_v54 = vpop.permute.xlu1 %1612 }
 0x2ff   :  { %v1611_v27 = vpop.permute.xlu0 %1610  ;;  %1645 = vst.msk [vmem:[%s3699_s5 + $0x1f8] sm:$0xff] %vm1453_vm1, %v1613_v54 }
 0x300   :  { %1644 = vst.msk [vmem:[%s3699_s5 + $0x1f0] sm:$0xff] %vm1453_vm1, %v1611_v27 }

// kernel: glam_forward.8
= control target key start
LH: loop header
LB: loop body
LE: loop exit
PB: predicated region body
PF: predicated region fallthrough
CT: control target
= control target key end

     0   :  { %vm292_vm0 = vcmask 654336   ;;  %vm678_vm1 = vcmask 261120   ;;  %s3743_s1 = inlined_call_operand.vmem [shape: bf16[80,32], index: 1, kind: input, shape index: {}]   ;;  %s3744_s0 = inlined_call_operand.vmem [shape: bf16[512,80], index: 0, kind: input, shape index: {}]   ;;  %s3745_s2 = inlined_call_operand.vmem [shape: f32[1,32], index: 2, kind: input, shape index: {}]   ;;  %s3746_s3 = inlined_call_operand.vmem [shape: f32[1,32], index: 3, kind: input, shape index: {}]   ;;  %s3747_s4 = inlined_call_operand.vmem [shape: f32[1,32], index: 4, kind: input, shape index: {}]   ;;  %s3748_s5 = inlined_call_operand.vmem [shape: f32[512,32], index: 5, kind: output, shape index: {}]  }
   0x1   :  { %v1608_v0 = vld [vmem:[%s3743_s1 + $0x20] sm:$0xff]   ;;  %v1609_v1 = vld [vmem:[%s3743_s1 + $0x18] sm:$0xff]   ;;  %v1610_v2 = vld [vmem:[%s3743_s1 + $0x10] sm:$0xff]  }
   0x2   :  { %1524 = vmatprep.subr.bf16.mxu0 %v1608_v0  ;;  %1598 = vmatprep.subr.bf16.mxu1 %v1608_v0  ;;  %v1613_v3 = vld [vmem:[%s3744_s0] sm:$0xff]   ;;  %v1611_v4 = vld [vmem:[%s3743_s1 + $0x8] sm:$0xff]   ;;  %v1615_v7 = vld [vmem:[%s3744_s0 + $0x10] sm:$0xff]  }
   0x3   :  { %1525 = vmatpush3.bf16.msra.mxu0 %v1608_v0  ;;  %1603 = vmatpush3.bf16.msra.mxu1 %v1608_v0  ;;  %v1612_v5 = vld [vmem:[%s3743_s1] sm:$0xff]   ;;  %v1614_v6 = vld [vmem:[%s3744_s0 + $0x8] sm:$0xff]   ;;  %v1631_v10 = vld [vmem:[%s3744_s0 + $0x90] sm:$0xff]  }
   0x4   :  { %1526 = vmatprep.subr.bf16.mxu0 %v1609_v1  ;;  %1599 = vmatprep.subr.bf16.mxu1 %v1609_v1  ;;  %v1629_v8 = vld [vmem:[%s3744_s0 + $0x80] sm:$0xff]   ;;  %v1630_v9 = vld [vmem:[%s3744_s0 + $0x88] sm:$0xff]   ;;  %v1616_v11 = vld [vmem:[%s3744_s0 + $0x18] sm:$0xff]  }
   0x5   :  { %1534 = vmatprep.mubr.msk.bf16.mxu0 %vm292_vm0, %v1613_v3  ;;  %1566 = vmatprep.mubr.msk.bf16.mxu1 %vm292_vm0, %v1629_v8  ;;  %v1617_v12 = vld [vmem:[%s3744_s0 + $0x20] sm:$0xff]   ;;  %v1632_v13 = vld [vmem:[%s3744_s0 + $0x98] sm:$0xff]   ;;  %v1618_v15 = vld [vmem:[%s3744_s0 + $0x28] sm:$0xff]  }
   0x6   :  { %v1633_v14 = vld [vmem:[%s3744_s0 + $0xa0] sm:$0xff]   ;;  %v1619_v16 = vld [vmem:[%s3744_s0 + $0x30] sm:$0xff]   ;;  %v1634_v17 = vld [vmem:[%s3744_s0 + $0xa8] sm:$0xff]  }
   0x7   :  { %1527 = vmatpush3.bf16.msra.mxu0 %v1609_v1  ;;  %1604 = vmatpush3.bf16.msra.mxu1 %v1609_v1  ;;  %v1635_v18 = vld [vmem:[%s3744_s0 + $0xb0] sm:$0xff]   ;;  %v1620_v19 = vld [vmem:[%s3744_s0 + $0x38] sm:$0xff]   ;;  %v1621_v20 = vld [vmem:[%s3744_s0 + $0x40] sm:$0xff]  }
   0x8   :  { %1528 = vmatprep.subr.bf16.mxu0 %v1610_v2  ;;  %1600 = vmatprep.subr.bf16.mxu1 %v1610_v2  ;;  %v1636_v21 = vld [vmem:[%s3744_s0 + $0xb8] sm:$0xff]   ;;  %v1637_v22 = vld [vmem:[%s3744_s0 + $0xc0] sm:$0xff]   ;;  %v1622_v23 = vld [vmem:[%s3744_s0 + $0x48] sm:$0xff]  }
   0x9   :  { %v1623_v24 = vld [vmem:[%s3744_s0 + $0x50] sm:$0xff]   ;;  %v1638_v25 = vld [vmem:[%s3744_s0 + $0xc8] sm:$0xff]   ;;  %v1624_v27 = vld [vmem:[%s3744_s0 + $0x58] sm:$0xff]  }
   0xa   :  { %v1639_v26 = vld [vmem:[%s3744_s0 + $0xd0] sm:$0xff]   ;;  %v1625_v28 = vld [vmem:[%s3744_s0 + $0x60] sm:$0xff]   ;;  %v1640_v29 = vld [vmem:[%s3744_s0 + $0xd8] sm:$0xff]  }
   0xb   :  { %1529 = vmatpush3.bf16.msra.mxu0 %v1610_v2  ;;  %1605 = vmatpush3.bf16.msra.mxu1 %v1610_v2  ;;  %v1641_v30 = vld [vmem:[%s3744_s0 + $0xe0] sm:$0xff]   ;;  %v1626_v31 = vld [vmem:[%s3744_s0 + $0x68] sm:$0xff]   ;;  %v1627_v32 = vld [vmem:[%s3744_s0 + $0x70] sm:$0xff]  }
   0xc   :  { %1530 = vmatprep.subr.bf16.mxu0 %v1611_v4  ;;  %1601 = vmatprep.subr.bf16.mxu1 %v1611_v4  ;;  %v1642_v33 = vld [vmem:[%s3744_s0 + $0xe8] sm:$0xff]   ;;  %v1643_v34 = vld [vmem:[%s3744_s0 + $0xf0] sm:$0xff]   ;;  %v1628_v35 = vld [vmem:[%s3744_s0 + $0x78] sm:$0xff]  }
   0xd   :  { %v1644_v36 = vld [vmem:[%s3744_s0 + $0xf8] sm:$0xff]   ;;  %v1825_v40 = vld [vmem:[%s3745_s2] ss:$0 sm:$0xff] }
   0xf   :  { %1531 = vmatpush3.bf16.msra.mxu0 %v1611_v4  ;;  %1606 = vmatpush3.bf16.msra.mxu1 %v1611_v4 }
  0x10   :  { %1532 = vmatprep.subr.bf16.mxu0 %v1612_v5  ;;  %1602 = vmatprep.subr.bf16.mxu1 %v1612_v5 }
  0x13   :  { %1533 = vmatpush3.bf16.msra.mxu0 %v1612_v5  ;;  %1607 = vmatpush3.bf16.msra.mxu1 %v1612_v5 }
  0x16   :  { %1535 = vmatmul.mubr.msk.bf16.vlgmr.msra.gmra.mxu0 %vm292_vm0, %v1614_v6  ;;  %1567 = vmatmul.mubr.msk.bf16.vlgmr.msra.gmra.mxu1 %vm292_vm0, %v1630_v9 }
  0x17   :  { %1538 = vmatprep.mubr.msk.bf16.mxu0 %vm292_vm0, %v1615_v7  ;;  %1570 = vmatprep.mubr.msk.bf16.mxu1 %vm292_vm0, %v1631_v10 }
  0x1e   :  { %1539 = vmatmul.mubr.msk.bf16.gmra.mxu0 %vm292_vm0, %v1616_v11  ;;  %1571 = vmatmul.mubr.msk.bf16.gmra.mxu1 %vm292_vm0, %v1632_v13 }
  0x1f   :  { %1542 = vmatprep.mubr.msk.bf16.mxu0 %vm292_vm0, %v1617_v12  ;;  %1574 = vmatprep.mubr.msk.bf16.mxu1 %vm292_vm0, %v1633_v14 }
  0x26   :  { %1543 = vmatmul.mubr.msk.bf16.gmra.mxu0 %vm292_vm0, %v1618_v15  ;;  %1575 = vmatmul.mubr.msk.bf16.gmra.mxu1 %vm292_vm0, %v1634_v17 }
  0x27   :  { %1546 = vmatprep.mubr.msk.bf16.mxu0 %vm292_vm0, %v1619_v16  ;;  %1578 = vmatprep.mubr.msk.bf16.mxu1 %vm292_vm0, %v1635_v18 }
  0x2e   :  { %1547 = vmatmul.mubr.msk.bf16.gmra.mxu0 %vm292_vm0, %v1620_v19  ;;  %1579 = vmatmul.mubr.msk.bf16.gmra.mxu1 %vm292_vm0, %v1636_v21 }
  0x2f   :  { %1550 = vmatprep.mubr.msk.bf16.mxu0 %vm292_vm0, %v1621_v20  ;;  %1582 = vmatprep.mubr.msk.bf16.mxu1 %vm292_vm0, %v1637_v22 }
  0x36   :  { %1551 = vmatmul.mubr.msk.bf16.gmra.mxu0 %vm292_vm0, %v1622_v23  ;;  %1583 = vmatmul.mubr.msk.bf16.gmra.mxu1 %vm292_vm0, %v1638_v25 }
  0x37   :  { %1554 = vmatprep.mubr.msk.bf16.mxu0 %vm292_vm0, %v1623_v24  ;;  %1586 = vmatprep.mubr.msk.bf16.mxu1 %vm292_vm0, %v1639_v26 }
  0x3e   :  { %1555 = vmatmul.mubr.msk.bf16.gmra.mxu0 %vm292_vm0, %v1624_v27  ;;  %1587 = vmatmul.mubr.msk.bf16.gmra.mxu1 %vm292_vm0, %v1640_v29 }
  0x3f   :  { %1558 = vmatprep.mubr.msk.bf16.mxu0 %vm292_vm0, %v1625_v28  ;;  %1590 = vmatprep.mubr.msk.bf16.mxu1 %vm292_vm0, %v1641_v30 }
  0x46   :  { %1559 = vmatmul.mubr.msk.bf16.gmra.mxu0 %vm292_vm0, %v1626_v31  ;;  %1591 = vmatmul.mubr.msk.bf16.gmra.mxu1 %vm292_vm0, %v1642_v33 }
  0x47   :  { %1562 = vmatprep.mubr.msk.bf16.mxu0 %vm292_vm0, %v1627_v32  ;;  %1594 = vmatprep.mubr.msk.bf16.mxu1 %vm292_vm0, %v1643_v34 }
  0x4e   :  { %1563 = vmatmul.mubr.msk.bf16.gmra.mxu0 %vm292_vm0, %v1628_v35  ;;  %1595 = vmatmul.mubr.msk.bf16.gmra.mxu1 %vm292_vm0, %v1644_v36 }
  0xd6   :  { %v1536_v37 = vpop.f32.mrf.mxu0  ;;  %v1820_v39 = vpop.f32.mrf.mxu1 }
  0xd7   :  { %v1833_v45 = vadd.f32 %v1536_v37, %v1825_v40 }
  0xd8   :  { %v423_v38 = vpop.f32.mrf.mxu0  ;;  %v1830_v44 = vpop.f32.mrf.mxu1 }
  0xd9   :  { %v1828_v42 = vadd.f32 %v1825_v40, %v423_v38  ;;  %v682_v54 = vsel %vm678_vm1, %v1833_v45, 0.0 }
  0xda   :  { %v1537_v41 = vpop.f32.mrf.mxu0  ;;  %v1845_v53 = vpop.f32.mrf.mxu1 }
  0xdb   :  { %v679_v48 = vsel %vm678_vm1, %v1828_v42, 0.0  ;;  %v1841_v49 = vadd.f32 %v1537_v41, %v1825_v40 }
  0xdc   :  { %v426_v43 = vpop.f32.mrf.mxu0  ;;  %v1854_v61 = vpop.f32.mrf.mxu1 }
  0xdd   :  { %v1836_v46 = vadd.f32 %v1825_v40, %v426_v43  ;;  %v684_v58 = vsel %vm678_vm1, %v1841_v49, 0.0 }
  0xde   :  { %v1540_v47 = vpop.f32.mrf.mxu0  ;;  %v1869_v7 = vpop.f32.mrf.mxu1 }
  0xdf   :  { %v680_v50 = vsel %vm678_vm1, %v1836_v46, 0.0  ;;  %v1857_v62 = vadd.f32 %v1540_v47, %v1825_v40 }
  0xe0   :  { %v681_v51 = vadd.f32 %v680_v50, %v679_v48  ;;  %v439_v52 = vpop.f32.mrf.mxu0  ;;  %v1878_v15 = vpop.f32.mrf.mxu1 }
  0xe1   :  { %v1850_v55 = vadd.f32 %v1825_v40, %v439_v52  ;;  %v690_v8 = vsel %vm678_vm1, %v1857_v62, 0.0 }
  0xe2   :  { %v683_v56 = vadd.f32 %v682_v54, %v681_v51  ;;  %v1541_v57 = vpop.f32.mrf.mxu0  ;;  %v1893_v25 = vpop.f32.mrf.mxu1 }
  0xe3   :  { %v686_v63 = vsel %vm678_vm1, %v1850_v55, 0.0  ;;  %v1865_v3 = vadd.f32 %v1541_v57, %v1825_v40 }
  0xe4   :  { %v685_v59 = vadd.f32 %v684_v58, %v683_v56  ;;  %v442_v60 = vpop.f32.mrf.mxu0  ;;  %v1902_v33 = vpop.f32.mrf.mxu1 }
  0xe5   :  { %v1862_v0 = vadd.f32 %v1825_v40, %v442_v60  ;;  %v692_v12 = vsel %vm678_vm1, %v1865_v3, 0.0 }
  0xe6   :  { %v687_v1 = vadd.f32 %v686_v63, %v685_v59  ;;  %v1544_v2 = vpop.f32.mrf.mxu0  ;;  %v1917_v50 = vpop.f32.mrf.mxu1 }
  0xe7   :  { %v688_v4 = vsel %vm678_vm1, %v1862_v0, 0.0  ;;  %v1881_v16 = vadd.f32 %v1544_v2, %v1825_v40 }
  0xe8   :  { %v689_v5 = vadd.f32 %v688_v4, %v687_v1  ;;  %v455_v6 = vpop.f32.mrf.mxu0  ;;  %v1926_v60 = vpop.f32.mrf.mxu1 }
  0xe9   :  { %v1874_v9 = vadd.f32 %v1825_v40, %v455_v6  ;;  %v698_v26 = vsel %vm678_vm1, %v1881_v16, 0.0 }
  0xea   :  { %v691_v10 = vadd.f32 %v690_v8, %v689_v5  ;;  %v1545_v11 = vpop.f32.mrf.mxu0 }
  0xeb   :  { %v694_v17 = vsel %vm678_vm1, %v1874_v9, 0.0  ;;  %v1889_v21 = vadd.f32 %v1545_v11, %v1825_v40 }
  0xec   :  { %v693_v13 = vadd.f32 %v692_v12, %v691_v10  ;;  %v458_v14 = vpop.f32.mrf.mxu0  ;;  %v1941_v12 = vpop.f32.mrf.mxu1 }
  0xed   :  { %v1886_v18 = vadd.f32 %v1825_v40, %v458_v14  ;;  %v700_v30 = vsel %vm678_vm1, %v1889_v21, 0.0 }
  0xee   :  { %v695_v19 = vadd.f32 %v694_v17, %v693_v13  ;;  %v1548_v20 = vpop.f32.mrf.mxu0 }
  0xef   :  { %v696_v22 = vsel %vm678_vm1, %v1886_v18, 0.0  ;;  %v1905_v34 = vadd.f32 %v1548_v20, %v1825_v40 }
  0xf0   :  { %v697_v23 = vadd.f32 %v696_v22, %v695_v19  ;;  %v471_v24 = vpop.f32.mrf.mxu0 }
  0xf1   :  { %v1898_v27 = vadd.f32 %v1825_v40, %v471_v24  ;;  %v706_v51 = vsel %vm678_vm1, %v1905_v34, 0.0  ;;  %v1950_v24 = vpop.f32.mrf.mxu1 }
  0xf2   :  { %v699_v28 = vadd.f32 %v698_v26, %v697_v23  ;;  %v1549_v29 = vpop.f32.mrf.mxu0 }
  0xf3   :  { %v702_v35 = vsel %vm678_vm1, %v1898_v27, 0.0  ;;  %v1913_v41 = vadd.f32 %v1549_v29, %v1825_v40 }
  0xf4   :  { %v701_v31 = vadd.f32 %v700_v30, %v699_v28  ;;  %v474_v32 = vpop.f32.mrf.mxu0 }
  0xf5   :  { %v1910_v36 = vadd.f32 %v1825_v40, %v474_v32  ;;  %v708_v57 = vsel %vm678_vm1, %v1913_v41, 0.0 }
  0xf6   :  { %v703_v37 = vadd.f32 %v702_v35, %v701_v31  ;;  %v1552_v38 = vpop.f32.mrf.mxu0 }
  0xf7   :  { %v704_v43 = vsel %vm678_vm1, %v1910_v36, 0.0  ;;  %v1929_v63 = vadd.f32 %v1552_v38, %v1825_v40 }
  0xf8   :  { %v705_v47 = vadd.f32 %v704_v43, %v703_v37  ;;  %v487_v48 = vpop.f32.mrf.mxu0  ;;  %v1965_v43 = vpop.f32.mrf.mxu1 }
  0xf9   :  { %v1922_v52 = vadd.f32 %v1825_v40, %v487_v48  ;;  %v714_v13 = vsel %vm678_vm1, %v1929_v63, 0.0 }
  0xfa   :  { %v707_v54 = vadd.f32 %v706_v51, %v705_v47  ;;  %v1553_v56 = vpop.f32.mrf.mxu0 }
  0xfb   :  { %v710_v1 = vsel %vm678_vm1, %v1922_v52, 0.0  ;;  %v1937_v6 = vadd.f32 %v1553_v56, %v1825_v40 }
  0xfc   :  { %v709_v58 = vadd.f32 %v708_v57, %v707_v54  ;;  %v490_v59 = vpop.f32.mrf.mxu0 }
  0xfd   :  { %v1934_v2 = vadd.f32 %v1825_v40, %v490_v59  ;;  %v716_v20 = vsel %vm678_vm1, %v1937_v6, 0.0  ;;  %v1974_v59 = vpop.f32.mrf.mxu1 }
  0xfe   :  { %v711_v4 = vadd.f32 %v710_v1, %v709_v58  ;;  %v1556_v5 = vpop.f32.mrf.mxu0 }
  0xff   :  { %v712_v8 = vsel %vm678_vm1, %v1934_v2, 0.0  ;;  %v1953_v26 = vadd.f32 %v1556_v5, %v1825_v40 }
 0x100   :  { %v713_v10 = vadd.f32 %v712_v8, %v711_v4  ;;  %v503_v11 = vpop.f32.mrf.mxu0 }
 0x101   :  { %v1946_v14 = vadd.f32 %v1825_v40, %v503_v11  ;;  %v722_v47 = vsel %vm678_vm1, %v1953_v26, 0.0 }
 0x102   :  { %v715_v17 = vadd.f32 %v714_v13, %v713_v10  ;;  %v1557_v19 = vpop.f32.mrf.mxu0 }
 0x103   :  { %v718_v28 = vsel %vm678_vm1, %v1946_v14, 0.0  ;;  %v1961_v32 = vadd.f32 %v1557_v19, %v1825_v40 }
 0x104   :  { %v717_v22 = vadd.f32 %v716_v20, %v715_v17  ;;  %v506_v23 = vpop.f32.mrf.mxu0  ;;  %v1989_v20 = vpop.f32.mrf.mxu1 }
 0x105   :  { %v1958_v29 = vadd.f32 %v1825_v40, %v506_v23  ;;  %v724_v56 = vsel %vm678_vm1, %v1961_v32, 0.0 }
 0x106   :  { %v719_v30 = vadd.f32 %v718_v28, %v717_v22  ;;  %v1560_v31 = vpop.f32.mrf.mxu0 }
 0x107   :  { %v720_v35 = vsel %vm678_vm1, %v1958_v29, 0.0  ;;  %v1977_v1 = vadd.f32 %v1560_v31, %v1825_v40 }
 0x108   :  { %v721_v37 = vadd.f32 %v720_v35, %v719_v30  ;;  %v519_v38 = vpop.f32.mrf.mxu0 }
 0x109   :  { %v1970_v48 = vadd.f32 %v1825_v40, %v519_v38  ;;  %v730_v22 = vsel %vm678_vm1, %v1977_v1, 0.0  ;;  %v602_v38 = vpop.f32.mrf.mxu1 }
 0x10a   :  { %v723_v51 = vadd.f32 %v722_v47, %v721_v37  ;;  %v1561_v54 = vpop.f32.mrf.mxu0 }
 0x10b   :  { %v726_v4 = vsel %vm678_vm1, %v1970_v48, 0.0  ;;  %v1985_v11 = vadd.f32 %v1561_v54, %v1825_v40 }
 0x10c   :  { %v725_v57 = vadd.f32 %v724_v56, %v723_v51  ;;  %v522_v58 = vpop.f32.mrf.mxu0 }
 0x10d   :  { %v1982_v5 = vadd.f32 %v1825_v40, %v522_v58  ;;  %v732_v31 = vsel %vm678_vm1, %v1985_v11, 0.0 }
 0x10e   :  { %v727_v8 = vadd.f32 %v726_v4, %v725_v57  ;;  %v1564_v10 = vpop.f32.mrf.mxu0 }
 0x10f   :  { %v728_v13 = vsel %vm678_vm1, %v1982_v5, 0.0  ;;  %v1999_v47 = vadd.f32 %v1564_v10, %v1825_v40 }
 0x110   :  { %v729_v17 = vadd.f32 %v728_v13, %v727_v8  ;;  %v535_v19 = vpop.f32.mrf.mxu0  ;;  %v2011_v8 = vpop.f32.mrf.mxu1  ;;  %v2017_v13 = vadd.f32 %v1825_v40, %v1830_v44  ;;  %v2033_v44 = vadd.f32 %v1845_v53, %v1825_v40  ;;  %v2047_v53 = vadd.f32 %v1825_v40, %v1902_v33 }
 0x111   :  { %v1994_v23 = vadd.f32 %v1825_v40, %v535_v19  ;;  %v738_v10 = vsel %vm678_vm1, %v1999_v47, 0.0 }
 0x112   :  { %v731_v28 = vadd.f32 %v730_v22, %v729_v17  ;;  %v1565_v30 = vpop.f32.mrf.mxu0  ;;  %v2023_v22 = vadd.f32 %v1825_v40, %v1854_v61 }
 0x113   :  { %v734_v51 = vsel %vm678_vm1, %v1994_v23, 0.0  ;;  %v2007_v57 = vadd.f32 %v1565_v30, %v1825_v40  ;;  %v615_v30 = vpop.f32.mrf.mxu1 }
 0x114   :  { %v733_v35 = vadd.f32 %v732_v31, %v731_v28  ;;  %v538_v37 = vpop.f32.mrf.mxu0  ;;  %v2027_v31 = vadd.f32 %v1820_v39, %v1825_v40  ;;  %v2041_v39 = vadd.f32 %v1825_v40, %v1878_v15  ;;  %v2057_v15 = vadd.f32 %v1893_v25, %v1825_v40 }
 0x115   :  { %v2004_v54 = vadd.f32 %v1825_v40, %v538_v37  ;;  %v740_v19 = vsel %vm678_vm1, %v2007_v57, 0.0  ;;  %v1585_v61 = vpop.f32.mrf.mxu1  ;;  %v2071_v25 = vadd.f32 %v1825_v40, %v1950_v24 }
 0x116   :  { %v735_v56 = vadd.f32 %v734_v51, %v733_v35  ;;  %v742_v35 = vsel %vm678_vm1, %v2017_v13, 0.0  ;;  %v744_v51 = vsel %vm678_vm1, %v2023_v22, 0.0 }
 0x117   :  { %v736_v58 = vsel %vm678_vm1, %v2004_v54, 0.0 }
 0x118   :  { %v737_v4 = vadd.f32 %v736_v58, %v735_v56  ;;  %v746_v58 = vsel %vm678_vm1, %v2027_v31, 0.0 }
 0x11a   :  { %v739_v17 = vadd.f32 %v738_v10, %v737_v4  ;;  %v748_v10 = vsel %vm678_vm1, %v2033_v44, 0.0 }
 0x11c   :  { %v741_v28 = vadd.f32 %v740_v19, %v739_v17  ;;  %v618_v19 = vpop.f32.mrf.mxu1 }
 0x11e   :  { %v743_v37 = vadd.f32 %v742_v35, %v741_v28  ;;  %v2051_v28 = vadd.f32 %v1869_v7, %v1825_v40  ;;  %v750_v35 = vsel %vm678_vm1, %v2041_v39, 0.0  ;;  %v1588_v33 = vpop.f32.mrf.mxu1  ;;  %v2065_v7 = vadd.f32 %v1825_v40, %v1926_v60 }
 0x11f   :  { %v2081_v60 = vadd.f32 %v1941_v12, %v1825_v40 }
 0x120   :  { %v745_v56 = vadd.f32 %v744_v51, %v743_v37  ;;  %3784 = vst [vmem:[#allocation2_spill] sm:$0xff] %v2051_v28  ;;  %v752_v51 = vsel %vm678_vm1, %v2047_v53, 0.0  ;;  %3785 = vst [vmem:[#allocation3_spill] sm:$0xff] %v2065_v7 }
 0x122   :  { %v747_v4 = vadd.f32 %v746_v58, %v745_v56  ;;  %v754_v58 = vsel %vm678_vm1, %v2051_v28, 0.0 }
 0x124   :  { %v749_v17 = vadd.f32 %v748_v10, %v747_v4  ;;  %v756_v10 = vsel %vm678_vm1, %v2057_v15, 0.0 }
 0x126   :  { %v751_v37 = vadd.f32 %v750_v35, %v749_v17  ;;  %v631_v35 = vpop.f32.mrf.mxu1 }
 0x128   :  { %v753_v56 = vadd.f32 %v752_v51, %v751_v37  ;;  %v2075_v37 = vadd.f32 %v1917_v50, %v1825_v40  ;;  %v758_v51 = vsel %vm678_vm1, %v2065_v7, 0.0  ;;  %v1589_v24 = vpop.f32.mrf.mxu1  ;;  %v2089_v50 = vadd.f32 %v1825_v40, %v1974_v59 }
 0x129   :  { %v2104_v59 = vadd.f32 %v1989_v20, %v1825_v40 }
 0x12a   :  { %v755_v4 = vadd.f32 %v754_v58, %v753_v56  ;;  %3786 = vst [vmem:[#allocation4_spill] sm:$0xff] %v2075_v37  ;;  %v760_v56 = vsel %vm678_vm1, %v2071_v25, 0.0  ;;  %3787 = vst [vmem:[#allocation5_spill] sm:$0xff] %v2089_v50  ;;  %v634_v7 = vpop.f32.mrf.mxu1 }
 0x12b   :  { %3789 = vst [vmem:[#allocation7_spill] sm:$0xff] %v2104_v59 }
 0x12c   :  { %v757_v17 = vadd.f32 %v756_v10, %v755_v4  ;;  %v762_v4 = vsel %vm678_vm1, %v2075_v37, 0.0 }
 0x12e   :  { %v759_v28 = vadd.f32 %v758_v51, %v757_v17  ;;  %v764_v17 = vsel %vm678_vm1, %v2081_v60, 0.0  ;;  %v2094_v51 = vadd.f32 %v1825_v40, %v602_v38  ;;  %v1592_v38 = vpop.f32.mrf.mxu1 }
 0x130   :  { %v761_v58 = vadd.f32 %v760_v56, %v759_v28  ;;  %3788 = vst [vmem:[#allocation6_spill] sm:$0xff] %v2094_v51  ;;  %v2098_v28 = vadd.f32 %v1965_v43, %v1825_v40  ;;  %v766_v56 = vsel %vm678_vm1, %v2089_v50, 0.0  ;;  %v772_v50 = vsel %vm678_vm1, %v2104_v59, 0.0 }
 0x132   :  { %v763_v10 = vadd.f32 %v762_v4, %v761_v58  ;;  %v768_v58 = vsel %vm678_vm1, %v2094_v51, 0.0  ;;  %v2120_v51 = vadd.f32 %v2011_v8, %v1825_v40 }
 0x134   :  { %v765_v12 = vadd.f32 %v764_v17, %v763_v10  ;;  %v770_v10 = vsel %vm678_vm1, %v2098_v28, 0.0  ;;  %v2111_v17 = vadd.f32 %v1825_v40, %v615_v30  ;;  %3791 = vst [vmem:[#allocation9_spill] sm:$0xff] %v2120_v51  ;;  %v2125_v30 = vadd.f32 %v1585_v61, %v1825_v40 }
 0x136   :  { %v767_v37 = vadd.f32 %v766_v56, %v765_v12  ;;  %3790 = vst [vmem:[#allocation8_spill] sm:$0xff] %v2111_v17  ;;  %v2116_v12 = vadd.f32 %v1825_v40, %v618_v19  ;;  %v647_v56 = vpop.f32.mrf.mxu1  ;;  %v778_v19 = vsel %vm678_vm1, %v2120_v51, 0.0  ;;  %v2145_v51 = vadd.f32 %v1589_v24, %v1825_v40 }
 0x138   :  { %v769_v4 = vadd.f32 %v768_v58, %v767_v37  ;;  %v774_v37 = vsel %vm678_vm1, %v2111_v17, 0.0  ;;  %v1593_v59 = vpop.f32.mrf.mxu1  ;;  %v2140_v17 = vadd.f32 %v1588_v33, %v1825_v40  ;;  %3794 = vst [vmem:[#allocation12_spill] sm:$0xff] %v2145_v51 }
 0x13a   :  { %v771_v43 = vadd.f32 %v770_v10, %v769_v4  ;;  %v776_v4 = vsel %vm678_vm1, %v2116_v12, 0.0  ;;  %3793 = vst [vmem:[#allocation11_spill] sm:$0xff] %v2140_v17 }
 0x13c   :  { %v773_v20 = vadd.f32 %v772_v50, %v771_v43  ;;  %v2132_v50 = vadd.f32 %v1825_v40, %v631_v35  ;;  %v780_v43 = vsel %vm678_vm1, %v2125_v30, 0.0 }
 0x13e   :  { %v775_v58 = vadd.f32 %v774_v37, %v773_v20  ;;  %3792 = vst [vmem:[#allocation10_spill] sm:$0xff] %v2132_v50  ;;  %v2137_v20 = vadd.f32 %v1825_v40, %v634_v7  ;;  %v650_v37 = vpop.f32.mrf.mxu1  ;;  %v786_v7 = vsel %vm678_vm1, %v2140_v17, 0.0  ;;  %v2165_v17 = vadd.f32 %v1593_v59, %v1825_v40 }
 0x140   :  { %v777_v10 = vadd.f32 %v776_v4, %v775_v58  ;;  %v782_v58 = vsel %vm678_vm1, %v2132_v50, 0.0  ;;  %v784_v35 = vsel %vm678_vm1, %v2137_v20, 0.0  ;;  %v2160_v50 = vadd.f32 %v1592_v38, %v1825_v40  ;;  %3798 = vst [vmem:[#allocation16_spill] sm:$0xff] %v2165_v17 }
 0x141   :  { %v796_v38 = vsel %vm678_vm1, %v2165_v17, 0.0 }
 0x142   :  { %v779_v8 = vadd.f32 %v778_v19, %v777_v10  ;;  %v1596_v19 = vpop.f32.mrf.mxu1  ;;  %3797 = vst [vmem:[#allocation15_spill] sm:$0xff] %v2160_v50 }
 0x144   :  { %v781_v61 = vadd.f32 %v780_v43, %v779_v8  ;;  %v2152_v8 = vadd.f32 %v1825_v40, %v647_v56  ;;  %v788_v43 = vsel %vm678_vm1, %v2145_v51, 0.0 }
 0x146   :  { %v783_v4 = vadd.f32 %v782_v58, %v781_v61  ;;  %3795 = vst [vmem:[#allocation13_spill] sm:$0xff] %v2152_v8  ;;  %v2157_v61 = vadd.f32 %v1825_v40, %v650_v37  ;;  %v663_v58 = vpop.f32.mrf.mxu1  ;;  %v794_v37 = vsel %vm678_vm1, %v2160_v50, 0.0 }
 0x148   :  { %v785_v10 = vadd.f32 %v784_v35, %v783_v4  ;;  %3796 = vst [vmem:[#allocation14_spill] sm:$0xff] %v2157_v61  ;;  %v790_v4 = vsel %vm678_vm1, %v2152_v8, 0.0  ;;  %v792_v56 = vsel %vm678_vm1, %v2157_v61, 0.0 }
 0x14a   :  { %v787_v33 = vadd.f32 %v786_v7, %v785_v10  ;;  %v1597_v7 = vpop.f32.mrf.mxu1 }
 0x14c   :  { %v789_v24 = vadd.f32 %v788_v43, %v787_v33  ;;  %v2174_v43 = vadd.f32 %v1825_v40, %v663_v58 }
 0x14e   :  { %v791_v35 = vadd.f32 %v790_v4, %v789_v24  ;;  %3799 = vst [vmem:[#allocation17_spill] sm:$0xff] %v2174_v43  ;;  %v666_v24 = vpop.f32.mrf.mxu1  ;;  %v798_v59 = vsel %vm678_vm1, %v2174_v43, 0.0 }
 0x14f   :  { %v2179_v4 = vadd.f32 %v1825_v40, %v666_v24 }
 0x150   :  { %v793_v10 = vadd.f32 %v792_v56, %v791_v35  ;;  %v2182_v56 = vadd.f32 %v1596_v19, %v1825_v40 }
 0x152   :  { %v795_v33 = vadd.f32 %v794_v37, %v793_v10  ;;  %v800_v10 = vsel %vm678_vm1, %v2179_v4, 0.0  ;;  %v802_v58 = vsel %vm678_vm1, %v2182_v56, 0.0 }
 0x154   :  { %v797_v8 = vadd.f32 %v796_v38, %v795_v33  ;;  %v2189_v33 = vadd.f32 %v1597_v7, %v1825_v40 }
 0x156   :  { %v799_v35 = vadd.f32 %v798_v59, %v797_v8  ;;  %v804_v43 = vsel %vm678_vm1, %v2189_v33, 0.0 }
 0x158   :  { %v801_v37 = vadd.f32 %v800_v10, %v799_v35 }
 0x15a   :  { %v803_v38 = vadd.f32 %v802_v58, %v801_v37 }
 0x15c   :  { %v805_v24 = vadd.f32 %v804_v43, %v803_v38 }
 0x15e   :  { %v806_v17 = vrot.slane %v805_v24, 4 }
 0x160   :  { %v807_v8 = vadd.f32 %v806_v17, %v805_v24 }
 0x162   :  { %v808_v59 = vrot.slane %v807_v8, 2 }
 0x164   :  { %v809_v19 = vadd.f32 %v808_v59, %v807_v8 }
 0x166   :  { %v810_v50 = vrot.slane %v809_v19, 1 }
 0x168   :  { %v811_v61 = vadd.f32 %v810_v50, %v809_v19 }
 0x16a   :  { %v2193_v51 = vmul.f32 0.001953125, %v811_v61 }
 0x16c   :  { %v2197_v35 = vsub.f32 %v1828_v42, %v2193_v51  ;;  %v2201_v40 = vsub.f32 %v1836_v46, %v2193_v51  ;;  %v2205_v7 = vsub.f32 %v1833_v45, %v2193_v51  ;;  %v2209_v17 = vsub.f32 %v1841_v49, %v2193_v51 }
 0x16d   :  { %v2217_v42 = vsub.f32 %v1850_v55, %v2193_v51  ;;  %v2223_v45 = vsub.f32 %v1862_v0, %v2193_v51  ;;  %v2231_v58 = vsub.f32 %v1857_v62, %v2193_v51  ;;  %v2238_v0 = vsub.f32 %v1865_v3, %v2193_v51 }
 0x16e   :  { %v877_v50 = vmul.f32 %v2197_v35, %v2197_v35  ;;  %v878_v61 = vmul.f32 %v2201_v40, %v2201_v40  ;;  %v879_v46 = vmul.f32 %v2205_v7, %v2205_v7  ;;  %v880_v49 = vmul.f32 %v2209_v17, %v2209_v17 }
 0x16f   :  { %v881_v55 = vmul.f32 %v2217_v42, %v2217_v42  ;;  %v882_v8 = vmul.f32 %v2223_v45, %v2223_v45  ;;  %v2245_v62 = vsub.f32 %v1874_v9, %v2193_v51  ;;  %v2252_v3 = vsub.f32 %v1886_v18, %v2193_v51 }
 0x170   :  { %v941_v43 = vsel %vm678_vm1, %v877_v50, 0.0  ;;  %v942_v10 = vsel %vm678_vm1, %v878_v61, 0.0  ;;  %v944_v38 = vsel %vm678_vm1, %v879_v46, 0.0  ;;  %v946_v59 = vsel %vm678_vm1, %v880_v49, 0.0 }
 0x171   :  { %v943_v37 = vadd.f32 %v942_v10, %v941_v43  ;;  %v883_v50 = vmul.f32 %v2231_v58, %v2231_v58  ;;  %v948_v61 = vsel %vm678_vm1, %v881_v55, 0.0  ;;  %v884_v43 = vmul.f32 %v2238_v0, %v2238_v0 }
 0x172   :  { %v950_v49 = vsel %vm678_vm1, %v882_v8, 0.0  ;;  %v2259_v9 = vsub.f32 %v1881_v16, %v2193_v51  ;;  %v2266_v18 = vsub.f32 %v1889_v21, %v2193_v51  ;;  %v2273_v16 = vsub.f32 %v1898_v27, %v2193_v51 }
 0x173   :  { %v945_v24 = vadd.f32 %v944_v38, %v943_v37  ;;  %v885_v37 = vmul.f32 %v2245_v62, %v2245_v62  ;;  %v952_v55 = vsel %vm678_vm1, %v883_v50, 0.0  ;;  %v954_v8 = vsel %vm678_vm1, %v884_v43, 0.0 }
 0x174   :  { %v2280_v21 = vsub.f32 %v1910_v36, %v2193_v51  ;;  %v2287_v27 = vsub.f32 %v1905_v34, %v2193_v51  ;;  %v2294_v36 = vsub.f32 %v1913_v41, %v2193_v51  ;;  %v2301_v34 = vsub.f32 %v1922_v52, %v2193_v51 }
 0x175   :  { %v947_v19 = vadd.f32 %v946_v59, %v945_v24  ;;  %v886_v24 = vmul.f32 %v2252_v3, %v2252_v3  ;;  %v956_v50 = vsel %vm678_vm1, %v885_v37, 0.0  ;;  %v2308_v41 = vsub.f32 %v1934_v2, %v2193_v51 }
 0x176   :  { %v2315_v52 = vsub.f32 %v1929_v63, %v2193_v51  ;;  %v2322_v2 = vsub.f32 %v1937_v6, %v2193_v51  ;;  %v2329_v63 = vsub.f32 %v1946_v14, %v2193_v51  ;;  %v2336_v6 = vsub.f32 %v1958_v29, %v2193_v51 }
 0x177   :  { %v949_v46 = vadd.f32 %v948_v61, %v947_v19  ;;  %v887_v19 = vmul.f32 %v2259_v9, %v2259_v9  ;;  %v958_v43 = vsel %vm678_vm1, %v886_v24, 0.0  ;;  %v2343_v14 = vsub.f32 %v1953_v26, %v2193_v51 }
 0x178   :  { %v2350_v29 = vsub.f32 %v1961_v32, %v2193_v51  ;;  %v2357_v26 = vsub.f32 %v1970_v48, %v2193_v51  ;;  %v2364_v32 = vsub.f32 %v1982_v5, %v2193_v51  ;;  %v2371_v48 = vsub.f32 %v1977_v1, %v2193_v51 }
 0x179   :  { %v951_v10 = vadd.f32 %v950_v49, %v949_v46  ;;  %v888_v46 = vmul.f32 %v2266_v18, %v2266_v18  ;;  %v960_v37 = vsel %vm678_vm1, %v887_v19, 0.0  ;;  %v2378_v5 = vsub.f32 %v1985_v11, %v2193_v51 }
 0x17a   :  { %v2385_v1 = vsub.f32 %v1994_v23, %v2193_v51  ;;  %v2392_v11 = vsub.f32 %v2004_v54, %v2193_v51  ;;  %v2399_v23 = vsub.f32 %v1999_v47, %v2193_v51  ;;  %v2406_v54 = vsub.f32 %v2007_v57, %v2193_v51 }
 0x17b   :  { %v953_v38 = vadd.f32 %v952_v55, %v951_v10  ;;  %v889_v10 = vmul.f32 %v2273_v16, %v2273_v16  ;;  %v962_v24 = vsel %vm678_vm1, %v888_v46, 0.0  ;;  %v2413_v47 = vsub.f32 %v2017_v13, %v2193_v51 }
 0x17c   :  { %v2420_v57 = vsub.f32 %v2023_v22, %v2193_v51  ;;  %v2427_v13 = vsub.f32 %v2027_v31, %v2193_v51  ;;  %v2434_v22 = vsub.f32 %v2033_v44, %v2193_v51  ;;  %v2441_v31 = vsub.f32 %v2041_v39, %v2193_v51 }
 0x17d   :  { %v955_v59 = vadd.f32 %v954_v8, %v953_v38  ;;  %v890_v38 = vmul.f32 %v2280_v21, %v2280_v21  ;;  %v964_v19 = vsel %vm678_vm1, %v889_v10, 0.0  ;;  %v2448_v44 = vsub.f32 %v2047_v53, %v2193_v51 }
 0x17e   :  { %v2462_v53 = vsub.f32 %v2057_v15, %v2193_v51  ;;  %v2476_v15 = vsub.f32 %v2071_v25, %v2193_v51  ;;  %v2490_v25 = vsub.f32 %v2081_v60, %v2193_v51 }
 0x17f   :  { %v957_v61 = vadd.f32 %v956_v50, %v955_v59  ;;  %v891_v59 = vmul.f32 %v2287_v27, %v2287_v27  ;;  %v966_v46 = vsel %vm678_vm1, %v890_v38, 0.0 }
 0x181   :  { %v959_v49 = vadd.f32 %v958_v43, %v957_v61  ;;  %v892_v61 = vmul.f32 %v2294_v36, %v2294_v36  ;;  %v968_v10 = vsel %vm678_vm1, %v891_v59, 0.0 }
 0x183   :  { %v961_v55 = vadd.f32 %v960_v37, %v959_v49  ;;  %v893_v49 = vmul.f32 %v2301_v34, %v2301_v34  ;;  %v970_v38 = vsel %vm678_vm1, %v892_v61, 0.0 }
 0x185   :  { %v963_v8 = vadd.f32 %v962_v24, %v961_v55  ;;  %v894_v55 = vmul.f32 %v2308_v41, %v2308_v41  ;;  %v972_v59 = vsel %vm678_vm1, %v893_v49, 0.0 }
 0x187   :  { %v965_v50 = vadd.f32 %v964_v19, %v963_v8  ;;  %v895_v8 = vmul.f32 %v2315_v52, %v2315_v52  ;;  %v974_v61 = vsel %vm678_vm1, %v894_v55, 0.0 }
 0x189   :  { %v967_v43 = vadd.f32 %v966_v46, %v965_v50  ;;  %v896_v50 = vmul.f32 %v2322_v2, %v2322_v2  ;;  %v976_v49 = vsel %vm678_vm1, %v895_v8, 0.0 }
 0x18b   :  { %v969_v37 = vadd.f32 %v968_v10, %v967_v43  ;;  %v897_v43 = vmul.f32 %v2329_v63, %v2329_v63  ;;  %v978_v55 = vsel %vm678_vm1, %v896_v50, 0.0 }
 0x18d   :  { %v971_v24 = vadd.f32 %v970_v38, %v969_v37  ;;  %v898_v37 = vmul.f32 %v2336_v6, %v2336_v6  ;;  %v980_v8 = vsel %vm678_vm1, %v897_v43, 0.0 }
 0x18f   :  { %v973_v19 = vadd.f32 %v972_v59, %v971_v24  ;;  %v899_v24 = vmul.f32 %v2343_v14, %v2343_v14  ;;  %v982_v50 = vsel %vm678_vm1, %v898_v37, 0.0 }
 0x191   :  { %v975_v46 = vadd.f32 %v974_v61, %v973_v19  ;;  %v900_v19 = vmul.f32 %v2350_v29, %v2350_v29  ;;  %v984_v43 = vsel %vm678_vm1, %v899_v24, 0.0 }
 0x193   :  { %v977_v10 = vadd.f32 %v976_v49, %v975_v46  ;;  %v901_v46 = vmul.f32 %v2357_v26, %v2357_v26  ;;  %v986_v37 = vsel %vm678_vm1, %v900_v19, 0.0 }
 0x195   :  { %v979_v38 = vadd.f32 %v978_v55, %v977_v10  ;;  %v902_v10 = vmul.f32 %v2364_v32, %v2364_v32  ;;  %v988_v24 = vsel %vm678_vm1, %v901_v46, 0.0 }
 0x197   :  { %v981_v59 = vadd.f32 %v980_v8, %v979_v38  ;;  %v903_v38 = vmul.f32 %v2371_v48, %v2371_v48  ;;  %v990_v19 = vsel %vm678_vm1, %v902_v10, 0.0 }
 0x199   :  { %v983_v61 = vadd.f32 %v982_v50, %v981_v59  ;;  %v904_v59 = vmul.f32 %v2378_v5, %v2378_v5  ;;  %v992_v46 = vsel %vm678_vm1, %v903_v38, 0.0 }
 0x19b   :  { %v985_v49 = vadd.f32 %v984_v43, %v983_v61  ;;  %v905_v61 = vmul.f32 %v2385_v1, %v2385_v1  ;;  %v994_v10 = vsel %vm678_vm1, %v904_v59, 0.0 }
 0x19d   :  { %v987_v55 = vadd.f32 %v986_v37, %v985_v49  ;;  %v906_v49 = vmul.f32 %v2392_v11, %v2392_v11  ;;  %v996_v38 = vsel %vm678_vm1, %v905_v61, 0.0 }
 0x19f   :  { %v989_v8 = vadd.f32 %v988_v24, %v987_v55  ;;  %v907_v55 = vmul.f32 %v2399_v23, %v2399_v23  ;;  %v998_v59 = vsel %vm678_vm1, %v906_v49, 0.0 }
 0x1a1   :  { %v991_v50 = vadd.f32 %v990_v19, %v989_v8  ;;  %v908_v8 = vmul.f32 %v2406_v54, %v2406_v54  ;;  %v1000_v61 = vsel %vm678_vm1, %v907_v55, 0.0 }
 0x1a3   :  { %v993_v43 = vadd.f32 %v992_v46, %v991_v50  ;;  %v909_v50 = vmul.f32 %v2413_v47, %v2413_v47  ;;  %v1002_v49 = vsel %vm678_vm1, %v908_v8, 0.0 }
 0x1a5   :  { %v995_v37 = vadd.f32 %v994_v10, %v993_v43  ;;  %v910_v43 = vmul.f32 %v2420_v57, %v2420_v57  ;;  %v1004_v55 = vsel %vm678_vm1, %v909_v50, 0.0 }
 0x1a7   :  { %v997_v24 = vadd.f32 %v996_v38, %v995_v37  ;;  %v911_v37 = vmul.f32 %v2427_v13, %v2427_v13  ;;  %v1006_v8 = vsel %vm678_vm1, %v910_v43, 0.0 }
 0x1a9   :  { %v999_v19 = vadd.f32 %v998_v59, %v997_v24  ;;  %v912_v24 = vmul.f32 %v2434_v22, %v2434_v22  ;;  %v1008_v50 = vsel %vm678_vm1, %v911_v37, 0.0 }
 0x1ab   :  { %v1001_v46 = vadd.f32 %v1000_v61, %v999_v19  ;;  %v3800_v19 = vld [vmem:[#allocation2_spill] sm:$0xff]  ;;  %v913_v61 = vmul.f32 %v2441_v31, %v2441_v31  ;;  %v1010_v43 = vsel %vm678_vm1, %v912_v24, 0.0 }
 0x1ac   :  { %v2455_v39 = vsub.f32 %v3800_v19, %v2193_v51  ;;  %v916_v19 = vmul.f32 %v2462_v53, %v2462_v53 }
 0x1ad   :  { %v1003_v10 = vadd.f32 %v1002_v49, %v1001_v46  ;;  %v914_v49 = vmul.f32 %v2448_v44, %v2448_v44  ;;  %v1012_v37 = vsel %vm678_vm1, %v913_v61, 0.0 }
 0x1af   :  { %v1005_v38 = vadd.f32 %v1004_v55, %v1003_v10  ;;  %v3801_v55 = vld [vmem:[#allocation3_spill] sm:$0xff]  ;;  %v1014_v24 = vsel %vm678_vm1, %v914_v49, 0.0  ;;  %v1018_v49 = vsel %vm678_vm1, %v916_v19, 0.0 }
 0x1b0   :  { %3803 = vst [vmem:[#allocation3_spill] sm:$0xff] %v2476_v15 }
 0x1b1   :  { %v1007_v59 = vadd.f32 %v1006_v8, %v1005_v38  ;;  %v2469_v38 = vsub.f32 %v3801_v55, %v2193_v51  ;;  %v915_v8 = vmul.f32 %v2455_v39, %v2455_v39 }
 0x1b3   :  { %v1009_v46 = vadd.f32 %v1008_v50, %v1007_v59  ;;  %3802 = vst [vmem:[#allocation2_spill] sm:$0xff] %v2469_v38  ;;  %v917_v55 = vmul.f32 %v2469_v38, %v2469_v38  ;;  %v1016_v61 = vsel %vm678_vm1, %v915_v8, 0.0 }
 0x1b5   :  { %v1011_v10 = vadd.f32 %v1010_v43, %v1009_v46  ;;  %v3804_v46 = vld [vmem:[#allocation4_spill] sm:$0xff]  ;;  %v1020_v8 = vsel %vm678_vm1, %v917_v55, 0.0 }
 0x1b6   :  { %v2483_v43 = vsub.f32 %v3804_v46, %v2193_v51  ;;  %3805 = vst [vmem:[#allocation4_spill] sm:$0xff] %v2490_v25 }
 0x1b7   :  { %v1013_v59 = vadd.f32 %v1012_v37, %v1011_v10  ;;  %v918_v37 = vmul.f32 %v2476_v15, %v2476_v15  ;;  %v920_v15 = vmul.f32 %v2490_v25, %v2490_v25 }
 0x1b8   :  { %v919_v38 = vmul.f32 %v2483_v43, %v2483_v43 }
 0x1b9   :  { %v1015_v50 = vadd.f32 %v1014_v24, %v1013_v59  ;;  %v3806_v24 = vld [vmem:[#allocation5_spill] sm:$0xff]  ;;  %v1022_v19 = vsel %vm678_vm1, %v918_v37, 0.0  ;;  %v1026_v37 = vsel %vm678_vm1, %v920_v15, 0.0 }
 0x1ba   :  { %v2497_v46 = vsub.f32 %v3806_v24, %v2193_v51  ;;  %v1024_v55 = vsel %vm678_vm1, %v919_v38, 0.0 }
 0x1bb   :  { %v1017_v10 = vadd.f32 %v1016_v61, %v1015_v50  ;;  %v3808_v61 = vld [vmem:[#allocation6_spill] sm:$0xff] }
 0x1bc   :  { %3807 = vst [vmem:[#allocation5_spill] sm:$0xff] %v2497_v46  ;;  %v2504_v60 = vsub.f32 %v3808_v61, %v2193_v51  ;;  %v921_v24 = vmul.f32 %v2497_v46, %v2497_v46 }
 0x1bd   :  { %v1019_v59 = vadd.f32 %v1018_v49, %v1017_v10  ;;  %v2511_v49 = vsub.f32 %v2098_v28, %v2193_v51 }
 0x1be   :  { %v922_v25 = vmul.f32 %v2504_v60, %v2504_v60  ;;  %v1028_v38 = vsel %vm678_vm1, %v921_v24, 0.0 }
 0x1bf   :  { %v1021_v50 = vadd.f32 %v1020_v8, %v1019_v59  ;;  %3809 = vst [vmem:[#allocation6_spill] sm:$0xff] %v2511_v49  ;;  %v3810_v8 = vld [vmem:[#allocation7_spill] sm:$0xff]  ;;  %v923_v46 = vmul.f32 %v2511_v49, %v2511_v49 }
 0x1c0   :  { %v2518_v61 = vsub.f32 %v3810_v8, %v2193_v51  ;;  %v1030_v15 = vsel %vm678_vm1, %v922_v25, 0.0 }
 0x1c1   :  { %v1023_v10 = vadd.f32 %v1022_v19, %v1021_v50  ;;  %v3811_v19 = vld [vmem:[#allocation8_spill] sm:$0xff]  ;;  %v1032_v24 = vsel %vm678_vm1, %v923_v46, 0.0 }
 0x1c2   :  { %v2525_v28 = vsub.f32 %v3811_v19, %v2193_v51  ;;  %v924_v8 = vmul.f32 %v2518_v61, %v2518_v61 }
 0x1c3   :  { %v1025_v59 = vadd.f32 %v1024_v55, %v1023_v10  ;;  %v2532_v55 = vsub.f32 %v2116_v12, %v2193_v51  ;;  %v2546_v12 = vsub.f32 %v2125_v30, %v2193_v51  ;;  %v2560_v30 = vsub.f32 %v2137_v20, %v2193_v51 }
 0x1c4   :  { %3812 = vst [vmem:[#allocation7_spill] sm:$0xff] %v2525_v28  ;;  %v925_v49 = vmul.f32 %v2525_v28, %v2525_v28  ;;  %v1034_v25 = vsel %vm678_vm1, %v924_v8, 0.0 }
 0x1c5   :  { %v1027_v50 = vadd.f32 %v1026_v37, %v1025_v59  ;;  %v3813_v37 = vld [vmem:[#allocation9_spill] sm:$0xff]  ;;  %3818 = vst [vmem:[#allocation18_spill] sm:$0xff] %v2560_v30 }
 0x1c6   :  { %v2539_v19 = vsub.f32 %v3813_v37, %v2193_v51  ;;  %3815 = vst [vmem:[#allocation9_spill] sm:$0xff] %v2546_v12  ;;  %v1036_v46 = vsel %vm678_vm1, %v925_v49, 0.0 }
 0x1c7   :  { %v1029_v10 = vadd.f32 %v1028_v38, %v1027_v50  ;;  %v926_v38 = vmul.f32 %v2532_v55, %v2532_v55 }
 0x1c8   :  { %3814 = vst [vmem:[#allocation8_spill] sm:$0xff] %v2539_v19  ;;  %v927_v28 = vmul.f32 %v2539_v19, %v2539_v19 }
 0x1c9   :  { %v1031_v59 = vadd.f32 %v1030_v15, %v1029_v10  ;;  %v3816_v15 = vld [vmem:[#allocation10_spill] sm:$0xff]  ;;  %v1038_v8 = vsel %vm678_vm1, %v926_v38, 0.0 }
 0x1ca   :  { %v2553_v37 = vsub.f32 %v3816_v15, %v2193_v51  ;;  %v1040_v49 = vsel %vm678_vm1, %v927_v28, 0.0 }
 0x1cb   :  { %v1033_v50 = vadd.f32 %v1032_v24, %v1031_v59  ;;  %v928_v24 = vmul.f32 %v2546_v12, %v2546_v12  ;;  %v930_v12 = vmul.f32 %v2560_v30, %v2560_v30 }
 0x1cc   :  { %3817 = vst [vmem:[#allocation10_spill] sm:$0xff] %v2553_v37  ;;  %v929_v19 = vmul.f32 %v2553_v37, %v2553_v37 }
 0x1cd   :  { %v1035_v10 = vadd.f32 %v1034_v25, %v1033_v50  ;;  %v3819_v25 = vld [vmem:[#allocation11_spill] sm:$0xff]  ;;  %v1042_v38 = vsel %vm678_vm1, %v928_v24, 0.0  ;;  %v1046_v24 = vsel %vm678_vm1, %v930_v12, 0.0 }
 0x1ce   :  { %v2567_v15 = vsub.f32 %v3819_v25, %v2193_v51  ;;  %v1044_v28 = vsel %vm678_vm1, %v929_v19, 0.0 }
 0x1cf   :  { %v1037_v59 = vadd.f32 %v1036_v46, %v1035_v10  ;;  %v3821_v46 = vld [vmem:[#allocation12_spill] sm:$0xff] }
 0x1d0   :  { %3820 = vst [vmem:[#allocation11_spill] sm:$0xff] %v2567_v15  ;;  %v2574_v20 = vsub.f32 %v3821_v46, %v2193_v51  ;;  %v931_v37 = vmul.f32 %v2567_v15, %v2567_v15 }
 0x1d1   :  { %v1039_v50 = vadd.f32 %v1038_v8, %v1037_v59  ;;  %v3823_v8 = vld [vmem:[#allocation13_spill] sm:$0xff] }
 0x1d2   :  { %3822 = vst [vmem:[#allocation12_spill] sm:$0xff] %v2574_v20  ;;  %v2581_v25 = vsub.f32 %v3823_v8, %v2193_v51  ;;  %v932_v30 = vmul.f32 %v2574_v20, %v2574_v20  ;;  %v1048_v19 = vsel %vm678_vm1, %v931_v37, 0.0 }
 0x1d3   :  { %v1041_v10 = vadd.f32 %v1040_v49, %v1039_v50  ;;  %v3825_v49 = vld [vmem:[#allocation14_spill] sm:$0xff] }
 0x1d4   :  { %3824 = vst [vmem:[#allocation13_spill] sm:$0xff] %v2581_v25  ;;  %v2588_v46 = vsub.f32 %v3825_v49, %v2193_v51  ;;  %v933_v15 = vmul.f32 %v2581_v25, %v2581_v25  ;;  %v1050_v12 = vsel %vm678_vm1, %v932_v30, 0.0 }
 0x1d5   :  { %v1043_v59 = vadd.f32 %v1042_v38, %v1041_v10  ;;  %v3827_v38 = vld [vmem:[#allocation15_spill] sm:$0xff] }
 0x1d6   :  { %3826 = vst [vmem:[#allocation14_spill] sm:$0xff] %v2588_v46  ;;  %v2595_v8 = vsub.f32 %v3827_v38, %v2193_v51  ;;  %v934_v20 = vmul.f32 %v2588_v46, %v2588_v46  ;;  %v1052_v37 = vsel %vm678_vm1, %v933_v15, 0.0 }
 0x1d7   :  { %v1045_v50 = vadd.f32 %v1044_v28, %v1043_v59  ;;  %v3829_v28 = vld [vmem:[#allocation16_spill] sm:$0xff] }
 0x1d8   :  { %3828 = vst [vmem:[#allocation15_spill] sm:$0xff] %v2595_v8  ;;  %v2602_v49 = vsub.f32 %v3829_v28, %v2193_v51  ;;  %v935_v25 = vmul.f32 %v2595_v8, %v2595_v8  ;;  %v1054_v30 = vsel %vm678_vm1, %v934_v20, 0.0 }
 0x1d9   :  { %v1047_v10 = vadd.f32 %v1046_v24, %v1045_v50  ;;  %v3831_v24 = vld [vmem:[#allocation17_spill] sm:$0xff] }
 0x1da   :  { %3830 = vst [vmem:[#allocation16_spill] sm:$0xff] %v2602_v49  ;;  %v2609_v38 = vsub.f32 %v3831_v24, %v2193_v51  ;;  %v936_v28 = vmul.f32 %v2602_v49, %v2602_v49  ;;  %v1056_v15 = vsel %vm678_vm1, %v935_v25, 0.0 }
 0x1db   :  { %v1049_v59 = vadd.f32 %v1048_v19, %v1047_v10  ;;  %v2616_v19 = vsub.f32 %v2179_v4, %v2193_v51  ;;  %v2630_v4 = vsub.f32 %v2189_v33, %v2193_v51 }
 0x1dc   :  { %3832 = vst [vmem:[#allocation17_spill] sm:$0xff] %v2609_v38  ;;  %v937_v24 = vmul.f32 %v2609_v38, %v2609_v38  ;;  %v1058_v20 = vsel %vm678_vm1, %v936_v28, 0.0 }
 0x1dd   :  { %v1051_v50 = vadd.f32 %v1050_v12, %v1049_v59  ;;  %3833 = vst [vmem:[#allocation19_spill] sm:$0xff] %v2616_v19  ;;  %v2623_v12 = vsub.f32 %v2182_v56, %v2193_v51  ;;  %v940_v25 = vmul.f32 %v2630_v4, %v2630_v4 }
 0x1df   :  { %v1053_v10 = vadd.f32 %v1052_v37, %v1051_v50  ;;  %3834 = vst [vmem:[#allocation20_spill] sm:$0xff] %v2623_v12  ;;  %v938_v37 = vmul.f32 %v2616_v19, %v2616_v19  ;;  %v939_v56 = vmul.f32 %v2623_v12, %v2623_v12  ;;  %v1066_v19 = vsel %vm678_vm1, %v940_v25, 0.0  ;;  %v3838_v25 = vld [vmem:[#allocation5_spill] sm:$0xff] }
 0x1e1   :  { %v1055_v59 = vadd.f32 %v1054_v30, %v1053_v10  ;;  %v1060_v30 = vsel %vm678_vm1, %v937_v24, 0.0  ;;  %v1064_v51 = vsel %vm678_vm1, %v939_v56, 0.0  ;;  %v3837_v56 = vld [vmem:[#allocation4_spill] sm:$0xff] }
 0x1e3   :  { %v1057_v50 = vadd.f32 %v1056_v15, %v1055_v59  ;;  %v1062_v59 = vsel %vm678_vm1, %v938_v37, 0.0 }
 0x1e5   :  { %v1059_v10 = vadd.f32 %v1058_v20, %v1057_v50 }
 0x1e7   :  { %v1061_v49 = vadd.f32 %v1060_v30, %v1059_v10 }
 0x1e9   :  { %v1063_v15 = vadd.f32 %v1062_v59, %v1061_v49 }
 0x1eb   :  { %v1065_v33 = vadd.f32 %v1064_v51, %v1063_v15  ;;  %v3839_v15 = vld [vmem:[#allocation6_spill] sm:$0xff] }
 0x1ed   :  { %v1067_v38 = vadd.f32 %v1066_v19, %v1065_v33  ;;  %v3835_v19 = vld [vmem:[#allocation2_spill] sm:$0xff]  ;;  %v3840_v33 = vld [vmem:[#allocation7_spill] sm:$0xff] }
 0x1ef   :  { %v1068_v28 = vrot.slane %v1067_v38, 4 }
 0x1f1   :  { %v1069_v50 = vadd.f32 %v1068_v28, %v1067_v38 }
 0x1f3   :  { %v1070_v20 = vrot.slane %v1069_v50, 2 }
 0x1f5   :  { %v1071_v8 = vadd.f32 %v1070_v20, %v1069_v50  ;;  %v3841_v20 = vld [vmem:[#allocation8_spill] sm:$0xff] }
 0x1f7   :  { %v1072_v12 = vrot.slane %v1071_v8, 1 }
 0x1f9   :  { %v1073_v46 = vadd.f32 %v1072_v12, %v1071_v8  ;;  %v3836_v12 = vld [vmem:[#allocation3_spill] sm:$0xff] }
 0x1fb   :  { %v1074_v24 = vmul.f32 0.001953125, %v1073_v46 }
 0x1fd   :  { %v1075_v10 = vadd.f32 1e-05, %v1074_v24  ;;  %v3843_v24 = vld [vmem:[#allocation9_spill] sm:$0xff] }
 0x1ff   :  { %1645 = vrsqrt.f32 %v1075_v10 }
 0x20c   :  { %v2643_v30 = vpop.eup %1645 }
 0x20d   :  { %v2647_v49 = vmul.f32 %v2643_v30, %v2197_v35  ;;  %v2651_v37 = vmul.f32 %v2643_v30, %v2201_v40  ;;  %v2655_v38 = vmul.f32 %v2643_v30, %v2205_v7  ;;  %v2659_v8 = vmul.f32 %v2643_v30, %v2209_v17 }
 0x20e   :  { %v2663_v46 = vmul.f32 %v2643_v30, %v2217_v42  ;;  %v2667_v35 = vmul.f32 %v2643_v30, %v2223_v45  ;;  %v2671_v40 = vmul.f32 %v2643_v30, %v2231_v58  ;;  %v2675_v7 = vmul.f32 %v2643_v30, %v2238_v0 }
 0x20f   :  { %v2679_v17 = vmul.f32 %v2643_v30, %v2245_v62  ;;  %v2683_v42 = vmul.f32 %v2643_v30, %v2252_v3  ;;  %v2687_v45 = vmul.f32 %v2643_v30, %v2259_v9  ;;  %v2691_v58 = vmul.f32 %v2643_v30, %v2266_v18 }
 0x210   :  { %v2695_v0 = vmul.f32 %v2643_v30, %v2273_v16  ;;  %v2699_v62 = vmul.f32 %v2643_v30, %v2280_v21  ;;  %v2703_v3 = vmul.f32 %v2643_v30, %v2287_v27  ;;  %v2707_v9 = vmul.f32 %v2643_v30, %v2294_v36 }
 0x211   :  { %v2711_v18 = vmul.f32 %v2643_v30, %v2301_v34  ;;  %v2715_v16 = vmul.f32 %v2643_v30, %v2308_v41  ;;  %v2719_v21 = vmul.f32 %v2643_v30, %v2315_v52  ;;  %v2723_v27 = vmul.f32 %v2643_v30, %v2322_v2 }
 0x212   :  { %v2727_v36 = vmul.f32 %v2643_v30, %v2329_v63  ;;  %v2731_v34 = vmul.f32 %v2643_v30, %v2336_v6  ;;  %v2735_v41 = vmul.f32 %v2643_v30, %v2343_v14  ;;  %v2739_v52 = vmul.f32 %v2643_v30, %v2350_v29 }
 0x213   :  { %v2743_v2 = vmul.f32 %v2643_v30, %v2357_v26  ;;  %v2747_v63 = vmul.f32 %v2643_v30, %v2364_v32  ;;  %v2751_v6 = vmul.f32 %v2643_v30, %v2371_v48  ;;  %v2755_v14 = vmul.f32 %v2643_v30, %v2378_v5 }
 0x214   :  { %v2759_v29 = vmul.f32 %v2643_v30, %v2385_v1  ;;  %v2763_v26 = vmul.f32 %v2643_v30, %v2392_v11  ;;  %v2767_v32 = vmul.f32 %v2643_v30, %v2399_v23  ;;  %v2771_v48 = vmul.f32 %v2643_v30, %v2406_v54 }
 0x215   :  { %v2775_v5 = vmul.f32 %v2643_v30, %v2413_v47  ;;  %v2779_v1 = vmul.f32 %v2643_v30, %v2420_v57  ;;  %v2783_v11 = vmul.f32 %v2643_v30, %v2427_v13  ;;  %v2787_v23 = vmul.f32 %v2643_v30, %v2434_v22 }
 0x216   :  { %v2791_v54 = vmul.f32 %v2643_v30, %v2441_v31  ;;  %v2795_v47 = vmul.f32 %v2643_v30, %v2448_v44  ;;  %v2799_v57 = vmul.f32 %v2643_v30, %v2455_v39  ;;  %v2803_v13 = vmul.f32 %v2643_v30, %v2462_v53 }
 0x217   :  { %v2807_v22 = vmul.f32 %v2643_v30, %v3835_v19  ;;  %v2811_v31 = vmul.f32 %v2643_v30, %v3836_v12  ;;  %v2815_v44 = vmul.f32 %v2643_v30, %v2483_v43  ;;  %v2819_v39 = vmul.f32 %v2643_v30, %v3837_v56  ;;  %v3845_v19 = vld [vmem:[#allocation10_spill] sm:$0xff] }
 0x218   :  { %v2823_v53 = vmul.f32 %v2643_v30, %v3838_v25  ;;  %v2827_v59 = vmul.f32 %v2643_v30, %v2504_v60  ;;  %v2831_v51 = vmul.f32 %v2643_v30, %v3839_v15  ;;  %v2835_v43 = vmul.f32 %v2643_v30, %v2518_v61  ;;  %v3847_v12 = vld [vmem:[#allocation18_spill] sm:$0xff]  ;;  %v3849_v25 = vld [vmem:[#allocation11_spill] sm:$0xff]  ;;  %v3851_v15 = vld [vmem:[#allocation12_spill] sm:$0xff] }
 0x219   :  { %v2839_v28 = vmul.f32 %v2643_v30, %v3840_v33  ;;  %v2843_v50 = vmul.f32 %v2643_v30, %v2532_v55  ;;  %v2847_v60 = vmul.f32 %v2643_v30, %v3841_v20  ;;  %v2851_v10 = vmul.f32 %v2643_v30, %v3843_v24  ;;  %v2872_v20 = vld [vmem:[%s3746_s3] ss:$0 sm:$0xff]  ;;  %v3853_v24 = vld [vmem:[#allocation13_spill] sm:$0xff] }
 0x21a   :  { %v2855_v61 = vmul.f32 %v2643_v30, %v3845_v19  ;;  %v2859_v56 = vmul.f32 %v2643_v30, %v3847_v12  ;;  %v2863_v55 = vmul.f32 %v2643_v30, %v3849_v25  ;;  %v2867_v33 = vmul.f32 %v2643_v30, %v3851_v15 }
 0x21b   :  { %3842 = vst [vmem:[#allocation2_spill] sm:$0xff] %v2847_v60  ;;  %3844 = vst [vmem:[#allocation3_spill] sm:$0xff] %v2851_v10  ;;  %v2876_v19 = vmul.f32 %v2643_v30, %v3853_v24  ;;  %v3859_v60 = vld [vmem:[#allocation19_spill] sm:$0xff] }
 0x21c   :  { %3846 = vst [vmem:[#allocation4_spill] sm:$0xff] %v2855_v61  ;;  %3848 = vst [vmem:[#allocation5_spill] sm:$0xff] %v2859_v56  ;;  %v3855_v61 = vld [vmem:[#allocation14_spill] sm:$0xff]  ;;  %v3856_v56 = vld [vmem:[#allocation15_spill] sm:$0xff]  ;;  %v2896_v24 = vmul.f32 %v2643_v30, %v3859_v60  ;;  %v2916_v60 = vmul.f32 %v2872_v20, %v2655_v38  ;;  %v2940_v38 = vmul.f32 %v2872_v20, %v2679_v17 }
 0x21d   :  { %3850 = vst [vmem:[#allocation6_spill] sm:$0xff] %v2863_v55  ;;  %3852 = vst [vmem:[#allocation7_spill] sm:$0xff] %v2867_v33  ;;  %v2880_v12 = vmul.f32 %v2643_v30, %v3855_v61  ;;  %v2884_v25 = vmul.f32 %v2643_v30, %v3856_v56  ;;  %v3857_v55 = vld [vmem:[#allocation16_spill] sm:$0xff]  ;;  %v3858_v33 = vld [vmem:[#allocation17_spill] sm:$0xff]  ;;  %v2904_v56 = vmul.f32 %v2643_v30, %v2630_v4 }
 0x21e   :  { %3854 = vst [vmem:[#allocation8_spill] sm:$0xff] %v2876_v19  ;;  %v2888_v15 = vmul.f32 %v2643_v30, %v3857_v55  ;;  %v2892_v10 = vmul.f32 %v2643_v30, %v3858_v33  ;;  %v3860_v19 = vld [vmem:[#allocation20_spill] sm:$0xff]  ;;  %v2908_v55 = vmul.f32 %v2872_v20, %v2647_v49  ;;  %v2912_v33 = vmul.f32 %v2872_v20, %v2651_v37 }
 0x21f   :  { %v2900_v61 = vmul.f32 %v2643_v30, %v3860_v19  ;;  %v2920_v19 = vmul.f32 %v2872_v20, %v2659_v8  ;;  %v2924_v4 = vmul.f32 %v2872_v20, %v2663_v46  ;;  %v2928_v30 = vmul.f32 %v2872_v20, %v2667_v35 }
 0x220   :  { %v2932_v49 = vmul.f32 %v2872_v20, %v2671_v40  ;;  %v2936_v37 = vmul.f32 %v2872_v20, %v2675_v7  ;;  %v2944_v8 = vmul.f32 %v2872_v20, %v2683_v42  ;;  %v2948_v46 = vmul.f32 %v2872_v20, %v2687_v45 }
 0x221   :  { %v2952_v35 = vmul.f32 %v2872_v20, %v2691_v58  ;;  %v2956_v40 = vmul.f32 %v2872_v20, %v2695_v0  ;;  %v2960_v7 = vmul.f32 %v2872_v20, %v2699_v62  ;;  %v2964_v17 = vmul.f32 %v2872_v20, %v2703_v3 }
 0x222   :  { %v2968_v42 = vmul.f32 %v2872_v20, %v2707_v9  ;;  %v2972_v45 = vmul.f32 %v2872_v20, %v2711_v18  ;;  %v2976_v58 = vmul.f32 %v2872_v20, %v2715_v16  ;;  %v2980_v0 = vmul.f32 %v2872_v20, %v2719_v21 }
 0x223   :  { %v2984_v62 = vmul.f32 %v2872_v20, %v2723_v27  ;;  %v2988_v3 = vmul.f32 %v2872_v20, %v2727_v36  ;;  %v2992_v9 = vmul.f32 %v2872_v20, %v2731_v34  ;;  %v2996_v18 = vmul.f32 %v2872_v20, %v2735_v41 }
 0x224   :  { %v3000_v16 = vmul.f32 %v2872_v20, %v2739_v52  ;;  %v3004_v21 = vmul.f32 %v2872_v20, %v2743_v2  ;;  %v3008_v27 = vmul.f32 %v2872_v20, %v2747_v63  ;;  %v3012_v36 = vmul.f32 %v2872_v20, %v2751_v6 }
 0x225   :  { %v3016_v34 = vmul.f32 %v2872_v20, %v2755_v14  ;;  %v3020_v41 = vmul.f32 %v2872_v20, %v2759_v29  ;;  %v3024_v52 = vmul.f32 %v2872_v20, %v2763_v26  ;;  %v3028_v2 = vmul.f32 %v2872_v20, %v2767_v32 }
 0x226   :  { %v3032_v63 = vmul.f32 %v2872_v20, %v2771_v48  ;;  %v3036_v6 = vmul.f32 %v2872_v20, %v2775_v5  ;;  %v3040_v14 = vmul.f32 %v2872_v20, %v2779_v1  ;;  %v3044_v29 = vmul.f32 %v2872_v20, %v2783_v11 }
 0x227   :  { %v3048_v26 = vmul.f32 %v2872_v20, %v2787_v23  ;;  %v3052_v32 = vmul.f32 %v2872_v20, %v2791_v54  ;;  %v3056_v48 = vmul.f32 %v2872_v20, %v2795_v47  ;;  %v3060_v5 = vmul.f32 %v2872_v20, %v2799_v57 }
 0x228   :  { %v3064_v1 = vmul.f32 %v2872_v20, %v2803_v13  ;;  %v3068_v11 = vmul.f32 %v2872_v20, %v2807_v22  ;;  %v3072_v23 = vmul.f32 %v2872_v20, %v2811_v31  ;;  %v3076_v54 = vmul.f32 %v2872_v20, %v2815_v44 }
 0x229   :  { %v3080_v47 = vmul.f32 %v2872_v20, %v2819_v39  ;;  %v3084_v57 = vmul.f32 %v2872_v20, %v2823_v53  ;;  %v3088_v13 = vmul.f32 %v2872_v20, %v2827_v59  ;;  %v3092_v22 = vmul.f32 %v2872_v20, %v2831_v51  ;;  %v3866_v53 = vld [vmem:[#allocation2_spill] sm:$0xff] }
 0x22a   :  { %v3096_v31 = vmul.f32 %v2872_v20, %v2835_v43  ;;  %v3100_v44 = vmul.f32 %v2872_v20, %v2839_v28  ;;  %v3104_v39 = vmul.f32 %v2872_v20, %v2843_v50  ;;  %v3108_v59 = vmul.f32 %v2872_v20, %v3866_v53 }
 0x22b   :  { %3861 = vst [vmem:[#allocation9_spill] sm:$0xff] %v3088_v13  ;;  %3862 = vst [vmem:[#allocation10_spill] sm:$0xff] %v3092_v22  ;;  %v3867_v13 = vld [vmem:[#allocation3_spill] sm:$0xff]  ;;  %v3869_v22 = vld [vmem:[#allocation4_spill] sm:$0xff] }
 0x22c   :  { %3863 = vst [vmem:[#allocation18_spill] sm:$0xff] %v3096_v31  ;;  %3864 = vst [vmem:[#allocation11_spill] sm:$0xff] %v3100_v44  ;;  %v3112_v51 = vmul.f32 %v2872_v20, %v3867_v13  ;;  %v3116_v43 = vmul.f32 %v2872_v20, %v3869_v22  ;;  %v3870_v31 = vld [vmem:[#allocation5_spill] sm:$0xff]  ;;  %v3871_v44 = vld [vmem:[#allocation6_spill] sm:$0xff] }
 0x22d   :  { %3865 = vst [vmem:[#allocation12_spill] sm:$0xff] %v3104_v39  ;;  %v3120_v28 = vmul.f32 %v2872_v20, %v3870_v31  ;;  %v3124_v50 = vmul.f32 %v2872_v20, %v3871_v44  ;;  %v3872_v39 = vld [vmem:[#allocation7_spill] sm:$0xff]  ;;  %v3133_v13 = vld [vmem:[%s3747_s4] ss:$0 sm:$0xff]  ;;  %v3141_v31 = vmul.f32 %v2872_v20, %v2880_v12  ;;  %v3145_v44 = vmul.f32 %v2872_v20, %v2884_v25 }
 0x22e   :  { %3868 = vst [vmem:[#allocation13_spill] sm:$0xff] %v3112_v51  ;;  %v3128_v53 = vmul.f32 %v2872_v20, %v3872_v39  ;;  %v3874_v51 = vld [vmem:[#allocation8_spill] sm:$0xff]  ;;  %v3149_v39 = vmul.f32 %v2872_v20, %v2888_v15  ;;  %v3161_v12 = vmul.f32 %v2872_v20, %v2900_v61  ;;  %v3165_v25 = vmul.f32 %v2872_v20, %v2904_v56 }
 0x22f   :  { %v3137_v22 = vmul.f32 %v2872_v20, %v3874_v51  ;;  %v3157_v51 = vmul.f32 %v2872_v20, %v2896_v24  ;;  %v3169_v15 = vadd.f32 %v3133_v13, %v2908_v55  ;;  %v3177_v24 = vadd.f32 %v3133_v13, %v2916_v60 }
 0x230   :  { %3873 = vst [vmem:[#allocation14_spill] sm:$0xff] %v3128_v53  ;;  %v3153_v53 = vmul.f32 %v2872_v20, %v2892_v10  ;;  %v3173_v10 = vadd.f32 %v3133_v13, %v2912_v33  ;;  %v3181_v61 = vadd.f32 %v3133_v13, %v2920_v19  ;;  %v3185_v20 = vadd.f32 %v3133_v13, %v2924_v4 }
 0x231   :  { %v3189_v56 = vadd.f32 %v3133_v13, %v2928_v30  ;;  %v3193_v55 = vadd.f32 %v3133_v13, %v2932_v49  ;;  %v3197_v33 = vadd.f32 %v3133_v13, %v2936_v37  ;;  %v3201_v60 = vadd.f32 %v3133_v13, %v2940_v38 }
 0x232   :  { %v3205_v19 = vadd.f32 %v3133_v13, %v2944_v8  ;;  %v3209_v4 = vadd.f32 %v3133_v13, %v2948_v46  ;;  %v3213_v30 = vadd.f32 %v3133_v13, %v2952_v35  ;;  %v3217_v49 = vadd.f32 %v3133_v13, %v2956_v40 }
 0x233   :  { %v3221_v37 = vadd.f32 %v3133_v13, %v2960_v7  ;;  %v3225_v38 = vadd.f32 %v3133_v13, %v2964_v17  ;;  %v3229_v8 = vadd.f32 %v3133_v13, %v2968_v42  ;;  %v3233_v46 = vadd.f32 %v3133_v13, %v2972_v45 }
 0x234   :  { %v3237_v35 = vadd.f32 %v3133_v13, %v2976_v58  ;;  %v3241_v40 = vadd.f32 %v3133_v13, %v2980_v0  ;;  %v3245_v7 = vadd.f32 %v3133_v13, %v2984_v62  ;;  %v3249_v17 = vadd.f32 %v3133_v13, %v2988_v3 }
 0x235   :  { %v3253_v42 = vadd.f32 %v3133_v13, %v2992_v9  ;;  %v3257_v45 = vadd.f32 %v3133_v13, %v2996_v18  ;;  %v3261_v58 = vadd.f32 %v3133_v13, %v3000_v16  ;;  %v3265_v0 = vadd.f32 %v3133_v13, %v3004_v21 }
 0x236   :  { %v3269_v62 = vadd.f32 %v3133_v13, %v3008_v27  ;;  %v3273_v3 = vadd.f32 %v3133_v13, %v3012_v36  ;;  %v3277_v9 = vadd.f32 %v3133_v13, %v3016_v34  ;;  %v3281_v18 = vadd.f32 %v3133_v13, %v3020_v41 }
 0x237   :  { %v3285_v16 = vadd.f32 %v3133_v13, %v3024_v52  ;;  %v3289_v21 = vadd.f32 %v3133_v13, %v3028_v2  ;;  %v3293_v27 = vadd.f32 %v3133_v13, %v3032_v63  ;;  %v3297_v36 = vadd.f32 %v3133_v13, %v3036_v6 }
 0x238   :  { %v3301_v34 = vadd.f32 %v3133_v13, %v3040_v14  ;;  %v3305_v41 = vadd.f32 %v3133_v13, %v3044_v29  ;;  %v3309_v52 = vadd.f32 %v3133_v13, %v3048_v26  ;;  %v3313_v2 = vadd.f32 %v3133_v13, %v3052_v32 }
 0x239   :  { %v3317_v63 = vadd.f32 %v3133_v13, %v3056_v48  ;;  %v3321_v6 = vadd.f32 %v3133_v13, %v3060_v5  ;;  %v3325_v14 = vadd.f32 %v3133_v13, %v3064_v1  ;;  %v3329_v29 = vadd.f32 %v3133_v13, %v3068_v11  ;;  %v3879_v1 = vld [vmem:[#allocation9_spill] sm:$0xff] }
 0x23a   :  { %v3333_v26 = vadd.f32 %v3133_v13, %v3072_v23  ;;  %v3337_v32 = vadd.f32 %v3133_v13, %v3076_v54  ;;  %v3341_v48 = vadd.f32 %v3133_v13, %v3080_v47  ;;  %v3345_v5 = vadd.f32 %v3133_v13, %v3084_v57 }
 0x23b   :  { %3875 = vst [vmem:[#allocation15_spill] sm:$0xff] %v3329_v29  ;;  %v3349_v11 = vadd.f32 %v3133_v13, %v3879_v1  ;;  %v3881_v29 = vld [vmem:[#allocation10_spill] sm:$0xff]  ;;  %v3369_v1 = vadd.f32 %v3133_v13, %v3108_v59 }
 0x23c   :  { %3876 = vst [vmem:[#allocation16_spill] sm:$0xff] %v3333_v26  ;;  %3877 = vst [vmem:[#allocation17_spill] sm:$0xff] %v3337_v32  ;;  %v3353_v23 = vadd.f32 %v3133_v13, %v3881_v29  ;;  %v3882_v26 = vld [vmem:[#allocation18_spill] sm:$0xff]  ;;  %v3883_v32 = vld [vmem:[#allocation11_spill] sm:$0xff] }
 0x23d   :  { %3878 = vst [vmem:[#allocation19_spill] sm:$0xff] %v3341_v48  ;;  %3880 = vst [vmem:[#allocation20_spill] sm:$0xff] %v3349_v11  ;;  %v3357_v54 = vadd.f32 %v3133_v13, %v3882_v26  ;;  %v3361_v47 = vadd.f32 %v3133_v13, %v3883_v32  ;;  %v3884_v48 = vld [vmem:[#allocation12_spill] sm:$0xff]  ;;  %v3886_v11 = vld [vmem:[#allocation13_spill] sm:$0xff]  ;;  %v3377_v26 = vadd.f32 %v3133_v13, %v3116_v43 }
 0x23e   :  { %v3365_v57 = vadd.f32 %v3133_v13, %v3884_v48  ;;  %v3373_v29 = vadd.f32 %v3133_v13, %v3886_v11  ;;  %v3381_v32 = vadd.f32 %v3133_v13, %v3120_v28  ;;  %v3385_v48 = vadd.f32 %v3133_v13, %v3124_v50 }
 0x23f   :  { %v3393_v11 = vadd.f32 %v3133_v13, %v3137_v22  ;;  %v3397_v43 = vadd.f32 %v3133_v13, %v3141_v31  ;;  %v3401_v28 = vadd.f32 %v3133_v13, %v3145_v44  ;;  %v3405_v50 = vadd.f32 %v3133_v13, %v3149_v39 }
 0x240   :  { %3885 = vst [vmem:[#allocation2_spill] sm:$0xff] %v3365_v57  ;;  %v3887_v57 = vld [vmem:[#allocation14_spill] sm:$0xff]  ;;  %v3413_v22 = vadd.f32 %v3133_v13, %v3157_v51  ;;  %v3417_v31 = vadd.f32 %v3133_v13, %v3161_v12  ;;  %v3421_v44 = vadd.f32 %v3133_v13, %v3165_v25  ;;  %v1284_v39 = vmax.f32 %v3173_v10, 0.0 }
 0x241   :  { %v3389_v59 = vadd.f32 %v3133_v13, %v3887_v57  ;;  %3888 = vst [vmem:[#allocation3_spill] sm:$0xff] %v3401_v28  ;;  %3889 = vst [vmem:[#allocation4_spill] sm:$0xff] %v3405_v50  ;;  %v3409_v57 = vadd.f32 %v3133_v13, %v3153_v53  ;;  %v1283_v28 = vmax.f32 %v3169_v15, 0.0  ;;  %v1285_v50 = vmax.f32 %v3177_v24, 0.0 }
 0x242   :  { %3891 = vst [vmem:[#allocation6_spill] sm:$0xff] %v3413_v22  ;;  %3892 = vst [vmem:[#allocation7_spill] sm:$0xff] %v3417_v31  ;;  %v1286_v53 = vmax.f32 %v3181_v61, 0.0  ;;  %v1288_v51 = vmax.f32 %v3189_v56, 0.0  ;;  %v1289_v22 = vmax.f32 %v3193_v55, 0.0  ;;  %v1290_v12 = vmax.f32 %v3197_v33, 0.0 }
 0x243   :  { %3890 = vst [vmem:[#allocation5_spill] sm:$0xff] %v3409_v57  ;;  %v1287_v57 = vmax.f32 %v3185_v20, 0.0  ;;  %v1291_v31 = vmax.f32 %v3201_v60, 0.0  ;;  %v1292_v13 = vmax.f32 %v3205_v19, 0.0  ;;  %v1293_v25 = vmax.f32 %v3209_v4, 0.0  ;;  %1347 = vst.msk [vmem:[%s3748_s5] sm:$0xff] %vm678_vm1, %v1283_v28 }
 0x244   :  { %v1294_v15 = vmax.f32 %v3213_v30, 0.0  ;;  %1348 = vst.msk [vmem:[%s3748_s5 + $0x8] sm:$0xff] %vm678_vm1, %v1284_v39  ;;  %1349 = vst.msk [vmem:[%s3748_s5 + $0x10] sm:$0xff] %vm678_vm1, %v1285_v50  ;;  %v1295_v10 = vmax.f32 %v3217_v49, 0.0  ;;  %v1296_v24 = vmax.f32 %v3221_v37, 0.0  ;;  %v1297_v61 = vmax.f32 %v3225_v38, 0.0 }
 0x245   :  { %1350 = vst.msk [vmem:[%s3748_s5 + $0x18] sm:$0xff] %vm678_vm1, %v1286_v53  ;;  %v1298_v20 = vmax.f32 %v3229_v8, 0.0  ;;  %1351 = vst.msk [vmem:[%s3748_s5 + $0x20] sm:$0xff] %vm678_vm1, %v1287_v57  ;;  %v1299_v56 = vmax.f32 %v3233_v46, 0.0  ;;  %v1300_v55 = vmax.f32 %v3237_v35, 0.0  ;;  %v1301_v33 = vmax.f32 %v3241_v40, 0.0 }
 0x246   :  { %1352 = vst.msk [vmem:[%s3748_s5 + $0x28] sm:$0xff] %vm678_vm1, %v1288_v51  ;;  %1353 = vst.msk [vmem:[%s3748_s5 + $0x30] sm:$0xff] %vm678_vm1, %v1289_v22  ;;  %v1302_v60 = vmax.f32 %v3245_v7, 0.0  ;;  %v1303_v19 = vmax.f32 %v3249_v17, 0.0  ;;  %v1304_v4 = vmax.f32 %v3253_v42, 0.0  ;;  %v1305_v30 = vmax.f32 %v3257_v45, 0.0 }
 0x247   :  { %1354 = vst.msk [vmem:[%s3748_s5 + $0x38] sm:$0xff] %vm678_vm1, %v1290_v12  ;;  %1355 = vst.msk [vmem:[%s3748_s5 + $0x40] sm:$0xff] %vm678_vm1, %v1291_v31  ;;  %v1306_v49 = vmax.f32 %v3261_v58, 0.0  ;;  %v1307_v37 = vmax.f32 %v3265_v0, 0.0  ;;  %v1308_v38 = vmax.f32 %v3269_v62, 0.0  ;;  %v1309_v8 = vmax.f32 %v3273_v3, 0.0 }
 0x248   :  { %1356 = vst.msk [vmem:[%s3748_s5 + $0x48] sm:$0xff] %vm678_vm1, %v1292_v13  ;;  %1357 = vst.msk [vmem:[%s3748_s5 + $0x50] sm:$0xff] %vm678_vm1, %v1293_v25  ;;  %v1310_v46 = vmax.f32 %v3277_v9, 0.0  ;;  %v1311_v35 = vmax.f32 %v3281_v18, 0.0  ;;  %v1312_v40 = vmax.f32 %v3285_v16, 0.0  ;;  %v1313_v7 = vmax.f32 %v3289_v21, 0.0 }
 0x249   :  { %1358 = vst.msk [vmem:[%s3748_s5 + $0x58] sm:$0xff] %vm678_vm1, %v1294_v15  ;;  %1359 = vst.msk [vmem:[%s3748_s5 + $0x60] sm:$0xff] %vm678_vm1, %v1295_v10  ;;  %v1314_v17 = vmax.f32 %v3293_v27, 0.0  ;;  %v1315_v42 = vmax.f32 %v3297_v36, 0.0  ;;  %v1316_v45 = vmax.f32 %v3301_v34, 0.0  ;;  %v1317_v58 = vmax.f32 %v3305_v41, 0.0 }
 0x24a   :  { %1360 = vst.msk [vmem:[%s3748_s5 + $0x68] sm:$0xff] %vm678_vm1, %v1296_v24  ;;  %1361 = vst.msk [vmem:[%s3748_s5 + $0x70] sm:$0xff] %vm678_vm1, %v1297_v61  ;;  %v1318_v0 = vmax.f32 %v3309_v52, 0.0  ;;  %v1319_v62 = vmax.f32 %v3313_v2, 0.0  ;;  %v1320_v3 = vmax.f32 %v3317_v63, 0.0  ;;  %v1321_v9 = vmax.f32 %v3321_v6, 0.0 }
 0x24b   :  { %1362 = vst.msk [vmem:[%s3748_s5 + $0x78] sm:$0xff] %vm678_vm1, %v1298_v20  ;;  %1363 = vst.msk [vmem:[%s3748_s5 + $0x80] sm:$0xff] %vm678_vm1, %v1299_v56  ;;  %v1322_v18 = vmax.f32 %v3325_v14, 0.0  ;;  %v3893_v16 = vld [vmem:[#allocation15_spill] sm:$0xff]  ;;  %v3894_v27 = vld [vmem:[#allocation16_spill] sm:$0xff]  ;;  %v1327_v63 = vmax.f32 %v3345_v5, 0.0 }
 0x24c   :  { %1364 = vst.msk [vmem:[%s3748_s5 + $0x88] sm:$0xff] %vm678_vm1, %v1300_v55  ;;  %1365 = vst.msk [vmem:[%s3748_s5 + $0x90] sm:$0xff] %vm678_vm1, %v1301_v33  ;;  %v1323_v21 = vmax.f32 %v3893_v16, 0.0  ;;  %v1324_v36 = vmax.f32 %v3894_v27, 0.0  ;;  %v3895_v34 = vld [vmem:[#allocation17_spill] sm:$0xff]  ;;  %v3896_v52 = vld [vmem:[#allocation19_spill] sm:$0xff] }
 0x24d   :  { %1366 = vst.msk [vmem:[%s3748_s5 + $0x98] sm:$0xff] %vm678_vm1, %v1302_v60  ;;  %1367 = vst.msk [vmem:[%s3748_s5 + $0xa0] sm:$0xff] %vm678_vm1, %v1303_v19  ;;  %v1325_v41 = vmax.f32 %v3895_v34, 0.0  ;;  %v1326_v2 = vmax.f32 %v3896_v52, 0.0  ;;  %v3897_v6 = vld [vmem:[#allocation20_spill] sm:$0xff]  ;;  %v1329_v28 = vmax.f32 %v3353_v23, 0.0 }
 0x24e   :  { %1368 = vst.msk [vmem:[%s3748_s5 + $0xa8] sm:$0xff] %vm678_vm1, %v1304_v4  ;;  %1369 = vst.msk [vmem:[%s3748_s5 + $0xb0] sm:$0xff] %vm678_vm1, %v1305_v30  ;;  %v1328_v14 = vmax.f32 %v3897_v6, 0.0  ;;  %v1330_v50 = vmax.f32 %v3357_v54, 0.0  ;;  %v1331_v5 = vmax.f32 %v3361_v47, 0.0  ;;  %v3898_v23 = vld [vmem:[#allocation2_spill] sm:$0xff] }
 0x24f   :  { %1370 = vst.msk [vmem:[%s3748_s5 + $0xb8] sm:$0xff] %vm678_vm1, %v1306_v49  ;;  %1371 = vst.msk [vmem:[%s3748_s5 + $0xc0] sm:$0xff] %vm678_vm1, %v1307_v37  ;;  %v1332_v54 = vmax.f32 %v3898_v23, 0.0  ;;  %v1333_v57 = vmax.f32 %v3369_v1, 0.0  ;;  %v1334_v22 = vmax.f32 %v3373_v29, 0.0  ;;  %v1335_v47 = vmax.f32 %v3377_v26, 0.0 }
 0x250   :  { %1372 = vst.msk [vmem:[%s3748_s5 + $0xc8] sm:$0xff] %vm678_vm1, %v1308_v38  ;;  %1373 = vst.msk [vmem:[%s3748_s5 + $0xd0] sm:$0xff] %vm678_vm1, %v1309_v8  ;;  %v1336_v1 = vmax.f32 %v3381_v32, 0.0  ;;  %v1337_v29 = vmax.f32 %v3385_v48, 0.0  ;;  %v1338_v31 = vmax.f32 %v3389_v59, 0.0  ;;  %v1339_v26 = vmax.f32 %v3393_v11, 0.0 }
 0x251   :  { %1374 = vst.msk [vmem:[%s3748_s5 + $0xd8] sm:$0xff] %vm678_vm1, %v1310_v46  ;;  %1375 = vst.msk [vmem:[%s3748_s5 + $0xe0] sm:$0xff] %vm678_vm1, %v1311_v35  ;;  %v1340_v32 = vmax.f32 %v3397_v43, 0.0  ;;  %v3899_v48 = vld [vmem:[#allocation3_spill] sm:$0xff]  ;;  %v3900_v39 = vld [vmem:[#allocation4_spill] sm:$0xff]  ;;  %v1346_v15 = vmax.f32 %v3421_v44, 0.0 }
 0x252   :  { %1376 = vst.msk [vmem:[%s3748_s5 + $0xe8] sm:$0xff] %vm678_vm1, %v1312_v40  ;;  %1377 = vst.msk [vmem:[%s3748_s5 + $0xf0] sm:$0xff] %vm678_vm1, %v1313_v7  ;;  %v1341_v59 = vmax.f32 %v3899_v48, 0.0  ;;  %v1342_v53 = vmax.f32 %v3900_v39, 0.0  ;;  %v3901_v11 = vld [vmem:[#allocation5_spill] sm:$0xff]  ;;  %v3902_v51 = vld [vmem:[#allocation6_spill] sm:$0xff] }
 0x253   :  { %1378 = vst.msk [vmem:[%s3748_s5 + $0xf8] sm:$0xff] %vm678_vm1, %v1314_v17  ;;  %1379 = vst.msk [vmem:[%s3748_s5 + $0x100] sm:$0xff] %vm678_vm1, %v1315_v42  ;;  %v1343_v43 = vmax.f32 %v3901_v11, 0.0  ;;  %v1344_v12 = vmax.f32 %v3902_v51, 0.0  ;;  %v3903_v13 = vld [vmem:[#allocation7_spill] sm:$0xff] }
 0x254   :  { %1380 = vst.msk [vmem:[%s3748_s5 + $0x108] sm:$0xff] %vm678_vm1, %v1316_v45  ;;  %1381 = vst.msk [vmem:[%s3748_s5 + $0x110] sm:$0xff] %vm678_vm1, %v1317_v58  ;;  %v1345_v25 = vmax.f32 %v3903_v13, 0.0 }
 0x255   :  { %1382 = vst.msk [vmem:[%s3748_s5 + $0x118] sm:$0xff] %vm678_vm1, %v1318_v0  ;;  %1383 = vst.msk [vmem:[%s3748_s5 + $0x120] sm:$0xff] %vm678_vm1, %v1319_v62 }
 0x256   :  { %1384 = vst.msk [vmem:[%s3748_s5 + $0x128] sm:$0xff] %vm678_vm1, %v1320_v3  ;;  %1385 = vst.msk [vmem:[%s3748_s5 + $0x130] sm:$0xff] %vm678_vm1, %v1321_v9 }
 0x257   :  { %1386 = vst.msk [vmem:[%s3748_s5 + $0x138] sm:$0xff] %vm678_vm1, %v1322_v18  ;;  %1387 = vst.msk [vmem:[%s3748_s5 + $0x140] sm:$0xff] %vm678_vm1, %v1323_v21 }
 0x258   :  { %1388 = vst.msk [vmem:[%s3748_s5 + $0x148] sm:$0xff] %vm678_vm1, %v1324_v36  ;;  %1389 = vst.msk [vmem:[%s3748_s5 + $0x150] sm:$0xff] %vm678_vm1, %v1325_v41 }
 0x259   :  { %1390 = vst.msk [vmem:[%s3748_s5 + $0x158] sm:$0xff] %vm678_vm1, %v1326_v2  ;;  %1391 = vst.msk [vmem:[%s3748_s5 + $0x160] sm:$0xff] %vm678_vm1, %v1327_v63 }
 0x25a   :  { %1392 = vst.msk [vmem:[%s3748_s5 + $0x168] sm:$0xff] %vm678_vm1, %v1328_v14  ;;  %1393 = vst.msk [vmem:[%s3748_s5 + $0x170] sm:$0xff] %vm678_vm1, %v1329_v28 }
 0x25b   :  { %1394 = vst.msk [vmem:[%s3748_s5 + $0x178] sm:$0xff] %vm678_vm1, %v1330_v50  ;;  %1395 = vst.msk [vmem:[%s3748_s5 + $0x180] sm:$0xff] %vm678_vm1, %v1331_v5 }
 0x25c   :  { %1396 = vst.msk [vmem:[%s3748_s5 + $0x188] sm:$0xff] %vm678_vm1, %v1332_v54  ;;  %1397 = vst.msk [vmem:[%s3748_s5 + $0x190] sm:$0xff] %vm678_vm1, %v1333_v57 }
 0x25d   :  { %1398 = vst.msk [vmem:[%s3748_s5 + $0x198] sm:$0xff] %vm678_vm1, %v1334_v22  ;;  %1399 = vst.msk [vmem:[%s3748_s5 + $0x1a0] sm:$0xff] %vm678_vm1, %v1335_v47 }
 0x25e   :  { %1400 = vst.msk [vmem:[%s3748_s5 + $0x1a8] sm:$0xff] %vm678_vm1, %v1336_v1  ;;  %1401 = vst.msk [vmem:[%s3748_s5 + $0x1b0] sm:$0xff] %vm678_vm1, %v1337_v29 }
 0x25f   :  { %1402 = vst.msk [vmem:[%s3748_s5 + $0x1b8] sm:$0xff] %vm678_vm1, %v1338_v31  ;;  %1403 = vst.msk [vmem:[%s3748_s5 + $0x1c0] sm:$0xff] %vm678_vm1, %v1339_v26 }
 0x260   :  { %1404 = vst.msk [vmem:[%s3748_s5 + $0x1c8] sm:$0xff] %vm678_vm1, %v1340_v32  ;;  %1405 = vst.msk [vmem:[%s3748_s5 + $0x1d0] sm:$0xff] %vm678_vm1, %v1341_v59 }
 0x261   :  { %1406 = vst.msk [vmem:[%s3748_s5 + $0x1d8] sm:$0xff] %vm678_vm1, %v1342_v53  ;;  %1407 = vst.msk [vmem:[%s3748_s5 + $0x1e0] sm:$0xff] %vm678_vm1, %v1343_v43 }
 0x262   :  { %1408 = vst.msk [vmem:[%s3748_s5 + $0x1e8] sm:$0xff] %vm678_vm1, %v1344_v12  ;;  %1409 = vst.msk [vmem:[%s3748_s5 + $0x1f0] sm:$0xff] %vm678_vm1, %v1345_v25 }
 0x263   :  { %1410 = vst.msk [vmem:[%s3748_s5 + $0x1f8] sm:$0xff] %vm678_vm1, %v1346_v15 }

// kernel: glam_forward.9
= control target key start
LH: loop header
LB: loop body
LE: loop exit
PB: predicated region body
PF: predicated region fallthrough
CT: control target
= control target key end

     0   :  { %v621_v0 = vmov 0   ;;  %vm196_vm0 = vcmask 261120   ;;  %vm318_vm1 = vcmask 523264   ;;  %s926_s1 = inlined_call_operand.vmem [shape: bf16[160,64], index: 1, kind: input, shape index: {}]   ;;  %s927_s0 = inlined_call_operand.vmem [shape: bf16[128,160], index: 0, kind: input, shape index: {}]   ;;  %s928_s2 = inlined_call_operand.vmem [shape: f32[1,64], index: 2, kind: input, shape index: {}]   ;;  %s929_s3 = inlined_call_operand.vmem [shape: f32[1,64], index: 3, kind: input, shape index: {}]   ;;  %s930_s4 = inlined_call_operand.vmem [shape: f32[1,64], index: 4, kind: input, shape index: {}]   ;;  %s931_s5 = inlined_call_operand.vmem [shape: f32[128,64], index: 5, kind: output, shape index: {}]  }
   0x1   :  { %221 = vmatprep.subr.bf16.mxu0 %v621_v0  ;;  %v585_v1 = vld [vmem:[%s926_s1 + $0x38] sm:$0xff]   ;;  %564 = vmatprep.subr.bf16.mxu1 %v621_v0  ;;  %v586_v2 = vld [vmem:[%s926_s1 + $0x30] sm:$0xff]   ;;  %v587_v3 = vld [vmem:[%s926_s1 + $0x28] sm:$0xff]  }
   0x2   :  { %222 = vmatpush1.bf16.msra.mxu0 %v585_v1  ;;  %574 = vmatpush1.bf16.msra.mxu1 %v585_v1  ;;  %v588_v4 = vld [vmem:[%s926_s1 + $0x20] sm:$0xff]   ;;  %v589_v7 = vld [vmem:[%s926_s1 + $0x18] sm:$0xff]   ;;  %v590_v8 = vld [vmem:[%s926_s1 + $0x10] sm:$0xff]  }
   0x3   :  { %223 = vmatprep.subr.bf16.mxu0 %v621_v0  ;;  %565 = vmatprep.subr.bf16.mxu1 %v621_v0  ;;  %v597_v5 = vld [vmem:[%s927_s0 + $0x4] ss:$8 sps:$4 sm:$0xff]   ;;  %v595_v13 = vld [vmem:[%s927_s0] ss:$8 sps:$4 sm:$0xff]   ;;  %v598_v15 = vld [vmem:[%s927_s0 + $0x14] ss:$8 sps:$4 sm:$0xff]  }
   0x4   :  { %554 = vmatprep.mubr.msk.bf16.mxu0 %vm196_vm0, %v597_v5  ;;  %v603_v6 = vld [vmem:[%s927_s0 + $0x44] ss:$8 sps:$4 sm:$0xff]   ;;  %v601_v14 = vld [vmem:[%s927_s0 + $0x40] ss:$8 sps:$4 sm:$0xff]   ;;  %v607_v16 = vld [vmem:[%s927_s0 + $0x54] ss:$8 sps:$4 sm:$0xff]  }
   0x5   :  { %558 = vmatprep.mubr.msk.bf16.mxu1 %vm196_vm0, %v603_v6  ;;  %v591_v9 = vld [vmem:[%s926_s1 + $0x8] sm:$0xff]   ;;  %v592_v10 = vld [vmem:[%s926_s1] sm:$0xff]   ;;  %v600_v17 = vld [vmem:[%s927_s0 + $0x10] ss:$8 sps:$4 sm:$0xff]  }
   0x6   :  { %224 = vmatpush1.bf16.msra.mxu0 %v586_v2  ;;  %575 = vmatpush1.bf16.msra.mxu1 %v586_v2  ;;  %v593_v11 = vld [vmem:[%s926_s1 + $0x48] sm:$0xff]   ;;  %v594_v12 = vld [vmem:[%s926_s1 + $0x40] sm:$0xff]   ;;  %v609_v18 = vld [vmem:[%s927_s0 + $0x50] ss:$8 sps:$4 sm:$0xff]  }
   0x7   :  { %225 = vmatprep.subr.bf16.mxu0 %v621_v0  ;;  %566 = vmatprep.subr.bf16.mxu1 %v621_v0  ;;  %v604_v19 = vld [vmem:[%s927_s0 + $0x24] ss:$8 sps:$4 sm:$0xff]   ;;  %v606_v21 = vld [vmem:[%s927_s0 + $0x20] ss:$8 sps:$4 sm:$0xff]   ;;  %v610_v23 = vld [vmem:[%s927_s0 + $0x34] ss:$8 sps:$4 sm:$0xff]  }
   0x8   :  { %v613_v20 = vld [vmem:[%s927_s0 + $0x64] ss:$8 sps:$4 sm:$0xff]   ;;  %v615_v22 = vld [vmem:[%s927_s0 + $0x60] ss:$8 sps:$4 sm:$0xff]   ;;  %v616_v24 = vld [vmem:[%s927_s0 + $0x74] ss:$8 sps:$4 sm:$0xff]  }
   0x9   :  { %v612_v25 = vld [vmem:[%s927_s0 + $0x30] ss:$8 sps:$4 sm:$0xff]   ;;  %v741_v39 = vld [vmem:[%s928_s2] ss:$0 sm:$0xff] }
   0xa   :  { %226 = vmatpush1.bf16.msra.mxu0 %v587_v3  ;;  %576 = vmatpush1.bf16.msra.mxu1 %v587_v3  ;;  %v618_v26 = vld [vmem:[%s927_s0 + $0x70] ss:$8 sps:$4 sm:$0xff]  }
   0xb   :  { %227 = vmatprep.subr.bf16.mxu0 %v621_v0  ;;  %567 = vmatprep.subr.bf16.mxu1 %v621_v0 }
   0xe   :  { %228 = vmatpush1.bf16.msra.mxu0 %v588_v4  ;;  %577 = vmatpush1.bf16.msra.mxu1 %v588_v4 }
   0xf   :  { %229 = vmatprep.subr.bf16.mxu0 %v621_v0  ;;  %568 = vmatprep.subr.bf16.mxu1 %v621_v0 }
  0x12   :  { %230 = vmatpush1.bf16.msra.mxu0 %v589_v7  ;;  %578 = vmatpush1.bf16.msra.mxu1 %v589_v7 }
  0x13   :  { %231 = vmatprep.subr.bf16.mxu0 %v621_v0  ;;  %569 = vmatprep.subr.bf16.mxu1 %v621_v0 }
  0x16   :  { %232 = vmatpush1.bf16.msra.mxu0 %v590_v8  ;;  %579 = vmatpush1.bf16.msra.mxu1 %v590_v8 }
  0x17   :  { %233 = vmatprep.subr.bf16.mxu0 %v621_v0  ;;  %570 = vmatprep.subr.bf16.mxu1 %v621_v0 }
  0x1a   :  { %234 = vmatpush1.bf16.msra.mxu0 %v591_v9  ;;  %580 = vmatpush1.bf16.msra.mxu1 %v591_v9 }
  0x1b   :  { %235 = vmatprep.subr.bf16.mxu0 %v621_v0  ;;  %571 = vmatprep.subr.bf16.mxu1 %v621_v0 }
  0x1e   :  { %236 = vmatpush1.bf16.msra.mxu0 %v592_v10  ;;  %581 = vmatpush1.bf16.msra.mxu1 %v592_v10 }
  0x1f   :  { %249 = vmatprep.subr.bf16.mxu0 %v621_v0  ;;  %572 = vmatprep.subr.bf16.mxu1 %v621_v0 }
  0x22   :  { %250 = vmatpush2.bf16.msra.mxu0 %v593_v11  ;;  %582 = vmatpush2.bf16.msra.mxu1 %v593_v11 }
  0x23   :  { %251 = vmatprep.subr.bf16.mxu0 %v621_v0  ;;  %573 = vmatprep.subr.bf16.mxu1 %v621_v0 }
  0x26   :  { %252 = vmatpush2.bf16.msra.mxu0 %v594_v12  ;;  %583 = vmatpush2.bf16.msra.mxu1 %v594_v12 }
  0x29   :  { %254 = vmatmul.mubr.bf16.vlgmr.msra.gmra.mxu0 %v595_v13  ;;  %286 = vmatmul.mubr.bf16.vlgmr.msra.gmra.mxu1 %v601_v14 }
  0x2a   :  { %555 = vmatprep.mubr.msk.bf16.mxu0 %vm196_vm0, %v598_v15  ;;  %559 = vmatprep.mubr.msk.bf16.mxu1 %vm196_vm0, %v607_v16 }
  0x31   :  { %262 = vmatmul.mubr.bf16.gmra.mxu0 %v600_v17  ;;  %294 = vmatmul.mubr.bf16.gmra.mxu1 %v609_v18 }
  0x32   :  { %556 = vmatprep.mubr.msk.bf16.mxu0 %vm196_vm0, %v604_v19  ;;  %560 = vmatprep.mubr.msk.bf16.mxu1 %vm196_vm0, %v613_v20 }
  0x39   :  { %270 = vmatmul.mubr.bf16.gmra.mxu0 %v606_v21  ;;  %302 = vmatmul.mubr.bf16.gmra.mxu1 %v615_v22 }
  0x3a   :  { %557 = vmatprep.mubr.msk.bf16.mxu0 %vm196_vm0, %v610_v23  ;;  %561 = vmatprep.mubr.msk.bf16.mxu1 %vm196_vm0, %v616_v24 }
  0x41   :  { %278 = vmatmul.mubr.bf16.gmra.mxu0 %v612_v25  ;;  %310 = vmatmul.mubr.bf16.gmra.mxu1 %v618_v26 }
  0xe9   :  { %v255_v27 = vpop.f32.mrf.mxu0  ;;  %v287_v28 = vpop.f32.mrf.mxu1 }
  0xea   :  { %v747_v45 = vadd.f32 %v741_v39, %v255_v27  ;;  %v288_v13 = vadd.f32 %v741_v39, %v287_v28 }
  0xeb   :  { %v257_v29 = vpop.f32.mrf.mxu0  ;;  %v289_v30 = vpop.f32.mrf.mxu1 }
  0xec   :  { %v319_v53 = vsel %vm318_vm1, %v747_v45, 0.0  ;;  %v334_v21 = vsel %vm318_vm1, %v288_v13, 0.0 }
  0xed   :  { %v258_v31 = vpop.f32.mrf.mxu0  ;;  %v290_v32 = vpop.f32.mrf.mxu1 }
  0xee   :  { %v744_v42 = vadd.f32 %v741_v39, %v258_v31  ;;  %v291_v18 = vadd.f32 %v741_v39, %v290_v32 }
  0xef   :  { %v260_v33 = vpop.f32.mrf.mxu0  ;;  %v292_v34 = vpop.f32.mrf.mxu1 }
  0xf0   :  { %v320_v49 = vsel %vm318_vm1, %v744_v42, 0.0  ;;  %v336_v24 = vsel %vm318_vm1, %v291_v18, 0.0 }
  0xf1   :  { %v263_v35 = vpop.f32.mrf.mxu0  ;;  %v295_v36 = vpop.f32.mrf.mxu1  ;;  %v321_v56 = vadd.f32 %v320_v49, %v319_v53 }
  0xf2   :  { %v750_v46 = vadd.f32 %v741_v39, %v263_v35  ;;  %v296_v22 = vadd.f32 %v741_v39, %v295_v36 }
  0xf3   :  { %v265_v37 = vpop.f32.mrf.mxu0  ;;  %v297_v38 = vpop.f32.mrf.mxu1 }
  0xf4   :  { %v322_v54 = vsel %vm318_vm1, %v750_v46, 0.0  ;;  %v338_v27 = vsel %vm318_vm1, %v296_v22, 0.0 }
  0xf5   :  { %v266_v40 = vpop.f32.mrf.mxu0  ;;  %v298_v41 = vpop.f32.mrf.mxu1  ;;  %v323_v61 = vadd.f32 %v322_v54, %v321_v56 }
  0xf6   :  { %v755_v50 = vadd.f32 %v741_v39, %v266_v40  ;;  %v299_v25 = vadd.f32 %v741_v39, %v298_v41 }
  0xf7   :  { %v268_v43 = vpop.f32.mrf.mxu0  ;;  %v300_v44 = vpop.f32.mrf.mxu1 }
  0xf8   :  { %v324_v59 = vsel %vm318_vm1, %v755_v50, 0.0  ;;  %v340_v30 = vsel %vm318_vm1, %v299_v25, 0.0 }
  0xf9   :  { %v271_v47 = vpop.f32.mrf.mxu0  ;;  %v303_v48 = vpop.f32.mrf.mxu1  ;;  %v325_v1 = vadd.f32 %v324_v59, %v323_v61 }
  0xfa   :  { %v762_v55 = vadd.f32 %v741_v39, %v271_v47  ;;  %v304_v28 = vadd.f32 %v741_v39, %v303_v48 }
  0xfb   :  { %v273_v51 = vpop.f32.mrf.mxu0  ;;  %v305_v52 = vpop.f32.mrf.mxu1 }
  0xfc   :  { %v326_v0 = vsel %vm318_vm1, %v762_v55, 0.0  ;;  %v342_v33 = vsel %vm318_vm1, %v304_v28, 0.0 }
  0xfd   :  { %v274_v57 = vpop.f32.mrf.mxu0  ;;  %v306_v58 = vpop.f32.mrf.mxu1  ;;  %v327_v6 = vadd.f32 %v326_v0, %v325_v1 }
  0xfe   :  { %v275_v60 = vadd.f32 %v741_v39, %v274_v57  ;;  %v307_v31 = vadd.f32 %v741_v39, %v306_v58 }
  0xff   :  { %v276_v62 = vpop.f32.mrf.mxu0  ;;  %v308_v63 = vpop.f32.mrf.mxu1 }
 0x100   :  { %v328_v4 = vsel %vm318_vm1, %v275_v60, 0.0  ;;  %v344_v36 = vsel %vm318_vm1, %v307_v31, 0.0 }
 0x101   :  { %v279_v2 = vpop.f32.mrf.mxu0  ;;  %v311_v3 = vpop.f32.mrf.mxu1  ;;  %v329_v10 = vadd.f32 %v328_v4, %v327_v6 }
 0x102   :  { %v280_v5 = vadd.f32 %v741_v39, %v279_v2  ;;  %v312_v34 = vadd.f32 %v741_v39, %v311_v3 }
 0x103   :  { %v281_v7 = vpop.f32.mrf.mxu0  ;;  %v313_v8 = vpop.f32.mrf.mxu1 }
 0x104   :  { %v330_v9 = vsel %vm318_vm1, %v280_v5, 0.0  ;;  %v346_v40 = vsel %vm318_vm1, %v312_v34, 0.0 }
 0x105   :  { %v282_v11 = vpop.f32.mrf.mxu0  ;;  %v314_v12 = vpop.f32.mrf.mxu1  ;;  %v331_v15 = vadd.f32 %v330_v9, %v329_v10 }
 0x106   :  { %v283_v14 = vadd.f32 %v741_v39, %v282_v11  ;;  %v315_v37 = vadd.f32 %v741_v39, %v314_v12 }
 0x107   :  { %v284_v16 = vpop.f32.mrf.mxu0  ;;  %v316_v17 = vpop.f32.mrf.mxu1 }
 0x108   :  { %v332_v19 = vsel %vm318_vm1, %v283_v14, 0.0  ;;  %v348_v43 = vsel %vm318_vm1, %v315_v37, 0.0 }
 0x109   :  { %v333_v20 = vadd.f32 %v332_v19, %v331_v15 }
 0x10b   :  { %v335_v23 = vadd.f32 %v334_v21, %v333_v20 }
 0x10d   :  { %v337_v26 = vadd.f32 %v336_v24, %v335_v23 }
 0x10f   :  { %v339_v29 = vadd.f32 %v338_v27, %v337_v26 }
 0x111   :  { %v341_v32 = vadd.f32 %v340_v30, %v339_v29 }
 0x113   :  { %v343_v35 = vadd.f32 %v342_v33, %v341_v32 }
 0x115   :  { %v345_v38 = vadd.f32 %v344_v36, %v343_v35 }
 0x117   :  { %v347_v41 = vadd.f32 %v346_v40, %v345_v38 }
 0x119   :  { %v349_v44 = vadd.f32 %v348_v43, %v347_v41 }
 0x11b   :  { %v350_v47 = vrot.slane %v349_v44, 4 }
 0x11d   :  { %v351_v48 = vadd.f32 %v350_v47, %v349_v44 }
 0x11f   :  { %v352_v49 = vrot.slane %v351_v48, 2 }
 0x121   :  { %v353_v51 = vadd.f32 %v352_v49, %v351_v48 }
 0x123   :  { %v354_v52 = vrot.slane %v353_v51, 1 }
 0x125   :  { %v355_v53 = vadd.f32 %v354_v52, %v353_v51 }
 0x127   :  { %v356_v54 = vmul.f32 0.0078125, %v355_v53 }
 0x129   :  { %v791_v56 = vsub.f32 %v747_v45, %v356_v54  ;;  %v794_v57 = vsub.f32 %v744_v42, %v356_v54  ;;  %v797_v39 = vsub.f32 %v750_v46, %v356_v54  ;;  %v800_v58 = vsub.f32 %v755_v50, %v356_v54 }
 0x12a   :  { %v807_v62 = vsub.f32 %v762_v55, %v356_v54  ;;  %v811_v42 = vsub.f32 %v275_v60, %v356_v54  ;;  %v817_v1 = vsub.f32 %v280_v5, %v356_v54  ;;  %v822_v4 = vsub.f32 %v283_v14, %v356_v54 }
 0x12b   :  { %v373_v59 = vmul.f32 %v791_v56, %v791_v56  ;;  %v374_v61 = vmul.f32 %v794_v57, %v794_v57  ;;  %v375_v45 = vmul.f32 %v797_v39, %v797_v39  ;;  %v376_v46 = vmul.f32 %v800_v58, %v800_v58 }
 0x12c   :  { %v377_v2 = vmul.f32 %v807_v62, %v807_v62  ;;  %v378_v60 = vmul.f32 %v811_v42, %v811_v42  ;;  %v827_v8 = vsub.f32 %v288_v13, %v356_v54  ;;  %v379_v5 = vmul.f32 %v817_v1, %v817_v1 }
 0x12d   :  { %v389_v50 = vsel %vm318_vm1, %v373_v59, 0.0  ;;  %v390_v63 = vsel %vm318_vm1, %v374_v61, 0.0  ;;  %v392_v55 = vsel %vm318_vm1, %v375_v45, 0.0  ;;  %v394_v6 = vsel %vm318_vm1, %v376_v46, 0.0 }
 0x12e   :  { %v391_v0 = vadd.f32 %v390_v63, %v389_v50  ;;  %v396_v9 = vsel %vm318_vm1, %v377_v2, 0.0  ;;  %v366_v11 = vsub.f32 %v291_v18, %v356_v54  ;;  %v380_v12 = vmul.f32 %v822_v4, %v822_v4 }
 0x12f   :  { %v398_v14 = vsel %vm318_vm1, %v378_v60, 0.0  ;;  %v367_v16 = vsub.f32 %v296_v22, %v356_v54  ;;  %v381_v17 = vmul.f32 %v827_v8, %v827_v8  ;;  %v400_v13 = vsel %vm318_vm1, %v379_v5, 0.0 }
 0x130   :  { %v393_v3 = vadd.f32 %v392_v55, %v391_v0  ;;  %v368_v20 = vsub.f32 %v299_v25, %v356_v54  ;;  %v382_v21 = vmul.f32 %v366_v11, %v366_v11  ;;  %v402_v23 = vsel %vm318_vm1, %v380_v12, 0.0  ;;  %v562_v12 = vld [vmem:[%s929_s3] ss:$0 sm:$0xff] }
 0x131   :  { %v369_v26 = vsub.f32 %v304_v28, %v356_v54  ;;  %v383_v18 = vmul.f32 %v367_v16, %v367_v16  ;;  %v404_v27 = vsel %vm318_vm1, %v381_v17, 0.0  ;;  %v370_v30 = vsub.f32 %v307_v31, %v356_v54 }
 0x132   :  { %v395_v7 = vadd.f32 %v394_v6, %v393_v3  ;;  %v384_v32 = vmul.f32 %v368_v20, %v368_v20  ;;  %v406_v22 = vsel %vm318_vm1, %v382_v21, 0.0  ;;  %v371_v35 = vsub.f32 %v312_v34, %v356_v54 }
 0x133   :  { %v385_v36 = vmul.f32 %v369_v26, %v369_v26  ;;  %v408_v38 = vsel %vm318_vm1, %v383_v18, 0.0  ;;  %v372_v25 = vsub.f32 %v315_v37, %v356_v54  ;;  %v386_v41 = vmul.f32 %v370_v30, %v370_v30  ;;  %v563_v18 = vld [vmem:[%s930_s4] ss:$0 sm:$0xff] }
 0x134   :  { %v397_v10 = vadd.f32 %v396_v9, %v395_v7  ;;  %v410_v43 = vsel %vm318_vm1, %v384_v32, 0.0  ;;  %v387_v28 = vmul.f32 %v371_v35, %v371_v35 }
 0x135   :  { %v412_v47 = vsel %vm318_vm1, %v385_v36, 0.0  ;;  %v388_v49 = vmul.f32 %v372_v25, %v372_v25  ;;  %v414_v31 = vsel %vm318_vm1, %v386_v41, 0.0 }
 0x136   :  { %v399_v15 = vadd.f32 %v398_v14, %v397_v10  ;;  %v416_v52 = vsel %vm318_vm1, %v387_v28, 0.0 }
 0x137   :  { %v418_v53 = vsel %vm318_vm1, %v388_v49, 0.0 }
 0x138   :  { %v401_v19 = vadd.f32 %v400_v13, %v399_v15 }
 0x13a   :  { %v403_v24 = vadd.f32 %v402_v23, %v401_v19 }
 0x13c   :  { %v405_v29 = vadd.f32 %v404_v27, %v403_v24 }
 0x13e   :  { %v407_v33 = vadd.f32 %v406_v22, %v405_v29 }
 0x140   :  { %v409_v40 = vadd.f32 %v408_v38, %v407_v33 }
 0x142   :  { %v411_v44 = vadd.f32 %v410_v43, %v409_v40 }
 0x144   :  { %v413_v48 = vadd.f32 %v412_v47, %v411_v44 }
 0x146   :  { %v415_v51 = vadd.f32 %v414_v31, %v413_v48 }
 0x148   :  { %v417_v34 = vadd.f32 %v416_v52, %v415_v51 }
 0x14a   :  { %v419_v59 = vadd.f32 %v418_v53, %v417_v34 }
 0x14c   :  { %v420_v61 = vrot.slane %v419_v59, 4 }
 0x14e   :  { %v421_v37 = vadd.f32 %v420_v61, %v419_v59 }
 0x150   :  { %v422_v54 = vrot.slane %v421_v37, 2 }
 0x152   :  { %v423_v45 = vadd.f32 %v422_v54, %v421_v37 }
 0x154   :  { %v424_v46 = vrot.slane %v423_v45, 1 }
 0x156   :  { %v425_v50 = vadd.f32 %v424_v46, %v423_v45 }
 0x158   :  { %v426_v63 = vmul.f32 0.0078125, %v425_v50 }
 0x15a   :  { %v427_v0 = vadd.f32 1e-05, %v426_v63 }
 0x15c   :  { %619 = vrsqrt.f32 %v427_v0 }
 0x169   :  { %v620_v2 = vpop.eup %619 }
 0x16a   :  { %v429_v55 = vmul.f32 %v620_v2, %v791_v56  ;;  %v430_v3 = vmul.f32 %v620_v2, %v794_v57  ;;  %v431_v60 = vmul.f32 %v620_v2, %v797_v39  ;;  %v432_v6 = vmul.f32 %v620_v2, %v800_v58 }
 0x16b   :  { %v433_v7 = vmul.f32 %v620_v2, %v807_v62  ;;  %v434_v5 = vmul.f32 %v620_v2, %v811_v42  ;;  %v435_v9 = vmul.f32 %v620_v2, %v817_v1  ;;  %v436_v10 = vmul.f32 %v620_v2, %v822_v4 }
 0x16c   :  { %v437_v56 = vmul.f32 %v620_v2, %v827_v8  ;;  %v438_v14 = vmul.f32 %v620_v2, %v366_v11  ;;  %v439_v57 = vmul.f32 %v620_v2, %v367_v16  ;;  %v440_v15 = vmul.f32 %v620_v2, %v368_v20 }
 0x16d   :  { %v441_v39 = vmul.f32 %v620_v2, %v369_v26  ;;  %v442_v17 = vmul.f32 %v620_v2, %v370_v30  ;;  %v443_v58 = vmul.f32 %v620_v2, %v371_v35  ;;  %v444_v13 = vmul.f32 %v620_v2, %v372_v25 }
 0x16e   :  { %v452_v62 = vmul.f32 %v562_v12, %v429_v55  ;;  %v453_v19 = vmul.f32 %v562_v12, %v430_v3  ;;  %v454_v42 = vmul.f32 %v562_v12, %v431_v60  ;;  %v455_v21 = vmul.f32 %v562_v12, %v432_v6 }
 0x16f   :  { %v456_v1 = vmul.f32 %v562_v12, %v433_v7  ;;  %v457_v23 = vmul.f32 %v562_v12, %v434_v5  ;;  %v458_v4 = vmul.f32 %v562_v12, %v435_v9  ;;  %v459_v24 = vmul.f32 %v562_v12, %v436_v10 }
 0x170   :  { %v460_v8 = vmul.f32 %v562_v12, %v437_v56  ;;  %v461_v11 = vmul.f32 %v562_v12, %v438_v14  ;;  %v462_v16 = vmul.f32 %v562_v12, %v439_v57  ;;  %v463_v20 = vmul.f32 %v562_v12, %v440_v15 }
 0x171   :  { %v464_v26 = vmul.f32 %v562_v12, %v441_v39  ;;  %v465_v27 = vmul.f32 %v562_v12, %v442_v17  ;;  %v466_v29 = vmul.f32 %v562_v12, %v443_v58  ;;  %v467_v30 = vmul.f32 %v562_v12, %v444_v13 }
 0x172   :  { %v475_v32 = vadd.f32 %v563_v18, %v452_v62  ;;  %v476_v22 = vadd.f32 %v563_v18, %v453_v19  ;;  %v477_v33 = vadd.f32 %v563_v18, %v454_v42  ;;  %v478_v35 = vadd.f32 %v563_v18, %v455_v21 }
 0x173   :  { %v479_v36 = vadd.f32 %v563_v18, %v456_v1  ;;  %v480_v38 = vadd.f32 %v563_v18, %v457_v23  ;;  %v481_v40 = vadd.f32 %v563_v18, %v458_v4  ;;  %v482_v25 = vadd.f32 %v563_v18, %v459_v24 }
 0x174   :  { %v483_v41 = vadd.f32 %v563_v18, %v460_v8  ;;  %v484_v43 = vadd.f32 %v563_v18, %v461_v11  ;;  %v485_v44 = vadd.f32 %v563_v18, %v462_v16  ;;  %v486_v28 = vadd.f32 %v563_v18, %v463_v20 }
 0x175   :  { %v487_v47 = vadd.f32 %v563_v18, %v464_v26  ;;  %v488_v48 = vadd.f32 %v563_v18, %v465_v27  ;;  %v489_v49 = vadd.f32 %v563_v18, %v466_v29  ;;  %v490_v31 = vadd.f32 %v563_v18, %v467_v30 }
 0x176   :  { %v491_v51 = vmax.f32 %v475_v32, 0.0  ;;  %v492_v52 = vmax.f32 %v476_v22, 0.0  ;;  %v493_v34 = vmax.f32 %v477_v33, 0.0  ;;  %v494_v53 = vmax.f32 %v478_v35, 0.0 }
 0x177   :  { %v495_v59 = vmax.f32 %v479_v36, 0.0  ;;  %v496_v61 = vmax.f32 %v480_v38, 0.0  ;;  %v497_v37 = vmax.f32 %v481_v40, 0.0  ;;  %v498_v54 = vmax.f32 %v482_v25, 0.0 }
 0x178   :  { %v499_v45 = vmax.f32 %v483_v41, 0.0  ;;  %v500_v46 = vmax.f32 %v484_v43, 0.0  ;;  %v501_v50 = vmax.f32 %v485_v44, 0.0  ;;  %v502_v63 = vmax.f32 %v486_v28, 0.0  ;;  %507 = vst.msk [vmem:[%s931_s5] sm:$0xff] %vm318_vm1, %v491_v51  ;;  %508 = vst.msk [vmem:[%s931_s5 + $0x8] sm:$0xff] %vm318_vm1, %v492_v52 }
 0x179   :  { %509 = vst.msk [vmem:[%s931_s5 + $0x10] sm:$0xff] %vm318_vm1, %v493_v34  ;;  %510 = vst.msk [vmem:[%s931_s5 + $0x18] sm:$0xff] %vm318_vm1, %v494_v53  ;;  %v503_v0 = vmax.f32 %v487_v47, 0.0  ;;  %v504_v2 = vmax.f32 %v488_v48, 0.0  ;;  %v505_v55 = vmax.f32 %v489_v49, 0.0  ;;  %v506_v3 = vmax.f32 %v490_v31, 0.0 }
 0x17a   :  { %511 = vst.msk [vmem:[%s931_s5 + $0x20] sm:$0xff] %vm318_vm1, %v495_v59  ;;  %512 = vst.msk [vmem:[%s931_s5 + $0x28] sm:$0xff] %vm318_vm1, %v496_v61 }
 0x17b   :  { %513 = vst.msk [vmem:[%s931_s5 + $0x30] sm:$0xff] %vm318_vm1, %v497_v37  ;;  %514 = vst.msk [vmem:[%s931_s5 + $0x38] sm:$0xff] %vm318_vm1, %v498_v54 }
 0x17c   :  { %515 = vst.msk [vmem:[%s931_s5 + $0x40] sm:$0xff] %vm318_vm1, %v499_v45  ;;  %516 = vst.msk [vmem:[%s931_s5 + $0x48] sm:$0xff] %vm318_vm1, %v500_v46 }
 0x17d   :  { %517 = vst.msk [vmem:[%s931_s5 + $0x50] sm:$0xff] %vm318_vm1, %v501_v50  ;;  %518 = vst.msk [vmem:[%s931_s5 + $0x58] sm:$0xff] %vm318_vm1, %v502_v63 }
 0x17e   :  { %519 = vst.msk [vmem:[%s931_s5 + $0x60] sm:$0xff] %vm318_vm1, %v503_v0  ;;  %520 = vst.msk [vmem:[%s931_s5 + $0x68] sm:$0xff] %vm318_vm1, %v504_v2 }
 0x17f   :  { %521 = vst.msk [vmem:[%s931_s5 + $0x70] sm:$0xff] %vm318_vm1, %v505_v55  ;;  %522 = vst.msk [vmem:[%s931_s5 + $0x78] sm:$0xff] %vm318_vm1, %v506_v3 }

// kernel: glam_forward.10
= control target key start
LH: loop header
LB: loop body
LE: loop exit
PB: predicated region body
PF: predicated region fallthrough
CT: control target
= control target key end

     0   :  { %vm226_vm0 = vcmask 523264   ;;  %s637_s1 = inlined_call_operand.vmem [shape: bf16[320,128], index: 1, kind: input, shape index: {}]   ;;  %s638_s0 = inlined_call_operand.vmem [shape: bf16[32,320], index: 0, kind: input, shape index: {}]   ;;  %s639_s2 = inlined_call_operand.vmem [shape: f32[1,128], index: 2, kind: input, shape index: {}]   ;;  %s640_s3 = inlined_call_operand.vmem [shape: f32[1,128], index: 3, kind: input, shape index: {}]   ;;  %s641_s4 = inlined_call_operand.vmem [shape: f32[1,128], index: 4, kind: input, shape index: {}]   ;;  %s642_s5 = inlined_call_operand.vmem [shape: f32[32,128], index: 5, kind: output, shape index: {}]  }
   0x1   :  { %v476_v0 = vld [vmem:[%s637_s1 + $0x78] sm:$0xff]   ;;  %v478_v2 = vld [vmem:[%s637_s1 + $0x70] sm:$0xff]   ;;  %v480_v4 = vld [vmem:[%s637_s1 + $0x68] sm:$0xff]  }
   0x2   :  { %v477_v1 = vld [vmem:[%s637_s1 + $0x38] sm:$0xff]   ;;  %430 = vmatprep.subr.bf16.mxu0 %v476_v0  ;;  %v479_v3 = vld [vmem:[%s637_s1 + $0x30] sm:$0xff]   ;;  %v481_v5 = vld [vmem:[%s637_s1 + $0x28] sm:$0xff]  }
   0x3   :  { %431 = vmatpush3.bf16.msra.mxu0 %v477_v1  ;;  %v482_v6 = vld [vmem:[%s637_s1 + $0x60] sm:$0xff]   ;;  %v486_v7 = vld [vmem:[%s637_s1 + $0x98] sm:$0xff]   ;;  %v489_v10 = vld [vmem:[%s637_s1 + $0x90] sm:$0xff]  }
   0x4   :  { %432 = vmatprep.subr.bf16.mxu0 %v478_v2  ;;  %v483_v8 = vld [vmem:[%s637_s1 + $0x20] sm:$0xff]   ;;  %v484_v9 = vld [vmem:[%s637_s1 + $0x58] sm:$0xff]   ;;  %464 = vmatprep.subr.bf16.mxu1 %v486_v7  ;;  %v487_v12 = vld [vmem:[%s637_s1 + $0x50] sm:$0xff]  }
   0x5   :  { %465 = vmatpush3.bf16.msra.mxu1 %v486_v7  ;;  %v485_v11 = vld [vmem:[%s637_s1 + $0x18] sm:$0xff]   ;;  %v492_v13 = vld [vmem:[%s637_s1 + $0x88] sm:$0xff]   ;;  %v488_v14 = vld [vmem:[%s637_s1 + $0x10] sm:$0xff]  }
   0x6   :  { %466 = vmatprep.subr.bf16.mxu1 %v489_v10  ;;  %v495_v15 = vld [vmem:[%s637_s1 + $0x80] sm:$0xff]   ;;  %v490_v16 = vld [vmem:[%s637_s1 + $0x48] sm:$0xff]  }
   0x7   :  { %433 = vmatpush3.bf16.msra.mxu0 %v479_v3  ;;  %v498_v17 = vld [vmem:[%s638_s0 + $0x4] ss:$12 sps:$4 sm:$0xff]   ;;  %v499_v18 = vld [vmem:[%s638_s0 + $0x8] ss:$12 sps:$4 sm:$0xff]   ;;  %v500_v21 = vld [vmem:[%s638_s0 + $0x20] ss:$12 sps:$4 sm:$0xff]  }
   0x8   :  { %434 = vmatprep.subr.bf16.mxu0 %v480_v4  ;;  %v491_v19 = vld [vmem:[%s637_s1 + $0x8] sm:$0xff]   ;;  %265 = vmatprep.mubr.bf16.mxu0 %v498_v17  ;;  %v493_v20 = vld [vmem:[%s637_s1 + $0x40] sm:$0xff]  }
   0x9   :  { %467 = vmatpush3.bf16.msra.mxu1 %v489_v10  ;;  %472 = vmatprep.mubr.msk.bf16.mxu1 %vm226_vm0, %v499_v18  ;;  %v494_v22 = vld [vmem:[%s637_s1] sm:$0xff]   ;;  %v501_v24 = vld [vmem:[%s638_s0 + $0x1c] ss:$12 sps:$4 sm:$0xff]  }
   0xa   :  { %468 = vmatprep.subr.bf16.mxu1 %v492_v13  ;;  %v496_v23 = vld [vmem:[%s638_s0] ss:$12 sps:$4 sm:$0xff]   ;;  %v503_v25 = vld [vmem:[%s638_s0 + $0x18] ss:$12 sps:$4 sm:$0xff]  }
   0xb   :  { %435 = vmatpush3.bf16.msra.mxu0 %v481_v5  ;;  %v399_v34 = vld [vmem:[%s639_s2] ss:$0 sm:$0xff] }
   0xc   :  { %436 = vmatprep.subr.bf16.mxu0 %v482_v6  ;;  %v428_v17 = vld [vmem:[%s640_s3] ss:$0 sm:$0xff] }
   0xd   :  { %469 = vmatpush3.bf16.msra.mxu1 %v492_v13 }
   0xe   :  { %470 = vmatprep.subr.bf16.mxu1 %v495_v15 }
   0xf   :  { %437 = vmatpush3.bf16.msra.mxu0 %v483_v8 }
  0x10   :  { %438 = vmatprep.subr.bf16.mxu0 %v484_v9 }
  0x11   :  { %471 = vmatpush3.bf16.msra.mxu1 %v495_v15 }
  0x13   :  { %439 = vmatpush3.bf16.msra.mxu0 %v485_v11 }
  0x14   :  { %440 = vmatprep.subr.bf16.mxu0 %v487_v12  ;;  %473 = vmatmul.mubr.msk.bf16.vlgmr.msra.gmra.mxu1 %vm226_vm0, %v500_v21 }
  0x17   :  { %441 = vmatpush3.bf16.msra.mxu0 %v488_v14 }
  0x18   :  { %442 = vmatprep.subr.bf16.mxu0 %v490_v16 }
  0x1b   :  { %443 = vmatpush3.bf16.msra.mxu0 %v491_v19 }
  0x1c   :  { %444 = vmatprep.subr.bf16.mxu0 %v493_v20 }
  0x1f   :  { %445 = vmatpush3.bf16.msra.mxu0 %v494_v22  ;;  %v429_v22 = vld [vmem:[%s641_s4] ss:$0 sm:$0xff] }
  0x22   :  { %266 = vmatmul.mubr.bf16.vlgmr.msra.gmra.mxu0 %v496_v23 }
  0x23   :  { %273 = vmatprep.mubr.bf16.mxu0 %v501_v24 }
  0x2a   :  { %274 = vmatmul.mubr.bf16.gmra.mxu0 %v503_v25 }
  0xd4   :  { %v474_v27 = vpop.f32.mrf.mxu1 }
  0xd6   :  { %v316_v30 = vpop.f32.mrf.mxu1 }
  0xd8   :  { %v475_v35 = vpop.f32.mrf.mxu1 }
  0xda   :  { %v319_v41 = vpop.f32.mrf.mxu1 }
  0xe2   :  { %v446_v26 = vpop.f32.mrf.mxu0 }
  0xe4   :  { %v447_v28 = vpop.f32.mrf.mxu0 }
  0xe5   :  { %v448_v32 = vadd.f32 %v447_v28, %v446_v26 }
  0xe6   :  { %v449_v29 = vpop.f32.mrf.mxu0 }
  0xe7   :  { %v268_v39 = vadd.f32 %v448_v32, %v399_v34 }
  0xe8   :  { %v450_v31 = vpop.f32.mrf.mxu0 }
  0xe9   :  { %v451_v33 = vadd.f32 %v450_v31, %v449_v29  ;;  %v317_v46 = vadd.f32 %v316_v30, %v268_v39 }
  0xea   :  { %v452_v36 = vpop.f32.mrf.mxu0 }
  0xeb   :  { %v271_v37 = vadd.f32 %v451_v33, %v399_v34 }
  0xec   :  { %v453_v38 = vpop.f32.mrf.mxu0 }
  0xed   :  { %v454_v40 = vadd.f32 %v453_v38, %v452_v36  ;;  %v320_v43 = vadd.f32 %v319_v41, %v271_v37 }
  0xee   :  { %v455_v42 = vpop.f32.mrf.mxu0 }
  0xef   :  { %v276_v44 = vadd.f32 %v454_v40, %v399_v34  ;;  %v331_v49 = vadd.f32 %v320_v43, %v317_v46 }
  0xf0   :  { %v456_v45 = vpop.f32.mrf.mxu0 }
  0xf1   :  { %v325_v47 = vadd.f32 %v474_v27, %v276_v44  ;;  %v457_v48 = vadd.f32 %v456_v45, %v455_v42 }
  0xf3   :  { %v279_v50 = vadd.f32 %v457_v48, %v399_v34  ;;  %v332_v51 = vadd.f32 %v331_v49, %v325_v47 }
  0xf5   :  { %v328_v52 = vadd.f32 %v475_v35, %v279_v50 }
  0xf7   :  { %v333_v53 = vadd.f32 %v332_v51, %v328_v52 }
  0xf9   :  { %v334_v54 = vrot.slane %v333_v53, 4 }
  0xfb   :  { %v335_v55 = vadd.f32 %v334_v54, %v333_v53 }
  0xfd   :  { %v336_v56 = vrot.slane %v335_v55, 2 }
  0xff   :  { %v337_v57 = vadd.f32 %v336_v56, %v335_v55 }
 0x101   :  { %v338_v58 = vrot.slane %v337_v57, 1 }
 0x103   :  { %v339_v59 = vadd.f32 %v338_v58, %v337_v57 }
 0x105   :  { %v340_v60 = vmul.f32 0.03125, %v339_v59 }
 0x107   :  { %v341_v61 = vsub.f32 %v317_v46, %v340_v60  ;;  %v342_v62 = vsub.f32 %v320_v43, %v340_v60  ;;  %v343_v63 = vsub.f32 %v325_v47, %v340_v60  ;;  %v344_v0 = vsub.f32 %v328_v52, %v340_v60 }
 0x109   :  { %v345_v1 = vmul.f32 %v341_v61, %v341_v61  ;;  %v346_v2 = vmul.f32 %v342_v62, %v342_v62  ;;  %v347_v3 = vmul.f32 %v343_v63, %v343_v63  ;;  %v348_v5 = vmul.f32 %v344_v0, %v344_v0 }
 0x10b   :  { %v349_v4 = vadd.f32 %v346_v2, %v345_v1 }
 0x10d   :  { %v350_v6 = vadd.f32 %v349_v4, %v347_v3 }
 0x10f   :  { %v351_v7 = vadd.f32 %v350_v6, %v348_v5 }
 0x111   :  { %v352_v8 = vrot.slane %v351_v7, 4 }
 0x113   :  { %v353_v9 = vadd.f32 %v352_v8, %v351_v7 }
 0x115   :  { %v354_v10 = vrot.slane %v353_v9, 2 }
 0x117   :  { %v355_v11 = vadd.f32 %v354_v10, %v353_v9 }
 0x119   :  { %v356_v12 = vrot.slane %v355_v11, 1 }
 0x11b   :  { %v357_v13 = vadd.f32 %v356_v12, %v355_v11 }
 0x11d   :  { %v358_v14 = vmul.f32 0.03125, %v357_v13 }
 0x11f   :  { %v359_v15 = vadd.f32 1e-05, %v358_v14 }
 0x121   :  { %504 = vrsqrt.f32 %v359_v15 }
 0x12e   :  { %v505_v16 = vpop.eup %504 }
 0x12f   :  { %v361_v18 = vmul.f32 %v505_v16, %v341_v61  ;;  %v362_v19 = vmul.f32 %v505_v16, %v342_v62  ;;  %v363_v20 = vmul.f32 %v505_v16, %v343_v63  ;;  %v364_v21 = vmul.f32 %v505_v16, %v344_v0 }
 0x131   :  { %v372_v23 = vmul.f32 %v428_v17, %v361_v18  ;;  %v373_v24 = vmul.f32 %v428_v17, %v362_v19  ;;  %v374_v25 = vmul.f32 %v428_v17, %v363_v20  ;;  %v375_v26 = vmul.f32 %v428_v17, %v364_v21 }
 0x133   :  { %v383_v27 = vadd.f32 %v429_v22, %v372_v23  ;;  %v384_v28 = vadd.f32 %v429_v22, %v373_v24  ;;  %v385_v29 = vadd.f32 %v429_v22, %v374_v25  ;;  %v386_v30 = vadd.f32 %v429_v22, %v375_v26 }
 0x135   :  { %v387_v31 = vmax.f32 %v383_v27, 0.0  ;;  %v388_v32 = vmax.f32 %v384_v28, 0.0  ;;  %v389_v33 = vmax.f32 %v385_v29, 0.0  ;;  %v390_v34 = vmax.f32 %v386_v30, 0.0 }
 0x137   :  { %391 = vst [vmem:[%s642_s5] sm:$0xff] %v387_v31  ;;  %392 = vst [vmem:[%s642_s5 + $0x8] sm:$0xff] %v388_v32 }
 0x138   :  { %393 = vst [vmem:[%s642_s5 + $0x10] sm:$0xff] %v389_v33  ;;  %394 = vst [vmem:[%s642_s5 + $0x18] sm:$0xff] %v390_v34 }

// kernel: glam_forward.13
= control target key start
LH: loop header
LB: loop body
LE: loop exit
PB: predicated region body
PF: predicated region fallthrough
CT: control target
= control target key end

     0   :  { %v1056_v47 = vmov 1983009808   ;;  %v28_v49 = vlaneseq  ;;  %s1910_s0 = inlined_call_operand.vmem [shape: f32[2,2048], index: 0, kind: input, shape index: {}]   ;;  %s1911_s1 = inlined_call_operand.vmem [shape: f32[2048,4], index: 1, kind: input, shape index: {}]   ;;  %s1912_s2 = inlined_call_operand.vmem [shape: f32[1,4], index: 2, kind: input, shape index: {}]   ;;  %s1913_s3 = inlined_call_operand.hbm [shape: f32[2,4], index: 3, kind: output, shape index: {}]  }
   0x1   :  { %v154_v0 = vld [vmem:[%s1911_s1 + $0xf0] sm:$0xff]  ;;  %v155_v1 = vld [vmem:[%s1911_s1 + $0xf8] sm:$0xff]  ;;  %v152_v11 = vld [vmem:[%s1911_s1 + $0xe0] sm:$0xff]  ;;  %v26_v48 = vunpack.c.l.s4 %v1056_v47 }
   0x2   :  { %v186_v2 = vld [vmem:[%s1911_s1 + $0x1f0] sm:$0xff]  ;;  %v395_v3 = vpack.c.bf16 %v155_v1, %v154_v0  ;;  %v187_v4 = vld [vmem:[%s1911_s1 + $0x1f8] sm:$0xff]  ;;  %v153_v13 = vld [vmem:[%s1911_s1 + $0xe8] sm:$0xff]  ;;  %v29_v0 = vshrl.u32 %v28_v49, 7 }
   0x3   :  { %v138_v5 = vld [vmem:[%s1911_s1 + $0x70] sm:$0xff]  ;;  %v139_v6 = vld [vmem:[%s1911_s1 + $0x78] sm:$0xff]  ;;  %v411_v7 = vpack.c.bf16 %v187_v4, %v186_v2  ;;  %v184_v14 = vld [vmem:[%s1911_s1 + $0x1e0] sm:$0xff]  ;;  %v394_v16 = vpack.c.bf16 %v153_v13, %v152_v11  ;;  %v27_v63 = vunpack.c.0.s8 %v26_v48 }
   0x4   :  { %v387_v8 = vpack.c.bf16 %v139_v6, %v138_v5  ;;  %v170_v9 = vld [vmem:[%s1911_s1 + $0x170] sm:$0xff]  ;;  %v171_v10 = vld [vmem:[%s1911_s1 + $0x178] sm:$0xff]  ;;  %852 = vmatprep.subr.bf16.mxu0 %v395_v3  ;;  %v185_v15 = vld [vmem:[%s1911_s1 + $0x1e8] sm:$0xff] }
   0x5   :  { %v403_v12 = vpack.c.bf16 %v171_v10, %v170_v9  ;;  %874 = vmatprep.subr.bf16.mxu1 %v411_v7  ;;  %v410_v17 = vpack.c.bf16 %v185_v15, %v184_v14  ;;  %v136_v18 = vld [vmem:[%s1911_s1 + $0x60] sm:$0xff]  ;;  %v137_v19 = vld [vmem:[%s1911_s1 + $0x68] sm:$0xff]  ;;  %v150_v23 = vld [vmem:[%s1911_s1 + $0xd0] sm:$0xff]  ;;  %v1228_v13 = vsub.s32 %v27_v63, %v29_v0 }
   0x6   :  { %853 = vmatpush3.bf16.msra.mxu0 %v387_v8  ;;  %v168_v20 = vld [vmem:[%s1911_s1 + $0x160] sm:$0xff]  ;;  %v386_v21 = vpack.c.bf16 %v137_v19, %v136_v18  ;;  %v169_v22 = vld [vmem:[%s1911_s1 + $0x168] sm:$0xff]  ;;  %v151_v24 = vld [vmem:[%s1911_s1 + $0xd8] sm:$0xff] }
   0x7   :  { %875 = vmatpush3.bf16.msra.mxu1 %v403_v12  ;;  %854 = vmatprep.subr.bf16.mxu0 %v394_v16  ;;  %v402_v25 = vpack.c.bf16 %v169_v22, %v168_v20  ;;  %v393_v26 = vpack.c.bf16 %v151_v24, %v150_v23  ;;  %v182_v27 = vld [vmem:[%s1911_s1 + $0x1d0] sm:$0xff]  ;;  %v183_v28 = vld [vmem:[%s1911_s1 + $0x1d8] sm:$0xff]  ;;  %v148_v35 = vld [vmem:[%s1911_s1 + $0xc0] sm:$0xff] }
   0x8   :  { %876 = vmatprep.subr.bf16.mxu1 %v410_v17  ;;  %v134_v29 = vld [vmem:[%s1911_s1 + $0x50] sm:$0xff]  ;;  %v409_v30 = vpack.c.bf16 %v183_v28, %v182_v27  ;;  %v135_v31 = vld [vmem:[%s1911_s1 + $0x58] sm:$0xff]  ;;  %v149_v36 = vld [vmem:[%s1911_s1 + $0xc8] sm:$0xff] }
   0x9   :  { %v166_v32 = vld [vmem:[%s1911_s1 + $0x150] sm:$0xff]  ;;  %v167_v33 = vld [vmem:[%s1911_s1 + $0x158] sm:$0xff]  ;;  %v385_v34 = vpack.c.bf16 %v135_v31, %v134_v29  ;;  %v180_v37 = vld [vmem:[%s1911_s1 + $0x1c0] sm:$0xff]  ;;  %v392_v39 = vpack.c.bf16 %v149_v36, %v148_v35 }
   0xa   :  { %855 = vmatpush3.bf16.msra.mxu0 %v386_v21  ;;  %v401_v38 = vpack.c.bf16 %v167_v33, %v166_v32  ;;  %v181_v40 = vld [vmem:[%s1911_s1 + $0x1c8] sm:$0xff]  ;;  %v132_v41 = vld [vmem:[%s1911_s1 + $0x40] sm:$0xff]  ;;  %v146_v46 = vld [vmem:[%s1911_s1 + $0xb0] sm:$0xff] }
   0xb   :  { %877 = vmatpush3.bf16.msra.mxu1 %v402_v25  ;;  %856 = vmatprep.subr.bf16.mxu0 %v393_v26  ;;  %v133_v42 = vld [vmem:[%s1911_s1 + $0x48] sm:$0xff]  ;;  %v408_v43 = vpack.c.bf16 %v181_v40, %v180_v37  ;;  %v164_v44 = vld [vmem:[%s1911_s1 + $0x140] sm:$0xff]  ;;  %v147_v50 = vld [vmem:[%s1911_s1 + $0xb8] sm:$0xff] }
   0xc   :  { %878 = vmatprep.subr.bf16.mxu1 %v409_v30  ;;  %v165_v45 = vld [vmem:[%s1911_s1 + $0x148] sm:$0xff]  ;;  %v178_v51 = vld [vmem:[%s1911_s1 + $0x1b0] sm:$0xff]  ;;  %v179_v52 = vld [vmem:[%s1911_s1 + $0x1b8] sm:$0xff]  ;;  %v384_v53 = vpack.c.bf16 %v133_v42, %v132_v41  ;;  %v391_v55 = vpack.c.bf16 %v147_v50, %v146_v46 }
   0xd   :  { %v400_v54 = vpack.c.bf16 %v165_v45, %v164_v44  ;;  %v130_v56 = vld [vmem:[%s1911_s1 + $0x30] sm:$0xff]  ;;  %v131_v57 = vld [vmem:[%s1911_s1 + $0x38] sm:$0xff]  ;;  %v407_v59 = vpack.c.bf16 %v179_v52, %v178_v51  ;;  %v144_v61 = vld [vmem:[%s1911_s1 + $0xa0] sm:$0xff] }
   0xe   :  { %857 = vmatpush3.bf16.msra.mxu0 %v385_v34  ;;  %v162_v58 = vld [vmem:[%s1911_s1 + $0x130] sm:$0xff]  ;;  %v163_v60 = vld [vmem:[%s1911_s1 + $0x138] sm:$0xff]  ;;  %v145_v62 = vld [vmem:[%s1911_s1 + $0xa8] sm:$0xff]  ;;  %v383_v3 = vpack.c.bf16 %v131_v57, %v130_v56 }
   0xf   :  { %879 = vmatpush3.bf16.msra.mxu1 %v401_v38  ;;  %858 = vmatprep.subr.bf16.mxu0 %v392_v39  ;;  %v176_v1 = vld [vmem:[%s1911_s1 + $0x1a0] sm:$0xff]  ;;  %v177_v2 = vld [vmem:[%s1911_s1 + $0x1a8] sm:$0xff]  ;;  %v399_v4 = vpack.c.bf16 %v163_v60, %v162_v58  ;;  %v390_v5 = vpack.c.bf16 %v145_v62, %v144_v61  ;;  %v142_v11 = vld [vmem:[%s1911_s1 + $0x90] sm:$0xff] }
  0x10   :  { %880 = vmatprep.subr.bf16.mxu1 %v408_v43  ;;  %v128_v6 = vld [vmem:[%s1911_s1 + $0x20] sm:$0xff]  ;;  %v129_v7 = vld [vmem:[%s1911_s1 + $0x28] sm:$0xff]  ;;  %v406_v9 = vpack.c.bf16 %v177_v2, %v176_v1  ;;  %v143_v12 = vld [vmem:[%s1911_s1 + $0x98] sm:$0xff] }
  0x11   :  { %v160_v8 = vld [vmem:[%s1911_s1 + $0x120] sm:$0xff]  ;;  %v161_v10 = vld [vmem:[%s1911_s1 + $0x128] sm:$0xff]  ;;  %v174_v14 = vld [vmem:[%s1911_s1 + $0x190] sm:$0xff]  ;;  %v382_v16 = vpack.c.bf16 %v129_v7, %v128_v6  ;;  %v389_v19 = vpack.c.bf16 %v143_v12, %v142_v11 }
  0x12   :  { %859 = vmatpush3.bf16.msra.mxu0 %v384_v53  ;;  %v175_v15 = vld [vmem:[%s1911_s1 + $0x198] sm:$0xff]  ;;  %v126_v17 = vld [vmem:[%s1911_s1 + $0x10] sm:$0xff]  ;;  %v398_v18 = vpack.c.bf16 %v161_v10, %v160_v8  ;;  %v16_v22 = vld [vmem:[%s1910_s0] sm:$0xff] }
  0x13   :  { %881 = vmatpush3.bf16.msra.mxu1 %v400_v54  ;;  %860 = vmatprep.subr.bf16.mxu0 %v391_v55  ;;  %v127_v20 = vld [vmem:[%s1911_s1 + $0x18] sm:$0xff]  ;;  %v158_v21 = vld [vmem:[%s1911_s1 + $0x110] sm:$0xff]  ;;  %v405_v23 = vpack.c.bf16 %v175_v15, %v174_v14  ;;  %v140_v25 = vld [vmem:[%s1911_s1 + $0x80] sm:$0xff]  ;;  %v31_v27 = vrot.slane %v16_v22, %v1228_v13  ;;  %v24_v28 = vcombine.high %v16_v22, %v16_v22 }
  0x14   :  { %882 = vmatprep.subr.bf16.mxu1 %v407_v59  ;;  %v159_v24 = vld [vmem:[%s1911_s1 + $0x118] sm:$0xff]  ;;  %v141_v26 = vld [vmem:[%s1911_s1 + $0x88] sm:$0xff]  ;;  %v172_v29 = vld [vmem:[%s1911_s1 + $0x180] sm:$0xff]  ;;  %v381_v31 = vpack.c.bf16 %v127_v20, %v126_v17 }
  0x15   :  { %v173_v30 = vld [vmem:[%s1911_s1 + $0x188] sm:$0xff]  ;;  %v39_v32 = vcombine.high %v31_v27, %v31_v27  ;;  %v38_v33 = vrot.slane %v24_v28, %v1228_v13  ;;  %v397_v34 = vpack.c.bf16 %v159_v24, %v158_v21  ;;  %v388_v35 = vpack.c.bf16 %v141_v26, %v140_v25  ;;  %v124_v36 = vld [vmem:[%s1911_s1] sm:$0xff]  ;;  %v218_v43 = vld [vmem:[%s1911_s1 + $0x2f0] sm:$0xff] }
  0x16   :  { %861 = vmatpush3.bf16.msra.mxu0 %v383_v3  ;;  %v125_v37 = vld [vmem:[%s1911_s1 + $0x8] sm:$0xff]  ;;  %v156_v38 = vld [vmem:[%s1911_s1 + $0x100] sm:$0xff]  ;;  %v404_v39 = vpack.c.bf16 %v173_v30, %v172_v29  ;;  %v219_v44 = vld [vmem:[%s1911_s1 + $0x2f8] sm:$0xff]  ;;  %v108_v58 = vpack.c.bf16 %v31_v27, %v31_v27 }
  0x17   :  { %883 = vmatpush3.bf16.msra.mxu1 %v399_v4  ;;  %862 = vmatprep.subr.bf16.mxu0 %v390_v5  ;;  %v157_v40 = vld [vmem:[%s1911_s1 + $0x108] sm:$0xff]  ;;  %v109_v41 = vpack.c.bf16 %v39_v32, %v39_v32  ;;  %v40_v42 = vcombine.high %v38_v33, %v38_v33  ;;  %v250_v45 = vld [vmem:[%s1911_s1 + $0x3f0] sm:$0xff]  ;;  %v251_v46 = vld [vmem:[%s1911_s1 + $0x3f8] sm:$0xff]  ;;  %v380_v47 = vpack.c.bf16 %v125_v37, %v124_v36 }
  0x18   :  { %884 = vmatprep.subr.bf16.mxu1 %v406_v9  ;;  %v396_v49 = vpack.c.bf16 %v157_v40, %v156_v38  ;;  %v427_v50 = vpack.c.bf16 %v219_v44, %v218_v43  ;;  %v202_v51 = vld [vmem:[%s1911_s1 + $0x270] sm:$0xff]  ;;  %v203_v52 = vld [vmem:[%s1911_s1 + $0x278] sm:$0xff]  ;;  %v443_v54 = vpack.c.bf16 %v251_v46, %v250_v45  ;;  %v216_v56 = vld [vmem:[%s1911_s1 + $0x2e0] sm:$0xff]  ;;  %v110_v61 = vpack.c.bf16 %v38_v33, %v38_v33 }
  0x19   :  { %547 = vmatprep.mubr.bf16.mxu0 %v109_v41  ;;  %v111_v48 = vpack.c.bf16 %v40_v42, %v40_v42  ;;  %v234_v53 = vld [vmem:[%s1911_s1 + $0x370] sm:$0xff]  ;;  %v235_v55 = vld [vmem:[%s1911_s1 + $0x378] sm:$0xff]  ;;  %v217_v57 = vld [vmem:[%s1911_s1 + $0x2e8] sm:$0xff]  ;;  %v419_v62 = vpack.c.bf16 %v203_v52, %v202_v51 }
  0x1a   :  { %863 = vmatpush3.bf16.msra.mxu0 %v382_v16  ;;  %v248_v59 = vld [vmem:[%s1911_s1 + $0x3e0] sm:$0xff]  ;;  %v249_v60 = vld [vmem:[%s1911_s1 + $0x3e8] sm:$0xff]  ;;  %v435_v63 = vpack.c.bf16 %v235_v55, %v234_v53  ;;  %v426_v0 = vpack.c.bf16 %v217_v57, %v216_v56  ;;  %v214_v6 = vld [vmem:[%s1911_s1 + $0x2d0] sm:$0xff] }
  0x1b   :  { %885 = vmatpush3.bf16.msra.mxu1 %v398_v18  ;;  %864 = vmatprep.subr.bf16.mxu0 %v389_v19  ;;  %v200_v1 = vld [vmem:[%s1911_s1 + $0x260] sm:$0xff]  ;;  %v201_v2 = vld [vmem:[%s1911_s1 + $0x268] sm:$0xff]  ;;  %v442_v4 = vpack.c.bf16 %v249_v60, %v248_v59  ;;  %v215_v7 = vld [vmem:[%s1911_s1 + $0x2d8] sm:$0xff] }
  0x1c   :  { %886 = vmatprep.subr.bf16.mxu1 %v405_v23  ;;  %587 = vmatprep.mubr.bf16.mxu1 %v111_v48  ;;  %v232_v3 = vld [vmem:[%s1911_s1 + $0x360] sm:$0xff]  ;;  %v233_v5 = vld [vmem:[%s1911_s1 + $0x368] sm:$0xff]  ;;  %v246_v8 = vld [vmem:[%s1911_s1 + $0x3d0] sm:$0xff]  ;;  %v418_v10 = vpack.c.bf16 %v201_v2, %v200_v1  ;;  %v425_v12 = vpack.c.bf16 %v215_v7, %v214_v6 }
  0x1d   :  { %v247_v9 = vld [vmem:[%s1911_s1 + $0x3d8] sm:$0xff]  ;;  %v434_v11 = vpack.c.bf16 %v233_v5, %v232_v3  ;;  %v198_v14 = vld [vmem:[%s1911_s1 + $0x250] sm:$0xff]  ;;  %v212_v19 = vld [vmem:[%s1911_s1 + $0x2c0] sm:$0xff] }
  0x1e   :  { %865 = vmatpush3.bf16.msra.mxu0 %v381_v31  ;;  %v199_v15 = vld [vmem:[%s1911_s1 + $0x258] sm:$0xff]  ;;  %v230_v16 = vld [vmem:[%s1911_s1 + $0x350] sm:$0xff]  ;;  %v441_v17 = vpack.c.bf16 %v247_v9, %v246_v8  ;;  %v213_v20 = vld [vmem:[%s1911_s1 + $0x2c8] sm:$0xff] }
  0x1f   :  { %887 = vmatpush3.bf16.msra.mxu1 %v397_v34  ;;  %866 = vmatprep.subr.bf16.mxu0 %v388_v35  ;;  %v231_v18 = vld [vmem:[%s1911_s1 + $0x358] sm:$0xff]  ;;  %v244_v21 = vld [vmem:[%s1911_s1 + $0x3c0] sm:$0xff]  ;;  %v245_v22 = vld [vmem:[%s1911_s1 + $0x3c8] sm:$0xff]  ;;  %v417_v23 = vpack.c.bf16 %v199_v15, %v198_v14  ;;  %v424_v25 = vpack.c.bf16 %v213_v20, %v212_v19 }
  0x20   :  { %888 = vmatprep.subr.bf16.mxu1 %v404_v39  ;;  %v433_v24 = vpack.c.bf16 %v231_v18, %v230_v16  ;;  %v196_v26 = vld [vmem:[%s1911_s1 + $0x240] sm:$0xff]  ;;  %v197_v27 = vld [vmem:[%s1911_s1 + $0x248] sm:$0xff]  ;;  %v440_v29 = vpack.c.bf16 %v245_v22, %v244_v21  ;;  %v210_v31 = vld [vmem:[%s1911_s1 + $0x2b0] sm:$0xff] }
  0x21   :  { %v228_v28 = vld [vmem:[%s1911_s1 + $0x340] sm:$0xff]  ;;  %v229_v30 = vld [vmem:[%s1911_s1 + $0x348] sm:$0xff]  ;;  %v211_v32 = vld [vmem:[%s1911_s1 + $0x2b8] sm:$0xff]  ;;  %v416_v36 = vpack.c.bf16 %v197_v27, %v196_v26 }
  0x22   :  { %867 = vmatpush3.bf16.msra.mxu0 %v380_v47  ;;  %v242_v33 = vld [vmem:[%s1911_s1 + $0x3b0] sm:$0xff]  ;;  %v243_v34 = vld [vmem:[%s1911_s1 + $0x3b8] sm:$0xff]  ;;  %v17_v35 = vld [vmem:[%s1910_s0 + $0x8] sm:$0xff]  ;;  %v432_v39 = vpack.c.bf16 %v229_v30, %v228_v28  ;;  %v423_v40 = vpack.c.bf16 %v211_v32, %v210_v31 }
  0x23   :  { %889 = vmatpush3.bf16.msra.mxu1 %v396_v49  ;;  %896 = vmatprep.subr.bf16.mxu0 %v427_v50  ;;  %v1389_v37 = vrot.slane %v17_v35, %v1228_v13  ;;  %v41_v38 = vcombine.high %v17_v35, %v17_v35  ;;  %v194_v41 = vld [vmem:[%s1911_s1 + $0x230] sm:$0xff]  ;;  %v195_v42 = vld [vmem:[%s1911_s1 + $0x238] sm:$0xff]  ;;  %v439_v44 = vpack.c.bf16 %v243_v34, %v242_v33  ;;  %v208_v46 = vld [vmem:[%s1911_s1 + $0x2a0] sm:$0xff] }
  0x24   :  { %918 = vmatprep.subr.bf16.mxu1 %v443_v54  ;;  %v226_v43 = vld [vmem:[%s1911_s1 + $0x330] sm:$0xff]  ;;  %v227_v45 = vld [vmem:[%s1911_s1 + $0x338] sm:$0xff]  ;;  %v209_v47 = vld [vmem:[%s1911_s1 + $0x2a8] sm:$0xff]  ;;  %v415_v52 = vpack.c.bf16 %v195_v42, %v194_v41 }
  0x25   :  { %548 = vmatmul.mubr.bf16.vlgmr.msra.gmra.mxu0 %v108_v58  ;;  %v56_v48 = vcombine.high %v1389_v37, %v1389_v37  ;;  %v1412_v49 = vrot.slane %v41_v38, %v1228_v13  ;;  %v240_v50 = vld [vmem:[%s1911_s1 + $0x3a0] sm:$0xff]  ;;  %v241_v51 = vld [vmem:[%s1911_s1 + $0x3a8] sm:$0xff]  ;;  %v431_v55 = vpack.c.bf16 %v227_v45, %v226_v43  ;;  %v422_v56 = vpack.c.bf16 %v209_v47, %v208_v46  ;;  %v238_v1 = vld [vmem:[%s1911_s1 + $0x390] sm:$0xff] }
  0x26   :  { %588 = vmatmul.mubr.bf16.vlgmr.msra.gmra.mxu1 %v110_v61  ;;  %897 = vmatpush3.bf16.msra.mxu0 %v419_v62  ;;  %v192_v57 = vld [vmem:[%s1911_s1 + $0x220] sm:$0xff]  ;;  %v193_v58 = vld [vmem:[%s1911_s1 + $0x228] sm:$0xff]  ;;  %v438_v60 = vpack.c.bf16 %v241_v51, %v240_v50  ;;  %v206_v62 = vld [vmem:[%s1911_s1 + $0x290] sm:$0xff] }
  0x27   :  { %919 = vmatpush3.bf16.msra.mxu1 %v435_v63  ;;  %898 = vmatprep.subr.bf16.mxu0 %v426_v0  ;;  %v113_v53 = vpack.c.bf16 %v56_v48, %v56_v48  ;;  %v57_v54 = vcombine.high %v1412_v49, %v1412_v49  ;;  %v224_v59 = vld [vmem:[%s1911_s1 + $0x320] sm:$0xff]  ;;  %v225_v61 = vld [vmem:[%s1911_s1 + $0x328] sm:$0xff]  ;;  %v207_v63 = vld [vmem:[%s1911_s1 + $0x298] sm:$0xff]  ;;  %v414_v3 = vpack.c.bf16 %v193_v58, %v192_v57 }
  0x28   :  { %920 = vmatprep.subr.bf16.mxu1 %v442_v4  ;;  %v239_v2 = vld [vmem:[%s1911_s1 + $0x398] sm:$0xff]  ;;  %v430_v4 = vpack.c.bf16 %v225_v61, %v224_v59  ;;  %v421_v5 = vpack.c.bf16 %v207_v63, %v206_v62  ;;  %v190_v6 = vld [vmem:[%s1911_s1 + $0x210] sm:$0xff]  ;;  %v236_v14 = vld [vmem:[%s1911_s1 + $0x380] sm:$0xff]  ;;  %v114_v42 = vpack.c.bf16 %v1412_v49, %v1412_v49 }
  0x29   :  { %627 = vmatprep.mubr.bf16.mxu0 %v113_v53  ;;  %v115_v0 = vpack.c.bf16 %v57_v54, %v57_v54  ;;  %v191_v7 = vld [vmem:[%s1911_s1 + $0x218] sm:$0xff]  ;;  %v222_v8 = vld [vmem:[%s1911_s1 + $0x310] sm:$0xff]  ;;  %v437_v9 = vpack.c.bf16 %v239_v2, %v238_v1  ;;  %v237_v15 = vld [vmem:[%s1911_s1 + $0x388] sm:$0xff] }
  0x2a   :  { %899 = vmatpush3.bf16.msra.mxu0 %v418_v10  ;;  %v223_v10 = vld [vmem:[%s1911_s1 + $0x318] sm:$0xff]  ;;  %v413_v16 = vpack.c.bf16 %v191_v7, %v190_v6  ;;  %v188_v19 = vld [vmem:[%s1911_s1 + $0x200] sm:$0xff]  ;;  %v189_v20 = vld [vmem:[%s1911_s1 + $0x208] sm:$0xff]  ;;  %v436_v22 = vpack.c.bf16 %v237_v15, %v236_v14 }
  0x2b   :  { %921 = vmatpush3.bf16.msra.mxu1 %v434_v11  ;;  %900 = vmatprep.subr.bf16.mxu0 %v425_v12  ;;  %v204_v11 = vld [vmem:[%s1911_s1 + $0x280] sm:$0xff]  ;;  %v205_v12 = vld [vmem:[%s1911_s1 + $0x288] sm:$0xff]  ;;  %v314_v26 = vld [vmem:[%s1911_s1 + $0x5f0] sm:$0xff]  ;;  %v412_v28 = vpack.c.bf16 %v189_v20, %v188_v19 }
  0x2c   :  { %922 = vmatprep.subr.bf16.mxu1 %v441_v17  ;;  %667 = vmatprep.mubr.bf16.mxu1 %v115_v0  ;;  %v429_v17 = vpack.c.bf16 %v223_v10, %v222_v8  ;;  %v420_v18 = vpack.c.bf16 %v205_v12, %v204_v11  ;;  %v220_v21 = vld [vmem:[%s1911_s1 + $0x300] sm:$0xff]  ;;  %v315_v27 = vld [vmem:[%s1911_s1 + $0x5f8] sm:$0xff]  ;;  %v298_v33 = vld [vmem:[%s1911_s1 + $0x570] sm:$0xff] }
  0x2d   :  { %v267_v32 = vld [vmem:[%s1911_s1 + $0x478] sm:$0xff]  ;;  %v475_v35 = vpack.c.bf16 %v315_v27, %v314_v26  ;;  %v281_v38 = vld [vmem:[%s1911_s1 + $0x4e8] sm:$0xff]  ;;  %v264_v45 = vld [vmem:[%s1911_s1 + $0x460] sm:$0xff] }
  0x2e   :  { %901 = vmatpush3.bf16.msra.mxu0 %v417_v23  ;;  %v221_v23 = vld [vmem:[%s1911_s1 + $0x308] sm:$0xff]  ;;  %v299_v34 = vld [vmem:[%s1911_s1 + $0x578] sm:$0xff]  ;;  %v296_v48 = vld [vmem:[%s1911_s1 + $0x560] sm:$0xff] }
  0x2f   :  { %923 = vmatpush3.bf16.msra.mxu1 %v433_v24  ;;  %902 = vmatprep.subr.bf16.mxu0 %v424_v25  ;;  %v282_v24 = vld [vmem:[%s1911_s1 + $0x4f0] sm:$0xff]  ;;  %v283_v25 = vld [vmem:[%s1911_s1 + $0x4f8] sm:$0xff]  ;;  %v428_v30 = vpack.c.bf16 %v221_v23, %v220_v21  ;;  %v313_v41 = vld [vmem:[%s1911_s1 + $0x5e8] sm:$0xff] }
  0x30   :  { %924 = vmatprep.subr.bf16.mxu1 %v440_v29  ;;  %v266_v29 = vld [vmem:[%s1911_s1 + $0x470] sm:$0xff]  ;;  %v459_v31 = vpack.c.bf16 %v283_v25, %v282_v24  ;;  %v265_v47 = vld [vmem:[%s1911_s1 + $0x468] sm:$0xff]  ;;  %v279_v54 = vld [vmem:[%s1911_s1 + $0x4d8] sm:$0xff] }
  0x31   :  { %v451_v43 = vpack.c.bf16 %v267_v32, %v266_v29  ;;  %v297_v49 = vld [vmem:[%s1911_s1 + $0x568] sm:$0xff]  ;;  %v278_v53 = vld [vmem:[%s1911_s1 + $0x4d0] sm:$0xff]  ;;  %v450_v59 = vpack.c.bf16 %v265_v47, %v264_v45  ;;  %v263_v63 = vld [vmem:[%s1911_s1 + $0x458] sm:$0xff] }
  0x32   :  { %903 = vmatpush3.bf16.msra.mxu0 %v416_v36  ;;  %v280_v36 = vld [vmem:[%s1911_s1 + $0x4e0] sm:$0xff]  ;;  %v457_v61 = vpack.c.bf16 %v279_v54, %v278_v53  ;;  %v262_v62 = vld [vmem:[%s1911_s1 + $0x450] sm:$0xff]  ;;  %v277_v6 = vld [vmem:[%s1911_s1 + $0x4c8] sm:$0xff] }
  0x33   :  { %925 = vmatpush3.bf16.msra.mxu1 %v432_v39  ;;  %904 = vmatprep.subr.bf16.mxu0 %v423_v40  ;;  %v112_v39 = vpack.c.bf16 %v1389_v37, %v1389_v37  ;;  %v312_v40 = vld [vmem:[%s1911_s1 + $0x5e0] sm:$0xff]  ;;  %v18_v37 = vld [vmem:[%s1910_s0 + $0x10] sm:$0xff]  ;;  %v458_v46 = vpack.c.bf16 %v281_v38, %v280_v36  ;;  %v309_v8 = vld [vmem:[%s1911_s1 + $0x5c8] sm:$0xff]  ;;  %v449_v10 = vpack.c.bf16 %v263_v63, %v262_v62 }
  0x34   :  { %926 = vmatprep.subr.bf16.mxu1 %v439_v44  ;;  %v467_v44 = vpack.c.bf16 %v299_v34, %v298_v33  ;;  %v1538_v50 = vrot.slane %v18_v37, %v1228_v13  ;;  %v58_v51 = vcombine.high %v18_v37, %v18_v37  ;;  %v294_v0 = vld [vmem:[%s1911_s1 + $0x550] sm:$0xff]  ;;  %v308_v7 = vld [vmem:[%s1911_s1 + $0x5c0] sm:$0xff]  ;;  %v261_v15 = vld [vmem:[%s1911_s1 + $0x448] sm:$0xff] }
  0x35   :  { %v260_v14 = vld [vmem:[%s1911_s1 + $0x440] sm:$0xff]  ;;  %v274_v19 = vld [vmem:[%s1911_s1 + $0x4b0] sm:$0xff]  ;;  %v275_v20 = vld [vmem:[%s1911_s1 + $0x4b8] sm:$0xff] }
  0x36   :  { %905 = vmatpush3.bf16.msra.mxu0 %v415_v52  ;;  %v474_v52 = vpack.c.bf16 %v313_v41, %v312_v40  ;;  %v73_v57 = vcombine.high %v1538_v50, %v1538_v50  ;;  %v1555_v58 = vrot.slane %v58_v51, %v1228_v13  ;;  %v306_v21 = vld [vmem:[%s1911_s1 + $0x5b0] sm:$0xff]  ;;  %v448_v23 = vpack.c.bf16 %v261_v15, %v260_v14  ;;  %v259_v27 = vld [vmem:[%s1911_s1 + $0x438] sm:$0xff]  ;;  %v273_v32 = vld [vmem:[%s1911_s1 + $0x4a8] sm:$0xff] }
  0x37   :  { %927 = vmatpush3.bf16.msra.mxu1 %v431_v55  ;;  %906 = vmatprep.subr.bf16.mxu0 %v422_v56  ;;  %v310_v55 = vld [vmem:[%s1911_s1 + $0x5d0] sm:$0xff]  ;;  %v311_v56 = vld [vmem:[%s1911_s1 + $0x5d8] sm:$0xff]  ;;  %v455_v25 = vpack.c.bf16 %v275_v20, %v274_v19  ;;  %v304_v33 = vld [vmem:[%s1911_s1 + $0x5a0] sm:$0xff] }
  0x38   :  { %928 = vmatprep.subr.bf16.mxu1 %v438_v60  ;;  %v466_v60 = vpack.c.bf16 %v297_v49, %v296_v48  ;;  %v117_v1 = vpack.c.bf16 %v73_v57, %v73_v57  ;;  %v74_v2 = vcombine.high %v1555_v58, %v1555_v58  ;;  %v258_v26 = vld [vmem:[%s1911_s1 + $0x430] sm:$0xff]  ;;  %v305_v34 = vld [vmem:[%s1911_s1 + $0x5a8] sm:$0xff]  ;;  %v288_v41 = vld [vmem:[%s1911_s1 + $0x520] sm:$0xff] }
  0x39   :  { %v257_v40 = vld [vmem:[%s1911_s1 + $0x428] sm:$0xff]  ;;  %v271_v45 = vld [vmem:[%s1911_s1 + $0x498] sm:$0xff]  ;;  %v302_v37 = vld [vmem:[%s1911_s1 + $0x590] sm:$0xff] }
  0x3a   :  { %907 = vmatpush3.bf16.msra.mxu0 %v414_v3  ;;  %v473_v3 = vpack.c.bf16 %v311_v56, %v310_v55  ;;  %v254_v48 = vld [vmem:[%s1911_s1 + $0x410] sm:$0xff]  ;;  %v255_v49 = vld [vmem:[%s1911_s1 + $0x418] sm:$0xff]  ;;  %v268_v55 = vld [vmem:[%s1911_s1 + $0x480] sm:$0xff] }
  0x3b   :  { %929 = vmatpush3.bf16.msra.mxu1 %v430_v4  ;;  %908 = vmatprep.subr.bf16.mxu0 %v421_v5  ;;  %v295_v4 = vld [vmem:[%s1911_s1 + $0x558] sm:$0xff]  ;;  %v276_v5 = vld [vmem:[%s1911_s1 + $0x4c0] sm:$0xff]  ;;  %v286_v53 = vld [vmem:[%s1911_s1 + $0x510] sm:$0xff] }
  0x3c   :  { %930 = vmatprep.subr.bf16.mxu1 %v437_v9  ;;  %v119_v9 = vpack.c.bf16 %v74_v2, %v74_v2  ;;  %v465_v11 = vpack.c.bf16 %v295_v4, %v294_v0  ;;  %v456_v12 = vpack.c.bf16 %v277_v6, %v276_v5  ;;  %v287_v54 = vld [vmem:[%s1911_s1 + $0x518] sm:$0xff]  ;;  %v269_v57 = vld [vmem:[%s1911_s1 + $0x488] sm:$0xff] }
  0x3e   :  { %909 = vmatpush3.bf16.msra.mxu0 %v413_v16  ;;  %v292_v16 = vld [vmem:[%s1911_s1 + $0x540] sm:$0xff] }
  0x3f   :  { %931 = vmatpush3.bf16.msra.mxu1 %v429_v17  ;;  %910 = vmatprep.subr.bf16.mxu0 %v420_v18  ;;  %v472_v17 = vpack.c.bf16 %v309_v8, %v308_v7  ;;  %v293_v18 = vld [vmem:[%s1911_s1 + $0x548] sm:$0xff] }
  0x40   :  { %932 = vmatprep.subr.bf16.mxu1 %v436_v22  ;;  %v307_v22 = vld [vmem:[%s1911_s1 + $0x5b8] sm:$0xff]  ;;  %v464_v24 = vpack.c.bf16 %v293_v18, %v292_v16 }
  0x41   :  { %v471_v29 = vpack.c.bf16 %v307_v22, %v306_v21 }
  0x42   :  { %911 = vmatpush3.bf16.msra.mxu0 %v412_v28  ;;  %v290_v28 = vld [vmem:[%s1911_s1 + $0x530] sm:$0xff] }
  0x43   :  { %933 = vmatpush3.bf16.msra.mxu1 %v428_v30  ;;  %940 = vmatprep.subr.bf16.mxu0 %v459_v31  ;;  %v291_v30 = vld [vmem:[%s1911_s1 + $0x538] sm:$0xff]  ;;  %v272_v31 = vld [vmem:[%s1911_s1 + $0x4a0] sm:$0xff] }
  0x44   :  { %962 = vmatprep.subr.bf16.mxu1 %v475_v35  ;;  %v447_v35 = vpack.c.bf16 %v259_v27, %v258_v26  ;;  %v463_v36 = vpack.c.bf16 %v291_v30, %v290_v28  ;;  %v454_v38 = vpack.c.bf16 %v273_v32, %v272_v31 }
  0x45   :  { %628 = vmatmul.mubr.bf16.vlgmr.msra.gmra.mxu0 %v112_v39  ;;  %v256_v39 = vld [vmem:[%s1911_s1 + $0x420] sm:$0xff] }
  0x46   :  { %668 = vmatmul.mubr.bf16.vlgmr.msra.gmra.mxu1 %v114_v42  ;;  %941 = vmatpush3.bf16.msra.mxu0 %v451_v43  ;;  %v470_v42 = vpack.c.bf16 %v305_v34, %v304_v33  ;;  %v289_v43 = vld [vmem:[%s1911_s1 + $0x528] sm:$0xff]  ;;  %v446_v47 = vpack.c.bf16 %v257_v40, %v256_v39 }
  0x47   :  { %963 = vmatpush3.bf16.msra.mxu1 %v467_v44  ;;  %942 = vmatprep.subr.bf16.mxu0 %v458_v46  ;;  %v270_v44 = vld [vmem:[%s1911_s1 + $0x490] sm:$0xff]  ;;  %v303_v46 = vld [vmem:[%s1911_s1 + $0x598] sm:$0xff]  ;;  %v462_v51 = vpack.c.bf16 %v289_v43, %v288_v41 }
  0x48   :  { %964 = vmatprep.subr.bf16.mxu1 %v474_v52  ;;  %707 = vmatprep.mubr.bf16.mxu0 %v117_v1  ;;  %v453_v52 = vpack.c.bf16 %v271_v45, %v270_v44  ;;  %v469_v56 = vpack.c.bf16 %v303_v46, %v302_v37 }
  0x49   :  { %747 = vmatprep.mubr.bf16.mxu1 %v119_v9 }
  0x4a   :  { %943 = vmatpush3.bf16.msra.mxu0 %v450_v59  ;;  %v19_v59 = vld [vmem:[%s1910_s0 + $0x18] sm:$0xff] }
  0x4b   :  { %965 = vmatpush3.bf16.msra.mxu1 %v466_v60  ;;  %944 = vmatprep.subr.bf16.mxu0 %v457_v61 }
  0x4c   :  { %966 = vmatprep.subr.bf16.mxu1 %v473_v3 }
  0x4e   :  { %945 = vmatpush3.bf16.msra.mxu0 %v449_v10 }
  0x4f   :  { %967 = vmatpush3.bf16.msra.mxu1 %v465_v11  ;;  %946 = vmatprep.subr.bf16.mxu0 %v456_v12 }
  0x50   :  { %968 = vmatprep.subr.bf16.mxu1 %v472_v17 }
  0x52   :  { %947 = vmatpush3.bf16.msra.mxu0 %v448_v23 }
  0x53   :  { %969 = vmatpush3.bf16.msra.mxu1 %v464_v24  ;;  %948 = vmatprep.subr.bf16.mxu0 %v455_v25 }
  0x54   :  { %970 = vmatprep.subr.bf16.mxu1 %v471_v29 }
  0x56   :  { %949 = vmatpush3.bf16.msra.mxu0 %v447_v35 }
  0x57   :  { %971 = vmatpush3.bf16.msra.mxu1 %v463_v36  ;;  %950 = vmatprep.subr.bf16.mxu0 %v454_v38 }
  0x58   :  { %972 = vmatprep.subr.bf16.mxu1 %v470_v42 }
  0x59   :  { %8 = vsyncpa [#allocation3], 0  ;;  %v300_v60 = vld [vmem:[%s1911_s1 + $0x580] sm:$0xff]  ;;  %v301_v61 = vld [vmem:[%s1911_s1 + $0x588] sm:$0xff]  ;;  %v75_v62 = vcombine.high %v19_v59, %v19_v59  ;;  %v445_v63 = vpack.c.bf16 %v255_v49, %v254_v48  ;;  %v461_v0 = vpack.c.bf16 %v287_v54, %v286_v53  ;;  %v452_v1 = vpack.c.bf16 %v269_v57, %v268_v55 }
  0x5a   :  { %951 = vmatpush3.bf16.msra.mxu0 %v446_v47  ;;  %v252_v2 = vld [vmem:[%s1911_s1 + $0x400] sm:$0xff]  ;;  %v253_v3 = vld [vmem:[%s1911_s1 + $0x408] sm:$0xff]  ;;  %v468_v5 = vpack.c.bf16 %v301_v61, %v300_v60  ;;  %v346_v7 = vld [vmem:[%s1911_s1 + $0x6f0] sm:$0xff]  ;;  %v1701_v9 = vrot.slane %v19_v59, %v1228_v13  ;;  %v116_v24 = vpack.c.bf16 %v1538_v50, %v1538_v50  ;;  %v118_v28 = vpack.c.bf16 %v1555_v58, %v1555_v58 }
  0x5b   :  { %973 = vmatpush3.bf16.msra.mxu1 %v462_v51  ;;  %952 = vmatprep.subr.bf16.mxu0 %v453_v52  ;;  %v284_v4 = vld [vmem:[%s1911_s1 + $0x500] sm:$0xff]  ;;  %v285_v6 = vld [vmem:[%s1911_s1 + $0x508] sm:$0xff]  ;;  %v347_v8 = vld [vmem:[%s1911_s1 + $0x6f8] sm:$0xff]  ;;  %v1710_v12 = vrot.slane %v75_v62, %v1228_v13  ;;  %v444_v14 = vpack.c.bf16 %v253_v3, %v252_v2  ;;  %vm835_vm0 = vcmask 25600  }
  0x5c   :  { %974 = vmatprep.subr.bf16.mxu1 %v469_v56  ;;  %v378_v10 = vld [vmem:[%s1911_s1 + $0x7f0] sm:$0xff]  ;;  %v379_v11 = vld [vmem:[%s1911_s1 + $0x7f8] sm:$0xff]  ;;  %v460_v15 = vpack.c.bf16 %v285_v6, %v284_v4  ;;  %v491_v16 = vpack.c.bf16 %v347_v8, %v346_v7  ;;  %v344_v21 = vld [vmem:[%s1911_s1 + $0x6e0] sm:$0xff]  ;;  %v90_v23 = vcombine.high %v1701_v9, %v1701_v9 }
  0x5d   :  { %v330_v17 = vld [vmem:[%s1911_s1 + $0x670] sm:$0xff]  ;;  %v331_v18 = vld [vmem:[%s1911_s1 + $0x678] sm:$0xff]  ;;  %v507_v13 = vpack.c.bf16 %v379_v11, %v378_v10  ;;  %v345_v22 = vld [vmem:[%s1911_s1 + $0x6e8] sm:$0xff]  ;;  %v91_v27 = vcombine.high %v1710_v12, %v1710_v12 }
  0x5e   :  { %953 = vmatpush3.bf16.msra.mxu0 %v445_v63  ;;  %v362_v19 = vld [vmem:[%s1911_s1 + $0x770] sm:$0xff]  ;;  %v363_v20 = vld [vmem:[%s1911_s1 + $0x778] sm:$0xff]  ;;  %v376_v25 = vld [vmem:[%s1911_s1 + $0x7e0] sm:$0xff]  ;;  %v483_v29 = vpack.c.bf16 %v331_v18, %v330_v17  ;;  %v490_v50 = vpack.c.bf16 %v345_v22, %v344_v21  ;;  %v121_v38 = vpack.c.bf16 %v90_v23, %v90_v23 }
  0x5f   :  { %975 = vmatpush3.bf16.msra.mxu1 %v461_v0  ;;  %954 = vmatprep.subr.bf16.mxu0 %v452_v1  ;;  %v377_v26 = vld [vmem:[%s1911_s1 + $0x7e8] sm:$0xff]  ;;  %v499_v30 = vpack.c.bf16 %v363_v20, %v362_v19  ;;  %v328_v31 = vld [vmem:[%s1911_s1 + $0x660] sm:$0xff]  ;;  %v342_v35 = vld [vmem:[%s1911_s1 + $0x6d0] sm:$0xff]  ;;  %v123_v41 = vpack.c.bf16 %v91_v27, %v91_v27 }
  0x60   :  { %976 = vmatprep.subr.bf16.mxu1 %v468_v5  ;;  %v329_v32 = vld [vmem:[%s1911_s1 + $0x668] sm:$0xff]  ;;  %v360_v33 = vld [vmem:[%s1911_s1 + $0x760] sm:$0xff]  ;;  %v506_v34 = vpack.c.bf16 %v377_v26, %v376_v25  ;;  %v343_v36 = vld [vmem:[%s1911_s1 + $0x6d8] sm:$0xff] }
  0x61   :  { %v361_v58 = vld [vmem:[%s1911_s1 + $0x768] sm:$0xff]  ;;  %v374_v39 = vld [vmem:[%s1911_s1 + $0x7d0] sm:$0xff]  ;;  %v375_v40 = vld [vmem:[%s1911_s1 + $0x7d8] sm:$0xff]  ;;  %v482_v42 = vpack.c.bf16 %v329_v32, %v328_v31  ;;  %v489_v44 = vpack.c.bf16 %v343_v36, %v342_v35 }
  0x62   :  { %955 = vmatpush3.bf16.msra.mxu0 %v444_v14  ;;  %v498_v43 = vpack.c.bf16 %v361_v58, %v360_v33  ;;  %v326_v45 = vld [vmem:[%s1911_s1 + $0x650] sm:$0xff]  ;;  %v327_v37 = vld [vmem:[%s1911_s1 + $0x658] sm:$0xff]  ;;  %v505_v47 = vpack.c.bf16 %v375_v40, %v374_v39  ;;  %v340_v49 = vld [vmem:[%s1911_s1 + $0x6c0] sm:$0xff] }
  0x63   :  { %977 = vmatpush3.bf16.msra.mxu1 %v460_v15  ;;  %984 = vmatprep.subr.bf16.mxu0 %v491_v16  ;;  %v358_v46 = vld [vmem:[%s1911_s1 + $0x750] sm:$0xff]  ;;  %v359_v48 = vld [vmem:[%s1911_s1 + $0x758] sm:$0xff]  ;;  %v341_v51 = vld [vmem:[%s1911_s1 + $0x6c8] sm:$0xff]  ;;  %v481_v54 = vpack.c.bf16 %v327_v37, %v326_v45 }
  0x64   :  { %1006 = vmatprep.subr.bf16.mxu1 %v507_v13  ;;  %v372_v52 = vld [vmem:[%s1911_s1 + $0x7c0] sm:$0xff]  ;;  %v373_v53 = vld [vmem:[%s1911_s1 + $0x7c8] sm:$0xff]  ;;  %v497_v55 = vpack.c.bf16 %v359_v48, %v358_v46  ;;  %v488_v56 = vpack.c.bf16 %v341_v51, %v340_v49  ;;  %v338_v63 = vld [vmem:[%s1911_s1 + $0x6b0] sm:$0xff]  ;;  %v120_v49 = vpack.c.bf16 %v1701_v9, %v1701_v9  ;;  %v122_v51 = vpack.c.bf16 %v1710_v12, %v1710_v12 }
  0x65   :  { %708 = vmatmul.mubr.bf16.vlgmr.msra.gmra.mxu0 %v116_v24  ;;  %v324_v57 = vld [vmem:[%s1911_s1 + $0x640] sm:$0xff]  ;;  %v325_v59 = vld [vmem:[%s1911_s1 + $0x648] sm:$0xff]  ;;  %v504_v61 = vpack.c.bf16 %v373_v53, %v372_v52  ;;  %v339_v0 = vld [vmem:[%s1911_s1 + $0x6b8] sm:$0xff] }
  0x66   :  { %748 = vmatmul.mubr.bf16.vlgmr.msra.gmra.mxu1 %v118_v28  ;;  %985 = vmatpush3.bf16.msra.mxu0 %v483_v29  ;;  %v356_v60 = vld [vmem:[%s1911_s1 + $0x740] sm:$0xff]  ;;  %v357_v62 = vld [vmem:[%s1911_s1 + $0x748] sm:$0xff]  ;;  %v370_v1 = vld [vmem:[%s1911_s1 + $0x7b0] sm:$0xff]  ;;  %v480_v3 = vpack.c.bf16 %v325_v59, %v324_v57  ;;  %v487_v5 = vpack.c.bf16 %v339_v0, %v338_v63 }
  0x67   :  { %1007 = vmatpush3.bf16.msra.mxu1 %v499_v30  ;;  %986 = vmatprep.subr.bf16.mxu0 %v490_v50  ;;  %v371_v2 = vld [vmem:[%s1911_s1 + $0x7b8] sm:$0xff]  ;;  %v496_v4 = vpack.c.bf16 %v357_v62, %v356_v60  ;;  %v322_v6 = vld [vmem:[%s1911_s1 + $0x630] sm:$0xff]  ;;  %v336_v14 = vld [vmem:[%s1911_s1 + $0x6a0] sm:$0xff] }
  0x68   :  { %1008 = vmatprep.subr.bf16.mxu1 %v506_v34  ;;  %787 = vmatprep.mubr.bf16.mxu0 %v121_v38  ;;  %v323_v7 = vld [vmem:[%s1911_s1 + $0x638] sm:$0xff]  ;;  %v354_v8 = vld [vmem:[%s1911_s1 + $0x730] sm:$0xff]  ;;  %v503_v10 = vpack.c.bf16 %v371_v2, %v370_v1  ;;  %v337_v15 = vld [vmem:[%s1911_s1 + $0x6a8] sm:$0xff] }
  0x69   :  { %827 = vmatprep.mubr.bf16.mxu1 %v123_v41  ;;  %v355_v11 = vld [vmem:[%s1911_s1 + $0x738] sm:$0xff]  ;;  %v368_v16 = vld [vmem:[%s1911_s1 + $0x7a0] sm:$0xff]  ;;  %v369_v17 = vld [vmem:[%s1911_s1 + $0x7a8] sm:$0xff]  ;;  %v479_v18 = vpack.c.bf16 %v323_v7, %v322_v6  ;;  %v486_v13 = vpack.c.bf16 %v337_v15, %v336_v14 }
  0x6a   :  { %987 = vmatpush3.bf16.msra.mxu0 %v482_v42  ;;  %v495_v19 = vpack.c.bf16 %v355_v11, %v354_v8  ;;  %v320_v20 = vld [vmem:[%s1911_s1 + $0x620] sm:$0xff]  ;;  %v321_v21 = vld [vmem:[%s1911_s1 + $0x628] sm:$0xff]  ;;  %v502_v23 = vpack.c.bf16 %v369_v17, %v368_v16  ;;  %v334_v25 = vld [vmem:[%s1911_s1 + $0x690] sm:$0xff] }
  0x6b   :  { %1009 = vmatpush3.bf16.msra.mxu1 %v498_v43  ;;  %988 = vmatprep.subr.bf16.mxu0 %v489_v44  ;;  %v352_v22 = vld [vmem:[%s1911_s1 + $0x720] sm:$0xff]  ;;  %v353_v24 = vld [vmem:[%s1911_s1 + $0x728] sm:$0xff]  ;;  %v335_v26 = vld [vmem:[%s1911_s1 + $0x698] sm:$0xff]  ;;  %v478_v29 = vpack.c.bf16 %v321_v21, %v320_v20 }
  0x6c   :  { %1010 = vmatprep.subr.bf16.mxu1 %v505_v47  ;;  %v366_v27 = vld [vmem:[%s1911_s1 + $0x790] sm:$0xff]  ;;  %v367_v28 = vld [vmem:[%s1911_s1 + $0x798] sm:$0xff]  ;;  %v494_v30 = vpack.c.bf16 %v353_v24, %v352_v22  ;;  %v485_v50 = vpack.c.bf16 %v335_v26, %v334_v25  ;;  %v332_v35 = vld [vmem:[%s1911_s1 + $0x680] sm:$0xff] }
  0x6d   :  { %v318_v31 = vld [vmem:[%s1911_s1 + $0x610] sm:$0xff]  ;;  %v319_v32 = vld [vmem:[%s1911_s1 + $0x618] sm:$0xff]  ;;  %v501_v34 = vpack.c.bf16 %v367_v28, %v366_v27  ;;  %v333_v36 = vld [vmem:[%s1911_s1 + $0x688] sm:$0xff] }
  0x6e   :  { %989 = vmatpush3.bf16.msra.mxu0 %v481_v54  ;;  %v350_v33 = vld [vmem:[%s1911_s1 + $0x710] sm:$0xff]  ;;  %v351_v58 = vld [vmem:[%s1911_s1 + $0x718] sm:$0xff]  ;;  %v364_v38 = vld [vmem:[%s1911_s1 + $0x780] sm:$0xff]  ;;  %v477_v40 = vpack.c.bf16 %v319_v32, %v318_v31  ;;  %v484_v42 = vpack.c.bf16 %v333_v36, %v332_v35 }
  0x6f   :  { %1011 = vmatpush3.bf16.msra.mxu1 %v497_v55  ;;  %990 = vmatprep.subr.bf16.mxu0 %v488_v56  ;;  %v365_v39 = vld [vmem:[%s1911_s1 + $0x788] sm:$0xff]  ;;  %v493_v41 = vpack.c.bf16 %v351_v58, %v350_v33  ;;  %v316_v43 = vld [vmem:[%s1911_s1 + $0x600] sm:$0xff] }
  0x70   :  { %1012 = vmatprep.subr.bf16.mxu1 %v504_v61  ;;  %v317_v44 = vld [vmem:[%s1911_s1 + $0x608] sm:$0xff]  ;;  %v500_v45 = vpack.c.bf16 %v365_v39, %v364_v38  ;;  %v348_v37 = vld [vmem:[%s1911_s1 + $0x700] sm:$0xff] }
  0x71   :  { %v349_v46 = vld [vmem:[%s1911_s1 + $0x708] sm:$0xff]  ;;  %v476_v47 = vpack.c.bf16 %v317_v44, %v316_v43  ;;  %v851_v54 = vld [vmem:[%s1912_s2] ss:$0 sm:$0xff]  ;;  %s1057_s2 = smov [#allocation2]  }
  0x72   :  { %991 = vmatpush3.bf16.msra.mxu0 %v480_v3  ;;  %v492_v48 = vpack.c.bf16 %v349_v46, %v348_v37  ;;  %s843_s15 = sshll.u32 %s1057_s2, 4  ;;  %s844_s15 = int_to_ptr.vmem [resolvable:$true] %s843_s15 }
  0x73   :  { %1013 = vmatpush3.bf16.msra.mxu1 %v496_v4  ;;  %992 = vmatprep.subr.bf16.mxu0 %v487_v5  ;;  %s1034_s16 = scalar_lea.vmem %s844_s15, 32  ;;  %p1039_p1 = scmp.lt.s32.totalorder %s844_s15, %s844_s15 }
  0x74   :  { %1014 = vmatprep.subr.bf16.mxu1 %v503_v10  ;;  %p1035_p0 = scmp.ne.s32.totalorder %s844_s15, %s1034_s16  ;;  %p1040_p2 = scmp.lt.s32.totalorder %s1034_s16, %s1034_s16 }
  0x76   :  { %993 = vmatpush3.bf16.msra.mxu0 %v479_v18  ;;  %p1041_p3 = por %p1040_p2, %p1039_p1 }
  0x77   :  { %1015 = vmatpush3.bf16.msra.mxu1 %v495_v19  ;;  %994 = vmatprep.subr.bf16.mxu0 %v486_v13 }
  0x78   :  { %1016 = vmatprep.subr.bf16.mxu1 %v502_v23  ;;  %p1042_p4 = pnand %p1041_p3, %p1035_p0 }
  0x7a   :  { %995 = vmatpush3.bf16.msra.mxu0 %v478_v29 }
  0x7b   :  { %1017 = vmatpush3.bf16.msra.mxu1 %v494_v30  ;;  %996 = vmatprep.subr.bf16.mxu0 %v485_v50 }
  0x7c   :  { %1018 = vmatprep.subr.bf16.mxu1 %v501_v34 }
  0x7e   :  { %997 = vmatpush3.bf16.msra.mxu0 %v477_v40 }
  0x7f   :  { %1019 = vmatpush3.bf16.msra.mxu1 %v493_v41  ;;  %998 = vmatprep.subr.bf16.mxu0 %v484_v42 }
  0x80   :  { %1020 = vmatprep.subr.bf16.mxu1 %v500_v45 }
  0x82   :  { %999 = vmatpush3.bf16.msra.mxu0 %v476_v47 }
  0x83   :  { %1021 = vmatpush3.bf16.msra.mxu1 %v492_v48 }
  0x85   :  { %788 = vmatmul.mubr.bf16.vlgmr.msra.gmra.mxu0 %v120_v49 }
  0x86   :  { %828 = vmatmul.mubr.bf16.vlgmr.msra.gmra.mxu1 %v122_v51 }
  0xe5   :  { %v868_v52 = vpop.f32.mrf.mxu0 }
  0xe6   :  { %v890_v53 = vpop.f32.mrf.mxu1 }
  0xe7   :  { %v869_v55 = vpop.f32.mrf.mxu0 }
  0xe8   :  { %v870_v56 = vadd.f32 %v869_v55, %v868_v52  ;;  %v891_v57 = vpop.f32.mrf.mxu1 }
  0xe9   :  { %v892_v59 = vadd.f32 %v891_v57, %v890_v53  ;;  %v871_v60 = vpop.f32.mrf.mxu0 }
  0xea   :  { %v550_v61 = vadd.f32 %v870_v56, %v851_v54  ;;  %v893_v9 = vpop.f32.mrf.mxu1 }
  0xeb   :  { %v872_v62 = vpop.f32.mrf.mxu0 }
  0xec   :  { %v590_v63 = vadd.f32 %v892_v59, %v550_v61  ;;  %v894_v0 = vpop.f32.mrf.mxu1 }
 0x105   :  { %v912_v12 = vpop.f32.mrf.mxu0 }
 0x106   :  { %v934_v1 = vpop.f32.mrf.mxu1 }
 0x107   :  { %v913_v2 = vpop.f32.mrf.mxu0 }
 0x108   :  { %v935_v3 = vpop.f32.mrf.mxu1  ;;  %v914_v19 = vadd.f32 %v913_v2, %v912_v12 }
 0x109   :  { %v915_v4 = vpop.f32.mrf.mxu0  ;;  %v936_v20 = vadd.f32 %v935_v3, %v934_v1 }
 0x10a   :  { %v937_v5 = vpop.f32.mrf.mxu1  ;;  %v630_v13 = vadd.f32 %v914_v19, %v590_v63 }
 0x10b   :  { %v916_v6 = vpop.f32.mrf.mxu0 }
 0x10c   :  { %v938_v7 = vpop.f32.mrf.mxu1  ;;  %v670_v22 = vadd.f32 %v936_v20, %v630_v13 }
 0x125   :  { %v956_v8 = vpop.f32.mrf.mxu0 }
 0x126   :  { %v978_v10 = vpop.f32.mrf.mxu1 }
 0x127   :  { %v957_v11 = vpop.f32.mrf.mxu0 }
 0x128   :  { %v979_v14 = vpop.f32.mrf.mxu1  ;;  %v958_v21 = vadd.f32 %v957_v11, %v956_v8 }
 0x129   :  { %v959_v15 = vpop.f32.mrf.mxu0  ;;  %v980_v24 = vadd.f32 %v979_v14, %v978_v10 }
 0x12a   :  { %v981_v16 = vpop.f32.mrf.mxu1  ;;  %v710_v23 = vadd.f32 %v958_v21, %v670_v22 }
 0x12b   :  { %v960_v17 = vpop.f32.mrf.mxu0 }
 0x12c   :  { %v982_v18 = vpop.f32.mrf.mxu1  ;;  %v750_v28 = vadd.f32 %v980_v24, %v710_v23 }
 0x145   :  { %v1000_v25 = vpop.f32.mrf.mxu0 }
 0x146   :  { %v1022_v26 = vpop.f32.mrf.mxu1 }
 0x147   :  { %v1001_v27 = vpop.f32.mrf.mxu0 }
 0x148   :  { %v1002_v29 = vadd.f32 %v1001_v27, %v1000_v25  ;;  %v1023_v30 = vpop.f32.mrf.mxu1 }
 0x149   :  { %v1003_v50 = vpop.f32.mrf.mxu0  ;;  %v1024_v32 = vadd.f32 %v1023_v30, %v1022_v26 }
 0x14a   :  { %v790_v31 = vadd.f32 %v1002_v29, %v750_v28  ;;  %v1025_v33 = vpop.f32.mrf.mxu1 }
 0x14b   :  { %v1004_v34 = vpop.f32.mrf.mxu0 }
 0x14c   :  { %v830_v58 = vadd.f32 %v1024_v32, %v790_v31  ;;  %v1026_v35 = vpop.f32.mrf.mxu1 }
 0x14e   :  { %836 = vst.msk [vmem:[#allocation2] sm:$0x3] %vm835_vm0, %v830_v58 }
 0x14f   :  { %1045 = shalt.err (!%p1042_p4)
}
 0x150   :  { %846 = dma.vmem_to_hbm [thread:$0]  %s844_s15, 32, %s1913_s3, [#allocation3]  }
 0x151   :  { %1054 = dma.done.wait [#allocation3], 32  }
 0x152   :  { %1055 = vsyncadd [#allocation3], 4294967264 }
 0x153   :  { %850 = vsyncpa [#allocation3], 1 }

// kernel: glam_forward.12
= control target key start
LH: loop header
LB: loop body
LE: loop exit
PB: predicated region body
PF: predicated region fallthrough
CT: control target
= control target key end

     0   :  { %s3435_s29 = smov 0   ;;  %s5098_s0 = inlined_call_operand.vmem [shape: f32[256,128], index: 0, kind: input, shape index: {}]   ;;  %s5099_s1 = inlined_call_operand.vmem [shape: f32[1,128], index: 1, kind: input, shape index: {}]   ;;  %s5100_s2 = inlined_call_operand.vmem [shape: f32[1,128], index: 2, kind: input, shape index: {}]   ;;  %s5101_s3 = inlined_call_operand.vmem [shape: f32[128,256], index: 3, kind: input, shape index: {}]   ;;  %s5102_s4 = inlined_call_operand.vmem [shape: f32[1,256], index: 4, kind: input, shape index: {}]   ;;  %s5103_s5 = inlined_call_operand.vmem [shape: f32[128,384], index: 5, kind: input, shape index: {}]   ;;  %s5104_s6 = inlined_call_operand.vmem [shape: f32[128,128], index: 6, kind: input, shape index: {}]   ;;  %s5105_s7 = inlined_call_operand.vmem [shape: f32[1,128], index: 7, kind: input, shape index: {}]   ;;  %s5106_s8 = inlined_call_operand.vmem [shape: f32[1,128], index: 8, kind: input, shape index: {}]   ;;  %s5107_s9 = inlined_call_operand.vmem [shape: f32[1,128], index: 9, kind: input, shape index: {}]   ;;  %s5108_s10 = inlined_call_operand.vmem [shape: f32[128,128], index: 10, kind: input, shape index: {}]   ;;  %s5109_s11 = inlined_call_operand.vmem [shape: f32[128,1], index: 11, kind: input, shape index: {}]   ;;  %s5110_s12 = inlined_call_operand.vmem [shape: f32[128,128], index: 12, kind: input, shape index: {}]   ;;  %s5111_s13 = inlined_call_operand.vmem [shape: f32[1,128], index: 13, kind: input, shape index: {}]   ;;  %s5112_s14 = inlined_call_operand.vmem [shape: f32[256,128], index: 14, kind: output, shape index: {}]  }
   0x1 LB: > { %s2790_s30 = sadd.s32 4294967295, %s3356_s29   ;;  %p2794_p0 = scmp.ge.s32.totalorder %s3356_s29, 1  ;;  %s3356_s29 = sphi %s3435_s29, %s24_s29  }
   0x2   : > { %p413_p1 = scmp.lt.s32.totalorder %s3356_s29, 3 }
   0x4   : > { %p414_p2 = pnand %p2794_p0, %p413_p1 }
   0x6   : > { %417 = sbr.rel (%p414_p2) target bundleno = 1840 (0x730), region = 76 }
   0xb   : > { %s2795_s15 = sshll.u32 %s2790_s30, 4  ;;  %v5114_v0 = vlaneseq  ;;  %v5113_v2 = vmov 0.0   ;;  %v784_v36 = vld [vmem:[%s5101_s3 + $0xe8] sm:$0xff]  ;;  %v786_v37 = vld [vmem:[%s5101_s3 + $0xf8] sm:$0xff]  ;;  %v1262_v40 = vld [vmem:[%s5103_s5 + $0x170] sm:$0xff] }
   0xc   : > { %p460_p3 = scmp.lt.s32.totalorder %s2795_s15, 31  ;;  %v1259_v38 = vld [vmem:[%s5103_s5 + $0x158] sm:$0xff]  ;;  %v802_v39 = vpack.c.bf16 %v786_v37, %v784_v36  ;;  %v783_v41 = vld [vmem:[%s5101_s3 + $0xe0] sm:$0xff]  ;;  %v785_v42 = vld [vmem:[%s5101_s3 + $0xf0] sm:$0xff] }
   0xd   : > { %v3444_v1 = vand.u32 127, %v5114_v0  ;;  %v1286_v43 = vpack.c.bf16 %v1262_v40, %v1259_v38  ;;  %v801_v44 = vpack.c.bf16 %v785_v42, %v783_v41  ;;  %v1258_v45 = vld [vmem:[%s5103_s5 + $0x150] sm:$0xff]  ;;  %v1261_v46 = vld [vmem:[%s5103_s5 + $0x168] sm:$0xff] }
   0xe   : > { %s5149_s15 = smov (!%p460_p3, %s2795_s15), 31  ;;  %815 = vmatprep.subr.bf16.mxu0 %v802_v39  ;;  %v1285_v47 = vpack.c.bf16 %v1261_v46, %v1258_v45  ;;  %v1253_v40 = vld [vmem:[%s5103_s5 + $0x128] sm:$0xff]  ;;  %v779_v45 = vld [vmem:[%s5101_s3 + $0xc0] sm:$0xff]  ;;  %v781_v46 = vld [vmem:[%s5101_s3 + $0xd0] sm:$0xff] }
   0xf   : > { %vm492_vm0 = vcmp.lt.s32.totalorder %v3444_v1, 16  ;;  %s2796_s16 = sshll.u32 %s5149_s15, 3  ;;  %1288 = vmatprep.subr.bf16.mxu1 %v1286_v43  ;;  %816 = vmatpush1.bf16.msra.mxu0 %v801_v44  ;;  %v1256_v44 = vld [vmem:[%s5103_s5 + $0x140] sm:$0xff]  ;;  %vm2022_vm1 = vcmp.lt.s32.totalorder %v3444_v1, 32  ;;  %v5135_v1 = vmov 0.0  }
  0x10   : > { %v3451_v3 = vsel %vm492_vm0, 1.0, %v5113_v2  ;;  %s3458_s19 = scalar_lea.vmem %s5098_s0, %s2796_s16  ;;  %1289 = vmatpush1.bf16.msra.mxu1 %v1285_v47  ;;  %s5048_s26 = scalar_lea.vmem %s5112_s14, %s2796_s16 }
  0x11   : > { %v3461_v4 = vld [vmem:[%s3458_s19] sm:$0xff]  ;;  %v3464_v5 = vld [vmem:[%s3458_s19 + $0x10] sm:$0xff]  ;;  %v3467_v6 = vld [vmem:[%s3458_s19 + $0x8] sm:$0xff] }
  0x12   : > { %v495_v7 = vmul.f32 %v3451_v3, %v3461_v4  ;;  %v497_v8 = vmul.f32 %v3451_v3, %v3464_v5  ;;  %v3474_v9 = vld [vmem:[%s3458_s19 + $0x18] sm:$0xff]  ;;  %v496_v10 = vmul.f32 %v3451_v3, %v3467_v6  ;;  %v3481_v12 = vld [vmem:[%s3458_s19 + $0x20] sm:$0xff]  ;;  %v3484_v13 = vld [vmem:[%s3458_s19 + $0x28] sm:$0xff] }
  0x13   : > { %v498_v11 = vmul.f32 %v3451_v3, %v3474_v9  ;;  %v499_v14 = vmul.f32 %v3451_v3, %v3481_v12  ;;  %v500_v15 = vmul.f32 %v3451_v3, %v3484_v13  ;;  %v3491_v16 = vld [vmem:[%s3458_s19 + $0x30] sm:$0xff]  ;;  %v3494_v17 = vld [vmem:[%s3458_s19 + $0x38] sm:$0xff]  ;;  %v3501_v20 = vld [vmem:[%s3458_s19 + $0x40] sm:$0xff] }
  0x14   : > { %511 = vadd.xlane.f32.xlu0 %v495_v7  ;;  %515 = vadd.xlane.f32.xlu1 %v497_v8  ;;  %v501_v18 = vmul.f32 %v3451_v3, %v3491_v16  ;;  %v502_v19 = vmul.f32 %v3451_v3, %v3494_v17  ;;  %v3504_v21 = vld [vmem:[%s3458_s19 + $0x48] sm:$0xff]  ;;  %v503_v22 = vmul.f32 %v3451_v3, %v3501_v20  ;;  %v3511_v24 = vld [vmem:[%s3458_s19 + $0x50] sm:$0xff]  ;;  %v3514_v25 = vld [vmem:[%s3458_s19 + $0x58] sm:$0xff] }
  0x15   : > { %v504_v23 = vmul.f32 %v3451_v3, %v3504_v21  ;;  %v505_v26 = vmul.f32 %v3451_v3, %v3511_v24  ;;  %v506_v27 = vmul.f32 %v3451_v3, %v3514_v25  ;;  %v3521_v28 = vld [vmem:[%s3458_s19 + $0x60] sm:$0xff]  ;;  %v3524_v29 = vld [vmem:[%s3458_s19 + $0x68] sm:$0xff]  ;;  %v3531_v32 = vld [vmem:[%s3458_s19 + $0x70] sm:$0xff] }
  0x16   : > { %v507_v30 = vmul.f32 %v3451_v3, %v3521_v28  ;;  %v508_v31 = vmul.f32 %v3451_v3, %v3524_v29  ;;  %v3534_v33 = vld [vmem:[%s3458_s19 + $0x78] sm:$0xff]  ;;  %v509_v34 = vmul.f32 %v3451_v3, %v3531_v32 }
  0x17   : > { %v510_v35 = vmul.f32 %v3451_v3, %v3534_v33 }
  0x18   : > { %513 = vadd.xlane.f32.xlu0 %v496_v10  ;;  %517 = vadd.xlane.f32.xlu1 %v498_v11 }
  0x1c   : > { %519 = vadd.xlane.f32.xlu0 %v499_v14  ;;  %521 = vadd.xlane.f32.xlu1 %v500_v15 }
  0x20   : > { %523 = vadd.xlane.f32.xlu0 %v501_v18  ;;  %525 = vadd.xlane.f32.xlu1 %v502_v19 }
  0x24   : > { %527 = vadd.xlane.f32.xlu0 %v503_v22  ;;  %529 = vadd.xlane.f32.xlu1 %v504_v23 }
  0x28   : > { %531 = vadd.xlane.f32.xlu0 %v505_v26  ;;  %533 = vadd.xlane.f32.xlu1 %v506_v27 }
  0x2c   : > { %535 = vadd.xlane.f32.xlu0 %v507_v30  ;;  %537 = vadd.xlane.f32.xlu1 %v508_v31 }
  0x30   : > { %539 = vadd.xlane.f32.xlu0 %v509_v34  ;;  %541 = vadd.xlane.f32.xlu1 %v510_v35 }
  0x9d   : > { %v512_v48 = vpop.xlane.xlu0 %511  ;;  %v516_v49 = vpop.xlane.xlu1 %515 }
  0x9e   : > { %v543_v50 = vmul.f32 0.0625, %v512_v48  ;;  %v545_v51 = vmul.f32 0.0625, %v516_v49  ;;  %v1283_v49 = vpack.c.bf16 %v1256_v44, %v1253_v40  ;;  %v773_v44 = vld [vmem:[%s5101_s3 + $0x90] sm:$0xff] }
  0xa0   : > { %v559_v52 = vsub.f32 %v3461_v4, %v543_v50  ;;  %v561_v53 = vsub.f32 %v3464_v5, %v545_v51  ;;  %v799_v50 = vpack.c.bf16 %v781_v46, %v779_v45  ;;  %v1252_v51 = vld [vmem:[%s5103_s5 + $0x120] sm:$0xff]  ;;  %1290 = vmatprep.subr.bf16.mxu1 %v1283_v49 }
  0xa1   : > { %v514_v54 = vpop.xlane.xlu0 %513  ;;  %v518_v55 = vpop.xlane.xlu1 %517 }
  0xa2   : > { %v544_v56 = vmul.f32 0.0625, %v514_v54  ;;  %v546_v57 = vmul.f32 0.0625, %v518_v55  ;;  %v3567_v58 = vmul.f32 %v3451_v3, %v559_v52  ;;  %v3570_v59 = vmul.f32 %v3451_v3, %v561_v53  ;;  %v1255_v52 = vld [vmem:[%s5103_s5 + $0x138] sm:$0xff] }
  0xa4   : > { %v560_v60 = vsub.f32 %v3467_v6, %v544_v56  ;;  %v562_v61 = vsub.f32 %v3474_v9, %v546_v57  ;;  %v591_v62 = vmul.f32 %v3567_v58, %v3567_v58  ;;  %v593_v5 = vmul.f32 %v3570_v59, %v3570_v59 }
  0xa5   : > { %v520_v63 = vpop.xlane.xlu0 %519  ;;  %v522_v4 = vpop.xlane.xlu1 %521  ;;  %v1282_v57 = vpack.c.bf16 %v1255_v52, %v1252_v51 }
  0xa6   : > { %v547_v7 = vmul.f32 0.0625, %v520_v63  ;;  %607 = vadd.xlane.f32.xlu0 %v591_v62  ;;  %v548_v8 = vmul.f32 0.0625, %v522_v4  ;;  %v3579_v10 = vmul.f32 %v3451_v3, %v560_v60  ;;  %v3582_v11 = vmul.f32 %v3451_v3, %v562_v61  ;;  %v776_v63 = vld [vmem:[%s5101_s3 + $0xa8] sm:$0xff]  ;;  %v778_v4 = vld [vmem:[%s5101_s3 + $0xb8] sm:$0xff] }
  0xa7   : > { %1291 = vmatpush1.bf16.msra.mxu1 %v1282_v57  ;;  %v768_v57 = vld [vmem:[%s5101_s3 + $0x68] sm:$0xff] }
  0xa8   : > { %v563_v6 = vsub.f32 %v3481_v12, %v547_v7  ;;  %v564_v9 = vsub.f32 %v3484_v13, %v548_v8  ;;  %v592_v14 = vmul.f32 %v3579_v10, %v3579_v10  ;;  %v594_v19 = vmul.f32 %v3582_v11, %v3582_v11 }
  0xa9   : > { %v524_v15 = vpop.xlane.xlu0 %523  ;;  %v526_v18 = vpop.xlane.xlu1 %525  ;;  %v798_v8 = vpack.c.bf16 %v778_v4, %v776_v63  ;;  %v767_v63 = vld [vmem:[%s5101_s3 + $0x60] sm:$0xff]  ;;  %v769_v4 = vld [vmem:[%s5101_s3 + $0x70] sm:$0xff] }
  0xaa   : > { %v549_v22 = vmul.f32 0.0625, %v524_v15  ;;  %611 = vadd.xlane.f32.xlu0 %v593_v5  ;;  %609 = vadd.xlane.f32.xlu1 %v592_v14  ;;  %v550_v23 = vmul.f32 0.0625, %v526_v18  ;;  %v3591_v26 = vmul.f32 %v3451_v3, %v563_v6  ;;  %v3594_v27 = vmul.f32 %v3451_v3, %v564_v9  ;;  %v1247_v5 = vld [vmem:[%s5103_s5 + $0xf8] sm:$0xff]  ;;  %v1250_v6 = vld [vmem:[%s5103_s5 + $0x110] sm:$0xff]  ;;  %v775_v9 = vld [vmem:[%s5101_s3 + $0xa0] sm:$0xff] }
  0xab   : > { %v777_v14 = vld [vmem:[%s5101_s3 + $0xb0] sm:$0xff] }
  0xac   : > { %v565_v12 = vsub.f32 %v3491_v16, %v549_v22  ;;  %v566_v13 = vsub.f32 %v3494_v17, %v550_v23  ;;  %v595_v30 = vmul.f32 %v3591_v26, %v3591_v26  ;;  %v596_v35 = vmul.f32 %v3594_v27, %v3594_v27  ;;  %v780_v16 = vld [vmem:[%s5101_s3 + $0xc8] sm:$0xff]  ;;  %v782_v17 = vld [vmem:[%s5101_s3 + $0xd8] sm:$0xff]  ;;  %v1246_v23 = vld [vmem:[%s5103_s5 + $0xf0] sm:$0xff] }
  0xad   : > { %v528_v31 = vpop.xlane.xlu0 %527  ;;  %v530_v34 = vpop.xlane.xlu1 %529 }
  0xae   : > { %v551_v36 = vmul.f32 0.0625, %v528_v31  ;;  %613 = vadd.xlane.f32.xlu1 %v594_v19  ;;  %615 = vadd.xlane.f32.xlu0 %v595_v30  ;;  %v552_v37 = vmul.f32 0.0625, %v530_v34  ;;  %v3603_v38 = vmul.f32 %v3451_v3, %v565_v12  ;;  %v3606_v39 = vmul.f32 %v3451_v3, %v566_v13  ;;  %v1249_v12 = vld [vmem:[%s5103_s5 + $0x108] sm:$0xff] }
  0xaf   : > { %v1280_v13 = vpack.c.bf16 %v1250_v6, %v1247_v5  ;;  %v797_v30 = vpack.c.bf16 %v777_v14, %v775_v9  ;;  %v1279_v31 = vpack.c.bf16 %v1249_v12, %v1246_v23  ;;  %v793_v6 = vpack.c.bf16 %v769_v4, %v767_v63  ;;  %v1232_v12 = vld [vmem:[%s5103_s5 + $0x80] sm:$0xff] }
  0xb0   : > { %v567_v41 = vsub.f32 %v3501_v20, %v551_v36  ;;  %v568_v42 = vsub.f32 %v3504_v21, %v552_v37  ;;  %v597_v43 = vmul.f32 %v3603_v38, %v3603_v38  ;;  %v598_v20 = vmul.f32 %v3606_v39, %v3606_v39  ;;  %v772_v37 = vld [vmem:[%s5101_s3 + $0x88] sm:$0xff]  ;;  %v1260_v4 = vld [vmem:[%s5103_s5 + $0x160] sm:$0xff] }
  0xb1   : > { %v532_v47 = vpop.xlane.xlu0 %531  ;;  %v534_v48 = vpop.xlane.xlu1 %533  ;;  %v800_v21 = vpack.c.bf16 %v782_v17, %v780_v16  ;;  %v774_v16 = vld [vmem:[%s5101_s3 + $0x98] sm:$0xff]  ;;  %v1241_v17 = vld [vmem:[%s5103_s5 + $0xc8] sm:$0xff]  ;;  %1292 = vmatprep.subr.bf16.mxu1 %v1280_v13  ;;  %v763_v13 = vld [vmem:[%s5101_s3 + $0x40] sm:$0xff]  ;;  %v3359_v63 = vmov 0  }
  0xb2   : > { %v553_v53 = vmul.f32 0.0625, %v532_v47  ;;  %617 = vadd.xlane.f32.xlu1 %v596_v35  ;;  %619 = vadd.xlane.f32.xlu0 %v597_v43  ;;  %v554_v54 = vmul.f32 0.0625, %v534_v48  ;;  %v3639_v55 = vmul.f32 %v3451_v3, %v567_v41  ;;  %v3642_v56 = vmul.f32 %v3451_v3, %v568_v42  ;;  %v1244_v42 = vld [vmem:[%s5103_s5 + $0xe0] sm:$0xff] }
  0xb3   : > { %817 = vmatprep.subr.bf16.mxu0 %v800_v21  ;;  %v771_v43 = vld [vmem:[%s5101_s3 + $0x80] sm:$0xff]  ;;  %v1243_v21 = vld [vmem:[%s5103_s5 + $0xd8] sm:$0xff]  ;;  %1293 = vmatpush1.bf16.msra.mxu1 %v1279_v31  ;;  %v1277_v49 = vpack.c.bf16 %v1244_v42, %v1241_v17  ;;  %v760_v17 = vld [vmem:[%s5101_s3 + $0x28] sm:$0xff] }
  0xb4   : > { %v569_v60 = vsub.f32 %v3511_v24, %v553_v53  ;;  %v570_v61 = vsub.f32 %v3514_v25, %v554_v54  ;;  %v599_v62 = vmul.f32 %v3639_v55, %v3639_v55  ;;  %818 = vmatpush1.bf16.msra.mxu0 %v799_v50  ;;  %v600_v25 = vmul.f32 %v3642_v56, %v3642_v56  ;;  %v759_v42 = vld [vmem:[%s5101_s3 + $0x20] sm:$0xff] }
  0xb5   : > { %v536_v7 = vpop.xlane.xlu0 %535  ;;  %v538_v24 = vpop.xlane.xlu1 %537  ;;  %819 = vmatprep.subr.bf16.mxu0 %v798_v8  ;;  %v795_v50 = vpack.c.bf16 %v773_v44, %v771_v43  ;;  %1294 = vmatprep.subr.bf16.mxu1 %v1277_v49  ;;  %v1237_v8 = vld [vmem:[%s5103_s5 + $0xa8] sm:$0xff]  ;;  %v761_v43 = vld [vmem:[%s5101_s3 + $0x30] sm:$0xff] }
  0xb6   : > { %v555_v15 = vmul.f32 0.0625, %v536_v7  ;;  %621 = vadd.xlane.f32.xlu1 %v598_v20  ;;  %623 = vadd.xlane.f32.xlu0 %v599_v62  ;;  %v556_v18 = vmul.f32 0.0625, %v538_v24  ;;  %v3669_v19 = vmul.f32 %v3451_v3, %v569_v60  ;;  %v3672_v22 = vmul.f32 %v3451_v3, %v570_v61  ;;  %v1240_v20 = vld [vmem:[%s5103_s5 + $0xc0] sm:$0xff]  ;;  %v770_v60 = vld [vmem:[%s5101_s3 + $0x78] sm:$0xff]  ;;  %v1238_v62 = vld [vmem:[%s5103_s5 + $0xb0] sm:$0xff] }
  0xb7   : > { %v1276_v51 = vpack.c.bf16 %v1243_v21, %v1240_v20  ;;  %v1235_v61 = vld [vmem:[%s5103_s5 + $0x98] sm:$0xff]  ;;  %v1225_v20 = vld [vmem:[%s5103_s5 + $0x48] sm:$0xff]  ;;  %847 = vmatprep.mubr.bf16.mxu0 %v3359_v63  ;;  %1320 = vmatprep.mubr.bf16.mxu1 %v3359_v63 }
  0xb8   : > { %v571_v34 = vsub.f32 %v3521_v28, %v555_v15  ;;  %v572_v35 = vsub.f32 %v3524_v29, %v556_v18  ;;  %v601_v36 = vmul.f32 %v3669_v19, %v3669_v19  ;;  %v602_v28 = vmul.f32 %v3672_v22, %v3672_v22  ;;  %820 = vmatpush1.bf16.msra.mxu0 %v797_v30  ;;  %v766_v15 = vld [vmem:[%s5101_s3 + $0x58] sm:$0xff]  ;;  %v1229_v18 = vld [vmem:[%s5103_s5 + $0x68] sm:$0xff]  ;;  %v765_v30 = vld [vmem:[%s5101_s3 + $0x50] sm:$0xff] }
  0xb9   : > { %v540_v40 = vpop.xlane.xlu0 %539  ;;  %v542_v41 = vpop.xlane.xlu1 %541  ;;  %v796_v29 = vpack.c.bf16 %v774_v16, %v772_v37  ;;  %v1274_v24 = vpack.c.bf16 %v1238_v62, %v1235_v61  ;;  %1295 = vmatpush1.bf16.msra.mxu1 %v1276_v51  ;;  %v1231_v37 = vld [vmem:[%s5103_s5 + $0x78] sm:$0xff]  ;;  %v756_v49 = vld [vmem:[%s5101_s3 + $0x8] sm:$0xff]  ;;  %3108 = vset.pattern.permute.xlu1 %v3359_v63 }
  0xba   : > { %v557_v45 = vmul.f32 0.0625, %v540_v40  ;;  %625 = vadd.xlane.f32.xlu1 %v600_v25  ;;  %627 = vadd.xlane.f32.xlu0 %v601_v36  ;;  %v558_v46 = vmul.f32 0.0625, %v542_v41  ;;  %v3705_v47 = vmul.f32 %v3451_v3, %v571_v34  ;;  %v3708_v48 = vmul.f32 %v3451_v3, %v572_v35  ;;  %v1234_v25 = vld [vmem:[%s5103_s5 + $0x90] sm:$0xff]  ;;  %v1228_v36 = vld [vmem:[%s5103_s5 + $0x60] sm:$0xff]  ;;  %v762_v40 = vld [vmem:[%s5101_s3 + $0x38] sm:$0xff] }
  0xbb   : > { %821 = vmatprep.subr.bf16.mxu0 %v796_v29  ;;  %v1273_v9 = vpack.c.bf16 %v1237_v8, %v1234_v25  ;;  %1296 = vmatprep.subr.bf16.mxu1 %v1274_v24  ;;  %v1271_v34 = vpack.c.bf16 %v1232_v12, %v1229_v18  ;;  %v791_v35 = vpack.c.bf16 %v765_v30, %v763_v13  ;;  %v1223_v41 = vld [vmem:[%s5103_s5 + $0x38] sm:$0xff]  ;;  %v1226_v29 = vld [vmem:[%s5103_s5 + $0x50] sm:$0xff]  ;;  %v1217_v51 = vld [vmem:[%s5103_s5 + $0x8] sm:$0xff] }
  0xbc   : > { %v573_v52 = vsub.f32 %v3531_v32, %v557_v45  ;;  %v574_v53 = vsub.f32 %v3534_v33, %v558_v46  ;;  %v603_v54 = vmul.f32 %v3705_v47, %v3705_v47  ;;  %v604_v32 = vmul.f32 %v3708_v48, %v3708_v48  ;;  %822 = vmatpush1.bf16.msra.mxu0 %v795_v50  ;;  %v1222_v46 = vld [vmem:[%s5103_s5 + $0x30] sm:$0xff]  ;;  %v758_v50 = vld [vmem:[%s5101_s3 + $0x18] sm:$0xff] }
  0xbd   : > { %v794_v33 = vpack.c.bf16 %v770_v60, %v768_v57  ;;  %1297 = vmatpush1.bf16.msra.mxu1 %v1273_v9  ;;  %v1270_v16 = vpack.c.bf16 %v1231_v37, %v1228_v36  ;;  %v1268_v44 = vpack.c.bf16 %v1226_v29, %v1223_v41  ;;  %v789_v45 = vpack.c.bf16 %v761_v43, %v759_v42  ;;  %v757_v57 = vld [vmem:[%s5101_s3 + $0x10] sm:$0xff]  ;;  %v1263_v24 = vld [vmem:[%s5103_s5 + $0x178] sm:$0xff] }
  0xbe   : > { %629 = vadd.xlane.f32.xlu1 %v602_v28  ;;  %631 = vadd.xlane.f32.xlu0 %v603_v54  ;;  %v3741_v5 = vmul.f32 %v3451_v3, %v573_v52  ;;  %v3744_v7 = vmul.f32 %v3451_v3, %v574_v53  ;;  %v764_v3 = vld [vmem:[%s5101_s3 + $0x48] sm:$0xff]  ;;  %v790_v28 = vpack.c.bf16 %v762_v40, %v760_v17  ;;  %v1220_v53 = vld [vmem:[%s5103_s5 + $0x20] sm:$0xff] }
  0xbf   : > { %823 = vmatprep.subr.bf16.mxu0 %v794_v33  ;;  %v792_v23 = vpack.c.bf16 %v766_v15, %v764_v3  ;;  %1298 = vmatprep.subr.bf16.mxu1 %v1271_v34  ;;  %v1267_v21 = vpack.c.bf16 %v1225_v20, %v1222_v46  ;;  %v788_v52 = vpack.c.bf16 %v758_v50, %v756_v49  ;;  %v755_v54 = vld [vmem:[%s5101_s3] sm:$0xff]  ;;  %v1219_v33 = vld [vmem:[%s5103_s5 + $0x18] sm:$0xff] }
  0xc0   : > { %v605_v14 = vmul.f32 %v3741_v5, %v3741_v5  ;;  %824 = vmatpush1.bf16.msra.mxu0 %v793_v6  ;;  %v606_v31 = vmul.f32 %v3744_v7, %v3744_v7  ;;  %v1265_v60 = vpack.c.bf16 %v1220_v53, %v1217_v51  ;;  %v787_v61 = vpack.c.bf16 %v757_v57, %v755_v54  ;;  %v3852_v53 = vld [vmem:[%s5100_s2] ss:$0 sm:$0xff] }
  0xc1   : > { %825 = vmatprep.subr.bf16.mxu0 %v792_v23  ;;  %1299 = vmatpush1.bf16.msra.mxu1 %v1270_v16  ;;  %v3838_v25 = vpack.c.bf16 %v1263_v24, %v1260_v4  ;;  %v1257_v4 = vld [vmem:[%s5103_s5 + $0x148] sm:$0xff] }
  0xc2   : > { %633 = vadd.xlane.f32.xlu1 %v604_v32  ;;  %635 = vadd.xlane.f32.xlu0 %v605_v14  ;;  %v1216_v32 = vld [vmem:[%s5103_s5] sm:$0xff] }
  0xc3   : > { %1300 = vmatprep.subr.bf16.mxu1 %v1268_v44  ;;  %v1264_v62 = vpack.c.bf16 %v1219_v33, %v1216_v32  ;;  %3107 = vset.pattern.permute.xlu0 %v3359_v63  ;;  %v3845_v44 = vld [vmem:[%s5099_s1] ss:$0 sm:$0xff] }
  0xc4   : > { %826 = vmatpush1.bf16.msra.mxu0 %v791_v35 }
  0xc5   : > { %827 = vmatprep.subr.bf16.mxu0 %v790_v28  ;;  %1301 = vmatpush1.bf16.msra.mxu1 %v1267_v21 }
  0xc6   : > { %637 = vadd.xlane.f32.xlu1 %v606_v31  ;;  %1302 = vmatprep.subr.bf16.mxu1 %v1265_v60 }
  0xc8   : > { %828 = vmatpush1.bf16.msra.mxu0 %v789_v45 }
  0xc9   : > { %829 = vmatprep.subr.bf16.mxu0 %v788_v52  ;;  %1303 = vmatpush1.bf16.msra.mxu1 %v1264_v62  ;;  %v1254_v62 = vld [vmem:[%s5103_s5 + $0x130] sm:$0xff] }
  0xcc   : > { %830 = vmatpush1.bf16.msra.mxu0 %v787_v61 }
  0xcd   : > { %2905 = vmatprep.subr.bf16.mxu0 %v3838_v25 }
 0x12f   : > { %v608_v8 = vpop.xlane.xlu0 %607 }
 0x130   : > { %v639_v6 = vmul.f32 0.0625, %v608_v8 }
 0x132   : > { %v655_v9 = vadd.f32 1e-05, %v639_v6 }
 0x133   : > { %v610_v14 = vpop.xlane.xlu1 %609  ;;  %v612_v3 = vpop.xlane.xlu0 %611 }
 0x134   : > { %3109 = vrsqrt.f32 %v655_v9  ;;  %v640_v15 = vmul.f32 0.0625, %v610_v14  ;;  %v641_v18 = vmul.f32 0.0625, %v612_v3  ;;  %v1284_v3 = vpack.c.bf16 %v1257_v4, %v1254_v62 }
 0x136   : > { %v656_v23 = vadd.f32 1e-05, %v640_v15  ;;  %v657_v12 = vadd.f32 1e-05, %v641_v18  ;;  %v1251_v18 = vld [vmem:[%s5103_s5 + $0x118] sm:$0xff] }
 0x137   : > { %v614_v13 = vpop.xlane.xlu1 %613  ;;  %v616_v30 = vpop.xlane.xlu0 %615 }
 0x138   : > { %3111 = vrsqrt.f32 %v656_v23  ;;  %v642_v31 = vmul.f32 0.0625, %v614_v13  ;;  %v643_v35 = vmul.f32 0.0625, %v616_v30 }
 0x139   : > { %3113 = vrsqrt.f32 %v657_v12 }
 0x13a   : > { %v658_v34 = vadd.f32 1e-05, %v642_v31  ;;  %v659_v16 = vadd.f32 1e-05, %v643_v35 }
 0x13b   : > { %v618_v36 = vpop.xlane.xlu1 %617  ;;  %v620_v40 = vpop.xlane.xlu0 %619 }
 0x13c   : > { %3115 = vrsqrt.f32 %v658_v34  ;;  %v644_v37 = vmul.f32 0.0625, %v618_v36  ;;  %v645_v42 = vmul.f32 0.0625, %v620_v40 }
 0x13e   : > { %v660_v17 = vadd.f32 1e-05, %v644_v37  ;;  %v661_v20 = vadd.f32 1e-05, %v645_v42 }
 0x13f   : > { %v622_v41 = vpop.xlane.xlu1 %621  ;;  %v624_v49 = vpop.xlane.xlu0 %623 }
 0x140   : > { %3117 = vrsqrt.f32 %v660_v17  ;;  %v646_v28 = vmul.f32 0.0625, %v622_v41  ;;  %v647_v60 = vmul.f32 0.0625, %v624_v49  ;;  %v1245_v17 = vld [vmem:[%s5103_s5 + $0xe8] sm:$0xff] }
 0x141   : > { %v3110_v29 = vpop.eup %3109  ;;  %3119 = vrsqrt.f32 %v659_v16  ;;  %v1242_v16 = vld [vmem:[%s5103_s5 + $0xd0] sm:$0xff] }
 0x142   : > { %v687_v43 = vmul.f32 %v3110_v29, %v3567_v58  ;;  %v662_v45 = vadd.f32 1e-05, %v646_v28  ;;  %v663_v15 = vadd.f32 1e-05, %v647_v60  ;;  %v1278_v29 = vpack.c.bf16 %v1245_v17, %v1242_v16  ;;  %v1233_v60 = vld [vmem:[%s5103_s5 + $0x88] sm:$0xff] }
 0x143   : > { %v626_v21 = vpop.xlane.xlu1 %625  ;;  %v628_v12 = vpop.xlane.xlu0 %627 }
 0x144   : > { %v709_v51 = vmul.f32 %v3845_v44, %v687_v43  ;;  %3121 = vrsqrt.f32 %v662_v45  ;;  %v648_v58 = vmul.f32 0.0625, %v626_v21  ;;  %v649_v35 = vmul.f32 0.0625, %v628_v12  ;;  %v1236_v45 = vld [vmem:[%s5103_s5 + $0xa0] sm:$0xff] }
 0x145   : > { %v3112_v46 = vpop.eup %3111  ;;  %3123 = vrsqrt.f32 %v661_v20 }
 0x146   : > { %v688_v50 = vmul.f32 %v3112_v46, %v3579_v10  ;;  %v3114_v52 = vpop.eup %3113  ;;  %v731_v61 = vadd.f32 %v3852_v53, %v709_v51  ;;  %v664_v24 = vadd.f32 1e-05, %v648_v58  ;;  %v1239_v46 = vld [vmem:[%s5103_s5 + $0xb8] sm:$0xff] }
 0x147   : > { %v689_v10 = vmul.f32 %v3114_v52, %v3570_v59  ;;  %v630_v9 = vpop.xlane.xlu1 %629  ;;  %v632_v20 = vpop.xlane.xlu0 %631  ;;  %v1275_v51 = vpack.c.bf16 %v1239_v46, %v1236_v45 }
 0x148   : > { %v710_v54 = vmul.f32 %v3845_v44, %v688_v50  ;;  %3125 = vrsqrt.f32 %v664_v24  ;;  %v650_v13 = vmul.f32 0.0625, %v630_v9  ;;  %v651_v52 = vmul.f32 0.0625, %v632_v20  ;;  %v1224_v24 = vld [vmem:[%s5103_s5 + $0x40] sm:$0xff] }
 0x149   : > { %v3116_v57 = vpop.eup %3115  ;;  %v711_v59 = vmul.f32 %v3845_v44, %v689_v10  ;;  %3127 = vrsqrt.f32 %v663_v15 }
 0x14a   : > { %v732_v32 = vadd.f32 %v3852_v53, %v710_v54  ;;  %v690_v33 = vmul.f32 %v3116_v57, %v3582_v11  ;;  %v1248_v11 = vld [vmem:[%s5103_s5 + $0x100] sm:$0xff]  ;;  %v666_v40 = vadd.f32 1e-05, %v650_v13  ;;  %v1230_v57 = vld [vmem:[%s5103_s5 + $0x70] sm:$0xff]  ;;  %v667_v4 = vadd.f32 1e-05, %v651_v52 }
 0x14b   : > { %v1281_v34 = vpack.c.bf16 %v1251_v18, %v1248_v11  ;;  %v733_v36 = vadd.f32 %v3852_v53, %v711_v59  ;;  %v634_v28 = vpop.xlane.xlu1 %633  ;;  %v1272_v62 = vpack.c.bf16 %v1233_v60, %v1230_v57  ;;  %v1218_v13 = vld [vmem:[%s5103_s5 + $0x10] sm:$0xff] }
 0x14c   : > { %v3865_v8 = vpack.c.bf16 %v732_v32, %v731_v61  ;;  %v712_v14 = vmul.f32 %v3845_v44, %v690_v33  ;;  %3129 = vrsqrt.f32 %v666_v40  ;;  %v652_v21 = vmul.f32 0.0625, %v634_v28 }
 0x14d   : > { %v3118_v6 = vpop.eup %3117 }
 0x14e   : > { %848 = vmatmul.mubr.bf16.vlgmr.msra.gmra.mxu0 %v3865_v8  ;;  %1321 = vmatmul.mubr.bf16.vlgmr.msra.gmra.mxu1 %v3865_v8  ;;  %v3120_v23 = vpop.eup %3119  ;;  %v734_v30 = vadd.f32 %v3852_v53, %v712_v14  ;;  %v692_v31 = vmul.f32 %v3118_v6, %v3594_v27  ;;  %v668_v61 = vadd.f32 1e-05, %v652_v21  ;;  %v1227_v6 = vld [vmem:[%s5103_s5 + $0x58] sm:$0xff]  ;;  %v636_v14 = vpop.xlane.xlu0 %635 }
 0x14f   : > { %857 = vmatprep.mubr.bf16.mxu0 %v3359_v63  ;;  %1330 = vmatprep.mubr.bf16.mxu1 %v3359_v63  ;;  %v691_v37 = vmul.f32 %v3120_v23, %v3591_v26  ;;  %v665_v26 = vadd.f32 1e-05, %v649_v35  ;;  %v638_v33 = vpop.xlane.xlu1 %637  ;;  %v1269_v11 = vpack.c.bf16 %v1227_v6, %v1224_v24  ;;  %v653_v18 = vmul.f32 0.0625, %v636_v14 }
 0x150   : > { %2906 = vmatpush3.bf16.msra.mxu0 %v3838_v25  ;;  %v3890_v27 = vpack.c.bf16 %v734_v30, %v733_v36  ;;  %v714_v25 = vmul.f32 %v3845_v44, %v692_v31  ;;  %v1221_v30 = vld [vmem:[%s5103_s5 + $0x28] sm:$0xff] }
 0x151   : > { %2907 = vmatprep.subr.bf16.mxu0 %v1284_v3  ;;  %v3122_v41 = vpop.eup %3121  ;;  %v713_v43 = vmul.f32 %v3845_v44, %v691_v37  ;;  %3131 = vrsqrt.f32 %v665_v26  ;;  %v1266_v36 = vpack.c.bf16 %v1221_v30, %v1218_v13  ;;  %v669_v37 = vadd.f32 1e-05, %v653_v18 }
 0x152   : > { %v3124_v42 = vpop.eup %3123  ;;  %v736_v49 = vadd.f32 %v3852_v53, %v714_v25  ;;  %v694_v50 = vmul.f32 %v3122_v41, %v3606_v39  ;;  %3133 = vrsqrt.f32 %v668_v61 }
 0x153   : > { %v735_v58 = vadd.f32 %v3852_v53, %v713_v43  ;;  %v693_v54 = vmul.f32 %v3124_v42, %v3603_v38  ;;  %3135 = vrsqrt.f32 %v667_v4 }
 0x154   : > { %2908 = vmatpush3.bf16.msra.mxu0 %v1284_v3  ;;  %v716_v39 = vmul.f32 %v3845_v44, %v694_v50  ;;  %v654_v3 = vmul.f32 0.0625, %v638_v33 }
 0x155   : > { %2909 = vmatprep.subr.bf16.mxu0 %v1281_v34  ;;  %v3914_v32 = vpack.c.bf16 %v736_v49, %v735_v58  ;;  %v3126_v10 = vpop.eup %3125  ;;  %v715_v38 = vmul.f32 %v3845_v44, %v693_v54 }
 0x156   : > { %858 = vmatmul.mubr.bf16.gmra.mxu0 %v3890_v27  ;;  %1331 = vmatmul.mubr.bf16.gmra.mxu1 %v3890_v27  ;;  %v3128_v9 = vpop.eup %3127  ;;  %v738_v15 = vadd.f32 %v3852_v53, %v716_v39  ;;  %v696_v59 = vmul.f32 %v3126_v10, %v3642_v56  ;;  %v670_v31 = vadd.f32 1e-05, %v654_v3 }
 0x157   : > { %867 = vmatprep.mubr.bf16.mxu0 %v3359_v63  ;;  %1340 = vmatprep.mubr.bf16.mxu1 %v3359_v63  ;;  %v737_v23 = vadd.f32 %v3852_v53, %v715_v38  ;;  %v695_v12 = vmul.f32 %v3128_v9, %v3639_v55 }
 0x158   : > { %2910 = vmatpush3.bf16.msra.mxu0 %v1281_v34  ;;  %v718_v56 = vmul.f32 %v3845_v44, %v696_v59  ;;  %3137 = vrsqrt.f32 %v670_v31 }
 0x159   : > { %2911 = vmatprep.subr.bf16.mxu0 %v1278_v29  ;;  %v750_v34 = vpack.c.bf16 %v738_v15, %v737_v23  ;;  %v3130_v35 = vpop.eup %3129  ;;  %v717_v55 = vmul.f32 %v3845_v44, %v695_v12  ;;  %3139 = vrsqrt.f32 %v669_v37 }
 0x15a   : > { %v740_v17 = vadd.f32 %v3852_v53, %v718_v56  ;;  %v698_v40 = vmul.f32 %v3130_v35, %v3672_v22 }
 0x15b   : > { %v739_v25 = vadd.f32 %v3852_v53, %v717_v55 }
 0x15c   : > { %2912 = vmatpush3.bf16.msra.mxu0 %v1278_v29  ;;  %v720_v29 = vmul.f32 %v3845_v44, %v698_v40 }
 0x15d   : > { %2913 = vmatprep.subr.bf16.mxu0 %v1275_v51  ;;  %v751_v28 = vpack.c.bf16 %v740_v17, %v739_v25 }
 0x15e   : > { %868 = vmatmul.mubr.bf16.gmra.mxu0 %v3914_v32  ;;  %1341 = vmatmul.mubr.bf16.gmra.mxu1 %v3914_v32  ;;  %v3132_v16 = vpop.eup %3131  ;;  %v742_v22 = vadd.f32 %v3852_v53, %v720_v29 }
 0x15f   : > { %877 = vmatprep.mubr.bf16.mxu0 %v3359_v63  ;;  %1350 = vmatprep.mubr.bf16.mxu1 %v3359_v63  ;;  %v697_v41 = vmul.f32 %v3132_v16, %v3669_v19  ;;  %v3134_v42 = vpop.eup %3133 }
 0x160   : > { %2914 = vmatpush3.bf16.msra.mxu0 %v1275_v51  ;;  %v3136_v43 = vpop.eup %3135  ;;  %v700_v45 = vmul.f32 %v3134_v42, %v3708_v48 }
 0x161   : > { %2915 = vmatprep.subr.bf16.mxu0 %v1272_v62  ;;  %v719_v26 = vmul.f32 %v3845_v44, %v697_v41  ;;  %v699_v46 = vmul.f32 %v3136_v43, %v3705_v47 }
 0x162   : > { %v722_v21 = vmul.f32 %v3845_v44, %v700_v45 }
 0x163   : > { %v741_v19 = vadd.f32 %v3852_v53, %v719_v26  ;;  %v721_v50 = vmul.f32 %v3845_v44, %v699_v46 }
 0x164   : > { %2916 = vmatpush3.bf16.msra.mxu0 %v1272_v62  ;;  %v744_v52 = vadd.f32 %v3852_v53, %v722_v21 }
 0x165   : > { %2917 = vmatprep.subr.bf16.mxu0 %v1269_v11  ;;  %v752_v20 = vpack.c.bf16 %v742_v22, %v741_v19  ;;  %v3138_v49 = vpop.eup %3137  ;;  %v743_v58 = vadd.f32 %v3852_v53, %v721_v50 }
 0x166   : > { %878 = vmatmul.mubr.bf16.gmra.mxu0 %v750_v34  ;;  %1351 = vmatmul.mubr.bf16.gmra.mxu1 %v750_v34  ;;  %v3140_v51 = vpop.eup %3139  ;;  %v702_v48 = vmul.f32 %v3138_v49, %v3744_v7 }
 0x167   : > { %887 = vmatprep.mubr.bf16.mxu0 %v3359_v63  ;;  %1360 = vmatprep.mubr.bf16.mxu1 %v3359_v63  ;;  %v701_v47 = vmul.f32 %v3140_v51, %v3741_v5  ;;  %v753_v54 = vpack.c.bf16 %v744_v52, %v743_v58 }
 0x168   : > { %2918 = vmatpush3.bf16.msra.mxu0 %v1269_v11  ;;  %v724_v57 = vmul.f32 %v3845_v44, %v702_v48 }
 0x169   : > { %2919 = vmatprep.subr.bf16.mxu0 %v1266_v36  ;;  %v723_v60 = vmul.f32 %v3845_v44, %v701_v47 }
 0x16a   : > { %v746_v61 = vadd.f32 %v3852_v53, %v724_v57 }
 0x16b   : > { %v745_v39 = vadd.f32 %v3852_v53, %v723_v60 }
 0x16c   : > { %2920 = vmatpush3.bf16.msra.mxu0 %v1266_v36 }
 0x16d   : > { %v754_v7 = vpack.c.bf16 %v746_v61, %v745_v39 }
 0x16e   : > { %888 = vmatmul.mubr.bf16.gmra.mxu0 %v751_v28  ;;  %1361 = vmatmul.mubr.bf16.gmra.mxu1 %v751_v28 }
 0x16f   : > { %897 = vmatprep.mubr.bf16.mxu0 %v3359_v63  ;;  %1370 = vmatprep.mubr.bf16.mxu1 %v3359_v63 }
 0x176   : > { %898 = vmatmul.mubr.bf16.gmra.mxu0 %v752_v20  ;;  %1371 = vmatmul.mubr.bf16.gmra.mxu1 %v752_v20 }
 0x177   : > { %907 = vmatprep.mubr.bf16.mxu0 %v3359_v63  ;;  %1380 = vmatprep.mubr.bf16.mxu1 %v3359_v63 }
 0x17e   : > { %908 = vmatmul.mubr.bf16.gmra.mxu0 %v753_v54  ;;  %1381 = vmatmul.mubr.bf16.gmra.mxu1 %v753_v54 }
 0x17f   : > { %917 = vmatprep.mubr.bf16.mxu0 %v3359_v63  ;;  %1390 = vmatprep.mubr.bf16.mxu1 %v3359_v63 }
 0x186   : > { %918 = vmatmul.mubr.bf16.gmra.mxu0 %v754_v7  ;;  %1391 = vmatmul.mubr.bf16.gmra.mxu1 %v754_v7 }
 0x187   : > { %2921 = vmatprep.mubr.bf16.mxu0 %v3865_v8 }
 0x18e   : > { %2922 = vmatmul.mubr.bf16.vlgmr.msra.gmra.mxu0 %v3890_v27 }
 0x18f   : > { %2925 = vmatprep.mubr.bf16.mxu0 %v3914_v32 }
 0x196   : > { %2926 = vmatmul.mubr.bf16.gmra.mxu0 %v750_v34 }
 0x197   : > { %2929 = vmatprep.mubr.bf16.mxu0 %v751_v28 }
 0x19e   : > { %2930 = vmatmul.mubr.bf16.gmra.mxu0 %v752_v20 }
 0x19f   : > { %2933 = vmatprep.mubr.bf16.mxu0 %v753_v54 }
 0x1a6   : > { %2934 = vmatmul.mubr.bf16.gmra.mxu0 %v754_v7 }
 0x20e   : > { %v3971_v5 = vpop.f32.mrf.mxu0  ;;  %v1322_v63 = vpop.f32.mrf.mxu1 }
 0x210   : > { %v3973_v44 = vpop.f32.mrf.mxu0  ;;  %v1324_v53 = vpop.f32.mrf.mxu1 }
 0x212   : > { %v3975_v10 = vpop.f32.mrf.mxu0  ;;  %v1326_v33 = vpop.f32.mrf.mxu1 }
 0x213   : > { %v1498_v62 = vpack.c.bf16 %v1326_v33, %v1322_v63 }
 0x214   : > { %v3977_v8 = vpop.f32.mrf.mxu0  ;;  %v1328_v27 = vpop.f32.mrf.mxu1 }
 0x215   : > { %2953 = vmatprep.mubr.bf16.mxu1 %v1498_v62  ;;  %v3979_v32 = vpack.c.bf16 %v1328_v27, %v1324_v53 }
 0x216   : > { %v3981_v4 = vpop.f32.mrf.mxu0  ;;  %v3983_v38 = vpop.f32.mrf.mxu1 }
 0x218   : > { %v3985_v24 = vpop.f32.mrf.mxu0  ;;  %v1334_v6 = vpop.f32.mrf.mxu1 }
 0x21a   : > { %v3987_v9 = vpop.f32.mrf.mxu0  ;;  %v3989_v14 = vpop.f32.mrf.mxu1 }
 0x21c   : > { %v3993_v15 = vpop.f32.mrf.mxu0  ;;  %v1338_v59 = vpop.f32.mrf.mxu1 }
 0x21d   : > { %v3995_v11 = vpack.c.bf16 %v1338_v59, %v1334_v6 }
 0x21e   : > { %v3997_v18 = vpop.f32.mrf.mxu0  ;;  %v3999_v23 = vpop.f32.mrf.mxu1 }
 0x21f   : > { %5115 = vst [vmem:[#allocation2_spill] sm:$0xff] %v3997_v18 }
 0x220   : > { %v4001_v12 = vpop.f32.mrf.mxu0  ;;  %v1344_v13 = vpop.f32.mrf.mxu1 }
 0x222   : > { %v4003_v30 = vpop.f32.mrf.mxu0  ;;  %v4005_v31 = vpop.f32.mrf.mxu1 }
 0x223   : > { %5116 = vst [vmem:[#allocation3_spill] sm:$0xff] %v4003_v30 }
 0x224   : > { %v4009_v56 = vpop.f32.mrf.mxu0  ;;  %v1348_v35 = vpop.f32.mrf.mxu1 }
 0x225   : > { %v4011_v36 = vpack.c.bf16 %v1348_v35, %v1344_v13 }
 0x226   : > { %v4013_v37 = vpop.f32.mrf.mxu0  ;;  %v4015_v55 = vpop.f32.mrf.mxu1 }
 0x227   : > { %5117 = vst [vmem:[#allocation4_spill] sm:$0xff] %v4013_v37 }
 0x228   : > { %v4017_v16 = vpop.f32.mrf.mxu0  ;;  %v4019_v17 = vpop.f32.mrf.mxu1 }
 0x22a   : > { %v4021_v40 = vpop.f32.mrf.mxu0  ;;  %v4023_v25 = vpop.f32.mrf.mxu1 }
 0x22b   : > { %5118 = vst [vmem:[#allocation5_spill] sm:$0xff] %v4021_v40 }
 0x22c   : > { %v4027_v28 = vpop.f32.mrf.mxu0  ;;  %v1358_v29 = vpop.f32.mrf.mxu1 }
 0x22e   : > { %v4029_v42 = vpop.f32.mrf.mxu0  ;;  %v4031_v26 = vpop.f32.mrf.mxu1 }
 0x22f   : > { %5119 = vst [vmem:[#allocation6_spill] sm:$0xff] %v4029_v42 }
 0x230   : > { %v4033_v43 = vpop.f32.mrf.mxu0  ;;  %v1364_v22 = vpop.f32.mrf.mxu1 }
 0x232   : > { %v4035_v45 = vpop.f32.mrf.mxu0  ;;  %v4037_v19 = vpop.f32.mrf.mxu1 }
 0x233   : > { %5120 = vst [vmem:[#allocation7_spill] sm:$0xff] %v4035_v45 }
 0x234   : > { %v4041_v20 = vpop.f32.mrf.mxu0  ;;  %v1368_v21 = vpop.f32.mrf.mxu1 }
 0x235   : > { %v1510_v40 = vpack.c.bf16 %v1368_v21, %v1364_v22 }
 0x236   : > { %v4043_v49 = vpop.f32.mrf.mxu0  ;;  %v4045_v50 = vpop.f32.mrf.mxu1 }
 0x237   : > { %5121 = vst [vmem:[#allocation8_spill] sm:$0xff] %v4043_v49 }
 0x238   : > { %v4047_v51 = vpop.f32.mrf.mxu0  ;;  %v1374_v52 = vpop.f32.mrf.mxu1 }
 0x23a   : > { %v4049_v48 = vpop.f32.mrf.mxu0  ;;  %v4051_v58 = vpop.f32.mrf.mxu1 }
 0x23b   : > { %5122 = vst [vmem:[#allocation9_spill] sm:$0xff] %v4049_v48 }
 0x23c   : > { %v4055_v54 = vpop.f32.mrf.mxu0  ;;  %v1378_v57 = vpop.f32.mrf.mxu1 }
 0x23d   : > { %v1511_v49 = vpack.c.bf16 %v1378_v57, %v1374_v52 }
 0x23e   : > { %v4057_v60 = vpop.f32.mrf.mxu0  ;;  %v4059_v61 = vpop.f32.mrf.mxu1 }
 0x23f   : > { %5123 = vst [vmem:[#allocation10_spill] sm:$0xff] %v4057_v60 }
 0x240   : > { %v4061_v39 = vpop.f32.mrf.mxu0  ;;  %v1384_v7 = vpop.f32.mrf.mxu1 }
 0x242   : > { %v4063_v63 = vpop.f32.mrf.mxu0  ;;  %v4065_v53 = vpop.f32.mrf.mxu1 }
 0x243   : > { %5124 = vst [vmem:[#allocation11_spill] sm:$0xff] %v4063_v63 }
 0x244   : > { %v4069_v62 = vpop.f32.mrf.mxu0  ;;  %v1388_v27 = vpop.f32.mrf.mxu1 }
 0x245   : > { %v1512_v3 = vpack.c.bf16 %v1388_v27, %v1384_v7 }
 0x246   : > { %v4071_v6 = vpop.f32.mrf.mxu0  ;;  %v4073_v59 = vpop.f32.mrf.mxu1 }
 0x247   : > { %5125 = vst [vmem:[#allocation12_spill] sm:$0xff] %v4071_v6 }
 0x248   : > { %v4075_v13 = vpop.f32.mrf.mxu0  ;;  %v1394_v35 = vpop.f32.mrf.mxu1 }
 0x24a   : > { %v4077_v2 = vpop.f32.mrf.mxu0  ;;  %v4079_v0 = vpop.f32.mrf.mxu1 }
 0x24b   : > { %5126 = vst [vmem:[#allocation13_spill] sm:$0xff] %v4077_v2 }
 0x24c   : > { %v4083_v46 = vpop.f32.mrf.mxu0  ;;  %v1398_v33 = vpop.f32.mrf.mxu1 }
 0x24d   : > { %v1513_v41 = vpack.c.bf16 %v1398_v33, %v1394_v35 }
 0x24e   : > { %v2923_v34 = vpop.f32.mrf.mxu0 }
 0x24f   : > { %2937 = vmatprep.subr.bf16.mxu1 %v1513_v41 }
 0x250   : > { %v1435_v6 = vpop.f32.mrf.mxu0  ;;  %2938 = vmatpush3.bf16.xpose.msra.mxu1 %v1513_v41  ;;  %v1509_v41 = vpack.c.bf16 %v1358_v29, %v4019_v17 }
 0x251   : > { %2939 = vmatprep.subr.bf16.mxu1 %v1512_v3 }
 0x252   : > { %v2924_v63 = vpop.f32.mrf.mxu0 }
 0x254   : > { %v1438_v60 = vpop.f32.mrf.mxu0 }
 0x256   : > { %v2927_v48 = vpop.f32.mrf.mxu0 }
 0x258   : > { %v1451_v2 = vpop.f32.mrf.mxu0  ;;  %2940 = vmatpush3.bf16.xpose.msra.mxu1 %v1512_v3 }
 0x259   : > { %2941 = vmatprep.subr.bf16.mxu1 %v1511_v49 }
 0x25a   : > { %v2928_v45 = vpop.f32.mrf.mxu0 }
 0x25b   : > { %v1782_v17 = vpack.c.bf16 %v2928_v45, %v2927_v48 }
 0x25c   : > { %v1454_v42 = vpop.f32.mrf.mxu0 }
 0x25e   : > { %v2931_v47 = vpop.f32.mrf.mxu0 }
 0x260   : > { %v1467_v37 = vpop.f32.mrf.mxu0  ;;  %2942 = vmatpush3.bf16.xpose.msra.mxu1 %v1511_v49 }
 0x261   : > { %2943 = vmatprep.subr.bf16.mxu1 %v1510_v40 }
 0x262   : > { %v2932_v33 = vpop.f32.mrf.mxu0 }
 0x263   : > { %v1784_v18 = vpack.c.bf16 %v2932_v33, %v2931_v47 }
 0x264   : > { %v1470_v7 = vpop.f32.mrf.mxu0 }
 0x265   : > { %v1783_v22 = vpack.c.bf16 %v1470_v7, %v1467_v37  ;;  %v1779_v37 = vpack.c.bf16 %v1438_v60, %v1435_v6 }
 0x266   : > { %v2935_v27 = vpop.f32.mrf.mxu0 }
 0x268   : > { %v1483_v35 = vpop.f32.mrf.mxu0  ;;  %2944 = vmatpush3.bf16.xpose.msra.mxu1 %v1510_v40  ;;  %v1780_v40 = vpack.c.bf16 %v2924_v63, %v2923_v34  ;;  %v5130_v34 = vpack.c.bf16 %v4037_v19, %v4031_v26 }
 0x269   : > { %2945 = vmatprep.subr.bf16.mxu1 %v1509_v41 }
 0x26a   : > { %v2936_v30 = vpop.f32.mrf.mxu0 }
 0x26b   : > { %v1786_v52 = vpack.c.bf16 %v2936_v30, %v2935_v27  ;;  %v1781_v30 = vpack.c.bf16 %v1454_v42, %v1451_v2  ;;  %v5128_v2 = vpack.c.bf16 %v4005_v31, %v3999_v23 }
 0x26c   : > { %v1486_v57 = vpop.f32.mrf.mxu0 }
 0x26d   : > { %v1785_v3 = vpack.c.bf16 %v1486_v57, %v1483_v35  ;;  %2969 = vmatprep.subr.bf16.mxu0 %v1786_v52 }
 0x26e   : > { %2970 = vmatpush3.bf16.msra.mxu0 %v1786_v52 }
 0x26f   : > { %2971 = vmatprep.subr.bf16.mxu0 %v1785_v3 }
 0x270   : > { %2946 = vmatpush3.bf16.xpose.msra.mxu1 %v1509_v41 }
 0x271   : > { %2947 = vmatprep.subr.bf16.mxu1 %v4011_v36 }
 0x272   : > { %2972 = vmatpush3.bf16.msra.mxu0 %v1785_v3 }
 0x273   : > { %2973 = vmatprep.subr.bf16.mxu0 %v1784_v18 }
 0x276   : > { %2974 = vmatpush3.bf16.msra.mxu0 %v1784_v18  ;;  %v5127_v18 = vpack.c.bf16 %v3989_v14, %v3983_v38  ;;  %v5132_v38 = vpack.c.bf16 %v4065_v53, %v4059_v61  ;;  %v5133_v14 = vpack.c.bf16 %v4079_v0, %v4073_v59 }
 0x277   : > { %2975 = vmatprep.subr.bf16.mxu0 %v1783_v22 }
 0x278   : > { %2948 = vmatpush3.bf16.xpose.msra.mxu1 %v4011_v36 }
 0x279   : > { %2949 = vmatprep.subr.bf16.mxu1 %v3995_v11 }
 0x27a   : > { %2976 = vmatpush3.bf16.msra.mxu0 %v1783_v22 }
 0x27b   : > { %2977 = vmatprep.subr.bf16.mxu0 %v1782_v17 }
 0x27e   : > { %2978 = vmatpush3.bf16.msra.mxu0 %v1782_v17  ;;  %v5134_v17 = vlaneseq }
 0x27f   : > { %2979 = vmatprep.subr.bf16.mxu0 %v1781_v30 }
 0x280   : > { %2950 = vmatpush3.bf16.xpose.msra.mxu1 %v3995_v11  ;;  %v5129_v11 = vpack.c.bf16 %v4023_v25, %v4015_v55 }
 0x281   : > { %2951 = vmatprep.subr.bf16.mxu1 %v3979_v32 }
 0x282   : > { %2980 = vmatpush3.bf16.msra.mxu0 %v1781_v30  ;;  %v4159_v30 = vshrl.u32 %v5134_v17, 7 }
 0x283   : > { %2981 = vmatprep.subr.bf16.mxu0 %v1780_v40 }
 0x286   : > { %2982 = vmatpush3.bf16.msra.mxu0 %v1780_v40  ;;  %v811_v40 = vsub.s32 1, %v4159_v30 }
 0x287   : > { %2983 = vmatprep.subr.bf16.mxu0 %v1779_v37 }
 0x288   : > { %2952 = vmatpush3.bf16.xpose.msra.mxu1 %v3979_v32  ;;  %v5131_v32 = vpack.c.bf16 %v4051_v58, %v4045_v50 }
 0x28a   : > { %2984 = vmatpush3.bf16.msra.mxu0 %v1779_v37  ;;  %v803_v37 = vld [vmem:[%s5102_s4] sm:$0x3] }
 0x28f   : > { %2954 = vmatmul.mubr.bf16.vlgmr.msra.gmra.mxu1 %v5127_v18  ;;  %v4165_v18 = vrot.slane %v803_v37, %v811_v40 }
 0x290   : > { %2957 = vmatprep.mubr.bf16.mxu1 %v5128_v2 }
 0x291   : > { %v4169_v2 = vadd.f32 %v4075_v13, %v4165_v18 }
 0x297   : > { %2958 = vmatmul.mubr.bf16.gmra.mxu1 %v5129_v11 }
 0x298   : > { %2961 = vmatprep.mubr.bf16.mxu1 %v5130_v34 }
 0x29f   : > { %2962 = vmatmul.mubr.bf16.gmra.mxu1 %v5131_v32  ;;  %v4173_v32 = vadd.f32 %v4061_v39, %v4165_v18  ;;  %v4188_v39 = vadd.f32 %v3985_v24, %v4165_v18 }
 0x2a0   : > { %2965 = vmatprep.mubr.bf16.mxu1 %v5132_v38 }
 0x2a7   : > { %2966 = vmatmul.mubr.bf16.gmra.mxu1 %v5133_v14  ;;  %v989_v14 = vmul.f32 0.044715, %v4169_v2 }
 0x34f   : > { %v2955_v23 = vpop.f32.mrf.mxu1 }
 0x350   : > { %v4113_v29 = vmul.f32 0.125, %v2955_v23  ;;  %v4178_v23 = vadd.f32 %v4083_v46, %v4165_v18  ;;  %v4196_v46 = vadd.f32 %v4047_v51, %v4165_v18 }
 0x351   : > { %v1548_v31 = vpop.f32.mrf.mxu1 }
 0x352   : > { %v1611_v36 = vmul.f32 0.125, %v1548_v31  ;;  %v991_v24 = vmul.f32 0.044715, %v4178_v23 }
 0x353   : > { %v2956_v55 = vpop.f32.mrf.mxu1 }
 0x354   : > { %1627 = vmax.xlane.f32.xlu0 %v1611_v36  ;;  %v4119_v19 = vmul.f32 0.125, %v2956_v55 }
 0x355   : > { %v1551_v25 = vpop.f32.mrf.mxu1 }
 0x356   : > { %v4115_v42 = vmul.f32 0.125, %v1551_v25  ;;  %v4182_v25 = vadd.f32 %v3973_v44, %v4165_v18  ;;  %v985_v44 = vmul.f32 0.044715, %v4173_v32 }
 0x357   : > { %v2959_v26 = vpop.f32.mrf.mxu1 }
 0x358   : > { %1631 = vmax.xlane.f32.xlu0 %v4113_v29  ;;  %1629 = vmax.xlane.f32.xlu1 %v4115_v42  ;;  %v4125_v50 = vmul.f32 0.125, %v2959_v26  ;;  %v4192_v26 = vadd.f32 %v4001_v12, %v4165_v18  ;;  %v4206_v12 = vmul.f32 0.044715, %v4182_v25 }
 0x359   : > { %v1564_v45 = vpop.f32.mrf.mxu1 }
 0x35a   : > { %v4121_v0 = vmul.f32 0.125, %v1564_v45 }
 0x35b   : > { %v2960_v21 = vpop.f32.mrf.mxu1 }
 0x35c   : > { %1633 = vmax.xlane.f32.xlu1 %v4119_v19  ;;  %1635 = vmax.xlane.f32.xlu0 %v4121_v0  ;;  %v4131_v60 = vmul.f32 0.125, %v2960_v21 }
 0x35d   : > { %v1567_v49 = vpop.f32.mrf.mxu1 }
 0x35e   : > { %v4127_v48 = vmul.f32 0.125, %v1567_v49 }
 0x35f   : > { %v2963_v58 = vpop.f32.mrf.mxu1 }
 0x360   : > { %1639 = vmax.xlane.f32.xlu0 %v4125_v50  ;;  %1637 = vmax.xlane.f32.xlu1 %v4127_v48  ;;  %v4137_v6 = vmul.f32 0.125, %v2963_v58 }
 0x361   : > { %v1580_v47 = vpop.f32.mrf.mxu1 }
 0x362   : > { %v4133_v61 = vmul.f32 0.125, %v1580_v47 }
 0x363   : > { %v2964_v63 = vpop.f32.mrf.mxu1 }
 0x364   : > { %1641 = vmax.xlane.f32.xlu1 %v4131_v60  ;;  %1643 = vmax.xlane.f32.xlu0 %v4133_v61  ;;  %v4143_v27 = vmul.f32 0.125, %v2964_v63  ;;  %v4212_v63 = vadd.f32 %v3977_v8, %v4165_v18  ;;  %v1023_v8 = vmul.f32 %v991_v24, %v4178_v23 }
 0x365   : > { %v1583_v53 = vpop.f32.mrf.mxu1 }
 0x366   : > { %v4139_v59 = vmul.f32 0.125, %v1583_v53  ;;  %v969_v53 = vmul.f32 0.044715, %v4192_v26 }
 0x367   : > { %v2967_v33 = vpop.f32.mrf.mxu1 }
 0x368   : > { %1647 = vmax.xlane.f32.xlu0 %v4137_v6  ;;  %1645 = vmax.xlane.f32.xlu1 %v4139_v59  ;;  %v4149_v57 = vmul.f32 0.125, %v2967_v33  ;;  %v981_v33 = vmul.f32 0.044715, %v4196_v46 }
 0x369   : > { %v1596_v7 = vpop.f32.mrf.mxu1 }
 0x36a   : > { %v4145_v41 = vmul.f32 0.125, %v1596_v7  ;;  %v1017_v7 = vmul.f32 %v985_v44, %v4173_v32 }
 0x36b   : > { %v2968_v35 = vpop.f32.mrf.mxu1 }
 0x36c   : > { %1649 = vmax.xlane.f32.xlu1 %v4143_v27  ;;  %1651 = vmax.xlane.f32.xlu0 %v4145_v41  ;;  %v4155_v22 = vmul.f32 0.125, %v2968_v35 }
 0x36d   : > { %v1599_v52 = vpop.f32.mrf.mxu1 }
 0x36e   : > { %v4151_v3 = vmul.f32 0.125, %v1599_v52 }
 0x370   : > { %1655 = vmax.xlane.f32.xlu0 %v4149_v57  ;;  %1653 = vmax.xlane.f32.xlu1 %v4151_v3 }
 0x374   : > { %1657 = vmax.xlane.f32.xlu1 %v4155_v22 }
 0x3dd   : > { %v1628_v11 = vpop.xlane.xlu0 %1627 }
 0x3de   : > { %v1659_v34 = vsub.f32 %v1611_v36, %v1628_v11  ;;  %v4229_v11 = vadd.f32 %v3993_v15, %v4165_v18  ;;  %v1013_v15 = vmul.f32 %v981_v33, %v4196_v46 }
 0x3e0   : > { %v1675_v38 = vmul.f32 1.442695, %v1659_v34 }
 0x3e1   : > { %v1632_v31 = vpop.xlane.xlu0 %1631  ;;  %v1630_v55 = vpop.xlane.xlu1 %1629 }
 0x3e2   : > { %3141 = vpow2.f32 %v1675_v38  ;;  %v1661_v13 = vsub.f32 %v4113_v29, %v1632_v31  ;;  %v1660_v36 = vsub.f32 %v4115_v42, %v1630_v55  ;;  %v4201_v29 = vadd.f32 %v4069_v62, %v4165_v18 }
 0x3e3   : > { %v1021_v42 = vmul.f32 %v989_v14, %v4169_v2  ;;  %v4215_v62 = vmul.f32 0.044715, %v4188_v39  ;;  %v4238_v14 = vadd.f32 %v4017_v16, %v4165_v18  ;;  %v4242_v31 = vadd.f32 %v4055_v54, %v4165_v18 }
 0x3e4   : > { %v1679_v45 = vmul.f32 1.442695, %v1661_v13  ;;  %v1677_v21 = vmul.f32 1.442695, %v1660_v36  ;;  %v4252_v54 = vadd.f32 %v4041_v20, %v4165_v18 }
 0x3e5   : > { %v1634_v49 = vpop.xlane.xlu1 %1633  ;;  %v1636_v58 = vpop.xlane.xlu0 %1635  ;;  %v1053_v37 = vmul.f32 %v1021_v42, %v4169_v2 }
 0x3e6   : > { %3143 = vpow2.f32 %v1679_v45  ;;  %v1662_v51 = vsub.f32 %v4119_v19, %v1634_v49  ;;  %v1663_v47 = vsub.f32 %v4121_v0, %v1636_v58  ;;  %v4222_v19 = vadd.f32 %v4033_v43, %v4165_v18 }
 0x3e7   : > { %3145 = vpow2.f32 %v1677_v21  ;;  %v987_v0 = vmul.f32 0.044715, %v4201_v29  ;;  %v4234_v43 = vmul.f32 %v969_v53, %v4192_v26  ;;  %v1085_v16 = vadd.f32 %v1053_v37, %v4169_v2 }
 0x3e8   : > { %v1681_v35 = vmul.f32 1.442695, %v1662_v51  ;;  %v1683_v52 = vmul.f32 1.442695, %v1663_v47  ;;  %v1055_v21 = vmul.f32 %v1023_v8, %v4178_v23  ;;  %v4260_v58 = vadd.f32 %v4009_v56, %v4165_v18 }
 0x3e9   : > { %v1640_v17 = vpop.xlane.xlu0 %1639  ;;  %v1638_v40 = vpop.xlane.xlu1 %1637  ;;  %v1019_v36 = vmul.f32 %v987_v0, %v4201_v29  ;;  %v973_v51 = vmul.f32 0.044715, %v4238_v14  ;;  %v983_v47 = vmul.f32 0.044715, %v4242_v31  ;;  %v979_v8 = vmul.f32 0.044715, %v4252_v54 }
 0x3ea   : > { %3147 = vpow2.f32 %v1681_v35  ;;  %v1665_v34 = vsub.f32 %v4125_v50, %v1640_v17  ;;  %v1664_v38 = vsub.f32 %v4127_v48, %v1638_v40  ;;  %v1049_v50 = vmul.f32 %v1017_v7, %v4173_v32 }
 0x3eb   : > { %3149 = vpow2.f32 %v1683_v52  ;;  %v977_v48 = vmul.f32 0.044715, %v4222_v19  ;;  %v1117_v52 = vmul.f32 0.7978846, %v1085_v16  ;;  %v1087_v56 = vadd.f32 %v1055_v21, %v4178_v23 }
 0x3ec   : > { %v1687_v55 = vmul.f32 1.442695, %v1665_v34  ;;  %v1685_v13 = vmul.f32 1.442695, %v1664_v38  ;;  %v1081_v20 = vadd.f32 %v1049_v50, %v4173_v32  ;;  %v1051_v0 = vmul.f32 %v1019_v36, %v4201_v29 }
 0x3ed   : > { %v1642_v44 = vpop.xlane.xlu1 %1641  ;;  %v1644_v45 = vpop.xlane.xlu0 %1643  ;;  %v1005_v34 = vmul.f32 %v973_v51, %v4238_v14  ;;  %v4278_v38 = vadd.f32 %v4027_v28, %v4165_v18 }
 0x3ee   : > { %3151 = vpow2.f32 %v1687_v55  ;;  %v1666_v42 = vsub.f32 %v4131_v60, %v1642_v44  ;;  %v1667_v24 = vsub.f32 %v4133_v61, %v1644_v45  ;;  %v1045_v60 = vmul.f32 %v1013_v15, %v4196_v46 }
 0x3ef   : > { %v4256_v49 = vpop.eup %3141  ;;  %3153 = vpow2.f32 %v1685_v13  ;;  %v1009_v61 = vmul.f32 %v977_v48, %v4222_v19  ;;  %v1015_v15 = vmul.f32 %v983_v47, %v4242_v31  ;;  %v1119_v44 = vmul.f32 0.7978846, %v1087_v56 }
 0x3f0   : > { %v1689_v53 = vmul.f32 1.442695, %v1666_v42  ;;  %v1691_v33 = vmul.f32 1.442695, %v1667_v24  ;;  %1707 = vadd.xlane.f32.xlu0 %v4256_v49  ;;  %v1083_v28 = vadd.f32 %v1051_v0, %v4201_v29  ;;  %v1011_v45 = vmul.f32 %v979_v8, %v4252_v54 }
 0x3f1   : > { %v1648_v7 = vpop.xlane.xlu0 %1647  ;;  %v1646_v35 = vpop.xlane.xlu1 %1645  ;;  %v1041_v18 = vmul.f32 %v1009_v61, %v4222_v19  ;;  %v971_v24 = vmul.f32 0.044715, %v4260_v58  ;;  %v975_v51 = vmul.f32 0.044715, %v4278_v38  ;;  %v1047_v47 = vmul.f32 %v1015_v15, %v4242_v31 }
 0x3f2   : > { %3155 = vpow2.f32 %v1689_v53  ;;  %v1669_v17 = vsub.f32 %v4137_v6, %v1648_v7  ;;  %v1668_v40 = vsub.f32 %v4139_v59, %v1646_v35  ;;  %v1113_v6 = vmul.f32 0.7978846, %v1081_v20 }
 0x3f3   : > { %v4273_v37 = vpop.eup %3143  ;;  %3157 = vpow2.f32 %v1691_v33  ;;  %v1077_v59 = vadd.f32 %v1045_v60, %v4196_v46  ;;  %v1115_v61 = vmul.f32 0.7978846, %v1083_v28  ;;  %v1073_v7 = vadd.f32 %v1041_v18, %v4222_v19 }
 0x3f4   : > { %v4281_v55 = vpop.eup %3145  ;;  %v1695_v13 = vmul.f32 1.442695, %v1669_v17  ;;  %v1693_v50 = vmul.f32 1.442695, %v1668_v40  ;;  %1711 = vadd.xlane.f32.xlu0 %v4273_v37  ;;  %3159 = vtanh.f32 %v1117_v52  ;;  %v1037_v35 = vmul.f32 %v1005_v34, %v4238_v14 }
 0x3f5   : > { %1709 = vadd.xlane.f32.xlu1 %v4281_v55  ;;  %v1650_v48 = vpop.xlane.xlu1 %1649  ;;  %v1652_v36 = vpop.xlane.xlu0 %1651  ;;  %v1109_v60 = vmul.f32 0.7978846, %v1077_v59  ;;  %v1043_v0 = vmul.f32 %v1011_v45, %v4252_v54  ;;  %v997_v17 = vmul.f32 %v4215_v62, %v4188_v39  ;;  %v1007_v40 = vmul.f32 %v975_v51, %v4278_v38 }
 0x3f6   : > { %3161 = vpow2.f32 %v1695_v13  ;;  %v1670_v16 = vsub.f32 %v4143_v27, %v1650_v48  ;;  %v1671_v21 = vsub.f32 %v4145_v41, %v1652_v36  ;;  %v1079_v15 = vadd.f32 %v1047_v47, %v4242_v31 }
 0x3f7   : > { %v4291_v42 = vpop.eup %3147  ;;  %3163 = vpow2.f32 %v1693_v50  ;;  %v967_v34 = vmul.f32 0.044715, %v4229_v11  ;;  %v1069_v62 = vadd.f32 %v1037_v35, %v4238_v14  ;;  %v1033_v59 = vmul.f32 %v4234_v43, %v4192_v26 }
 0x3f8   : > { %v4296_v53 = vpop.eup %3149  ;;  %v1697_v33 = vmul.f32 1.442695, %v1670_v16  ;;  %v1699_v20 = vmul.f32 1.442695, %v1671_v21  ;;  %3165 = vtanh.f32 %v1113_v6  ;;  %v1105_v6 = vmul.f32 0.7978846, %v1073_v7 }
 0x3f9   : > { %1715 = vadd.xlane.f32.xlu0 %v4296_v53  ;;  %1713 = vadd.xlane.f32.xlu1 %v4291_v42  ;;  %v1656_v27 = vpop.xlane.xlu0 %1655  ;;  %v1654_v41 = vpop.xlane.xlu1 %1653  ;;  %3167 = vtanh.f32 %v1119_v44  ;;  %v1003_v48 = vmul.f32 %v971_v24, %v4260_v58  ;;  %v1075_v44 = vadd.f32 %v1043_v0, %v4252_v54  ;;  %v1111_v18 = vmul.f32 0.7978846, %v1079_v15 }
 0x3fa   : > { %3169 = vpow2.f32 %v1697_v33  ;;  %v1673_v52 = vsub.f32 %v4149_v57, %v1656_v27  ;;  %v1672_v56 = vsub.f32 %v4151_v3, %v1654_v41  ;;  %v1039_v45 = vmul.f32 %v1007_v40, %v4278_v38 }
 0x3fb   : > { %v4305_v8 = vpop.eup %3151  ;;  %3171 = vpow2.f32 %v1699_v20  ;;  %v993_v21 = vmul.f32 %v4206_v12, %v4182_v25  ;;  %v963_v43 = vmul.f32 0.044715, %v4212_v63  ;;  %v999_v24 = vmul.f32 %v967_v34, %v4229_v11 }
 0x3fc   : > { %v4311_v13 = vpop.eup %3153  ;;  %v1703_v50 = vmul.f32 1.442695, %v1673_v52  ;;  %v1701_v57 = vmul.f32 1.442695, %v1672_v56  ;;  %3173 = vtanh.f32 %v1109_v60  ;;  %v1029_v47 = vmul.f32 %v997_v17, %v4188_v39 }
 0x3fd   : > { %1719 = vadd.xlane.f32.xlu0 %v4305_v8  ;;  %1717 = vadd.xlane.f32.xlu1 %v4311_v13  ;;  %v1658_v3 = vpop.xlane.xlu1 %1657  ;;  %3175 = vtanh.f32 %v1115_v61  ;;  %v1107_v20 = vmul.f32 0.7978846, %v1075_v44  ;;  %v1065_v60 = vadd.f32 %v1033_v59, %v4192_v26  ;;  %v1035_v12 = vmul.f32 %v1003_v48, %v4260_v58 }
 0x3fe   : > { %3177 = vpow2.f32 %v1703_v50  ;;  %v1674_v36 = vsub.f32 %v4155_v22, %v1658_v3  ;;  %v1101_v22 = vmul.f32 0.7978846, %v1069_v62  ;;  %v1071_v41 = vadd.f32 %v1039_v45, %v4278_v38 }
 0x3ff   : > { %v4322_v28 = vpop.eup %3155  ;;  %3179 = vpow2.f32 %v1701_v57  ;;  %v995_v35 = vmul.f32 %v963_v43, %v4212_v63  ;;  %v1061_v52 = vadd.f32 %v1029_v47, %v4188_v39  ;;  %v1025_v56 = vmul.f32 %v993_v21, %v4182_v25 }
 0x400   : > { %v4325_v16 = vpop.eup %3157  ;;  %v1705_v51 = vmul.f32 1.442695, %v1674_v36  ;;  %3181 = vtanh.f32 %v1105_v6  ;;  %v1097_v17 = vmul.f32 0.7978846, %v1065_v60  ;;  %v1067_v40 = vadd.f32 %v1035_v12, %v4260_v58 }
 0x401   : > { %1723 = vadd.xlane.f32.xlu0 %v4325_v16  ;;  %1721 = vadd.xlane.f32.xlu1 %v4322_v28  ;;  %v3160_v33 = vpop.eup %3159  ;;  %v1031_v15 = vmul.f32 %v999_v24, %v4229_v11  ;;  %v1103_v57 = vmul.f32 0.7978846, %v1071_v41  ;;  %v957_v62 = vmul.f32 0.5, %v4169_v2  ;;  %v1093_v59 = vmul.f32 0.7978846, %v1061_v52 }
 0x402   : > { %3183 = vpow2.f32 %v1705_v51  ;;  %v1181_v50 = vadd.f32 1.0, %v3160_v33  ;;  %v1057_v48 = vadd.f32 %v1025_v56, %v4182_v25  ;;  %v1099_v44 = vmul.f32 0.7978846, %v1067_v40 }
 0x403   : > { %v4336_v27 = vpop.eup %3161  ;;  %3185 = vtanh.f32 %v1111_v18  ;;  %v1063_v18 = vadd.f32 %v1031_v15, %v4229_v11  ;;  %v1027_v45 = vmul.f32 %v995_v35, %v4212_v63  ;;  %v959_v47 = vmul.f32 0.5, %v4178_v23 }
 0x404   : > { %v4339_v61 = vpop.eup %3163  ;;  %3187 = vtanh.f32 %v1101_v22  ;;  %v4361_v43 = vmul.f32 %v1181_v50, %v957_v62  ;;  %v4366_v22 = vsel %vm2022_vm1, 1.0, %v5135_v1  ;;  %v953_v33 = vmul.f32 0.5, %v4173_v32 }
 0x405   : > { %v3166_v7 = vpop.eup %3165  ;;  %1727 = vadd.xlane.f32.xlu0 %v4336_v27  ;;  %1725 = vadd.xlane.f32.xlu1 %v4339_v61  ;;  %3189 = vtanh.f32 %v1107_v20  ;;  %v1089_v20 = vmul.f32 0.7978846, %v1057_v48  ;;  %v1095_v41 = vmul.f32 0.7978846, %v1063_v18  ;;  %v949_v32 = vmul.f32 0.5, %v4196_v46 }
 0x406   : > { %v3168_v0 = vpop.eup %3167  ;;  %3191 = vtanh.f32 %v1097_v17  ;;  %v1177_v24 = vadd.f32 1.0, %v3166_v7  ;;  %v1059_v7 = vadd.f32 %v1027_v45, %v4212_v63  ;;  %v2039_v52 = vmul.f32 %v4366_v22, %v4361_v43 }
 0x407   : > { %v4348_v34 = vpop.eup %3169  ;;  %v1183_v51 = vadd.f32 1.0, %v3168_v0  ;;  %3193 = vtanh.f32 %v1103_v57  ;;  %v955_v40 = vmul.f32 0.5, %v4201_v29  ;;  %v951_v29 = vmul.f32 0.5, %v4242_v31 }
 0x408   : > { %v4350_v3 = vpop.eup %3171  ;;  %3195 = vtanh.f32 %v1093_v59  ;;  %v4379_v0 = vmul.f32 %v1177_v24, %v953_v33 }
 0x409   : > { %v3174_v6 = vpop.eup %3173  ;;  %1731 = vadd.xlane.f32.xlu0 %v4350_v3  ;;  %1729 = vadd.xlane.f32.xlu1 %v4348_v34  ;;  %3197 = vtanh.f32 %v1099_v44  ;;  %v4377_v56 = vmul.f32 %v1183_v51, %v959_v47  ;;  %v945_v44 = vmul.f32 0.5, %v4222_v19  ;;  %v947_v19 = vmul.f32 0.5, %v4252_v54 }
 0x40a   : > { %v3176_v36 = vpop.eup %3175  ;;  %v1173_v12 = vadd.f32 1.0, %v3174_v6  ;;  %3199 = vtanh.f32 %v1089_v20  ;;  %v1091_v6 = vmul.f32 0.7978846, %v1059_v7  ;;  %v2037_v48 = vmul.f32 %v4366_v22, %v4379_v0 }
 0x40b   : > { %v4359_v21 = vpop.eup %3177  ;;  %v1179_v23 = vadd.f32 1.0, %v3176_v36  ;;  %3201 = vtanh.f32 %v1095_v41  ;;  %v2040_v59 = vmul.f32 %v4366_v22, %v4377_v56  ;;  %v943_v54 = vmul.f32 0.5, %v4278_v38 }
 0x40c   : > { %v4363_v2 = vpop.eup %3179  ;;  %v4384_v50 = vmul.f32 %v1173_v12, %v949_v32  ;;  %3203 = vtanh.f32 %v1091_v6  ;;  %v939_v38 = vmul.f32 0.5, %v4260_v58 }
 0x40d   : > { %1735 = vadd.xlane.f32.xlu0 %v4359_v21  ;;  %1733 = vadd.xlane.f32.xlu1 %v4363_v2  ;;  %v3182_v60 = vpop.eup %3181  ;;  %v4390_v46 = vmul.f32 %v1179_v23, %v955_v40 }
 0x40e   : > { %v1169_v57 = vadd.f32 1.0, %v3182_v60  ;;  %v2035_v1 = vmul.f32 %v4366_v22, %v4384_v50  ;;  %v941_v60 = vmul.f32 0.5, %v4238_v14  ;;  %v937_v14 = vmul.f32 0.5, %v4192_v26 }
 0x40f   : > { %v4373_v35 = vpop.eup %3183  ;;  %v2038_v24 = vmul.f32 %v4366_v22, %v4390_v46  ;;  %v933_v26 = vmul.f32 0.5, %v4188_v39  ;;  %v935_v39 = vmul.f32 0.5, %v4229_v11 }
 0x410   : > { %v3186_v17 = vpop.eup %3185  ;;  %v4400_v33 = vmul.f32 %v1169_v57, %v945_v44 }
 0x411   : > { %1737 = vadd.xlane.f32.xlu1 %v4373_v35  ;;  %2069 = vadd.xlane.f32.xlu0 %v2039_v52  ;;  %v3188_v15 = vpop.eup %3187  ;;  %v1175_v36 = vadd.f32 1.0, %v3186_v17 }
 0x412   : > { %v3190_v62 = vpop.eup %3189  ;;  %v1165_v45 = vadd.f32 1.0, %v3188_v15  ;;  %v2033_v23 = vmul.f32 %v4366_v22, %v4400_v33 }
 0x413   : > { %v1171_v18 = vadd.f32 1.0, %v3190_v62  ;;  %v3192_v51 = vpop.eup %3191  ;;  %v4398_v47 = vmul.f32 %v1175_v36, %v951_v29 }
 0x414   : > { %v3194_v20 = vpop.eup %3193  ;;  %v4404_v12 = vmul.f32 %v1165_v45, %v941_v60  ;;  %v1161_v41 = vadd.f32 1.0, %v3192_v51 }
 0x415   : > { %2071 = vadd.xlane.f32.xlu1 %v2040_v59  ;;  %2065 = vadd.xlane.f32.xlu0 %v2037_v48  ;;  %v3196_v31 = vpop.eup %3195  ;;  %v2036_v52 = vmul.f32 %v4366_v22, %v4398_v47  ;;  %v4410_v17 = vmul.f32 %v1171_v18, %v947_v19  ;;  %v1167_v32 = vadd.f32 1.0, %v3194_v20  ;;  %v929_v20 = vmul.f32 0.5, %v4182_v25 }
 0x416   : > { %v3198_v7 = vpop.eup %3197  ;;  %v4414_v15 = vmul.f32 %v1161_v41, %v937_v14  ;;  %v1157_v57 = vadd.f32 1.0, %v3196_v31  ;;  %v2031_v59 = vmul.f32 %v4366_v22, %v4404_v12 }
 0x417   : > { %v3200_v40 = vpop.eup %3199  ;;  %v2034_v62 = vmul.f32 %v4366_v22, %v4410_v17  ;;  %v4420_v48 = vmul.f32 %v1167_v32, %v943_v54  ;;  %v1163_v36 = vadd.f32 1.0, %v3198_v7  ;;  %v931_v7 = vmul.f32 0.5, %v4212_v63 }
 0x418   : > { %v3202_v6 = vpop.eup %3201  ;;  %v2029_v29 = vmul.f32 %v4366_v22, %v4414_v15  ;;  %v4426_v44 = vmul.f32 %v1157_v57, %v933_v26 }
 0x419   : > { %2067 = vadd.xlane.f32.xlu1 %v2038_v24  ;;  %2061 = vadd.xlane.f32.xlu0 %v2035_v1  ;;  %v3204_v18 = vpop.eup %3203  ;;  %v2032_v45 = vmul.f32 %v4366_v22, %v4420_v48  ;;  %v4430_v51 = vmul.f32 %v1163_v36, %v939_v38  ;;  %v1159_v24 = vadd.f32 1.0, %v3202_v6  ;;  %v1153_v1 = vadd.f32 1.0, %v3200_v40 }
 0x41a   : > { %v2027_v58 = vmul.f32 %v4366_v22, %v4426_v44  ;;  %v1155_v41 = vadd.f32 1.0, %v3204_v18 }
 0x41b   : > { %v2030_v60 = vmul.f32 %v4366_v22, %v4430_v51  ;;  %v4438_v19 = vmul.f32 %v1159_v24, %v935_v39  ;;  %v4440_v31 = vmul.f32 %v1153_v1, %v929_v20 }
 0x41d   : > { %2063 = vadd.xlane.f32.xlu1 %v2036_v52  ;;  %2057 = vadd.xlane.f32.xlu0 %v2033_v23  ;;  %v2028_v11 = vmul.f32 %v4366_v22, %v4438_v19  ;;  %v2025_v25 = vmul.f32 %v4366_v22, %v4440_v31  ;;  %v4447_v52 = vmul.f32 %v1155_v41, %v931_v7 }
 0x41f   : > { %v2026_v23 = vmul.f32 %v4366_v22, %v4447_v52 }
 0x421   : > { %2059 = vadd.xlane.f32.xlu1 %v2034_v62  ;;  %2053 = vadd.xlane.f32.xlu0 %v2031_v59 }
 0x425   : > { %2055 = vadd.xlane.f32.xlu1 %v2032_v45  ;;  %2049 = vadd.xlane.f32.xlu0 %v2029_v29 }
 0x429   : > { %2051 = vadd.xlane.f32.xlu1 %v2030_v60  ;;  %2045 = vadd.xlane.f32.xlu0 %v2027_v58 }
 0x42d   : > { %2047 = vadd.xlane.f32.xlu1 %v2028_v11  ;;  %2041 = vadd.xlane.f32.xlu0 %v2025_v25 }
 0x431   : > { %2043 = vadd.xlane.f32.xlu1 %v2026_v23 }
 0x479   : > { %v1708_v32 = vpop.xlane.xlu0 %1707 }
 0x47a   : > { %3205 = vrcp.f32 %v1708_v32 }
 0x47d   : > { %v1712_v14 = vpop.xlane.xlu0 %1711 }
 0x47e   : > { %v1710_v54 = vpop.xlane.xlu1 %1709 }
 0x47f   : > { %3207 = vrcp.f32 %v1710_v54 }
 0x480   : > { %3209 = vrcp.f32 %v1712_v14 }
 0x482   : > { %v1716_v63 = vpop.xlane.xlu0 %1715  ;;  %v1714_v40 = vpop.xlane.xlu1 %1713 }
 0x483   : > { %3211 = vrcp.f32 %v1714_v40 }
 0x484   : > { %3213 = vrcp.f32 %v1716_v63 }
 0x486   : > { %v1720_v57 = vpop.xlane.xlu0 %1719  ;;  %v1718_v6 = vpop.xlane.xlu1 %1717 }
 0x487   : > { %3215 = vrcp.f32 %v1718_v6  ;;  %v3206_v62 = vpop.eup %3205 }
 0x488   : > { %3217 = vrcp.f32 %v1720_v57  ;;  %v1755_v38 = vmul.f32 %v3206_v62, %v4256_v49 }
 0x48a   : > { %v1724_v59 = vpop.xlane.xlu0 %1723  ;;  %v1722_v36 = vpop.xlane.xlu1 %1721 }
 0x48b   : > { %3219 = vrcp.f32 %v1722_v36 }
 0x48c   : > { %v3208_v26 = vpop.eup %3207  ;;  %3221 = vrcp.f32 %v1724_v59 }
 0x48d   : > { %v1756_v29 = vmul.f32 %v3208_v26, %v4281_v55  ;;  %v3210_v24 = vpop.eup %3209 }
 0x48e   : > { %v1728_v18 = vpop.xlane.xlu0 %1727  ;;  %v1726_v45 = vpop.xlane.xlu1 %1725  ;;  %v1757_v60 = vmul.f32 %v3210_v24, %v4273_v37 }
 0x48f   : > { %v1771_v1 = vpack.c.bf16 %v1756_v29, %v1755_v38  ;;  %3223 = vrcp.f32 %v1726_v45 }
 0x490   : > { %v3212_v39 = vpop.eup %3211  ;;  %3225 = vrcp.f32 %v1728_v18 }
 0x491   : > { %2985 = vmatprep.mubr.bf16.mxu0 %v1771_v1  ;;  %v1758_v41 = vmul.f32 %v3212_v39, %v4291_v42  ;;  %v3214_v7 = vpop.eup %3213 }
 0x492   : > { %v1732_v20 = vpop.xlane.xlu0 %1731  ;;  %v1730_v58 = vpop.xlane.xlu1 %1729  ;;  %v1759_v23 = vmul.f32 %v3214_v7, %v4296_v53 }
 0x493   : > { %3227 = vrcp.f32 %v1730_v58  ;;  %v1772_v49 = vpack.c.bf16 %v1758_v41, %v1757_v60 }
 0x494   : > { %v3216_v11 = vpop.eup %3215  ;;  %3229 = vrcp.f32 %v1732_v20 }
 0x495   : > { %2986 = vmatmul.mubr.bf16.vlgmr.msra.gmra.mxu0 %v1772_v49  ;;  %v1760_v32 = vmul.f32 %v3216_v11, %v4311_v13  ;;  %v3218_v14 = vpop.eup %3217 }
 0x496   : > { %v1736_v55 = vpop.xlane.xlu0 %1735  ;;  %v1734_v25 = vpop.xlane.xlu1 %1733  ;;  %v1761_v40 = vmul.f32 %v3218_v14, %v4305_v8 }
 0x497   : > { %3231 = vrcp.f32 %v1734_v25  ;;  %v1773_v54 = vpack.c.bf16 %v1760_v32, %v1759_v23 }
 0x498   : > { %v3220_v63 = vpop.eup %3219  ;;  %3233 = vrcp.f32 %v1736_v55 }
 0x499   : > { %2989 = vmatprep.mubr.bf16.mxu0 %v1773_v54  ;;  %v1762_v57 = vmul.f32 %v3220_v63, %v4322_v28  ;;  %v3222_v6 = vpop.eup %3221 }
 0x49a   : > { %v1738_v37 = vpop.xlane.xlu1 %1737  ;;  %v2070_v42 = vpop.xlane.xlu0 %2069  ;;  %v1763_v38 = vmul.f32 %v3222_v6, %v4325_v16 }
 0x49b   : > { %3235 = vrcp.f32 %v1738_v37  ;;  %v2087_v62 = vmul.f32 0.03125, %v2070_v42  ;;  %v1774_v59 = vpack.c.bf16 %v1762_v57, %v1761_v40 }
 0x49c   : > { %v3224_v36 = vpop.eup %3223 }
 0x49d   : > { %v2103_v53 = vsub.f32 %v4361_v43, %v2087_v62  ;;  %2990 = vmatmul.mubr.bf16.gmra.mxu0 %v1774_v59  ;;  %v1764_v29 = vmul.f32 %v3224_v36, %v4339_v61  ;;  %v3226_v18 = vpop.eup %3225 }
 0x49e   : > { %v2072_v13 = vpop.xlane.xlu1 %2071  ;;  %v2066_v26 = vpop.xlane.xlu0 %2065  ;;  %v1765_v61 = vmul.f32 %v3226_v18, %v4336_v27 }
 0x49f   : > { %v2088_v45 = vmul.f32 0.03125, %v2072_v13  ;;  %v2085_v24 = vmul.f32 0.03125, %v2066_v26  ;;  %v4463_v8 = vmul.f32 %v4366_v22, %v2103_v53  ;;  %v1775_v28 = vpack.c.bf16 %v1764_v29, %v1763_v38 }
 0x4a0   : > { %v3228_v1 = vpop.eup %3227 }
 0x4a1   : > { %v2104_v39 = vsub.f32 %v4377_v56, %v2088_v45  ;;  %v2101_v20 = vsub.f32 %v4379_v0, %v2085_v24  ;;  %v2135_v43 = vmul.f32 %v4463_v8, %v4463_v8  ;;  %2993 = vmatprep.mubr.bf16.mxu0 %v1775_v28  ;;  %v1766_v60 = vmul.f32 %v3228_v1, %v4348_v34  ;;  %v3230_v41 = vpop.eup %3229 }
 0x4a2   : > { %v2068_v58 = vpop.xlane.xlu1 %2067  ;;  %v2062_v16 = vpop.xlane.xlu0 %2061  ;;  %v1767_v54 = vmul.f32 %v3230_v41, %v4350_v3 }
 0x4a3   : > { %v2086_v7 = vmul.f32 0.03125, %v2068_v58  ;;  %v2083_v49 = vmul.f32 0.03125, %v2062_v16  ;;  %2165 = vadd.xlane.f32.xlu0 %v2135_v43  ;;  %v4472_v11 = vmul.f32 %v4366_v22, %v2104_v39  ;;  %v4475_v56 = vmul.f32 %v4366_v22, %v2101_v20 }
 0x4a4   : > { %v1776_v0 = vpack.c.bf16 %v1766_v60, %v1765_v61  ;;  %v3232_v55 = vpop.eup %3231 }
 0x4a5   : > { %v2102_v25 = vsub.f32 %v4390_v46, %v2086_v7  ;;  %v2099_v23 = vsub.f32 %v4384_v50, %v2083_v49  ;;  %v2136_v27 = vmul.f32 %v4472_v11, %v4472_v11  ;;  %v2133_v34 = vmul.f32 %v4475_v56, %v4475_v56  ;;  %v3234_v37 = vpop.eup %3233 }
 0x4a6   : > { %2994 = vmatmul.mubr.bf16.gmra.mxu0 %v1776_v0  ;;  %v2064_v32 = vpop.xlane.xlu1 %2063  ;;  %v2058_v14 = vpop.xlane.xlu0 %2057  ;;  %v1768_v63 = vmul.f32 %v3232_v55, %v4363_v2  ;;  %v1769_v13 = vmul.f32 %v3234_v37, %v4359_v21 }
 0x4a7   : > { %v2084_v42 = vmul.f32 0.03125, %v2064_v32  ;;  %v2081_v40 = vmul.f32 0.03125, %v2058_v14  ;;  %2167 = vadd.xlane.f32.xlu1 %v2136_v27  ;;  %2161 = vadd.xlane.f32.xlu0 %v2133_v34  ;;  %v4486_v50 = vmul.f32 %v4366_v22, %v2102_v25  ;;  %v4489_v46 = vmul.f32 %v4366_v22, %v2099_v23 }
 0x4a8   : > { %v3236_v57 = vpop.eup %3235  ;;  %v1777_v6 = vpack.c.bf16 %v1768_v63, %v1767_v54 }
 0x4a9   : > { %v2100_v62 = vsub.f32 %v4398_v47, %v2084_v42  ;;  %v2097_v59 = vsub.f32 %v4400_v33, %v2081_v40  ;;  %v2134_v3 = vmul.f32 %v4486_v50, %v4486_v50  ;;  %v2131_v2 = vmul.f32 %v4489_v46, %v4489_v46 }
 0x4aa   : > { %2997 = vmatprep.mubr.bf16.mxu0 %v1777_v6  ;;  %v2060_v36 = vpop.xlane.xlu1 %2059  ;;  %v2054_v53 = vpop.xlane.xlu0 %2053  ;;  %v1770_v26 = vmul.f32 %v3236_v57, %v4373_v35 }
 0x4ab   : > { %v2082_v38 = vmul.f32 0.03125, %v2060_v36  ;;  %v2079_v29 = vmul.f32 0.03125, %v2054_v53  ;;  %2163 = vadd.xlane.f32.xlu1 %v2134_v3  ;;  %2157 = vadd.xlane.f32.xlu0 %v2131_v2  ;;  %v4500_v47 = vmul.f32 %v4366_v22, %v2100_v62  ;;  %v4503_v33 = vmul.f32 %v4366_v22, %v2097_v59  ;;  %v1906_v36 = vld [vmem:[%s5104_s6 + $0x70] sm:$0xff] }
 0x4ac   : > { %v1778_v18 = vpack.c.bf16 %v1770_v26, %v1769_v13  ;;  %v1905_v13 = vld [vmem:[%s5104_s6 + $0x68] sm:$0xff] }
 0x4ad   : > { %v2098_v45 = vsub.f32 %v4410_v17, %v2082_v38  ;;  %v2095_v24 = vsub.f32 %v4404_v12, %v2079_v29  ;;  %v2132_v21 = vmul.f32 %v4500_v47, %v4500_v47  ;;  %v2129_v35 = vmul.f32 %v4503_v33, %v4503_v33  ;;  %v1902_v38 = vld [vmem:[%s5104_s6 + $0x50] sm:$0xff]  ;;  %v1903_v29 = vld [vmem:[%s5104_s6 + $0x58] sm:$0xff] }
 0x4ae   : > { %2998 = vmatmul.mubr.bf16.gmra.mxu0 %v1778_v18  ;;  %v2056_v28 = vpop.xlane.xlu1 %2055  ;;  %v2050_v1 = vpop.xlane.xlu0 %2049  ;;  %v1913_v18 = vpack.c.bf16 %v1903_v29, %v1902_v38 }
 0x4af   : > { %v2080_v39 = vmul.f32 0.03125, %v2056_v28  ;;  %v2077_v20 = vmul.f32 0.03125, %v2050_v1  ;;  %2159 = vadd.xlane.f32.xlu1 %v2132_v21  ;;  %2153 = vadd.xlane.f32.xlu0 %v2129_v35  ;;  %v4512_v43 = vmul.f32 %v4366_v22, %v2098_v45  ;;  %v4515_v17 = vmul.f32 %v4366_v22, %v2095_v24  ;;  %v1900_v45 = vld [vmem:[%s5104_s6 + $0x40] sm:$0xff]  ;;  %v1901_v24 = vld [vmem:[%s5104_s6 + $0x48] sm:$0xff]  ;;  %v1898_v35 = vld [vmem:[%s5104_s6 + $0x30] sm:$0xff] }
 0x4b0   : > { %v1912_v21 = vpack.c.bf16 %v1901_v24, %v1900_v45  ;;  %v1899_v28 = vld [vmem:[%s5104_s6 + $0x38] sm:$0xff]  ;;  %v1896_v1 = vld [vmem:[%s5104_s6 + $0x20] sm:$0xff] }
 0x4b1   : > { %v2096_v12 = vsub.f32 %v4420_v48, %v2080_v39  ;;  %v2093_v58 = vsub.f32 %v4414_v15, %v2077_v20  ;;  %v2130_v16 = vmul.f32 %v4512_v43, %v4512_v43  ;;  %v2127_v61 = vmul.f32 %v4515_v17, %v4515_v17  ;;  %v1897_v20 = vld [vmem:[%s5104_s6 + $0x28] sm:$0xff] }
 0x4b2   : > { %v2052_v60 = vpop.xlane.xlu1 %2051  ;;  %v2046_v41 = vpop.xlane.xlu0 %2045  ;;  %v1911_v39 = vpack.c.bf16 %v1899_v28, %v1898_v35 }
 0x4b3   : > { %v2078_v7 = vmul.f32 0.03125, %v2052_v60  ;;  %v2075_v49 = vmul.f32 0.03125, %v2046_v41  ;;  %2155 = vadd.xlane.f32.xlu1 %v2130_v16  ;;  %2149 = vadd.xlane.f32.xlu0 %v2127_v61  ;;  %v4524_v0 = vmul.f32 %v4366_v22, %v2096_v12  ;;  %v4527_v55 = vmul.f32 %v4366_v22, %v2093_v58  ;;  %v1894_v58 = vld [vmem:[%s5104_s6 + $0x10] sm:$0xff]  ;;  %v1895_v16 = vld [vmem:[%s5104_s6 + $0x18] sm:$0xff]  ;;  %v1892_v60 = vld [vmem:[%s5104_s6] sm:$0xff] }
 0x4b4   : > { %v1910_v12 = vpack.c.bf16 %v1897_v20, %v1896_v1  ;;  %v1909_v61 = vpack.c.bf16 %v1895_v16, %v1894_v58  ;;  %v1893_v41 = vld [vmem:[%s5104_s6 + $0x8] sm:$0xff] }
 0x4b5   : > { %v2094_v15 = vsub.f32 %v4430_v51, %v2078_v7  ;;  %v2091_v48 = vsub.f32 %v4426_v44, %v2075_v49  ;;  %v2128_v25 = vmul.f32 %v4524_v0, %v4524_v0  ;;  %v2125_v23 = vmul.f32 %v4527_v55, %v4527_v55  ;;  %v2277_v49 = vld [vmem:[%s5108_s10] sm:$0xff] }
 0x4b6   : > { %v2048_v27 = vpop.xlane.xlu1 %2047  ;;  %v2042_v34 = vpop.xlane.xlu0 %2041  ;;  %v1908_v7 = vpack.c.bf16 %v1893_v41, %v1892_v60 }
 0x4b7   : > { %v2076_v32 = vmul.f32 0.03125, %v2048_v27  ;;  %v2073_v14 = vmul.f32 0.03125, %v2042_v34  ;;  %2151 = vadd.xlane.f32.xlu1 %v2128_v25  ;;  %2145 = vadd.xlane.f32.xlu0 %v2125_v23  ;;  %v4536_v54 = vmul.f32 %v4366_v22, %v2094_v15  ;;  %v4539_v63 = vmul.f32 %v4366_v22, %v2091_v48  ;;  %v2278_v15 = vld [vmem:[%s5108_s10 + $0x8] sm:$0xff]  ;;  %v2311_v23 = vld [vmem:[%s5109_s11 + $0x10] sm:$0xff]  ;;  %v2312_v27 = vld [vmem:[%s5109_s11 + $0x18] sm:$0xff] }
 0x4b8   : > { %v2293_v48 = vpack.c.bf16 %v2278_v15, %v2277_v49  ;;  %v2310_v25 = vld [vmem:[%s5109_s11 + $0x8] sm:$0xff]  ;;  %v2309_v34 = vld [vmem:[%s5109_s11] sm:$0xff] }
 0x4b9   : > { %v2092_v44 = vsub.f32 %v4438_v19, %v2076_v32  ;;  %v2089_v51 = vsub.f32 %v4440_v31, %v2073_v14  ;;  %v2126_v37 = vmul.f32 %v4536_v54, %v4536_v54  ;;  %v2123_v42 = vmul.f32 %v4539_v63, %v4539_v63  ;;  %v2318_v32 = vld [vmem:[%s5109_s11 + $0x48] sm:$0xff]  ;;  %v2313_v14 = vld [vmem:[%s5109_s11 + $0x20] sm:$0xff] }
 0x4ba   : > { %v2044_v40 = vpop.xlane.xlu1 %2043  ;;  %3049 = vmatprep.mubr.bf16.mxu0 %v2293_v48 }
 0x4bb   : > { %v2074_v57 = vmul.f32 0.03125, %v2044_v40  ;;  %2147 = vadd.xlane.f32.xlu1 %v2126_v37  ;;  %2141 = vadd.xlane.f32.xlu0 %v2123_v42  ;;  %v4548_v6 = vmul.f32 %v4366_v22, %v2092_v44  ;;  %v4551_v62 = vmul.f32 %v4366_v22, %v2089_v51  ;;  %v2320_v44 = vld [vmem:[%s5109_s11 + $0x58] sm:$0xff]  ;;  %v2314_v51 = vld [vmem:[%s5109_s11 + $0x28] sm:$0xff]  ;;  %v2315_v42 = vld [vmem:[%s5109_s11 + $0x30] sm:$0xff] }
 0x4bc   : > { %v2322_v37 = vld [vmem:[%s5109_s11 + $0x68] sm:$0xff]  ;;  %v2324_v40 = vld [vmem:[%s5109_s11 + $0x78] sm:$0xff] }
 0x4bd   : > { %v2090_v19 = vsub.f32 %v4447_v52, %v2074_v57  ;;  %v2124_v31 = vmul.f32 %v4548_v6, %v4548_v6  ;;  %v2121_v59 = vmul.f32 %v4551_v62, %v4551_v62  ;;  %v1907_v52 = vld [vmem:[%s5104_s6 + $0x78] sm:$0xff] }
 0x4be   : > { %v1915_v53 = vpack.c.bf16 %v1907_v52, %v1906_v36  ;;  %v2316_v57 = vld [vmem:[%s5109_s11 + $0x38] sm:$0xff] }
 0x4bf   : > { %2143 = vadd.xlane.f32.xlu1 %v2124_v31  ;;  %2137 = vadd.xlane.f32.xlu0 %v2121_v59  ;;  %v4559_v3 = vmul.f32 %v4366_v22, %v2090_v19  ;;  %v1904_v22 = vld [vmem:[%s5104_s6 + $0x60] sm:$0xff]  ;;  %v2319_v31 = vld [vmem:[%s5109_s11 + $0x50] sm:$0xff] }
 0x4c0   : > { %3001 = vmatprep.subr.bf16.mxu1 %v1915_v53  ;;  %v1914_v26 = vpack.c.bf16 %v1905_v13, %v1904_v22  ;;  %v2317_v19 = vld [vmem:[%s5109_s11 + $0x40] sm:$0xff] }
 0x4c1   : > { %v2122_v2 = vmul.f32 %v4559_v3, %v4559_v3  ;;  %3002 = vmatpush3.bf16.msra.mxu1 %v1915_v53  ;;  %v2321_v59 = vld [vmem:[%s5109_s11 + $0x60] sm:$0xff] }
 0x4c2   : > { %3003 = vmatprep.subr.bf16.mxu1 %v1914_v26 }
 0x4c3   : > { %2139 = vadd.xlane.f32.xlu1 %v2122_v2  ;;  %v2323_v2 = vld [vmem:[%s5109_s11 + $0x70] sm:$0xff] }
 0x4c5   : > { %3004 = vmatpush3.bf16.msra.mxu1 %v1914_v26 }
 0x4c6   : > { %3005 = vmatprep.subr.bf16.mxu1 %v1913_v18 }
 0x4c9   : > { %3006 = vmatpush3.bf16.msra.mxu1 %v1913_v18 }
 0x4ca   : > { %3007 = vmatprep.subr.bf16.mxu1 %v1912_v21 }
 0x4cd   : > { %3008 = vmatpush3.bf16.msra.mxu1 %v1912_v21 }
 0x4ce   : > { %3009 = vmatprep.subr.bf16.mxu1 %v1911_v39 }
 0x4d1   : > { %3010 = vmatpush3.bf16.msra.mxu1 %v1911_v39 }
 0x4d2   : > { %3011 = vmatprep.subr.bf16.mxu1 %v1910_v12 }
 0x4d4   : > { %2332 = vperm.xlu1 %3108, %v2310_v25  }
 0x4d5   : > { %3012 = vmatpush3.bf16.msra.mxu1 %v1910_v12  ;;  %2327 = vperm.xlu0 %3107, %v2309_v34  }
 0x4d6   : > { %3013 = vmatprep.subr.bf16.mxu1 %v1909_v61 }
 0x4d8   : > { %2337 = vperm.xlu1 %3108, %v2311_v23   ;;  %v4668_v23 = vld [vmem:[%s5106_s8] ss:$0 sm:$0xff] }
 0x4d9   : > { %3014 = vmatpush3.bf16.msra.mxu1 %v1909_v61  ;;  %2372 = vperm.xlu0 %3107, %v2318_v32  }
 0x4da   : > { %3015 = vmatprep.subr.bf16.mxu1 %v1908_v7 }
 0x4dc   : > { %2342 = vperm.xlu1 %3108, %v2312_v27  }
 0x4dd   : > { %3016 = vmatpush3.bf16.msra.mxu1 %v1908_v7  ;;  %2382 = vperm.xlu0 %3107, %v2320_v44  }
 0x4e0   : > { %2347 = vperm.xlu1 %3108, %v2313_v14  }
 0x4e1   : > { %2392 = vperm.xlu0 %3107, %v2322_v37  }
 0x4e4   : > { %2352 = vperm.xlu1 %3108, %v2314_v51  }
 0x4e5   : > { %2402 = vperm.xlu0 %3107, %v2324_v40  }
 0x4e8   : > { %2357 = vperm.xlu1 %3108, %v2315_v42  }
 0x4ec   : > { %2362 = vperm.xlu1 %3108, %v2316_v57  }
 0x4f0   : > { %2367 = vperm.xlu1 %3108, %v2317_v19   ;;  %v4675_v19 = vld [vmem:[%s5107_s9] ss:$0 sm:$0xff] }
 0x4f4   : > { %2377 = vperm.xlu1 %3108, %v2319_v31  }
 0x4f8   : > { %2387 = vperm.xlu1 %3108, %v2321_v59  }
 0x4fc   : > { %2397 = vperm.xlu1 %3108, %v2323_v2  }
 0x52c   : > { %v2166_v36 = vpop.xlane.xlu0 %2165 }
 0x52d   : > { %v2183_v52 = vmul.f32 0.03125, %v2166_v36 }
 0x52f   : > { %v2199_v53 = vadd.f32 1e-05, %v2183_v52 }
 0x530   : > { %v2168_v22 = vpop.xlane.xlu1 %2167  ;;  %v2162_v13 = vpop.xlane.xlu0 %2161 }
 0x531   : > { %3237 = vrsqrt.f32 %v2199_v53  ;;  %v2184_v26 = vmul.f32 0.03125, %v2168_v22  ;;  %v2181_v38 = vmul.f32 0.03125, %v2162_v13 }
 0x533   : > { %v2200_v29 = vadd.f32 1e-05, %v2184_v26  ;;  %v2197_v18 = vadd.f32 1e-05, %v2181_v38 }
 0x534   : > { %v2164_v45 = vpop.xlane.xlu1 %2163  ;;  %v2158_v24 = vpop.xlane.xlu0 %2157 }
 0x535   : > { %3239 = vrsqrt.f32 %v2200_v29  ;;  %v2182_v21 = vmul.f32 0.03125, %v2164_v45  ;;  %v2179_v35 = vmul.f32 0.03125, %v2158_v24 }
 0x536   : > { %3241 = vrsqrt.f32 %v2197_v18 }
 0x537   : > { %v2198_v28 = vadd.f32 1e-05, %v2182_v21  ;;  %v2195_v1 = vadd.f32 1e-05, %v2179_v35 }
 0x538   : > { %v2160_v39 = vpop.xlane.xlu1 %2159  ;;  %v2154_v20 = vpop.xlane.xlu0 %2153 }
 0x539   : > { %3243 = vrsqrt.f32 %v2198_v28  ;;  %v2180_v12 = vmul.f32 0.03125, %v2160_v39  ;;  %v2177_v58 = vmul.f32 0.03125, %v2154_v20 }
 0x53a   : > { %3245 = vrsqrt.f32 %v2195_v1 }
 0x53b   : > { %v2196_v16 = vadd.f32 1e-05, %v2180_v12  ;;  %v2193_v61 = vadd.f32 1e-05, %v2177_v58 }
 0x53c   : > { %v2156_v60 = vpop.xlane.xlu1 %2155  ;;  %v2150_v41 = vpop.xlane.xlu0 %2149 }
 0x53d   : > { %3247 = vrsqrt.f32 %v2196_v16  ;;  %v2178_v7 = vmul.f32 0.03125, %v2156_v60  ;;  %v2175_v49 = vmul.f32 0.03125, %v2150_v41 }
 0x53e   : > { %v3238_v15 = vpop.eup %3237  ;;  %3249 = vrsqrt.f32 %v2193_v61 }
 0x53f   : > { %v2194_v48 = vadd.f32 1e-05, %v2178_v7  ;;  %v2191_v25 = vadd.f32 1e-05, %v2175_v49  ;;  %v2231_v27 = vmul.f32 %v3238_v15, %v4463_v8 }
 0x540   : > { %v2152_v34 = vpop.xlane.xlu1 %2151  ;;  %v2146_v32 = vpop.xlane.xlu0 %2145 }
 0x541   : > { %3251 = vrsqrt.f32 %v2194_v48  ;;  %v2176_v14 = vmul.f32 0.03125, %v2152_v34  ;;  %v2173_v44 = vmul.f32 0.03125, %v2146_v32  ;;  %v2253_v37 = vmul.f32 %v4668_v23, %v2231_v27 }
 0x542   : > { %v3240_v51 = vpop.eup %3239  ;;  %3253 = vrsqrt.f32 %v2191_v25 }
 0x543   : > { %v3242_v42 = vpop.eup %3241  ;;  %v2192_v40 = vadd.f32 1e-05, %v2176_v14  ;;  %v2189_v57 = vadd.f32 1e-05, %v2173_v44  ;;  %v2232_v31 = vmul.f32 %v3240_v51, %v4472_v11  ;;  %v2275_v13 = vadd.f32 %v4675_v19, %v2253_v37 }
 0x544   : > { %v2148_v8 = vpop.xlane.xlu1 %2147  ;;  %v2142_v59 = vpop.xlane.xlu0 %2141  ;;  %v2229_v2 = vmul.f32 %v3242_v42, %v4475_v56 }
 0x545   : > { %3255 = vrsqrt.f32 %v2192_v40  ;;  %v2174_v36 = vmul.f32 0.03125, %v2148_v8  ;;  %v2171_v52 = vmul.f32 0.03125, %v2142_v59  ;;  %v2254_v53 = vmul.f32 %v4668_v23, %v2232_v31 }
 0x546   : > { %v3244_v22 = vpop.eup %3243  ;;  %3257 = vrsqrt.f32 %v2189_v57  ;;  %v2251_v56 = vmul.f32 %v4668_v23, %v2229_v2 }
 0x547   : > { %v3246_v26 = vpop.eup %3245  ;;  %v2190_v38 = vadd.f32 1e-05, %v2174_v36  ;;  %v2187_v29 = vadd.f32 1e-05, %v2171_v52  ;;  %v2276_v18 = vadd.f32 %v4675_v19, %v2254_v53  ;;  %v2230_v11 = vmul.f32 %v3244_v22, %v4486_v50 }
 0x548   : > { %v2144_v45 = vpop.xlane.xlu1 %2143  ;;  %v2138_v24 = vpop.xlane.xlu0 %2137  ;;  %v2227_v21 = vmul.f32 %v3246_v26, %v4489_v46  ;;  %v2273_v46 = vadd.f32 %v4675_v19, %v2251_v56 }
 0x549   : > { %3259 = vrsqrt.f32 %v2190_v38  ;;  %v2172_v35 = vmul.f32 0.03125, %v2144_v45  ;;  %v2169_v28 = vmul.f32 0.03125, %v2138_v24  ;;  %v2308_v1 = vpack.c.bf16 %v2276_v18, %v2275_v13 }
 0x54a   : > { %v3248_v39 = vpop.eup %3247  ;;  %3261 = vrsqrt.f32 %v2187_v29  ;;  %v2252_v20 = vmul.f32 %v4668_v23, %v2230_v11  ;;  %v2249_v12 = vmul.f32 %v4668_v23, %v2227_v21 }
 0x54b   : > { %v3250_v58 = vpop.eup %3249  ;;  %v2188_v16 = vadd.f32 1e-05, %v2172_v35  ;;  %v2185_v61 = vadd.f32 1e-05, %v2169_v28  ;;  %3033 = vmatprep.subr.bf16.mxu0 %v2308_v1  ;;  %v2228_v50 = vmul.f32 %v3248_v39, %v4500_v47 }
 0x54c   : > { %v2140_v60 = vpop.xlane.xlu1 %2139  ;;  %3034 = vmatpush3.bf16.msra.mxu0 %v2308_v1  ;;  %v2274_v41 = vadd.f32 %v4675_v19, %v2252_v20  ;;  %v2225_v7 = vmul.f32 %v3250_v58, %v4503_v33  ;;  %v2271_v27 = vadd.f32 %v4675_v19, %v2249_v12 }
 0x54d   : > { %3263 = vrsqrt.f32 %v2188_v16  ;;  %v2170_v49 = vmul.f32 0.03125, %v2140_v60  ;;  %v2250_v15 = vmul.f32 %v4668_v23, %v2228_v50 }
 0x54e   : > { %v3252_v48 = vpop.eup %3251  ;;  %3265 = vrsqrt.f32 %v2185_v61  ;;  %v2307_v25 = vpack.c.bf16 %v2274_v41, %v2273_v46  ;;  %v2247_v44 = vmul.f32 %v4668_v23, %v2225_v7 }
 0x54f   : > { %v3254_v34 = vpop.eup %3253  ;;  %v2186_v32 = vadd.f32 1e-05, %v2170_v49  ;;  %v2272_v47 = vadd.f32 %v4675_v19, %v2250_v15  ;;  %v2226_v14 = vmul.f32 %v3252_v48, %v4512_v43 }
 0x550   : > { %3035 = vmatprep.subr.bf16.mxu0 %v2307_v25  ;;  %v2223_v33 = vmul.f32 %v3254_v34, %v4515_v17  ;;  %v2269_v57 = vadd.f32 %v4675_v19, %v2247_v44  ;;  %v2280_v34 = vld [vmem:[%s5108_s10 + $0x18] sm:$0xff] }
 0x551   : > { %3267 = vrsqrt.f32 %v2186_v32  ;;  %3036 = vmatpush3.bf16.msra.mxu0 %v2307_v25  ;;  %v2306_v51 = vpack.c.bf16 %v2272_v47, %v2271_v27  ;;  %v2248_v37 = vmul.f32 %v4668_v23, %v2226_v14  ;;  %v2281_v47 = vld [vmem:[%s5108_s10 + $0x20] sm:$0xff] }
 0x552   : > { %v3256_v42 = vpop.eup %3255  ;;  %v2245_v43 = vmul.f32 %v4668_v23, %v2223_v33 }
 0x553   : > { %v3258_v40 = vpop.eup %3257  ;;  %3037 = vmatprep.subr.bf16.mxu0 %v2306_v51  ;;  %v2270_v31 = vadd.f32 %v4675_v19, %v2248_v37  ;;  %v2224_v8 = vmul.f32 %v3256_v42, %v4524_v0 }
 0x554   : > { %v2221_v59 = vmul.f32 %v3258_v40, %v4527_v55  ;;  %v2267_v22 = vadd.f32 %v4675_v19, %v2245_v43  ;;  %v2283_v40 = vld [vmem:[%s5108_s10 + $0x30] sm:$0xff]  ;;  %v2285_v43 = vld [vmem:[%s5108_s10 + $0x40] sm:$0xff] }
 0x555   : > { %3038 = vmatpush3.bf16.msra.mxu0 %v2306_v51  ;;  %v2305_v17 = vpack.c.bf16 %v2270_v31, %v2269_v57  ;;  %v2246_v2 = vmul.f32 %v4668_v23, %v2224_v8  ;;  %v2987_v52 = vpop.f32.mrf.mxu0  ;;  %v2284_v57 = vld [vmem:[%s5108_s10 + $0x38] sm:$0xff] }
 0x556   : > { %v3260_v36 = vpop.eup %3259  ;;  %v2243_v0 = vmul.f32 %v4668_v23, %v2221_v59  ;;  %v2286_v59 = vld [vmem:[%s5108_s10 + $0x48] sm:$0xff] }
 0x557   : > { %v3262_v53 = vpop.eup %3261  ;;  %3039 = vmatprep.subr.bf16.mxu0 %v2305_v17  ;;  %v2268_v13 = vadd.f32 %v4675_v19, %v2246_v2  ;;  %v2222_v26 = vmul.f32 %v3260_v36, %v4536_v54  ;;  %v1821_v38 = vpop.f32.mrf.mxu0  ;;  %v2296_v2 = vpack.c.bf16 %v2284_v57, %v2283_v40  ;;  %v2297_v36 = vpack.c.bf16 %v2286_v59, %v2285_v43  ;;  %v5136_v43 = vld [vmem:[#allocation2_spill] sm:$0xff]  ;;  %v5137_v59 = vld [vmem:[#allocation3_spill] sm:$0xff] }
 0x558   : > { %v2219_v29 = vmul.f32 %v3262_v53, %v4539_v63  ;;  %v2265_v21 = vadd.f32 %v4675_v19, %v2243_v0 }
 0x559   : > { %3040 = vmatpush3.bf16.msra.mxu0 %v2305_v17  ;;  %v2304_v55 = vpack.c.bf16 %v2268_v13, %v2267_v22  ;;  %v2244_v18 = vmul.f32 %v4668_v23, %v2222_v26  ;;  %v2988_v45 = vpop.f32.mrf.mxu0  ;;  %v2287_v13 = vld [vmem:[%s5108_s10 + $0x50] sm:$0xff]  ;;  %v2288_v26 = vld [vmem:[%s5108_s10 + $0x58] sm:$0xff] }
 0x55a   : > { %v3264_v11 = vpop.eup %3263  ;;  %v2241_v24 = vmul.f32 %v4668_v23, %v2219_v29  ;;  %v1885_v58 = vpack.c.bf16 %v2988_v45, %v2987_v52  ;;  %v2290_v29 = vld [vmem:[%s5108_s10 + $0x68] sm:$0xff]  ;;  %v2292_v45 = vld [vmem:[%s5108_s10 + $0x78] sm:$0xff] }
 0x55b   : > { %v3266_v56 = vpop.eup %3265  ;;  %3041 = vmatprep.subr.bf16.mxu0 %v2304_v55  ;;  %v2266_v35 = vadd.f32 %v4675_v19, %v2244_v18  ;;  %v2220_v54 = vmul.f32 %v3264_v11, %v4548_v6  ;;  %v1824_v28 = vpop.f32.mrf.mxu0  ;;  %v2291_v11 = vld [vmem:[%s5108_s10 + $0x70] sm:$0xff] }
 0x55c   : > { %v2217_v1 = vmul.f32 %v3266_v56, %v4551_v62  ;;  %v1884_v63 = vpack.c.bf16 %v1824_v28, %v1821_v38  ;;  %v2263_v61 = vadd.f32 %v4675_v19, %v2241_v24  ;;  %v2289_v38 = vld [vmem:[%s5108_s10 + $0x60] sm:$0xff]  ;;  %v2300_v24 = vpack.c.bf16 %v2292_v45, %v2291_v11  ;;  %v2572_v56 = vld [vmem:[%s5110_s12 + $0x70] sm:$0xff]  ;;  %v2571_v28 = vld [vmem:[%s5110_s12 + $0x68] sm:$0xff] }
 0x55d   : > { %3042 = vmatpush3.bf16.msra.mxu0 %v2304_v55  ;;  %v2303_v39 = vpack.c.bf16 %v2266_v35, %v2265_v21  ;;  %v2242_v20 = vmul.f32 %v4668_v23, %v2220_v54  ;;  %v2991_v16 = vpop.f32.mrf.mxu0  ;;  %v2298_v55 = vpack.c.bf16 %v2288_v26, %v2287_v13  ;;  %v2299_v18 = vpack.c.bf16 %v2290_v29, %v2289_v38  ;;  %v2573_v21 = vld [vmem:[%s5110_s12 + $0x78] sm:$0xff]  ;;  %v2570_v54 = vld [vmem:[%s5110_s12 + $0x60] sm:$0xff] }
 0x55e   : > { %v3268_v12 = vpop.eup %3267  ;;  %3017 = vmatprep.mubr.bf16.mxu1 %v1884_v63  ;;  %v2239_v6 = vmul.f32 %v4668_v23, %v2217_v1  ;;  %v2581_v35 = vpack.c.bf16 %v2573_v21, %v2572_v56  ;;  %v2580_v1 = vpack.c.bf16 %v2571_v28, %v2570_v54  ;;  %v2568_v63 = vld [vmem:[%s5110_s12 + $0x50] sm:$0xff] }
 0x55f   : > { %3043 = vmatprep.subr.bf16.mxu0 %v2303_v39  ;;  %v2264_v50 = vadd.f32 %v4675_v19, %v2242_v20  ;;  %v2218_v60 = vmul.f32 %v3268_v12, %v4559_v3  ;;  %v1837_v46 = vpop.f32.mrf.mxu0  ;;  %3018 = vmatmul.mubr.bf16.vlgmr.msra.gmra.mxu1 %v1885_v58  ;;  %v2279_v3 = vld [vmem:[%s5108_s10 + $0x10] sm:$0xff]  ;;  %v2566_v12 = vld [vmem:[%s5110_s12 + $0x40] sm:$0xff]  ;;  %v2567_v58 = vld [vmem:[%s5110_s12 + $0x48] sm:$0xff] }
 0x560   : > { %v2261_v49 = vadd.f32 %v4675_v19, %v2239_v6  ;;  %v2294_v44 = vpack.c.bf16 %v2280_v34, %v2279_v3  ;;  %3065 = vmatprep.subr.bf16.mxu1 %v2581_v35  ;;  %v2562_v6 = vld [vmem:[%s5110_s12 + $0x20] sm:$0xff] }
 0x561   : > { %3044 = vmatpush3.bf16.msra.mxu0 %v2303_v39  ;;  %v2302_v62 = vpack.c.bf16 %v2264_v50, %v2263_v61  ;;  %v2240_v41 = vmul.f32 %v4668_v23, %v2218_v60  ;;  %v2992_v7 = vpop.f32.mrf.mxu0  ;;  %3066 = vmatpush3.bf16.msra.mxu1 %v2581_v35  ;;  %v2569_v39 = vld [vmem:[%s5110_s12 + $0x58] sm:$0xff]  ;;  %v2564_v61 = vld [vmem:[%s5110_s12 + $0x30] sm:$0xff]  ;;  %v3333_v3 = vld [vmem:[%s5102_s4] sm:$0x3] }
 0x562   : > { %v1887_v32 = vpack.c.bf16 %v2992_v7, %v2991_v16  ;;  %3067 = vmatprep.subr.bf16.mxu1 %v2580_v1  ;;  %v2579_v20 = vpack.c.bf16 %v2569_v39, %v2568_v63  ;;  %v2578_v16 = vpack.c.bf16 %v2567_v58, %v2566_v12  ;;  %v2565_v50 = vld [vmem:[%s5110_s12 + $0x38] sm:$0xff] }
 0x563   : > { %3045 = vmatprep.subr.bf16.mxu0 %v2302_v62  ;;  %v2262_v15 = vadd.f32 %v4675_v19, %v2240_v41  ;;  %v1840_v48 = vpop.f32.mrf.mxu0  ;;  %v2282_v19 = vld [vmem:[%s5108_s10 + $0x28] sm:$0xff]  ;;  %v2577_v60 = vpack.c.bf16 %v2565_v50, %v2564_v61  ;;  %v2560_v41 = vld [vmem:[%s5110_s12 + $0x10] sm:$0xff]  ;;  %v2561_v7 = vld [vmem:[%s5110_s12 + $0x18] sm:$0xff] }
 0x564   : > { %v1886_v25 = vpack.c.bf16 %v1840_v48, %v1837_v46  ;;  %v2295_v33 = vpack.c.bf16 %v2282_v19, %v2281_v47  ;;  %v2563_v46 = vld [vmem:[%s5110_s12 + $0x28] sm:$0xff]  ;;  %v4821_v47 = vpop.permute.xlu1 %2332 }
 0x565   : > { %3046 = vmatpush3.bf16.msra.mxu0 %v2302_v62  ;;  %v2301_v27 = vpack.c.bf16 %v2262_v15, %v2261_v49  ;;  %3068 = vmatpush3.bf16.msra.mxu1 %v2580_v1  ;;  %v2576_v62 = vpack.c.bf16 %v2563_v46, %v2562_v6  ;;  %v2575_v49 = vpack.c.bf16 %v2561_v7, %v2560_v41  ;;  %v2558_v15 = vld [vmem:[%s5110_s12] sm:$0xff]  ;;  %v2559_v48 = vld [vmem:[%s5110_s12 + $0x8] sm:$0xff]  ;;  %v5143_v46 = vld [vmem:[#allocation9_spill] sm:$0xff] }
 0x566   : > { %v2995_v23 = vpop.f32.mrf.mxu0  ;;  %3021 = vmatprep.mubr.bf16.mxu1 %v1886_v25  ;;  %3069 = vmatprep.subr.bf16.mxu1 %v2579_v20  ;;  %v2574_v25 = vpack.c.bf16 %v2559_v48, %v2558_v15 }
 0x567   : > { %3047 = vmatprep.subr.bf16.mxu0 %v2301_v27  ;;  %3022 = vmatmul.mubr.bf16.gmra.mxu1 %v1887_v32 }
 0x568   : > { %v1853_v14 = vpop.f32.mrf.mxu0 }
 0x569   : > { %3048 = vmatpush3.bf16.msra.mxu0 %v2301_v27  ;;  %3070 = vmatpush3.bf16.msra.mxu1 %v2579_v20  ;;  %v807_v27 = vsub.s32 0, %v4159_v30  ;;  %v5142_v20 = vld [vmem:[#allocation8_spill] sm:$0xff] }
 0x56a   : > { %v2996_v51 = vpop.f32.mrf.mxu0  ;;  %3071 = vmatprep.subr.bf16.mxu1 %v2578_v16 }
 0x56b   : > { %v1889_v31 = vpack.c.bf16 %v2996_v51, %v2995_v23  ;;  %v4817_v34 = vrot.slane %v3333_v3, %v807_v27 }
 0x56c   : > { %v1856_v37 = vpop.f32.mrf.mxu0  ;;  %3050 = vmatmul.mubr.bf16.vlgmr.msra.gmra.mxu0 %v2294_v44  ;;  %v4823_v44 = vpop.permute.xlu1 %2337 }
 0x56d   : > { %v1888_v42 = vpack.c.bf16 %v1856_v37, %v1853_v14  ;;  %3053 = vmatprep.mubr.bf16.mxu0 %v2295_v33  ;;  %3072 = vmatpush3.bf16.msra.mxu1 %v2578_v16  ;;  %v860_v32 = vadd.f32 %v3981_v4, %v4817_v34  ;;  %v4827_v33 = vadd.f32 %v3987_v9, %v4817_v34 }
 0x56e   : > { %v2999_v8 = vpop.f32.mrf.mxu0  ;;  %3073 = vmatprep.subr.bf16.mxu1 %v2577_v60  ;;  %v850_v51 = vadd.f32 %v3971_v5, %v4817_v34  ;;  %v854_v37 = vadd.f32 %v3975_v10, %v4817_v34  ;;  %v4839_v9 = vadd.f32 %v5136_v43, %v4817_v34  ;;  %v5138_v5 = vld [vmem:[#allocation4_spill] sm:$0xff]  ;;  %v4878_v12 = vadd.f32 %v5142_v20, %v4817_v34 }
 0x56f   : > { %3025 = vmatprep.mubr.bf16.mxu1 %v1888_v42  ;;  %v964_v23 = vmul.f32 0.044715, %v860_v32  ;;  %v966_v4 = vmul.f32 0.044715, %v4827_v33  ;;  %v4847_v10 = vadd.f32 %v5138_v5, %v4817_v34 }
 0x570   : > { %v1869_v17 = vpop.f32.mrf.mxu0  ;;  %3026 = vmatmul.mubr.bf16.gmra.mxu1 %v1889_v31  ;;  %v4834_v42 = vpop.permute.xlu1 %2342  ;;  %v960_v57 = vmul.f32 0.044715, %v850_v51  ;;  %v962_v31 = vmul.f32 0.044715, %v854_v37  ;;  %v4893_v3 = vmul.f32 0.5, %v850_v51 }
 0x571   : > { %3074 = vmatpush3.bf16.msra.mxu1 %v2577_v60  ;;  %v996_v19 = vmul.f32 %v964_v23, %v860_v32  ;;  %v972_v11 = vmul.f32 0.044715, %v4847_v10  ;;  %v4895_v23 = vmul.f32 0.5, %v854_v37 }
 0x572   : > { %v3000_v52 = vpop.f32.mrf.mxu0  ;;  %3075 = vmatprep.subr.bf16.mxu1 %v2576_v62  ;;  %v994_v26 = vmul.f32 %v962_v31, %v854_v37 }
 0x573   : > { %v1891_v0 = vpack.c.bf16 %v3000_v52, %v2999_v8  ;;  %v1028_v14 = vmul.f32 %v996_v19, %v860_v32  ;;  %v998_v8 = vmul.f32 %v966_v4, %v4827_v33  ;;  %v1004_v63 = vmul.f32 %v972_v11, %v4847_v10 }
 0x574   : > { %v1872_v53 = vpop.f32.mrf.mxu0  ;;  %3054 = vmatmul.mubr.bf16.gmra.mxu0 %v2296_v2  ;;  %v992_v2 = vmul.f32 %v960_v57, %v850_v51  ;;  %v4857_v13 = vpop.permute.xlu1 %2347  ;;  %v1026_v21 = vmul.f32 %v994_v26, %v854_v37  ;;  %v5145_v26 = vld [vmem:[#allocation11_spill] sm:$0xff]  ;;  %v4924_v11 = vmul.f32 0.5, %v4827_v33 }
 0x575   : > { %v1890_v22 = vpack.c.bf16 %v1872_v53, %v1869_v17  ;;  %3057 = vmatprep.mubr.bf16.mxu0 %v2297_v36  ;;  %3076 = vmatpush3.bf16.msra.mxu1 %v2576_v62  ;;  %v1060_v30 = vadd.f32 %v1028_v14, %v860_v32  ;;  %v4843_v17 = vadd.f32 %v5137_v59, %v4817_v34  ;;  %v5139_v36 = vld [vmem:[#allocation5_spill] sm:$0xff]  ;;  %v5140_v53 = vld [vmem:[#allocation6_spill] sm:$0xff] }
 0x576   : > { %3077 = vmatprep.subr.bf16.mxu1 %v2575_v49  ;;  %v4851_v52 = vadd.f32 %v5139_v36, %v4817_v34  ;;  %v1030_v29 = vmul.f32 %v998_v8, %v4827_v33  ;;  %v1024_v45 = vmul.f32 %v992_v2, %v850_v51  ;;  %v1058_v60 = vadd.f32 %v1026_v21, %v854_v37  ;;  %v5144_v59 = vld [vmem:[#allocation10_spill] sm:$0xff] }
 0x577   : > { %3029 = vmatprep.mubr.bf16.mxu1 %v1890_v22  ;;  %v1092_v40 = vmul.f32 0.7978846, %v1060_v30  ;;  %v4855_v22 = vadd.f32 %v5140_v53, %v4817_v34  ;;  %v4885_v62 = vadd.f32 %v5143_v46, %v4817_v34  ;;  %v1036_v48 = vmul.f32 %v1004_v63, %v4847_v10 }
 0x578   : > { %3030 = vmatmul.mubr.bf16.gmra.mxu1 %v1891_v0  ;;  %v5141_v0 = vld [vmem:[#allocation7_spill] sm:$0xff]  ;;  %v1062_v54 = vadd.f32 %v1030_v29, %v4827_v33  ;;  %v4874_v39 = vpop.permute.xlu1 %2352  ;;  %v1056_v16 = vadd.f32 %v1024_v45, %v850_v51  ;;  %v932_v30 = vmul.f32 0.5, %v860_v32  ;;  %v1090_v31 = vmul.f32 0.7978846, %v1058_v60  ;;  %v5146_v29 = vld [vmem:[#allocation12_spill] sm:$0xff] }
 0x579   : > { %3078 = vmatpush3.bf16.msra.mxu1 %v2575_v49  ;;  %3269 = vtanh.f32 %v1092_v40  ;;  %v4861_v38 = vadd.f32 %v5141_v0, %v4817_v34  ;;  %v976_v56 = vmul.f32 0.044715, %v4855_v22  ;;  %v982_v43 = vmul.f32 0.044715, %v4885_v62  ;;  %v4938_v33 = vld [vmem:[%s5105_s7] ss:$0 sm:$0xff] }
 0x57a   : > { %3079 = vmatprep.subr.bf16.mxu1 %v2574_v25  ;;  %v1094_v7 = vmul.f32 0.7978846, %v1062_v54  ;;  %v1088_v14 = vmul.f32 0.7978846, %v1056_v16  ;;  %v4905_v51 = vadd.f32 %v5144_v59, %v4817_v34  ;;  %v1068_v2 = vadd.f32 %v1036_v48, %v4847_v10  ;;  %v5147_v54 = vld [vmem:[#allocation13_spill] sm:$0xff] }
 0x57b   : > { %v978_v35 = vmul.f32 0.044715, %v4861_v38  ;;  %v1008_v50 = vmul.f32 %v976_v56, %v4855_v22  ;;  %v4915_v0 = vadd.f32 %v5145_v26, %v4817_v34  ;;  %v1014_v21 = vmul.f32 %v982_v43, %v4885_v62 }
 0x57c   : > { %3058 = vmatmul.mubr.bf16.gmra.mxu0 %v2298_v55  ;;  %v968_v55 = vmul.f32 0.044715, %v4839_v9  ;;  %v4899_v57 = vpop.permute.xlu1 %2357  ;;  %3271 = vtanh.f32 %v1094_v7  ;;  %v1100_v16 = vmul.f32 0.7978846, %v1068_v2 }
 0x57d   : > { %3061 = vmatprep.mubr.bf16.mxu0 %v2299_v18  ;;  %3080 = vmatpush3.bf16.msra.mxu1 %v2574_v25  ;;  %v970_v18 = vmul.f32 0.044715, %v4843_v17  ;;  %v1010_v6 = vmul.f32 %v978_v35, %v4861_v38  ;;  %v980_v25 = vmul.f32 0.044715, %v4878_v12  ;;  %v1040_v40 = vmul.f32 %v1008_v50, %v4855_v22 }
 0x57e   : > { %v1000_v28 = vmul.f32 %v968_v55, %v4839_v9  ;;  %v4919_v55 = vadd.f32 %v5146_v29, %v4817_v34  ;;  %3273 = vtanh.f32 %v1088_v14  ;;  %v984_v35 = vmul.f32 0.044715, %v4905_v51 }
 0x57f   : > { %v1002_v1 = vmul.f32 %v970_v18, %v4843_v17  ;;  %v1042_v8 = vmul.f32 %v1010_v6, %v4861_v38  ;;  %v1012_v53 = vmul.f32 %v980_v25, %v4878_v12  ;;  %3275 = vtanh.f32 %v1090_v31  ;;  %v2328_v25 = vpop.permute.xlu0 %2327 }
 0x580   : > { %v1032_v49 = vmul.f32 %v1000_v28, %v4839_v9  ;;  %v4933_v28 = vadd.f32 %v5147_v54, %v4817_v34  ;;  %v986_v34 = vmul.f32 0.044715, %v4915_v0  ;;  %v988_v6 = vmul.f32 0.044715, %v4919_v55 }
 0x581   : > { %v1034_v15 = vmul.f32 %v1002_v1, %v4843_v17  ;;  %v1074_v56 = vadd.f32 %v1042_v8, %v4861_v38  ;;  %v1044_v60 = vmul.f32 %v1012_v53, %v4878_v12 }
 0x582   : > { %v1064_v32 = vadd.f32 %v1032_v49, %v4839_v9 }
 0x583   : > { %v1066_v5 = vadd.f32 %v1034_v15, %v4843_v17  ;;  %v1106_v14 = vmul.f32 0.7978846, %v1074_v56 }
 0x584   : > { %3062 = vmatmul.mubr.bf16.gmra.mxu0 %v2300_v24  ;;  %v974_v24 = vmul.f32 0.044715, %v4851_v52  ;;  %v1096_v63 = vmul.f32 0.7978846, %v1064_v32 }
 0x585   : > { %v1098_v20 = vmul.f32 0.7978846, %v1066_v5  ;;  %v1018_v5 = vmul.f32 %v986_v34, %v4915_v0 }
 0x586   : > { %v1006_v61 = vmul.f32 %v974_v24, %v4851_v52  ;;  %v3270_v19 = vpop.eup %3269  ;;  %v1072_v24 = vadd.f32 %v1040_v40, %v4855_v22  ;;  %v990_v40 = vmul.f32 0.044715, %v4933_v28  ;;  %3277 = vtanh.f32 %v1096_v63 }
 0x587   : > { %v1156_v36 = vadd.f32 1.0, %v3270_v19  ;;  %3279 = vtanh.f32 %v1098_v20 }
 0x588   : > { %v1038_v4 = vmul.f32 %v1006_v61, %v4851_v52  ;;  %v4942_v61 = vpop.permute.xlu1 %2362  ;;  %v1104_v15 = vmul.f32 0.7978846, %v1072_v24  ;;  %3281 = vtanh.f32 %v1100_v16  ;;  %v1022_v56 = vmul.f32 %v990_v40, %v4933_v28 }
 0x589   : > { %v4944_v50 = vmul.f32 %v1156_v36, %v932_v30  ;;  %v1046_v30 = vmul.f32 %v1014_v21, %v4885_v62  ;;  %v3272_v20 = vpop.eup %3271  ;;  %v1050_v16 = vmul.f32 %v1018_v5, %v4915_v0 }
 0x58a   : > { %v1070_v45 = vadd.f32 %v1038_v4, %v4851_v52  ;;  %v1016_v4 = vmul.f32 %v984_v35, %v4905_v51 }
 0x58c   : > { %v1102_v49 = vmul.f32 0.7978846, %v1070_v45  ;;  %v4964_v53 = vpop.permute.xlu1 %2367  ;;  %v1078_v45 = vadd.f32 %v1046_v30, %v4885_v62  ;;  %v1048_v24 = vmul.f32 %v1016_v4, %v4905_v51  ;;  %v4986_v30 = vpop.permute.xlu0 %2372 }
 0x58e   : > { %3283 = vtanh.f32 %v1102_v49 }
 0x590   : > { %v2378_v5 = vpop.permute.xlu1 %2377 }
 0x61f   : > { %v3019_v58 = vpop.f32.mrf.mxu1 }
 0x620   : > { %v1966_v48 = vadd.f32 %v3019_v58, %v4938_v33  ;;  %v1076_v58 = vadd.f32 %v1044_v60, %v4878_v12 }
 0x621   : > { %v1957_v41 = vpop.f32.mrf.mxu1 }
 0x622   : > { %v1958_v43 = vadd.f32 %v4938_v33, %v1957_v41 }
 0x623   : > { %v4891_v27 = vpop.f32.mrf.mxu1 }
 0x624   : > { %v1969_v26 = vadd.f32 %v4891_v27, %v4938_v33 }
 0x625   : > { %v4907_v37 = vpop.f32.mrf.mxu1 }
 0x626   : > { %v1961_v54 = vadd.f32 %v4938_v33, %v4907_v37 }
 0x627   : > { %v4921_v18 = vpop.f32.mrf.mxu1 }
 0x629   : > { %v4940_v1 = vpop.f32.mrf.mxu1 }
 0x62a   : > { %v1974_v40 = vadd.f32 %v4938_v33, %v4940_v1 }
 0x62b   : > { %v4949_v46 = vpop.f32.mrf.mxu1 }
 0x62c   : > { %v3051_v7 = vpop.f32.mrf.mxu0 }
 0x62d   : > { %v2448_v19 = vadd.f32 %v3051_v7, %v4823_v44  ;;  %v4956_v31 = vpop.f32.mrf.mxu1  ;;  %v1020_v44 = vmul.f32 %v988_v6, %v4919_v55  ;;  %v1982_v7 = vadd.f32 %v4921_v18, %v4938_v33 }
 0x62e   : > { %v2439_v8 = vpop.f32.mrf.mxu0 }
 0x62f   : > { %v2504_v59 = vadd.f32 %v2448_v19, %v1966_v48  ;;  %v2440_v32 = vadd.f32 %v2439_v8, %v2328_v25  ;;  %v1052_v60 = vmul.f32 %v1020_v44, %v4919_v55  ;;  %v3274_v48 = vpop.eup %3273  ;;  %v1110_v25 = vmul.f32 0.7978846, %v1078_v45 }
 0x630   : > { %v4962_v2 = vpop.f32.mrf.mxu1  ;;  %v3052_v36 = vpop.f32.mrf.mxu0  ;;  %v1054_v19 = vmul.f32 %v1022_v56, %v4933_v28  ;;  %v1977_v45 = vadd.f32 %v4938_v33, %v4956_v31 }
 0x631   : > { %v2502_v29 = vadd.f32 %v2440_v32, %v1958_v43  ;;  %v2451_v41 = vadd.f32 %v3052_v36, %v4834_v42  ;;  %3285 = vtanh.f32 %v2504_v59  ;;  %v1108_v42 = vmul.f32 0.7978846, %v1076_v58  ;;  %v3276_v59 = vpop.eup %3275 }
 0x632   : > { %v4972_v21 = vpop.f32.mrf.mxu1  ;;  %v2442_v35 = vpop.f32.mrf.mxu0  ;;  %v1082_v32 = vadd.f32 %v1050_v16, %v4915_v0  ;;  %v1084_v58 = vadd.f32 %v1052_v60, %v4919_v55 }
 0x633   : > { %v2505_v63 = vadd.f32 %v2451_v41, %v1969_v26  ;;  %v2443_v27 = vadd.f32 %v2442_v35, %v4821_v47  ;;  %3287 = vtanh.f32 %v2502_v29  ;;  %v1080_v47 = vadd.f32 %v1048_v24, %v4905_v51  ;;  %v5000_v35 = vpop.eup %3277 }
 0x634   : > { %v4979_v34 = vpop.f32.mrf.mxu1  ;;  %v3055_v6 = vpop.f32.mrf.mxu0  ;;  %v1086_v29 = vadd.f32 %v1054_v19, %v4933_v28  ;;  %v1152_v41 = vadd.f32 1.0, %v3274_v48 }
 0x635   : > { %3289 = vtanh.f32 %v2505_v63  ;;  %v2503_v49 = vadd.f32 %v2443_v27, %v1961_v54  ;;  %v2464_v37 = vadd.f32 %v3055_v6, %v4899_v57  ;;  %v1158_v57 = vadd.f32 1.0, %v3272_v20  ;;  %v3280_v20 = vpop.eup %3279 }
 0x636   : > { %v2455_v4 = vpop.f32.mrf.mxu0  ;;  %3291 = vtanh.f32 %v1104_v15  ;;  %v1992_v18 = vpop.f32.mrf.mxu1  ;;  %v1985_v15 = vadd.f32 %v4949_v46, %v4938_v33  ;;  %v1112_v26 = vmul.f32 0.7978846, %v1080_v47  ;;  %v1114_v46 = vmul.f32 0.7978846, %v1082_v32 }
 0x637   : > { %3293 = vtanh.f32 %v2503_v49  ;;  %v2508_v8 = vadd.f32 %v2464_v37, %v1982_v7  ;;  %v2456_v43 = vadd.f32 %v2455_v4, %v4857_v13  ;;  %v1116_v54 = vmul.f32 0.7978846, %v1084_v58  ;;  %v3282_v60 = vpop.eup %3281  ;;  %v2388_v7 = vpop.permute.xlu1 %2387 }
 0x638   : > { %v3056_v44 = vpop.f32.mrf.mxu0  ;;  %3295 = vtanh.f32 %v1106_v14  ;;  %v3031_v24 = vpop.f32.mrf.mxu1  ;;  %v1154_v27 = vadd.f32 1.0, %v3276_v59  ;;  %v1190_v6 = vmul.f32 %v1158_v57, %v4924_v11  ;;  %v1184_v37 = vmul.f32 %v1152_v41, %v4893_v3 }
 0x639   : > { %v2506_v36 = vadd.f32 %v2456_v43, %v1974_v40  ;;  %v2467_v1 = vadd.f32 %v3056_v44, %v4942_v61  ;;  %3297 = vtanh.f32 %v1108_v42  ;;  %v2383_v61 = vpop.permute.xlu0 %2382  ;;  %v1998_v42 = vadd.f32 %v4962_v2, %v4938_v33  ;;  %v3284_v48 = vpop.eup %3283 }
 0x63a   : > { %3299 = vtanh.f32 %v2508_v8  ;;  %v2458_v13 = vpop.f32.mrf.mxu0  ;;  %v2005_v47 = vpop.f32.mrf.mxu1  ;;  %v1186_v8 = vmul.f32 %v1154_v27, %v4895_v23  ;;  %v940_v11 = vmul.f32 0.5, %v4847_v10  ;;  %v942_v43 = vmul.f32 0.5, %v4851_v52 }
 0x63b   : > { %v2509_v56 = vadd.f32 %v2467_v1, %v1985_v15  ;;  %v2459_v14 = vadd.f32 %v2458_v13, %v4874_v39  ;;  %3301 = vtanh.f32 %v1110_v25  ;;  %v1118_v39 = vmul.f32 0.7978846, %v1086_v29 }
 0x63c   : > { %3303 = vtanh.f32 %v2506_v36  ;;  %v3059_v63 = vpop.f32.mrf.mxu0  ;;  %v1990_v25 = vadd.f32 %v4938_v33, %v4972_v21  ;;  %v2001_v59 = vadd.f32 %v4979_v34, %v4938_v33  ;;  %v1164_v44 = vadd.f32 1.0, %v3282_v60  ;;  %v3032_v10 = vpop.f32.mrf.mxu1 }
 0x63d   : > { %3305 = vtanh.f32 %v2509_v56  ;;  %v2507_v16 = vadd.f32 %v2459_v14, %v1977_v45  ;;  %v2480_v31 = vadd.f32 %v3059_v63, %v2378_v5  ;;  %v2393_v58 = vpop.permute.xlu0 %2392  ;;  %v1166_v15 = vadd.f32 1.0, %v3284_v48 }
 0x63e   : > { %v2471_v49 = vpop.f32.mrf.mxu0  ;;  %3307 = vtanh.f32 %v1112_v26  ;;  %v3286_v4 = vpop.eup %3285  ;;  %v2014_v29 = vadd.f32 %v3031_v24, %v4938_v33  ;;  %v1160_v27 = vadd.f32 1.0, %v5000_v35  ;;  %v938_v48 = vmul.f32 0.5, %v4843_v17 }
 0x63f   : > { %3309 = vtanh.f32 %v2507_v16  ;;  %v2512_v19 = vadd.f32 %v2480_v31, %v1998_v42  ;;  %v2472_v2 = vadd.f32 %v2471_v49, %v4964_v53  ;;  %v1993_v53 = vadd.f32 %v4938_v33, %v1992_v18  ;;  %v2398_v26 = vpop.permute.xlu1 %2397  ;;  %v2008_v24 = vpop.f32.mrf.mxu1 }
 0x640   : > { %v3060_v40 = vpop.f32.mrf.mxu0  ;;  %3311 = vtanh.f32 %v1114_v46  ;;  %v3288_v3 = vpop.eup %3287  ;;  %v2536_v18 = vmul.f32 %v3286_v4, %v4944_v50  ;;  %v1162_v42 = vadd.f32 1.0, %v3280_v20  ;;  %v1198_v20 = vmul.f32 %v1166_v15, %v942_v43 }
 0x641   : > { %v2510_v57 = vadd.f32 %v2472_v2, %v1990_v25  ;;  %v2483_v21 = vadd.f32 %v3060_v40, %v2383_v61  ;;  %3313 = vtanh.f32 %v1116_v54  ;;  %v2534_v41 = vmul.f32 %v3288_v3, %v1184_v37 }
 0x642   : > { %v3290_v32 = vpop.eup %3289  ;;  %v2474_v5 = vpop.f32.mrf.mxu0  ;;  %3315 = vtanh.f32 %v1118_v39  ;;  %v2006_v61 = vadd.f32 %v4938_v33, %v2005_v47  ;;  %v936_v37 = vmul.f32 0.5, %v4839_v9  ;;  %v1196_v25 = vmul.f32 %v1164_v44, %v940_v11 }
 0x643   : > { %v5015_v23 = vpop.eup %3291  ;;  %3317 = vtanh.f32 %v2512_v19  ;;  %v2513_v52 = vadd.f32 %v2483_v21, %v2001_v59  ;;  %v2475_v36 = vadd.f32 %v2474_v5, %v4986_v30  ;;  %v2537_v1 = vmul.f32 %v3290_v32, %v1190_v6  ;;  %v2403_v39 = vpop.permute.xlu0 %2402 }
 0x644   : > { %v3294_v34 = vpop.eup %3293  ;;  %3319 = vtanh.f32 %v2510_v57  ;;  %v3063_v13 = vpop.f32.mrf.mxu0  ;;  %v2017_v19 = vadd.f32 %v3032_v10, %v4938_v33  ;;  %v2009_v40 = vadd.f32 %v4938_v33, %v2008_v24  ;;  %v1194_v3 = vmul.f32 %v1162_v42, %v938_v48 }
 0x645   : > { %v3296_v45 = vpop.eup %3295  ;;  %3321 = vtanh.f32 %v2513_v52  ;;  %v2511_v56 = vadd.f32 %v2475_v36, %v1993_v53  ;;  %v2496_v14 = vadd.f32 %v3063_v13, %v2398_v26  ;;  %v2535_v46 = vmul.f32 %v3294_v34, %v1186_v8 }
 0x646   : > { %v3298_v54 = vpop.eup %3297  ;;  %v2487_v63 = vpop.f32.mrf.mxu0  ;;  %v2551_v30 = vpack.c.bf16 %v2537_v1, %v2536_v18  ;;  %v1192_v8 = vmul.f32 %v1160_v27, %v936_v37  ;;  %v948_v52 = vmul.f32 0.5, %v4878_v12  ;;  %v950_v36 = vmul.f32 0.5, %v4885_v62 }
 0x647   : > { %v3300_v16 = vpop.eup %3299  ;;  %3323 = vtanh.f32 %v2511_v56  ;;  %v2516_v31 = vadd.f32 %v2496_v14, %v2014_v29  ;;  %v2488_v60 = vadd.f32 %v2487_v63, %v2388_v7  ;;  %v2550_v6 = vpack.c.bf16 %v2535_v46, %v2534_v41 }
 0x648   : > { %v3302_v50 = vpop.eup %3301  ;;  %v3064_v49 = vpop.f32.mrf.mxu0  ;;  %v2540_v59 = vmul.f32 %v3300_v16, %v1196_v25  ;;  %v1172_v53 = vadd.f32 1.0, %v3298_v54  ;;  %v1170_v26 = vadd.f32 1.0, %v3296_v45  ;;  %v944_v41 = vmul.f32 0.5, %v4855_v22 }
 0x649   : > { %v3304_v47 = vpop.eup %3303  ;;  %v2514_v2 = vadd.f32 %v2488_v60, %v2006_v61  ;;  %v2499_v35 = vadd.f32 %v3064_v49, %v2403_v39  ;;  %3081 = vmatprep.mubr.bf16.mxu1 %v2550_v6  ;;  %3325 = vtanh.f32 %v2516_v31  ;;  %v1174_v5 = vadd.f32 1.0, %v3302_v50 }
 0x64a   : > { %v3306_v4 = vpop.eup %3305  ;;  %v2490_v7 = vpop.f32.mrf.mxu0  ;;  %3082 = vmatmul.mubr.bf16.vlgmr.msra.gmra.mxu1 %v2551_v30  ;;  %v2538_v32 = vmul.f32 %v3304_v47, %v1192_v8  ;;  %v946_v18 = vmul.f32 0.5, %v4861_v38  ;;  %v1204_v56 = vmul.f32 %v1172_v53, %v948_v52  ;;  %v956_v16 = vmul.f32 0.5, %v4919_v55  ;;  %v3334_v8 = vld [vmem:[%s3458_s19 + $0x10] sm:$0xff] }
 0x64b   : > { %v3308_v57 = vpop.eup %3307  ;;  %v2517_v9 = vadd.f32 %v2499_v35, %v2017_v19  ;;  %v2491_v17 = vadd.f32 %v2490_v7, %v2393_v58  ;;  %v2541_v11 = vmul.f32 %v3306_v4, %v1198_v20  ;;  %3327 = vtanh.f32 %v2514_v2 }
 0x64c   : > { %v3310_v21 = vpop.eup %3309  ;;  %v1168_v58 = vadd.f32 1.0, %v5015_v23  ;;  %v1206_v14 = vmul.f32 %v1174_v5, %v950_v36  ;;  %v1202_v54 = vmul.f32 %v1170_v26, %v946_v18  ;;  %v1176_v22 = vadd.f32 1.0, %v3308_v57  ;;  %v3336_v5 = vld [vmem:[%s3458_s19 + $0x18] sm:$0xff]  ;;  %v3339_v18 = vld [vmem:[%s3458_s19 + $0x20] sm:$0xff] }
 0x64d   : > { %v3312_v44 = vpop.eup %3311  ;;  %3329 = vtanh.f32 %v2517_v9  ;;  %v2515_v43 = vadd.f32 %v2491_v17, %v2009_v40  ;;  %v2539_v15 = vmul.f32 %v3310_v21, %v1194_v3  ;;  %v2553_v33 = vpack.c.bf16 %v2541_v11, %v2540_v59  ;;  %v3335_v17 = vld [vmem:[%s3458_s19] sm:$0xff] }
 0x64e   : > { %v3314_v10 = vpop.eup %3313  ;;  %v1200_v12 = vmul.f32 %v1168_v58, %v944_v41  ;;  %v1178_v31 = vadd.f32 1.0, %v3312_v44  ;;  %v958_v38 = vmul.f32 0.5, %v4933_v28  ;;  %v952_v50 = vmul.f32 0.5, %v4905_v51  ;;  %v5038_v51 = vld [vmem:[%s5111_s13] ss:$0 sm:$0xff]  ;;  %v3338_v58 = vld [vmem:[%s3458_s19 + $0x30] sm:$0xff] }
 0x64f   : > { %v3316_v1 = vpop.eup %3315  ;;  %3331 = vtanh.f32 %v2515_v43  ;;  %v2552_v34 = vpack.c.bf16 %v2539_v15, %v2538_v32  ;;  %v1180_v30 = vadd.f32 1.0, %v3314_v10  ;;  %v954_v39 = vmul.f32 0.5, %v4915_v0  ;;  %v3337_v10 = vld [vmem:[%s3458_s19 + $0x8] sm:$0xff] }
 0x650   : > { %v3318_v29 = vpop.eup %3317  ;;  %v1182_v42 = vadd.f32 1.0, %v3316_v1  ;;  %v1208_v25 = vmul.f32 %v1176_v22, %v952_v50 }
 0x651   : > { %v3320_v13 = vpop.eup %3319  ;;  %3085 = vmatprep.mubr.bf16.mxu1 %v2552_v34  ;;  %v2544_v62 = vmul.f32 %v3318_v29, %v1204_v56  ;;  %v1212_v49 = vmul.f32 %v1180_v30, %v956_v16  ;;  %v1210_v47 = vmul.f32 %v1178_v31, %v954_v39 }
 0x652   : > { %v3322_v46 = vpop.eup %3321  ;;  %3086 = vmatmul.mubr.bf16.gmra.mxu1 %v2553_v33  ;;  %v2542_v27 = vmul.f32 %v3320_v13, %v1200_v12  ;;  %v1214_v37 = vmul.f32 %v1182_v42, %v958_v38 }
 0x653   : > { %v2545_v61 = vmul.f32 %v3322_v46, %v1206_v14 }
 0x654   : > { %v3324_v63 = vpop.eup %3323 }
 0x655   : > { %v2543_v23 = vmul.f32 %v3324_v63, %v1202_v54  ;;  %v2555_v45 = vpack.c.bf16 %v2545_v61, %v2544_v62  ;;  %v3340_v54 = vld [vmem:[%s3458_s19 + $0x38] sm:$0xff] }
 0x656   : > { %v3326_v60 = vpop.eup %3325 }
 0x657   : > { %v2554_v24 = vpack.c.bf16 %v2543_v23, %v2542_v27  ;;  %v2548_v55 = vmul.f32 %v3326_v60, %v1212_v49  ;;  %v3341_v27 = vld [vmem:[%s3458_s19 + $0x28] sm:$0xff] }
 0x658   : > { %v3328_v6 = vpop.eup %3327 }
 0x659   : > { %3089 = vmatprep.mubr.bf16.mxu1 %v2554_v24  ;;  %v2546_v35 = vmul.f32 %v3328_v6, %v1208_v25  ;;  %v3342_v24 = vld [vmem:[%s3458_s19 + $0x50] sm:$0xff]  ;;  %v3343_v6 = vld [vmem:[%s3458_s19 + $0x40] sm:$0xff] }
 0x65a   : > { %v3330_v48 = vpop.eup %3329  ;;  %3090 = vmatmul.mubr.bf16.gmra.mxu1 %v2555_v45 }
 0x65b   : > { %v2549_v19 = vmul.f32 %v3330_v48, %v1214_v37  ;;  %v3344_v48 = vld [vmem:[%s3458_s19 + $0x58] sm:$0xff] }
 0x65c   : > { %v3332_v2 = vpop.eup %3331 }
 0x65d   : > { %v2547_v28 = vmul.f32 %v3332_v2, %v1210_v47  ;;  %v2557_v20 = vpack.c.bf16 %v2549_v19, %v2548_v55  ;;  %v3345_v2 = vld [vmem:[%s3458_s19 + $0x48] sm:$0xff] }
 0x65f   : > { %v2556_v4 = vpack.c.bf16 %v2547_v28, %v2546_v35 }
 0x661   : > { %3093 = vmatprep.mubr.bf16.mxu1 %v2556_v4 }
 0x662   : > { %3094 = vmatmul.mubr.bf16.gmra.mxu1 %v2557_v20 }
 0x70a   : > { %v3083_v0 = vpop.f32.mrf.mxu1 }
 0x70b   : > { %v2632_v40 = vadd.f32 %v3083_v0, %v5038_v51  ;;  %v3346_v0 = vld [vmem:[%s3458_s19 + $0x70] sm:$0xff] }
 0x70c   : > { %v2623_v7 = vpop.f32.mrf.mxu1 }
 0x70d   : > { %v2688_v3 = vadd.f32 %v3334_v8, %v2632_v40  ;;  %v2624_v59 = vadd.f32 %v5038_v51, %v2623_v7 }
 0x70e   : > { %v3084_v57 = vpop.f32.mrf.mxu1 }
 0x70f   : > { %v2704_v9 = vmax.f32 %v2688_v3, 0.0  ;;  %v2686_v11 = vadd.f32 %v3335_v17, %v2624_v59  ;;  %v2635_v21 = vadd.f32 %v3084_v57, %v5038_v51  ;;  %v3347_v59 = vld [vmem:[%s3458_s19 + $0x60] sm:$0xff] }
 0x710   : > { %v2626_v32 = vpop.f32.mrf.mxu1 }
 0x711   : > { %2720 = vst [vmem:[%s5048_s26 + $0x10] sm:$0xff] %v2704_v9  ;;  %v2702_v53 = vmax.f32 %v2686_v11, 0.0  ;;  %v2689_v44 = vadd.f32 %v3336_v5, %v2635_v21  ;;  %v2627_v43 = vadd.f32 %v5038_v51, %v2626_v32  ;;  %v3348_v21 = vld [vmem:[%s3458_s19 + $0x78] sm:$0xff] }
 0x712   : > { %v3087_v15 = vpop.f32.mrf.mxu1 }
 0x713   : > { %2718 = vst [vmem:[%s5048_s26] sm:$0xff] %v2702_v53  ;;  %v2705_v33 = vmax.f32 %v2689_v44, 0.0  ;;  %v2687_v52 = vadd.f32 %v3337_v10, %v2627_v43  ;;  %v2648_v36 = vadd.f32 %v3087_v15, %v5038_v51  ;;  %v3349_v44 = vld [vmem:[%s3458_s19 + $0x68] sm:$0xff] }
 0x714   : > { %v2639_v1 = vpop.f32.mrf.mxu1 }
 0x715   : > { %2721 = vst [vmem:[%s5048_s26 + $0x18] sm:$0xff] %v2705_v33  ;;  %v2703_v34 = vmax.f32 %v2687_v52, 0.0  ;;  %v2692_v26 = vadd.f32 %v3338_v58, %v2648_v36  ;;  %v2640_v29 = vadd.f32 %v5038_v51, %v2639_v1 }
 0x716   : > { %v3088_v13 = vpop.f32.mrf.mxu1 }
 0x717   : > { %2719 = vst [vmem:[%s5048_s26 + $0x8] sm:$0xff] %v2703_v34  ;;  %v2708_v41 = vmax.f32 %v2692_v26, 0.0  ;;  %v2690_v56 = vadd.f32 %v3339_v18, %v2640_v29  ;;  %v2651_v14 = vadd.f32 %v3088_v13, %v5038_v51 }
 0x718   : > { %v2642_v46 = vpop.f32.mrf.mxu1 }
 0x719   : > { %2724 = vst [vmem:[%s5048_s26 + $0x30] sm:$0xff] %v2708_v41  ;;  %v2706_v12 = vmax.f32 %v2690_v56, 0.0  ;;  %v2693_v62 = vadd.f32 %v3340_v54, %v2651_v14  ;;  %v2643_v61 = vadd.f32 %v5038_v51, %v2642_v46 }
 0x71a   : > { %v3091_v63 = vpop.f32.mrf.mxu1 }
 0x71b   : > { %2722 = vst [vmem:[%s5048_s26 + $0x20] sm:$0xff] %v2706_v12  ;;  %v2709_v30 = vmax.f32 %v2693_v62, 0.0  ;;  %v2691_v23 = vadd.f32 %v3341_v27, %v2643_v61  ;;  %v2664_v45 = vadd.f32 %v3091_v63, %v5038_v51 }
 0x71c   : > { %v2655_v42 = vpop.f32.mrf.mxu1 }
 0x71d   : > { %2725 = vst [vmem:[%s5048_s26 + $0x38] sm:$0xff] %v2709_v30  ;;  %v2707_v16 = vmax.f32 %v2691_v23, 0.0  ;;  %v2696_v22 = vadd.f32 %v3342_v24, %v2664_v45  ;;  %v2656_v31 = vadd.f32 %v5038_v51, %v2655_v42 }
 0x71e   : > { %v3092_v38 = vpop.f32.mrf.mxu1 }
 0x71f   : > { %2723 = vst [vmem:[%s5048_s26 + $0x28] sm:$0xff] %v2707_v16  ;;  %v2712_v60 = vmax.f32 %v2696_v22, 0.0  ;;  %v2694_v50 = vadd.f32 %v3343_v6, %v2656_v31  ;;  %v2667_v39 = vadd.f32 %v3092_v38, %v5038_v51 }
 0x720   : > { %v2658_v49 = vpop.f32.mrf.mxu1 }
 0x721   : > { %2728 = vst [vmem:[%s5048_s26 + $0x50] sm:$0xff] %v2712_v60  ;;  %v2710_v37 = vmax.f32 %v2694_v50, 0.0  ;;  %v2697_v25 = vadd.f32 %v3344_v48, %v2667_v39  ;;  %v2659_v47 = vadd.f32 %v5038_v51, %v2658_v49 }
 0x722   : > { %v3095_v55 = vpop.f32.mrf.mxu1 }
 0x723   : > { %2726 = vst [vmem:[%s5048_s26 + $0x40] sm:$0xff] %v2710_v37  ;;  %v2713_v19 = vmax.f32 %v2697_v25, 0.0  ;;  %v2695_v35 = vadd.f32 %v3345_v2, %v2659_v47  ;;  %v2680_v28 = vadd.f32 %v3095_v55, %v5038_v51 }
 0x724   : > { %v2671_v20 = vpop.f32.mrf.mxu1 }
 0x725   : > { %2729 = vst [vmem:[%s5048_s26 + $0x58] sm:$0xff] %v2713_v19  ;;  %v2711_v4 = vmax.f32 %v2695_v35, 0.0  ;;  %v2700_v40 = vadd.f32 %v3346_v0, %v2680_v28  ;;  %v2672_v7 = vadd.f32 %v5038_v51, %v2671_v20 }
 0x726   : > { %v3096_v8 = vpop.f32.mrf.mxu1 }
 0x727   : > { %2727 = vst [vmem:[%s5048_s26 + $0x48] sm:$0xff] %v2711_v4  ;;  %v2716_v3 = vmax.f32 %v2700_v40, 0.0  ;;  %v2698_v57 = vadd.f32 %v3347_v59, %v2672_v7  ;;  %v2683_v9 = vadd.f32 %v3096_v8, %v5038_v51 }
 0x728   : > { %v2674_v17 = vpop.f32.mrf.mxu1 }
 0x729   : > { %2732 = vst [vmem:[%s5048_s26 + $0x70] sm:$0xff] %v2716_v3  ;;  %v2714_v11 = vmax.f32 %v2698_v57, 0.0  ;;  %v2701_v32 = vadd.f32 %v3348_v21, %v2683_v9  ;;  %v2675_v53 = vadd.f32 %v5038_v51, %v2674_v17 }
 0x72b   : > { %2730 = vst [vmem:[%s5048_s26 + $0x60] sm:$0xff] %v2714_v11  ;;  %v2717_v5 = vmax.f32 %v2701_v32, 0.0  ;;  %v2699_v43 = vadd.f32 %v3349_v44, %v2675_v53 }
 0x72d   : > { %2733 = vst [vmem:[%s5048_s26 + $0x78] sm:$0xff] %v2717_v5  ;;  %v2715_v15 = vmax.f32 %v2699_v43, 0.0 }
 0x72f   : > { %2731 = vst [vmem:[%s5048_s26 + $0x68] sm:$0xff] %v2715_v15 }
 0x730 PF: > { %s24_s29 = sadd.s32 1, %s3356_s29  }
 0x731   : > { %p21_p4 = scmp.ge.s32.totalorder %s24_s29, 4  }
 0x733   :  { %23 = sbr.rel (!%p21_p4) target bundleno = 1 (0x1), region = 106 }

// kernel: glam_forward.11
= control target key start
LH: loop header
LB: loop body
LE: loop exit
PB: predicated region body
PF: predicated region fallthrough
CT: control target
= control target key end

     0   :  { %s4513_s1 = inlined_call_operand.vmem [shape: bf16[3200,128], index: 1, kind: input, shape index: {}]   ;;  %s4514_s0 = inlined_call_operand.vmem [shape: bf16[32,3200], index: 0, kind: input, shape index: {}]   ;;  %s4515_s2 = inlined_call_operand.vmem [shape: f32[1,128], index: 2, kind: input, shape index: {}]   ;;  %s4516_s3 = inlined_call_operand.vmem [shape: f32[1,128], index: 3, kind: input, shape index: {}]   ;;  %s4517_s4 = inlined_call_operand.vmem [shape: f32[1,128], index: 4, kind: input, shape index: {}]   ;;  %s4518_s5 = inlined_call_operand.vmem [shape: f32[32,128], index: 5, kind: output, shape index: {}]  }
   0x1   :  { %v3256_v0 = vld [vmem:[%s4513_s1 + $0x78] sm:$0xff]   ;;  %v3260_v4 = vld [vmem:[%s4513_s1 + $0x70] sm:$0xff]   ;;  %v3264_v8 = vld [vmem:[%s4513_s1 + $0x68] sm:$0xff]  }
   0x2   :  { %v3257_v1 = vld [vmem:[%s4513_s1 + $0x38] sm:$0xff]   ;;  %2890 = vmatprep.subr.bf16.mxu0 %v3256_v0  ;;  %v3261_v5 = vld [vmem:[%s4513_s1 + $0x30] sm:$0xff]   ;;  %v3265_v9 = vld [vmem:[%s4513_s1 + $0x28] sm:$0xff]  }
   0x3   :  { %v3258_v2 = vld [vmem:[%s4513_s1 + $0xf8] sm:$0xff]   ;;  %2891 = vmatpush3.bf16.msra.mxu0 %v3257_v1  ;;  %v3262_v6 = vld [vmem:[%s4513_s1 + $0xf0] sm:$0xff]   ;;  %v3266_v10 = vld [vmem:[%s4513_s1 + $0xe8] sm:$0xff]  }
   0x4   :  { %v3259_v3 = vld [vmem:[%s4513_s1 + $0xb8] sm:$0xff]   ;;  %2918 = vmatprep.subr.bf16.mxu1 %v3258_v2  ;;  %2892 = vmatprep.subr.bf16.mxu0 %v3260_v4  ;;  %v3263_v7 = vld [vmem:[%s4513_s1 + $0xb0] sm:$0xff]   ;;  %v3267_v11 = vld [vmem:[%s4513_s1 + $0xa8] sm:$0xff]  }
   0x5   :  { %2919 = vmatpush3.bf16.msra.mxu1 %v3259_v3  ;;  %v3268_v12 = vld [vmem:[%s4513_s1 + $0x60] sm:$0xff]   ;;  %v3272_v16 = vld [vmem:[%s4513_s1 + $0x58] sm:$0xff]   ;;  %v3276_v20 = vld [vmem:[%s4513_s1 + $0x50] sm:$0xff]  }
   0x6   :  { %2920 = vmatprep.subr.bf16.mxu1 %v3262_v6  ;;  %v3269_v13 = vld [vmem:[%s4513_s1 + $0x20] sm:$0xff]   ;;  %v3273_v17 = vld [vmem:[%s4513_s1 + $0x18] sm:$0xff]   ;;  %v3277_v21 = vld [vmem:[%s4513_s1 + $0x10] sm:$0xff]  }
   0x7   :  { %2893 = vmatpush3.bf16.msra.mxu0 %v3261_v5  ;;  %v3270_v14 = vld [vmem:[%s4513_s1 + $0xe0] sm:$0xff]   ;;  %v3274_v18 = vld [vmem:[%s4513_s1 + $0xd8] sm:$0xff]   ;;  %v3278_v22 = vld [vmem:[%s4513_s1 + $0xd0] sm:$0xff]  }
   0x8   :  { %2894 = vmatprep.subr.bf16.mxu0 %v3264_v8  ;;  %v3271_v15 = vld [vmem:[%s4513_s1 + $0xa0] sm:$0xff]   ;;  %v3275_v19 = vld [vmem:[%s4513_s1 + $0x98] sm:$0xff]   ;;  %v3279_v23 = vld [vmem:[%s4513_s1 + $0x90] sm:$0xff]  }
   0x9   :  { %2921 = vmatpush3.bf16.msra.mxu1 %v3263_v7  ;;  %v3280_v24 = vld [vmem:[%s4513_s1 + $0x48] sm:$0xff]   ;;  %v3284_v28 = vld [vmem:[%s4513_s1 + $0x40] sm:$0xff]   ;;  %v3291_v34 = vld [vmem:[%s4513_s1 + $0x178] sm:$0xff]  }
   0xa   :  { %2922 = vmatprep.subr.bf16.mxu1 %v3266_v10  ;;  %v3281_v25 = vld [vmem:[%s4513_s1 + $0x8] sm:$0xff]   ;;  %v3285_v29 = vld [vmem:[%s4513_s1] sm:$0xff]   ;;  %v3295_v37 = vld [vmem:[%s4513_s1 + $0x138] sm:$0xff]  }
   0xb   :  { %2895 = vmatpush3.bf16.msra.mxu0 %v3265_v9  ;;  %v3282_v26 = vld [vmem:[%s4513_s1 + $0xc8] sm:$0xff]   ;;  %v3286_v30 = vld [vmem:[%s4513_s1 + $0xc0] sm:$0xff]   ;;  %v3296_v38 = vld [vmem:[%s4513_s1 + $0x1f8] sm:$0xff]  }
   0xc   :  { %2896 = vmatprep.subr.bf16.mxu0 %v3268_v12  ;;  %v3283_v27 = vld [vmem:[%s4513_s1 + $0x88] sm:$0xff]   ;;  %v3287_v31 = vld [vmem:[%s4514_s0] ss:$100 sps:$4 sm:$0xff]   ;;  %v3297_v39 = vld [vmem:[%s4513_s1 + $0x1b8] sm:$0xff]  }
   0xd   :  { %2923 = vmatpush3.bf16.msra.mxu1 %v3267_v11  ;;  %v3289_v32 = vld [vmem:[%s4514_s0 + $0x4] ss:$100 sps:$4 sm:$0xff]   ;;  %v3294_v36 = vld [vmem:[%s4514_s0 + $0xc] ss:$100 sps:$4 sm:$0xff]   ;;  %v3310_v52 = vld [vmem:[%s4513_s1 + $0x158] sm:$0xff]  }
   0xe   :  { %2924 = vmatprep.subr.bf16.mxu1 %v3270_v14  ;;  %v3290_v33 = vld [vmem:[%s4513_s1 + $0x80] sm:$0xff]   ;;  %1964 = vmatprep.mubr.bf16.mxu0 %v3289_v32  ;;  %v3292_v35 = vld [vmem:[%s4514_s0 + $0x8] ss:$100 sps:$4 sm:$0xff]   ;;  %v3298_v40 = vld [vmem:[%s4513_s1 + $0x170] sm:$0xff]  }
   0xf   :  { %2897 = vmatpush3.bf16.msra.mxu0 %v3269_v13  ;;  %2013 = vmatprep.mubr.bf16.mxu1 %v3294_v36  ;;  %v3299_v41 = vld [vmem:[%s4513_s1 + $0x130] sm:$0xff]   ;;  %v3302_v44 = vld [vmem:[%s4513_s1 + $0x168] sm:$0xff]   ;;  %v3306_v48 = vld [vmem:[%s4513_s1 + $0x160] sm:$0xff]  }
  0x10   :  { %2898 = vmatprep.subr.bf16.mxu0 %v3272_v16  ;;  %v3300_v42 = vld [vmem:[%s4513_s1 + $0x1f0] sm:$0xff]   ;;  %v3303_v45 = vld [vmem:[%s4513_s1 + $0x128] sm:$0xff]   ;;  %v3307_v49 = vld [vmem:[%s4513_s1 + $0x120] sm:$0xff]  }
  0x11   :  { %2925 = vmatpush3.bf16.msra.mxu1 %v3271_v15  ;;  %v3301_v43 = vld [vmem:[%s4513_s1 + $0x1b0] sm:$0xff]   ;;  %v3304_v46 = vld [vmem:[%s4513_s1 + $0x1e8] sm:$0xff]   ;;  %v3308_v50 = vld [vmem:[%s4513_s1 + $0x1e0] sm:$0xff]  }
  0x12   :  { %2926 = vmatprep.subr.bf16.mxu1 %v3274_v18  ;;  %v3305_v47 = vld [vmem:[%s4513_s1 + $0x1a8] sm:$0xff]   ;;  %v3309_v51 = vld [vmem:[%s4513_s1 + $0x1a0] sm:$0xff]   ;;  %v3311_v53 = vld [vmem:[%s4513_s1 + $0x118] sm:$0xff]  }
  0x13   :  { %2899 = vmatpush3.bf16.msra.mxu0 %v3273_v17  ;;  %v3312_v54 = vld [vmem:[%s4514_s0 + $0xcc] ss:$100 sps:$4 sm:$0xff]   ;;  %v3314_v55 = vld [vmem:[%s4513_s1 + $0x1d8] sm:$0xff]   ;;  %v3328_v4 = vld [vmem:[%s4513_s1 + $0x140] sm:$0xff]  }
  0x14   :  { %2900 = vmatprep.subr.bf16.mxu0 %v3276_v20  ;;  %v3315_v56 = vld [vmem:[%s4514_s0 + $0xc8] ss:$100 sps:$4 sm:$0xff]   ;;  %v3316_v57 = vld [vmem:[%s4513_s1 + $0x198] sm:$0xff]   ;;  %v3319_v59 = vld [vmem:[%s4513_s1 + $0x150] sm:$0xff]  }
  0x15   :  { %2927 = vmatpush3.bf16.msra.mxu1 %v3275_v19  ;;  %v3317_v58 = vld [vmem:[%s4514_s0 + $0xd4] ss:$100 sps:$4 sm:$0xff]   ;;  %v3324_v0 = vld [vmem:[%s4513_s1 + $0x148] sm:$0xff]   ;;  %v3329_v5 = vld [vmem:[%s4513_s1 + $0x100] sm:$0xff]  }
  0x16   :  { %2928 = vmatprep.subr.bf16.mxu1 %v3278_v22  ;;  %v3320_v60 = vld [vmem:[%s4514_s0 + $0xd0] ss:$100 sps:$4 sm:$0xff]   ;;  %v3325_v1 = vld [vmem:[%s4513_s1 + $0x108] sm:$0xff]   ;;  %v3330_v6 = vld [vmem:[%s4513_s1 + $0x1c0] sm:$0xff]  }
  0x17   :  { %2901 = vmatpush3.bf16.msra.mxu0 %v3277_v21  ;;  %v3321_v61 = vld [vmem:[%s4513_s1 + $0x110] sm:$0xff]   ;;  %v3326_v2 = vld [vmem:[%s4513_s1 + $0x1c8] sm:$0xff]   ;;  %v3334_v9 = vld [vmem:[%s4513_s1 + $0x180] sm:$0xff]  }
  0x18   :  { %2902 = vmatprep.subr.bf16.mxu0 %v3280_v24  ;;  %v3322_v62 = vld [vmem:[%s4513_s1 + $0x1d0] sm:$0xff]   ;;  %v3327_v3 = vld [vmem:[%s4513_s1 + $0x188] sm:$0xff]   ;;  %v3335_v10 = vld [vmem:[%s4513_s1 + $0x278] sm:$0xff]  }
  0x19   :  { %2929 = vmatpush3.bf16.msra.mxu1 %v3279_v23  ;;  %v3323_v63 = vld [vmem:[%s4513_s1 + $0x190] sm:$0xff]   ;;  %v3336_v11 = vld [vmem:[%s4514_s0 + $0x18] ss:$100 sps:$4 sm:$0xff]   ;;  %v3349_v22 = vld [vmem:[%s4513_s1 + $0x268] sm:$0xff]  }
  0x1a   :  { %2930 = vmatprep.subr.bf16.mxu1 %v3282_v26  ;;  %v3331_v7 = vld [vmem:[%s4514_s0 + $0x10] ss:$100 sps:$4 sm:$0xff]   ;;  %v3338_v12 = vld [vmem:[%s4514_s0 + $0x1c] ss:$100 sps:$4 sm:$0xff]   ;;  %v3350_v23 = vld [vmem:[%s4514_s0 + $0xe4] ss:$100 sps:$4 sm:$0xff]  }
  0x1b   :  { %2903 = vmatpush3.bf16.msra.mxu0 %v3281_v25  ;;  %v3333_v8 = vld [vmem:[%s4514_s0 + $0x14] ss:$100 sps:$4 sm:$0xff]   ;;  %v3345_v19 = vld [vmem:[%s4514_s0 + $0xdc] ss:$100 sps:$4 sm:$0xff]   ;;  %v3352_v24 = vld [vmem:[%s4513_s1 + $0x228] sm:$0xff]  }
  0x1c   :  { %2904 = vmatprep.subr.bf16.mxu0 %v3284_v28  ;;  %v3339_v13 = vld [vmem:[%s4513_s1 + $0x238] sm:$0xff]   ;;  %v3342_v16 = vld [vmem:[%s4513_s1 + $0x270] sm:$0xff]   ;;  %v3353_v25 = vld [vmem:[%s4514_s0 + $0xe0] ss:$100 sps:$4 sm:$0xff]  }
  0x1d   :  { %2931 = vmatpush3.bf16.msra.mxu1 %v3283_v27  ;;  %v3340_v14 = vld [vmem:[%s4513_s1 + $0x2f8] sm:$0xff]   ;;  %v3343_v17 = vld [vmem:[%s4513_s1 + $0x230] sm:$0xff]   ;;  %v3354_v26 = vld [vmem:[%s4513_s1 + $0x2e8] sm:$0xff]  }
  0x1e   :  { %2932 = vmatprep.subr.bf16.mxu1 %v3286_v30  ;;  %v3341_v15 = vld [vmem:[%s4513_s1 + $0x2b8] sm:$0xff]   ;;  %v3344_v18 = vld [vmem:[%s4513_s1 + $0x2f0] sm:$0xff]   ;;  %v3355_v27 = vld [vmem:[%s4513_s1 + $0x2a8] sm:$0xff]  }
  0x1f   :  { %2905 = vmatpush3.bf16.msra.mxu0 %v3285_v29  ;;  %v3347_v20 = vld [vmem:[%s4513_s1 + $0x2b0] sm:$0xff]   ;;  %v3348_v21 = vld [vmem:[%s4514_s0 + $0xd8] ss:$100 sps:$4 sm:$0xff]   ;;  %v3356_v28 = vld [vmem:[%s4513_s1 + $0x260] sm:$0xff]  }
  0x20   :  { %2946 = vmatprep.subr.bf16.mxu0 %v3291_v34  ;;  %v3357_v29 = vld [vmem:[%s4513_s1 + $0x220] sm:$0xff]   ;;  %v3360_v32 = vld [vmem:[%s4513_s1 + $0x258] sm:$0xff]   ;;  %v3364_v36 = vld [vmem:[%s4513_s1 + $0x250] sm:$0xff]  }
  0x21   :  { %2933 = vmatpush3.bf16.msra.mxu1 %v3290_v33  ;;  %v3358_v30 = vld [vmem:[%s4513_s1 + $0x2e0] sm:$0xff]   ;;  %v3361_v33 = vld [vmem:[%s4513_s1 + $0x218] sm:$0xff]  }
  0x22   :  { %1965 = vmatmul.mubr.bf16.vlgmr.msra.gmra.mxu0 %v3287_v31  ;;  %2974 = vmatprep.subr.bf16.mxu1 %v3296_v38  ;;  %v3359_v31 = vld [vmem:[%s4513_s1 + $0x2a0] sm:$0xff]   ;;  %v3362_v34 = vld [vmem:[%s4513_s1 + $0x2d8] sm:$0xff]   ;;  %v3366_v38 = vld [vmem:[%s4513_s1 + $0x2d0] sm:$0xff]  }
  0x23   :  { %2947 = vmatpush3.bf16.msra.mxu0 %v3295_v37  ;;  %1972 = vmatprep.mubr.bf16.mxu0 %v3312_v54  ;;  %v3365_v37 = vld [vmem:[%s4513_s1 + $0x210] sm:$0xff]   ;;  %v3384_v54 = vld [vmem:[%s4513_s1 + $0x3f8] sm:$0xff]  }
  0x24   :  { %2014 = vmatmul.mubr.bf16.vlgmr.msra.gmra.mxu1 %v3292_v35  ;;  %2948 = vmatprep.subr.bf16.mxu0 %v3298_v40  ;;  %v3363_v35 = vld [vmem:[%s4513_s1 + $0x298] sm:$0xff]   ;;  %v3368_v40 = vld [vmem:[%s4513_s1 + $0x248] sm:$0xff]  }
  0x25   :  { %2975 = vmatpush3.bf16.msra.mxu1 %v3297_v39  ;;  %2021 = vmatprep.mubr.bf16.mxu1 %v3317_v58  ;;  %v3367_v39 = vld [vmem:[%s4513_s1 + $0x290] sm:$0xff]  }
  0x26   :  { %2976 = vmatprep.subr.bf16.mxu1 %v3300_v42  ;;  %v3370_v42 = vld [vmem:[%s4513_s1 + $0x2c8] sm:$0xff]   ;;  %v3388_v58 = vld [vmem:[%s4513_s1 + $0x3f0] sm:$0xff]  }
  0x27   :  { %2949 = vmatpush3.bf16.msra.mxu0 %v3299_v41  ;;  %v3369_v41 = vld [vmem:[%s4513_s1 + $0x208] sm:$0xff]  }
  0x28   :  { %2950 = vmatprep.subr.bf16.mxu0 %v3302_v44  ;;  %v3372_v44 = vld [vmem:[%s4513_s1 + $0x240] sm:$0xff]  }
  0x29   :  { %2977 = vmatpush3.bf16.msra.mxu1 %v3301_v43  ;;  %v3371_v43 = vld [vmem:[%s4513_s1 + $0x288] sm:$0xff]  }
  0x2a   :  { %2978 = vmatprep.subr.bf16.mxu1 %v3304_v46  ;;  %1973 = vmatmul.mubr.bf16.gmra.mxu0 %v3315_v56  ;;  %v3374_v46 = vld [vmem:[%s4513_s1 + $0x2c0] sm:$0xff]   ;;  %v3386_v56 = vld [vmem:[%s4513_s1 + $0x370] sm:$0xff]  }
  0x2b   :  { %2951 = vmatpush3.bf16.msra.mxu0 %v3303_v45  ;;  %2062 = vmatprep.mubr.bf16.mxu0 %v3333_v8  ;;  %v3373_v45 = vld [vmem:[%s4513_s1 + $0x200] sm:$0xff]   ;;  %v3404_v8 = vld [vmem:[%s4513_s1 + $0x358] sm:$0xff]  }
  0x2c   :  { %2952 = vmatprep.subr.bf16.mxu0 %v3306_v48  ;;  %2022 = vmatmul.mubr.bf16.gmra.mxu1 %v3320_v60  ;;  %v3377_v48 = vld [vmem:[%s4514_s0 + $0x24] ss:$100 sps:$4 sm:$0xff]   ;;  %v3391_v60 = vld [vmem:[%s4513_s1 + $0x3b0] sm:$0xff]  }
  0x2d   :  { %2979 = vmatpush3.bf16.msra.mxu1 %v3305_v47  ;;  %2111 = vmatprep.mubr.bf16.mxu1 %v3338_v12  ;;  %v3375_v47 = vld [vmem:[%s4514_s0 + $0x20] ss:$100 sps:$4 sm:$0xff]   ;;  %v3408_v12 = vld [vmem:[%s4513_s1 + $0x350] sm:$0xff]  }
  0x2e   :  { %2980 = vmatprep.subr.bf16.mxu1 %v3308_v50  ;;  %v3379_v50 = vld [vmem:[%s4513_s1 + $0x378] sm:$0xff]  }
  0x2f   :  { %2953 = vmatpush3.bf16.msra.mxu0 %v3307_v49  ;;  %v3378_v49 = vld [vmem:[%s4513_s1 + $0x280] sm:$0xff]  }
  0x30   :  { %2954 = vmatprep.subr.bf16.mxu0 %v3310_v52  ;;  %v3382_v52 = vld [vmem:[%s4514_s0 + $0x2c] ss:$100 sps:$4 sm:$0xff]  }
  0x31   :  { %2981 = vmatpush3.bf16.msra.mxu1 %v3309_v51  ;;  %v3380_v51 = vld [vmem:[%s4514_s0 + $0x28] ss:$100 sps:$4 sm:$0xff]  }
  0x32   :  { %2982 = vmatprep.subr.bf16.mxu1 %v3314_v55  ;;  %v3385_v55 = vld [vmem:[%s4513_s1 + $0x3b8] sm:$0xff]  }
  0x33   :  { %2955 = vmatpush3.bf16.msra.mxu0 %v3311_v53  ;;  %v3383_v53 = vld [vmem:[%s4513_s1 + $0x338] sm:$0xff]  }
  0x34   :  { %2956 = vmatprep.subr.bf16.mxu0 %v3319_v59  ;;  %v3389_v59 = vld [vmem:[%s4514_s0 + $0xec] ss:$100 sps:$4 sm:$0xff]  }
  0x35   :  { %2983 = vmatpush3.bf16.msra.mxu1 %v3316_v57  ;;  %v3387_v57 = vld [vmem:[%s4513_s1 + $0x330] sm:$0xff]  }
  0x36   :  { %2984 = vmatprep.subr.bf16.mxu1 %v3322_v62  ;;  %v3393_v62 = vld [vmem:[%s4513_s1 + $0x368] sm:$0xff]  }
  0x37   :  { %2957 = vmatpush3.bf16.msra.mxu0 %v3321_v61  ;;  %v3392_v61 = vld [vmem:[%s4514_s0 + $0xe8] ss:$100 sps:$4 sm:$0xff]  }
  0x38   :  { %2958 = vmatprep.subr.bf16.mxu0 %v3324_v0  ;;  %v3396_v0 = vld [vmem:[%s4513_s1 + $0x328] sm:$0xff]  }
  0x39   :  { %2985 = vmatpush3.bf16.msra.mxu1 %v3323_v63  ;;  %v3394_v63 = vld [vmem:[%s4514_s0 + $0xf4] ss:$100 sps:$4 sm:$0xff]  }
  0x3a   :  { %2986 = vmatprep.subr.bf16.mxu1 %v3326_v2  ;;  %v3398_v2 = vld [vmem:[%s4513_s1 + $0x3e8] sm:$0xff]  }
  0x3b   :  { %2959 = vmatpush3.bf16.msra.mxu0 %v3325_v1  ;;  %v3397_v1 = vld [vmem:[%s4514_s0 + $0xf0] ss:$100 sps:$4 sm:$0xff]  }
  0x3c   :  { %2960 = vmatprep.subr.bf16.mxu0 %v3328_v4  ;;  %v3400_v4 = vld [vmem:[%s4513_s1 + $0x360] sm:$0xff]  }
  0x3d   :  { %2987 = vmatpush3.bf16.msra.mxu1 %v3327_v3  ;;  %v3399_v3 = vld [vmem:[%s4513_s1 + $0x3a8] sm:$0xff]  }
  0x3e   :  { %2988 = vmatprep.subr.bf16.mxu1 %v3330_v6  ;;  %v3402_v6 = vld [vmem:[%s4513_s1 + $0x3e0] sm:$0xff]  }
  0x3f   :  { %2961 = vmatpush3.bf16.msra.mxu0 %v3329_v5  ;;  %v3401_v5 = vld [vmem:[%s4513_s1 + $0x320] sm:$0xff]  }
  0x40   :  { %3002 = vmatprep.subr.bf16.mxu0 %v3335_v10  ;;  %v3406_v10 = vld [vmem:[%s4513_s1 + $0x3d8] sm:$0xff]  }
  0x41   :  { %2989 = vmatpush3.bf16.msra.mxu1 %v3334_v9  ;;  %v3405_v9 = vld [vmem:[%s4513_s1 + $0x318] sm:$0xff]  }
  0x42   :  { %2063 = vmatmul.mubr.bf16.vlgmr.msra.gmra.mxu0 %v3331_v7  ;;  %3030 = vmatprep.subr.bf16.mxu1 %v3340_v14  ;;  %v3403_v7 = vld [vmem:[%s4513_s1 + $0x3a0] sm:$0xff]   ;;  %v3410_v14 = vld [vmem:[%s4513_s1 + $0x3d0] sm:$0xff]  }
  0x43   :  { %3003 = vmatpush3.bf16.msra.mxu0 %v3339_v13  ;;  %2070 = vmatprep.mubr.bf16.mxu0 %v3345_v19  ;;  %v3409_v13 = vld [vmem:[%s4513_s1 + $0x310] sm:$0xff]   ;;  %v3415_v19 = vld [vmem:[%s4513_s1 + $0x388] sm:$0xff]  }
  0x44   :  { %2112 = vmatmul.mubr.bf16.vlgmr.msra.gmra.mxu1 %v3336_v11  ;;  %3004 = vmatprep.subr.bf16.mxu0 %v3342_v16  ;;  %v3407_v11 = vld [vmem:[%s4513_s1 + $0x398] sm:$0xff]   ;;  %v3412_v16 = vld [vmem:[%s4513_s1 + $0x348] sm:$0xff]  }
  0x45   :  { %3031 = vmatpush3.bf16.msra.mxu1 %v3341_v15  ;;  %2119 = vmatprep.mubr.bf16.mxu1 %v3350_v23  ;;  %v3411_v15 = vld [vmem:[%s4513_s1 + $0x390] sm:$0xff]  }
  0x46   :  { %3032 = vmatprep.subr.bf16.mxu1 %v3344_v18  ;;  %v3414_v18 = vld [vmem:[%s4513_s1 + $0x3c8] sm:$0xff]   ;;  %v3419_v23 = vld [vmem:[%s4514_s0 + $0x30] ss:$100 sps:$4 sm:$0xff]  }
  0x47   :  { %3005 = vmatpush3.bf16.msra.mxu0 %v3343_v17  ;;  %v3413_v17 = vld [vmem:[%s4513_s1 + $0x308] sm:$0xff]  }
  0x48   :  { %3006 = vmatprep.subr.bf16.mxu0 %v3349_v22  ;;  %v3418_v22 = vld [vmem:[%s4513_s1 + $0x3c0] sm:$0xff]  }
  0x49   :  { %3033 = vmatpush3.bf16.msra.mxu1 %v3347_v20  ;;  %v3416_v20 = vld [vmem:[%s4513_s1 + $0x340] sm:$0xff]  }
  0x4a   :  { %2071 = vmatmul.mubr.bf16.gmra.mxu0 %v3348_v21  ;;  %3034 = vmatprep.subr.bf16.mxu1 %v3354_v26  ;;  %v3417_v21 = vld [vmem:[%s4513_s1 + $0x300] sm:$0xff]   ;;  %v3423_v26 = vld [vmem:[%s4513_s1 + $0x478] sm:$0xff]  }
  0x4b   :  { %3007 = vmatpush3.bf16.msra.mxu0 %v3352_v24  ;;  %2160 = vmatprep.mubr.bf16.mxu0 %v3377_v48  ;;  %v3421_v24 = vld [vmem:[%s4514_s0 + $0x34] ss:$100 sps:$4 sm:$0xff]  }
  0x4c   :  { %2120 = vmatmul.mubr.bf16.gmra.mxu1 %v3353_v25  ;;  %3008 = vmatprep.subr.bf16.mxu0 %v3356_v28  ;;  %v3422_v25 = vld [vmem:[%s4513_s1 + $0x380] sm:$0xff]   ;;  %v3448_v48 = vld [vmem:[%s4513_s1 + $0x458] sm:$0xff]  }
  0x4d   :  { %3035 = vmatpush3.bf16.msra.mxu1 %v3355_v27  ;;  %2209 = vmatprep.mubr.bf16.mxu1 %v3382_v52  ;;  %v3424_v27 = vld [vmem:[%s4514_s0 + $0x38] ss:$100 sps:$4 sm:$0xff]   ;;  %v3452_v52 = vld [vmem:[%s4513_s1 + $0x450] sm:$0xff]  }
  0x4e   :  { %3036 = vmatprep.subr.bf16.mxu1 %v3358_v30  ;;  %v3426_v28 = vld [vmem:[%s4514_s0 + $0x3c] ss:$100 sps:$4 sm:$0xff]  }
  0x4f   :  { %3009 = vmatpush3.bf16.msra.mxu0 %v3357_v29  ;;  %v3427_v29 = vld [vmem:[%s4513_s1 + $0x438] sm:$0xff]  }
  0x50   :  { %3010 = vmatprep.subr.bf16.mxu0 %v3360_v32  ;;  %v3428_v30 = vld [vmem:[%s4513_s1 + $0x4f8] sm:$0xff]   ;;  %v3430_v32 = vld [vmem:[%s4513_s1 + $0x470] sm:$0xff]  }
  0x51   :  { %3037 = vmatpush3.bf16.msra.mxu1 %v3359_v31  ;;  %v3429_v31 = vld [vmem:[%s4513_s1 + $0x4b8] sm:$0xff]  }
  0x52   :  { %3038 = vmatprep.subr.bf16.mxu1 %v3362_v34  ;;  %v3432_v34 = vld [vmem:[%s4513_s1 + $0x4f0] sm:$0xff]  }
  0x53   :  { %3011 = vmatpush3.bf16.msra.mxu0 %v3361_v33  ;;  %v3431_v33 = vld [vmem:[%s4513_s1 + $0x430] sm:$0xff]  }
  0x54   :  { %3012 = vmatprep.subr.bf16.mxu0 %v3364_v36  ;;  %v3435_v36 = vld [vmem:[%s4513_s1 + $0x4b0] sm:$0xff]  }
  0x55   :  { %3039 = vmatpush3.bf16.msra.mxu1 %v3363_v35  ;;  %v3433_v35 = vld [vmem:[%s4514_s0 + $0xfc] ss:$100 sps:$4 sm:$0xff]  }
  0x56   :  { %3040 = vmatprep.subr.bf16.mxu1 %v3366_v38  ;;  %v3437_v38 = vld [vmem:[%s4513_s1 + $0x468] sm:$0xff]  }
  0x57   :  { %3013 = vmatpush3.bf16.msra.mxu0 %v3365_v37  ;;  %v3436_v37 = vld [vmem:[%s4514_s0 + $0xf8] ss:$100 sps:$4 sm:$0xff]  }
  0x58   :  { %3014 = vmatprep.subr.bf16.mxu0 %v3368_v40  ;;  %v3440_v40 = vld [vmem:[%s4513_s1 + $0x428] sm:$0xff]  }
  0x59   :  { %3041 = vmatpush3.bf16.msra.mxu1 %v3367_v39  ;;  %v3438_v39 = vld [vmem:[%s4514_s0 + $0x104] ss:$100 sps:$4 sm:$0xff]  }
  0x5a   :  { %3042 = vmatprep.subr.bf16.mxu1 %v3370_v42  ;;  %v3442_v42 = vld [vmem:[%s4513_s1 + $0x4e8] sm:$0xff]  }
  0x5b   :  { %3015 = vmatpush3.bf16.msra.mxu0 %v3369_v41  ;;  %v3441_v41 = vld [vmem:[%s4514_s0 + $0x100] ss:$100 sps:$4 sm:$0xff]  }
  0x5c   :  { %3016 = vmatprep.subr.bf16.mxu0 %v3372_v44  ;;  %v3444_v44 = vld [vmem:[%s4513_s1 + $0x460] sm:$0xff]  }
  0x5d   :  { %3043 = vmatpush3.bf16.msra.mxu1 %v3371_v43  ;;  %v3443_v43 = vld [vmem:[%s4513_s1 + $0x4a8] sm:$0xff]  }
  0x5e   :  { %3044 = vmatprep.subr.bf16.mxu1 %v3374_v46  ;;  %v3446_v46 = vld [vmem:[%s4513_s1 + $0x4e0] sm:$0xff]  }
  0x5f   :  { %3017 = vmatpush3.bf16.msra.mxu0 %v3373_v45  ;;  %v3445_v45 = vld [vmem:[%s4513_s1 + $0x420] sm:$0xff]  }
  0x60   :  { %3058 = vmatprep.subr.bf16.mxu0 %v3379_v50  ;;  %v3450_v50 = vld [vmem:[%s4513_s1 + $0x4d8] sm:$0xff]  }
  0x61   :  { %3045 = vmatpush3.bf16.msra.mxu1 %v3378_v49  ;;  %v3449_v49 = vld [vmem:[%s4513_s1 + $0x418] sm:$0xff]  }
  0x62   :  { %2161 = vmatmul.mubr.bf16.vlgmr.msra.gmra.mxu0 %v3375_v47  ;;  %3086 = vmatprep.subr.bf16.mxu1 %v3384_v54  ;;  %v3447_v47 = vld [vmem:[%s4513_s1 + $0x4a0] sm:$0xff]   ;;  %v3454_v54 = vld [vmem:[%s4513_s1 + $0x4d0] sm:$0xff]  }
  0x63   :  { %3059 = vmatpush3.bf16.msra.mxu0 %v3383_v53  ;;  %2168 = vmatprep.mubr.bf16.mxu0 %v3389_v59  ;;  %v3453_v53 = vld [vmem:[%s4513_s1 + $0x410] sm:$0xff]   ;;  %v3459_v59 = vld [vmem:[%s4513_s1 + $0x488] sm:$0xff]  }
  0x64   :  { %2210 = vmatmul.mubr.bf16.vlgmr.msra.gmra.mxu1 %v3380_v51  ;;  %3060 = vmatprep.subr.bf16.mxu0 %v3386_v56  ;;  %v3451_v51 = vld [vmem:[%s4513_s1 + $0x498] sm:$0xff]   ;;  %v3456_v56 = vld [vmem:[%s4513_s1 + $0x448] sm:$0xff]  }
  0x65   :  { %3087 = vmatpush3.bf16.msra.mxu1 %v3385_v55  ;;  %2217 = vmatprep.mubr.bf16.mxu1 %v3394_v63  ;;  %v3455_v55 = vld [vmem:[%s4513_s1 + $0x490] sm:$0xff]   ;;  %v3463_v63 = vld [vmem:[%s4514_s0 + $0x40] ss:$100 sps:$4 sm:$0xff]  }
  0x66   :  { %3088 = vmatprep.subr.bf16.mxu1 %v3388_v58  ;;  %v3458_v58 = vld [vmem:[%s4513_s1 + $0x4c8] sm:$0xff]  }
  0x67   :  { %3061 = vmatpush3.bf16.msra.mxu0 %v3387_v57  ;;  %v3457_v57 = vld [vmem:[%s4513_s1 + $0x408] sm:$0xff]  }
  0x68   :  { %3062 = vmatprep.subr.bf16.mxu0 %v3393_v62  ;;  %v3462_v62 = vld [vmem:[%s4513_s1 + $0x4c0] sm:$0xff]  }
  0x69   :  { %3089 = vmatpush3.bf16.msra.mxu1 %v3391_v60  ;;  %v3460_v60 = vld [vmem:[%s4513_s1 + $0x440] sm:$0xff]  }
  0x6a   :  { %2169 = vmatmul.mubr.bf16.gmra.mxu0 %v3392_v61  ;;  %3090 = vmatprep.subr.bf16.mxu1 %v3398_v2  ;;  %v3461_v61 = vld [vmem:[%s4513_s1 + $0x400] sm:$0xff]   ;;  %v3467_v2 = vld [vmem:[%s4513_s1 + $0x578] sm:$0xff]  }
  0x6b   :  { %3063 = vmatpush3.bf16.msra.mxu0 %v3396_v0  ;;  %2258 = vmatprep.mubr.bf16.mxu0 %v3421_v24  ;;  %v3465_v0 = vld [vmem:[%s4514_s0 + $0x44] ss:$100 sps:$4 sm:$0xff]   ;;  %v3492_v24 = vld [vmem:[%s4513_s1 + $0x558] sm:$0xff]  }
  0x6c   :  { %2218 = vmatmul.mubr.bf16.gmra.mxu1 %v3397_v1  ;;  %3064 = vmatprep.subr.bf16.mxu0 %v3400_v4  ;;  %v3466_v1 = vld [vmem:[%s4513_s1 + $0x480] sm:$0xff]   ;;  %v3470_v4 = vld [vmem:[%s4514_s0 + $0x4c] ss:$100 sps:$4 sm:$0xff]  }
  0x6d   :  { %3091 = vmatpush3.bf16.msra.mxu1 %v3399_v3  ;;  %2307 = vmatprep.mubr.bf16.mxu1 %v3426_v28  ;;  %v3468_v3 = vld [vmem:[%s4514_s0 + $0x48] ss:$100 sps:$4 sm:$0xff]   ;;  %v3496_v28 = vld [vmem:[%s4513_s1 + $0x550] sm:$0xff]  }
  0x6e   :  { %3092 = vmatprep.subr.bf16.mxu1 %v3402_v6  ;;  %v3472_v6 = vld [vmem:[%s4513_s1 + $0x5f8] sm:$0xff]  }
  0x6f   :  { %3065 = vmatpush3.bf16.msra.mxu0 %v3401_v5  ;;  %v3471_v5 = vld [vmem:[%s4513_s1 + $0x538] sm:$0xff]  }
  0x70   :  { %3066 = vmatprep.subr.bf16.mxu0 %v3404_v8  ;;  %v3474_v8 = vld [vmem:[%s4513_s1 + $0x570] sm:$0xff]  }
  0x71   :  { %3093 = vmatpush3.bf16.msra.mxu1 %v3403_v7  ;;  %v3473_v7 = vld [vmem:[%s4513_s1 + $0x5b8] sm:$0xff]  }
  0x72   :  { %3094 = vmatprep.subr.bf16.mxu1 %v3406_v10  ;;  %v3476_v10 = vld [vmem:[%s4513_s1 + $0x5f0] sm:$0xff]  }
  0x73   :  { %3067 = vmatpush3.bf16.msra.mxu0 %v3405_v9  ;;  %v3475_v9 = vld [vmem:[%s4513_s1 + $0x530] sm:$0xff]  }
  0x74   :  { %3068 = vmatprep.subr.bf16.mxu0 %v3408_v12  ;;  %v3479_v12 = vld [vmem:[%s4513_s1 + $0x5b0] sm:$0xff]  }
  0x75   :  { %3095 = vmatpush3.bf16.msra.mxu1 %v3407_v11  ;;  %v3477_v11 = vld [vmem:[%s4514_s0 + $0x10c] ss:$100 sps:$4 sm:$0xff]  }
  0x76   :  { %3096 = vmatprep.subr.bf16.mxu1 %v3410_v14  ;;  %v3481_v14 = vld [vmem:[%s4513_s1 + $0x568] sm:$0xff]  }
  0x77   :  { %3069 = vmatpush3.bf16.msra.mxu0 %v3409_v13  ;;  %v3480_v13 = vld [vmem:[%s4514_s0 + $0x108] ss:$100 sps:$4 sm:$0xff]  }
  0x78   :  { %3070 = vmatprep.subr.bf16.mxu0 %v3412_v16  ;;  %v3484_v16 = vld [vmem:[%s4513_s1 + $0x528] sm:$0xff]  }
  0x79   :  { %3097 = vmatpush3.bf16.msra.mxu1 %v3411_v15  ;;  %v3482_v15 = vld [vmem:[%s4514_s0 + $0x114] ss:$100 sps:$4 sm:$0xff]  }
  0x7a   :  { %3098 = vmatprep.subr.bf16.mxu1 %v3414_v18  ;;  %v3486_v18 = vld [vmem:[%s4513_s1 + $0x5e8] sm:$0xff]  }
  0x7b   :  { %3071 = vmatpush3.bf16.msra.mxu0 %v3413_v17  ;;  %v3485_v17 = vld [vmem:[%s4514_s0 + $0x110] ss:$100 sps:$4 sm:$0xff]  }
  0x7c   :  { %3072 = vmatprep.subr.bf16.mxu0 %v3416_v20  ;;  %v3488_v20 = vld [vmem:[%s4513_s1 + $0x560] sm:$0xff]  }
  0x7d   :  { %3099 = vmatpush3.bf16.msra.mxu1 %v3415_v19  ;;  %v3487_v19 = vld [vmem:[%s4513_s1 + $0x5a8] sm:$0xff]  }
  0x7e   :  { %3100 = vmatprep.subr.bf16.mxu1 %v3418_v22  ;;  %v3490_v22 = vld [vmem:[%s4513_s1 + $0x5e0] sm:$0xff]  }
  0x7f   :  { %3073 = vmatpush3.bf16.msra.mxu0 %v3417_v21  ;;  %v3489_v21 = vld [vmem:[%s4513_s1 + $0x520] sm:$0xff]  }
  0x80   :  { %3114 = vmatprep.subr.bf16.mxu0 %v3423_v26  ;;  %v3494_v26 = vld [vmem:[%s4513_s1 + $0x5d8] sm:$0xff]  }
  0x81   :  { %3101 = vmatpush3.bf16.msra.mxu1 %v3422_v25  ;;  %v3493_v25 = vld [vmem:[%s4513_s1 + $0x518] sm:$0xff]  }
  0x82   :  { %2259 = vmatmul.mubr.bf16.vlgmr.msra.gmra.mxu0 %v3419_v23  ;;  %3142 = vmatprep.subr.bf16.mxu1 %v3428_v30  ;;  %v3491_v23 = vld [vmem:[%s4513_s1 + $0x5a0] sm:$0xff]   ;;  %v3498_v30 = vld [vmem:[%s4513_s1 + $0x5d0] sm:$0xff]  }
  0x83   :  { %3115 = vmatpush3.bf16.msra.mxu0 %v3427_v29  ;;  %2266 = vmatprep.mubr.bf16.mxu0 %v3433_v35  ;;  %v3497_v29 = vld [vmem:[%s4513_s1 + $0x510] sm:$0xff]   ;;  %v3503_v35 = vld [vmem:[%s4513_s1 + $0x588] sm:$0xff]  }
  0x84   :  { %2308 = vmatmul.mubr.bf16.vlgmr.msra.gmra.mxu1 %v3424_v27  ;;  %3116 = vmatprep.subr.bf16.mxu0 %v3430_v32  ;;  %v3495_v27 = vld [vmem:[%s4513_s1 + $0x598] sm:$0xff]   ;;  %v3500_v32 = vld [vmem:[%s4513_s1 + $0x548] sm:$0xff]  }
  0x85   :  { %3143 = vmatpush3.bf16.msra.mxu1 %v3429_v31  ;;  %2315 = vmatprep.mubr.bf16.mxu1 %v3438_v39  ;;  %v3499_v31 = vld [vmem:[%s4513_s1 + $0x590] sm:$0xff]  }
  0x86   :  { %3144 = vmatprep.subr.bf16.mxu1 %v3432_v34  ;;  %v3502_v34 = vld [vmem:[%s4513_s1 + $0x5c8] sm:$0xff]   ;;  %v3507_v39 = vld [vmem:[%s4514_s0 + $0x50] ss:$100 sps:$4 sm:$0xff]  }
  0x87   :  { %3117 = vmatpush3.bf16.msra.mxu0 %v3431_v33  ;;  %v3501_v33 = vld [vmem:[%s4513_s1 + $0x508] sm:$0xff]  }
  0x88   :  { %3118 = vmatprep.subr.bf16.mxu0 %v3437_v38  ;;  %v3506_v38 = vld [vmem:[%s4513_s1 + $0x5c0] sm:$0xff]  }
  0x89   :  { %3145 = vmatpush3.bf16.msra.mxu1 %v3435_v36  ;;  %v3504_v36 = vld [vmem:[%s4513_s1 + $0x540] sm:$0xff]  }
  0x8a   :  { %2267 = vmatmul.mubr.bf16.gmra.mxu0 %v3436_v37  ;;  %3146 = vmatprep.subr.bf16.mxu1 %v3442_v42  ;;  %v3505_v37 = vld [vmem:[%s4513_s1 + $0x500] sm:$0xff]   ;;  %v3511_v42 = vld [vmem:[%s4513_s1 + $0x638] sm:$0xff]  }
  0x8b   :  { %3119 = vmatpush3.bf16.msra.mxu0 %v3440_v40  ;;  %2356 = vmatprep.mubr.bf16.mxu0 %v3465_v0  ;;  %v3509_v40 = vld [vmem:[%s4514_s0 + $0x54] ss:$100 sps:$4 sm:$0xff]  }
  0x8c   :  { %2316 = vmatmul.mubr.bf16.gmra.mxu1 %v3441_v41  ;;  %3120 = vmatprep.subr.bf16.mxu0 %v3444_v44  ;;  %v3510_v41 = vld [vmem:[%s4513_s1 + $0x580] sm:$0xff]  }
  0x8d   :  { %3147 = vmatpush3.bf16.msra.mxu1 %v3443_v43  ;;  %2405 = vmatprep.mubr.bf16.mxu1 %v3470_v4  ;;  %v3512_v43 = vld [vmem:[%s4514_s0 + $0x58] ss:$100 sps:$4 sm:$0xff]  }
  0x8e   :  { %3148 = vmatprep.subr.bf16.mxu1 %v3446_v46  ;;  %v3514_v44 = vld [vmem:[%s4514_s0 + $0x5c] ss:$100 sps:$4 sm:$0xff]  }
  0x8f   :  { %3121 = vmatpush3.bf16.msra.mxu0 %v3445_v45  ;;  %v3515_v45 = vld [vmem:[%s4513_s1 + $0x630] sm:$0xff]   ;;  %v3516_v46 = vld [vmem:[%s4514_s0 + $0x11c] ss:$100 sps:$4 sm:$0xff]  }
  0x90   :  { %3122 = vmatprep.subr.bf16.mxu0 %v3448_v48  ;;  %v3519_v48 = vld [vmem:[%s4513_s1 + $0x628] sm:$0xff]  }
  0x91   :  { %3149 = vmatpush3.bf16.msra.mxu1 %v3447_v47  ;;  %v3518_v47 = vld [vmem:[%s4514_s0 + $0x118] ss:$100 sps:$4 sm:$0xff]  }
  0x92   :  { %3150 = vmatprep.subr.bf16.mxu1 %v3450_v50 }
  0x93   :  { %3123 = vmatpush3.bf16.msra.mxu0 %v3449_v49  ;;  %v3520_v49 = vld [vmem:[%s4514_s0 + $0x124] ss:$100 sps:$4 sm:$0xff]  }
  0x94   :  { %3124 = vmatprep.subr.bf16.mxu0 %v3452_v52  ;;  %v3522_v52 = vld [vmem:[%s4514_s0 + $0x120] ss:$100 sps:$4 sm:$0xff]  }
  0x95   :  { %3151 = vmatpush3.bf16.msra.mxu1 %v3451_v51  ;;  %v3523_v51 = vld [vmem:[%s4513_s1 + $0x620] sm:$0xff]  }
  0x96   :  { %3152 = vmatprep.subr.bf16.mxu1 %v3454_v54 }
  0x97   :  { %3125 = vmatpush3.bf16.msra.mxu0 %v3453_v53 }
  0x98   :  { %3126 = vmatprep.subr.bf16.mxu0 %v3456_v56  ;;  %v3524_v56 = vld [vmem:[%s4513_s1 + $0x618] sm:$0xff]  }
  0x99   :  { %3153 = vmatpush3.bf16.msra.mxu1 %v3455_v55 }
  0x9a   :  { %3154 = vmatprep.subr.bf16.mxu1 %v3458_v58  ;;  %v3528_v58 = vld [vmem:[%s4514_s0 + $0x60] ss:$100 sps:$4 sm:$0xff]  }
  0x9b   :  { %3127 = vmatpush3.bf16.msra.mxu0 %v3457_v57 }
  0x9c   :  { %3128 = vmatprep.subr.bf16.mxu0 %v3460_v60 }
  0x9d   :  { %3155 = vmatpush3.bf16.msra.mxu1 %v3459_v59 }
  0x9e   :  { %3156 = vmatprep.subr.bf16.mxu1 %v3462_v62  ;;  %v4303_v62 = vld [vmem:[%s4515_s2] ss:$0 sm:$0xff] }
  0x9f   :  { %3129 = vmatpush3.bf16.msra.mxu0 %v3461_v61 }
  0xa0   :  { %3170 = vmatprep.subr.bf16.mxu0 %v3467_v2  ;;  %v3525_v2 = vld [vmem:[%s4513_s1 + $0x610] sm:$0xff]  }
  0xa1   :  { %3157 = vmatpush3.bf16.msra.mxu1 %v3466_v1 }
  0xa2   :  { %2357 = vmatmul.mubr.bf16.vlgmr.msra.gmra.mxu0 %v3463_v63  ;;  %3198 = vmatprep.subr.bf16.mxu1 %v3472_v6 }
  0xa3   :  { %3171 = vmatpush3.bf16.msra.mxu0 %v3471_v5  ;;  %2364 = vmatprep.mubr.bf16.mxu0 %v3477_v11  ;;  %v3529_v11 = vld [vmem:[%s4514_s0 + $0x128] ss:$100 sps:$4 sm:$0xff]  }
  0xa4   :  { %2406 = vmatmul.mubr.bf16.vlgmr.msra.gmra.mxu1 %v3468_v3  ;;  %3172 = vmatprep.subr.bf16.mxu0 %v3474_v8  ;;  %v3526_v8 = vld [vmem:[%s4513_s1 + $0x608] sm:$0xff]  }
  0xa5   :  { %3199 = vmatpush3.bf16.msra.mxu1 %v3473_v7  ;;  %2413 = vmatprep.mubr.bf16.mxu1 %v3482_v15 }
  0xa6   :  { %3200 = vmatprep.subr.bf16.mxu1 %v3476_v10 }
  0xa7   :  { %3173 = vmatpush3.bf16.msra.mxu0 %v3475_v9  ;;  %v3527_v9 = vld [vmem:[%s4513_s1 + $0x600] sm:$0xff]  }
  0xa8   :  { %3174 = vmatprep.subr.bf16.mxu0 %v3481_v14 }
  0xa9   :  { %3201 = vmatpush3.bf16.msra.mxu1 %v3479_v12 }
  0xaa   :  { %2365 = vmatmul.mubr.bf16.gmra.mxu0 %v3480_v13  ;;  %3202 = vmatprep.subr.bf16.mxu1 %v3486_v18 }
  0xab   :  { %3175 = vmatpush3.bf16.msra.mxu0 %v3484_v16  ;;  %2454 = vmatprep.mubr.bf16.mxu0 %v3509_v40 }
  0xac   :  { %2414 = vmatmul.mubr.bf16.gmra.mxu1 %v3485_v17  ;;  %3176 = vmatprep.subr.bf16.mxu0 %v3488_v20 }
  0xad   :  { %3203 = vmatpush3.bf16.msra.mxu1 %v3487_v19  ;;  %2503 = vmatprep.mubr.bf16.mxu1 %v3514_v44 }
  0xae   :  { %3204 = vmatprep.subr.bf16.mxu1 %v3490_v22 }
  0xaf   :  { %3177 = vmatpush3.bf16.msra.mxu0 %v3489_v21 }
  0xb0   :  { %3178 = vmatprep.subr.bf16.mxu0 %v3492_v24 }
  0xb1   :  { %3205 = vmatpush3.bf16.msra.mxu1 %v3491_v23 }
  0xb2   :  { %3206 = vmatprep.subr.bf16.mxu1 %v3494_v26 }
  0xb3   :  { %3179 = vmatpush3.bf16.msra.mxu0 %v3493_v25 }
  0xb4   :  { %3180 = vmatprep.subr.bf16.mxu0 %v3496_v28 }
  0xb5   :  { %3207 = vmatpush3.bf16.msra.mxu1 %v3495_v27 }
  0xb6   :  { %3208 = vmatprep.subr.bf16.mxu1 %v3498_v30 }
  0xb7   :  { %3181 = vmatpush3.bf16.msra.mxu0 %v3497_v29 }
  0xb8   :  { %3182 = vmatprep.subr.bf16.mxu0 %v3500_v32 }
  0xb9   :  { %3209 = vmatpush3.bf16.msra.mxu1 %v3499_v31 }
  0xba   :  { %3210 = vmatprep.subr.bf16.mxu1 %v3502_v34 }
  0xbb   :  { %3183 = vmatpush3.bf16.msra.mxu0 %v3501_v33 }
  0xbc   :  { %3184 = vmatprep.subr.bf16.mxu0 %v3504_v36 }
  0xbd   :  { %3211 = vmatpush3.bf16.msra.mxu1 %v3503_v35 }
  0xbe   :  { %3212 = vmatprep.subr.bf16.mxu1 %v3506_v38 }
  0xbf   :  { %3185 = vmatpush3.bf16.msra.mxu0 %v3505_v37 }
  0xc0   :  { %3236 = vmatprep.subr.bf16.mxu0 %v3511_v42 }
  0xc1   :  { %3213 = vmatpush3.bf16.msra.mxu1 %v3510_v41 }
  0xc2   :  { %2455 = vmatmul.mubr.bf16.vlgmr.msra.gmra.mxu0 %v3507_v39 }
  0xc3   :  { %3237 = vmatpush3.bf16.msra.mxu0 %v3511_v42  ;;  %2462 = vmatprep.mubr.bf16.mxu0 %v3516_v46 }
  0xc4   :  { %2504 = vmatmul.mubr.bf16.vlgmr.msra.gmra.mxu1 %v3512_v43  ;;  %3238 = vmatprep.subr.bf16.mxu0 %v3515_v45 }
  0xc5   :  { %2511 = vmatprep.mubr.bf16.mxu1 %v3520_v49 }
  0xc7   :  { %3239 = vmatpush3.bf16.msra.mxu0 %v3515_v45 }
  0xc8   :  { %3240 = vmatprep.subr.bf16.mxu0 %v3519_v48 }
  0xca   :  { %2463 = vmatmul.mubr.bf16.gmra.mxu0 %v3518_v47 }
  0xcb   :  { %3241 = vmatpush3.bf16.msra.mxu0 %v3519_v48  ;;  %3252 = vmatprep.mubr.bf16.mxu0 %v3528_v58 }
  0xcc   :  { %3242 = vmatprep.subr.bf16.mxu0 %v3523_v51  ;;  %2512 = vmatmul.mubr.bf16.gmra.mxu1 %v3522_v52 }
  0xcf   :  { %3243 = vmatpush3.bf16.msra.mxu0 %v3523_v51 }
  0xd0   :  { %3244 = vmatprep.subr.bf16.mxu0 %v3524_v56 }
  0xd3   :  { %3245 = vmatpush3.bf16.msra.mxu0 %v3524_v56 }
  0xd4   :  { %3246 = vmatprep.subr.bf16.mxu0 %v3525_v2 }
  0xd7   :  { %3247 = vmatpush3.bf16.msra.mxu0 %v3525_v2 }
  0xd8   :  { %3248 = vmatprep.subr.bf16.mxu0 %v3526_v8 }
  0xdb   :  { %3249 = vmatpush3.bf16.msra.mxu0 %v3526_v8 }
  0xdc   :  { %3250 = vmatprep.subr.bf16.mxu0 %v3527_v9 }
  0xdf   :  { %3251 = vmatpush3.bf16.msra.mxu0 %v3527_v9 }
  0xe2   :  { %v2906_v50 = vpop.f32.mrf.mxu0  ;;  %3253 = vmatmul.mubr.bf16.vlgmr.msra.gmra.mxu0 %v3529_v11 }
  0xe4   :  { %v2907_v53 = vpop.f32.mrf.mxu0  ;;  %v2934_v55 = vpop.f32.mrf.mxu1 }
  0xe5   :  { %v2908_v54 = vadd.f32 %v2907_v53, %v2906_v50 }
  0xe6   :  { %v2909_v57 = vpop.f32.mrf.mxu0  ;;  %v2935_v59 = vpop.f32.mrf.mxu1 }
  0xe7   :  { %v2936_v60 = vadd.f32 %v2935_v59, %v2934_v55  ;;  %v1967_v1 = vadd.f32 %v2908_v54, %v4303_v62 }
  0xe8   :  { %v2910_v61 = vpop.f32.mrf.mxu0  ;;  %v2937_v0 = vpop.f32.mrf.mxu1 }
  0xe9   :  { %v2911_v63 = vadd.f32 %v2910_v61, %v2909_v57  ;;  %v2016_v5 = vadd.f32 %v2936_v60, %v1967_v1 }
  0xea   :  { %v2938_v4 = vpop.f32.mrf.mxu1  ;;  %v2912_v10 = vpop.f32.mrf.mxu0 }
  0xeb   :  { %v1970_v3 = vadd.f32 %v2911_v63, %v4303_v62  ;;  %v2939_v6 = vadd.f32 %v2938_v4, %v2937_v0 }
  0xec   :  { %v2913_v12 = vpop.f32.mrf.mxu0  ;;  %v2940_v14 = vpop.f32.mrf.mxu1 }
  0xed   :  { %v4310_v7 = vadd.f32 %v2939_v6, %v1970_v3  ;;  %v2914_v13 = vadd.f32 %v2913_v12, %v2912_v10 }
  0xee   :  { %v2915_v15 = vpop.f32.mrf.mxu0  ;;  %v2941_v17 = vpop.f32.mrf.mxu1 }
  0xef   :  { %v1975_v16 = vadd.f32 %v2914_v13, %v4303_v62  ;;  %v2942_v19 = vadd.f32 %v2941_v17, %v2940_v14 }
  0xf0   :  { %v2916_v18 = vpop.f32.mrf.mxu0  ;;  %v4328_v26 = vpop.f32.mrf.mxu1 }
  0xf1   :  { %v4322_v20 = vadd.f32 %v2916_v18, %v2915_v15  ;;  %v4324_v21 = vadd.f32 %v2942_v19, %v1975_v16 }
  0xf2   :  { %v4330_v27 = vpop.f32.mrf.mxu1 }
 0x102   :  { %v2962_v22 = vpop.f32.mrf.mxu0 }
 0x104   :  { %v2963_v23 = vpop.f32.mrf.mxu0  ;;  %v4332_v28 = vpop.f32.mrf.mxu1 }
 0x105   :  { %v2964_v24 = vadd.f32 %v2963_v23, %v2962_v22 }
 0x106   :  { %v2965_v29 = vpop.f32.mrf.mxu0  ;;  %v4334_v30 = vpop.f32.mrf.mxu1 }
 0x107   :  { %v4326_v25 = vadd.f32 %v2964_v24, %v2016_v5 }
 0x108   :  { %v2966_v31 = vpop.f32.mrf.mxu0  ;;  %v4336_v32 = vpop.f32.mrf.mxu1 }
 0x10a   :  { %v2968_v33 = vpop.f32.mrf.mxu0  ;;  %v4338_v34 = vpop.f32.mrf.mxu1 }
 0x10c   :  { %v2969_v35 = vpop.f32.mrf.mxu0  ;;  %v4340_v36 = vpop.f32.mrf.mxu1 }
 0x10e   :  { %v4342_v37 = vpop.f32.mrf.mxu0  ;;  %v4344_v38 = vpop.f32.mrf.mxu1 }
 0x110   :  { %v2972_v39 = vpop.f32.mrf.mxu0  ;;  %v4346_v40 = vpop.f32.mrf.mxu1 }
 0x112   :  { %v4348_v42 = vpop.f32.mrf.mxu1 }
 0x122   :  { %v3018_v41 = vpop.f32.mrf.mxu0 }
 0x124   :  { %v3019_v43 = vpop.f32.mrf.mxu0  ;;  %v4350_v44 = vpop.f32.mrf.mxu1 }
 0x126   :  { %v3021_v45 = vpop.f32.mrf.mxu0  ;;  %v4352_v46 = vpop.f32.mrf.mxu1 }
 0x128   :  { %v3022_v47 = vpop.f32.mrf.mxu0  ;;  %v4354_v48 = vpop.f32.mrf.mxu1 }
 0x12a   :  { %v3024_v49 = vpop.f32.mrf.mxu0  ;;  %v4356_v50 = vpop.f32.mrf.mxu1 }
 0x12c   :  { %v3025_v51 = vpop.f32.mrf.mxu0  ;;  %v4358_v52 = vpop.f32.mrf.mxu1 }
 0x12e   :  { %v4360_v53 = vpop.f32.mrf.mxu0  ;;  %v4362_v54 = vpop.f32.mrf.mxu1 }
 0x130   :  { %v4364_v55 = vpop.f32.mrf.mxu0  ;;  %v4366_v56 = vpop.f32.mrf.mxu1 }
 0x132   :  { %v4370_v58 = vpop.f32.mrf.mxu1 }
 0x142   :  { %v4368_v57 = vpop.f32.mrf.mxu0 }
 0x144   :  { %v4372_v59 = vpop.f32.mrf.mxu0  ;;  %v4374_v60 = vpop.f32.mrf.mxu1 }
 0x146   :  { %v4376_v61 = vpop.f32.mrf.mxu0  ;;  %v4378_v63 = vpop.f32.mrf.mxu1 }
 0x148   :  { %v3078_v0 = vpop.f32.mrf.mxu0  ;;  %v4380_v1 = vpop.f32.mrf.mxu1 }
 0x14a   :  { %v3080_v2 = vpop.f32.mrf.mxu0  ;;  %v4382_v3 = vpop.f32.mrf.mxu1 }
 0x14c   :  { %v3081_v4 = vpop.f32.mrf.mxu0  ;;  %v4384_v5 = vpop.f32.mrf.mxu1 }
 0x14e   :  { %v4386_v6 = vpop.f32.mrf.mxu0  ;;  %v4388_v8 = vpop.f32.mrf.mxu1 }
 0x150   :  { %v4390_v9 = vpop.f32.mrf.mxu0  ;;  %v4392_v10 = vpop.f32.mrf.mxu1 }
 0x151   :  { %4519 = vst [vmem:[#allocation2_spill] sm:$0xff] %v4392_v10 }
 0x152   :  { %v4396_v12 = vpop.f32.mrf.mxu1 }
 0x153   :  { %4520 = vst [vmem:[#allocation3_spill] sm:$0xff] %v4396_v12 }
 0x162   :  { %v4394_v11 = vpop.f32.mrf.mxu0 }
 0x164   :  { %v4398_v13 = vpop.f32.mrf.mxu0  ;;  %v4400_v14 = vpop.f32.mrf.mxu1 }
 0x165   :  { %4521 = vst [vmem:[#allocation4_spill] sm:$0xff] %v4398_v13  ;;  %4522 = vst [vmem:[#allocation5_spill] sm:$0xff] %v4400_v14 }
 0x166   :  { %v4402_v15 = vpop.f32.mrf.mxu0  ;;  %v4404_v16 = vpop.f32.mrf.mxu1 }
 0x167   :  { %4523 = vst [vmem:[#allocation6_spill] sm:$0xff] %v4402_v15  ;;  %4524 = vst [vmem:[#allocation7_spill] sm:$0xff] %v4404_v16 }
 0x168   :  { %v4406_v17 = vpop.f32.mrf.mxu0  ;;  %v4408_v18 = vpop.f32.mrf.mxu1 }
 0x169   :  { %4525 = vst [vmem:[#allocation8_spill] sm:$0xff] %v4406_v17  ;;  %4526 = vst [vmem:[#allocation9_spill] sm:$0xff] %v4408_v18  ;;  %v2967_v18 = vadd.f32 %v2966_v31, %v2965_v29  ;;  %v2973_v29 = vadd.f32 %v2972_v39, %v4342_v37 }
 0x16a   :  { %v4410_v19 = vpop.f32.mrf.mxu0  ;;  %v4412_v22 = vpop.f32.mrf.mxu1 }
 0x16b   :  { %4527 = vst [vmem:[#allocation10_spill] sm:$0xff] %v4410_v19  ;;  %4528 = vst [vmem:[#allocation11_spill] sm:$0xff] %v4412_v22  ;;  %v2970_v19 = vadd.f32 %v2969_v35, %v2968_v33  ;;  %v2998_v33 = vadd.f32 %v4344_v38, %v4340_v36  ;;  %v3020_v35 = vadd.f32 %v3019_v43, %v3018_v41 }
 0x16c   :  { %v4414_v23 = vpop.f32.mrf.mxu0  ;;  %v4416_v24 = vpop.f32.mrf.mxu1  ;;  %v3051_v41 = vadd.f32 %v4356_v50, %v4354_v48  ;;  %v3057_v48 = vadd.f32 %v4370_v58, %v4366_v56 }
 0x16d   :  { %4529 = vst [vmem:[#allocation12_spill] sm:$0xff] %v4416_v24  ;;  %v1978_v24 = vadd.f32 %v4322_v20, %v4303_v62  ;;  %v2073_v31 = vadd.f32 %v2970_v19, %v4324_v21  ;;  %v3048_v21 = vadd.f32 %v4352_v46, %v4350_v44  ;;  %v3082_v46 = vadd.f32 %v3081_v4, %v3080_v2 }
 0x16e   :  { %v4418_v12 = vpop.f32.mrf.mxu0  ;;  %v4420_v10 = vpop.f32.mrf.mxu1 }
 0x16f   :  { %4530 = vst [vmem:[#allocation13_spill] sm:$0xff] %v4420_v10  ;;  %v2945_v10 = vadd.f32 %v4330_v27, %v4328_v26  ;;  %v3023_v27 = vadd.f32 %v3022_v47, %v3021_v45  ;;  %v3054_v45 = vadd.f32 %v4362_v54, %v4358_v52  ;;  %v3079_v47 = vadd.f32 %v3078_v0, %v4376_v61  ;;  %v4534_v0 = vld [vmem:[#allocation4_spill] sm:$0xff] }
 0x170   :  { %v4422_v14 = vpop.f32.mrf.mxu0  ;;  %v4424_v15 = vpop.f32.mrf.mxu1  ;;  %v3104_v52 = vadd.f32 %v4378_v63, %v4374_v60  ;;  %v3110_v61 = vadd.f32 %v4388_v8, %v4384_v5  ;;  %v3132_v2 = vadd.f32 %v4534_v0, %v4394_v11  ;;  %v4540_v8 = vld [vmem:[#allocation5_spill] sm:$0xff] }
 0x171   :  { %4531 = vst [vmem:[#allocation14_spill] sm:$0xff] %v4422_v14  ;;  %4532 = vst [vmem:[#allocation15_spill] sm:$0xff] %v4424_v15  ;;  %v2992_v14 = vadd.f32 %v4334_v30, %v4332_v28  ;;  %v2068_v15 = vadd.f32 %v2967_v18, %v4310_v7  ;;  %v2027_v26 = vadd.f32 %v2945_v10, %v1978_v24 }
 0x172   :  { %v4428_v17 = vpop.f32.mrf.mxu1  ;;  %v3026_v30 = vadd.f32 %v3025_v51, %v3024_v49  ;;  %v4537_v19 = vld [vmem:[#allocation10_spill] sm:$0xff] }
 0x173   :  { %4533 = vst [vmem:[#allocation16_spill] sm:$0xff] %v4428_v17  ;;  %v2995_v17 = vadd.f32 %v4338_v34, %v4336_v32  ;;  %v2114_v28 = vadd.f32 %v2992_v14, %v4326_v25  ;;  %v2076_v18 = vadd.f32 %v2973_v29, %v2027_v26  ;;  %v3001_v32 = vadd.f32 %v4348_v42, %v4346_v40 }
 0x174   :  { %v2122_v34 = vadd.f32 %v2998_v33, %v2073_v31  ;;  %v3029_v25 = vadd.f32 %v4364_v55, %v4360_v53  ;;  %v3076_v40 = vadd.f32 %v4372_v59, %v4368_v57  ;;  %v3107_v55 = vadd.f32 %v4382_v3, %v4380_v1  ;;  %v4541_v33 = vld [vmem:[#allocation7_spill] sm:$0xff] }
 0x175   :  { %v2117_v7 = vadd.f32 %v2995_v17, %v2068_v15  ;;  %v2163_v37 = vadd.f32 %v3020_v35, %v2114_v28  ;;  %v2125_v42 = vadd.f32 %v3001_v32, %v2076_v18  ;;  %v3085_v57 = vadd.f32 %v4390_v9, %v4386_v6  ;;  %v4535_v15 = vld [vmem:[#allocation6_spill] sm:$0xff]  ;;  %v4536_v17 = vld [vmem:[#allocation8_spill] sm:$0xff]  ;;  %v4539_v9 = vld [vmem:[#allocation3_spill] sm:$0xff] }
 0x176   :  { %v2171_v43 = vadd.f32 %v3026_v30, %v2122_v34  ;;  %v3135_v60 = vadd.f32 %v4536_v17, %v4535_v15  ;;  %v3138_v1 = vadd.f32 %v4414_v23, %v4537_v19  ;;  %v4538_v6 = vld [vmem:[#allocation2_spill] sm:$0xff]  ;;  %v3160_v11 = vadd.f32 %v4541_v33, %v4540_v8  ;;  %v4542_v28 = vld [vmem:[#allocation9_spill] sm:$0xff]  ;;  %v4543_v30 = vld [vmem:[#allocation11_spill] sm:$0xff] }
 0x177   :  { %v2166_v39 = vadd.f32 %v3023_v27, %v2117_v7  ;;  %v2212_v44 = vadd.f32 %v3048_v21, %v2163_v37  ;;  %v2174_v14 = vadd.f32 %v3029_v25, %v2125_v42  ;;  %v3113_v29 = vadd.f32 %v4539_v9, %v4538_v6  ;;  %v4545_v34 = vld [vmem:[#allocation12_spill] sm:$0xff]  ;;  %v4546_v37 = vld [vmem:[#allocation13_spill] sm:$0xff] }
 0x178   :  { %v2220_v50 = vadd.f32 %v3054_v45, %v2171_v43  ;;  %v3163_v7 = vadd.f32 %v4543_v30, %v4542_v28  ;;  %v4544_v18 = vld [vmem:[#allocation14_spill] sm:$0xff]  ;;  %v3166_v21 = vadd.f32 %v4546_v37, %v4545_v34 }
 0x179   :  { %v2215_v10 = vadd.f32 %v3051_v41, %v2166_v39  ;;  %v2261_v53 = vadd.f32 %v3076_v40, %v2212_v44  ;;  %v2223_v4 = vadd.f32 %v3057_v48, %v2174_v14  ;;  %v3141_v32 = vadd.f32 %v4544_v18, %v4418_v12  ;;  %v4547_v44 = vld [vmem:[#allocation15_spill] sm:$0xff] }
 0x17a   :  { %v2269_v59 = vadd.f32 %v3082_v46, %v2220_v50  ;;  %v4548_v46 = vld [vmem:[#allocation16_spill] sm:$0xff] }
 0x17b   :  { %v2264_v54 = vadd.f32 %v3079_v47, %v2215_v10  ;;  %v2310_v63 = vadd.f32 %v3104_v52, %v2261_v53  ;;  %v2272_v24 = vadd.f32 %v3085_v57, %v2223_v4  ;;  %v3169_v10 = vadd.f32 %v4548_v46, %v4547_v44 }
 0x17c   :  { %v2318_v31 = vadd.f32 %v3110_v61, %v2269_v59 }
 0x17d   :  { %v2313_v3 = vadd.f32 %v3107_v55, %v2264_v54  ;;  %v2359_v5 = vadd.f32 %v3132_v2, %v2310_v63  ;;  %v2321_v41 = vadd.f32 %v3113_v29, %v2272_v24 }
 0x17e   :  { %v2367_v23 = vadd.f32 %v3138_v1, %v2318_v31 }
 0x17f   :  { %v2362_v27 = vadd.f32 %v3135_v60, %v2313_v3  ;;  %v2408_v43 = vadd.f32 %v3160_v11, %v2359_v5  ;;  %v2370_v47 = vadd.f32 %v3141_v32, %v2321_v41 }
 0x180   :  { %v2416_v48 = vadd.f32 %v3166_v21, %v2367_v23 }
 0x181   :  { %v2411_v42 = vadd.f32 %v3163_v7, %v2362_v27 }
 0x182   :  { %v4426_v16 = vpop.f32.mrf.mxu0 }
 0x184   :  { %v4430_v13 = vpop.f32.mrf.mxu0  ;;  %v4432_v22 = vpop.f32.mrf.mxu1 }
 0x185   :  { %v3188_v39 = vadd.f32 %v4430_v13, %v4426_v16 }
 0x186   :  { %v3189_v62 = vpop.f32.mrf.mxu0  ;;  %v4447_v20 = vpop.f32.mrf.mxu1 }
 0x187   :  { %v2457_v12 = vadd.f32 %v3188_v39, %v2408_v43  ;;  %v3216_v53 = vadd.f32 %v4447_v20, %v4432_v22 }
 0x188   :  { %v3190_v36 = vpop.f32.mrf.mxu0  ;;  %v3217_v38 = vpop.f32.mrf.mxu1 }
 0x189   :  { %v3191_v25 = vadd.f32 %v3190_v36, %v3189_v62  ;;  %v2419_v36 = vadd.f32 %v3169_v10, %v2370_v47  ;;  %v2506_v2 = vadd.f32 %v3216_v53, %v2457_v12  ;;  %v2889_v47 = vld [vmem:[%s4517_s4] ss:$0 sm:$0xff] }
 0x18a   :  { %v3192_v49 = vpop.f32.mrf.mxu0  ;;  %v3218_v51 = vpop.f32.mrf.mxu1 }
 0x18b   :  { %v2460_v52 = vadd.f32 %v3191_v25, %v2411_v42  ;;  %v3219_v54 = vadd.f32 %v3218_v51, %v3217_v38  ;;  %v2888_v25 = vld [vmem:[%s4516_s3] ss:$0 sm:$0xff] }
 0x18c   :  { %v3193_v56 = vpop.f32.mrf.mxu0  ;;  %v3220_v58 = vpop.f32.mrf.mxu1 }
 0x18d   :  { %v3194_v14 = vadd.f32 %v3193_v56, %v3192_v49  ;;  %v2509_v4 = vadd.f32 %v3219_v54, %v2460_v52 }
 0x18e   :  { %v3195_v35 = vpop.f32.mrf.mxu0  ;;  %v3221_v26 = vpop.f32.mrf.mxu1 }
 0x18f   :  { %v2465_v55 = vadd.f32 %v3194_v14, %v2416_v48  ;;  %v3222_v57 = vadd.f32 %v3221_v26, %v3220_v58 }
 0x190   :  { %v3196_v45 = vpop.f32.mrf.mxu0  ;;  %v3223_v40 = vpop.f32.mrf.mxu1 }
 0x191   :  { %v3197_v13 = vadd.f32 %v3196_v45, %v3195_v35  ;;  %v2514_v56 = vadd.f32 %v3222_v57, %v2465_v55 }
 0x192   :  { %v3224_v16 = vpop.f32.mrf.mxu1 }
 0x193   :  { %v2468_v61 = vadd.f32 %v3197_v13, %v2419_v36  ;;  %v3225_v0 = vadd.f32 %v3224_v16, %v3223_v40 }
 0x195   :  { %v2517_v63 = vadd.f32 %v3225_v0, %v2468_v61 }
 0x1a2   :  { %v3254_v50 = vpop.f32.mrf.mxu0 }
 0x1a3   :  { %v2563_v60 = vadd.f32 %v3254_v50, %v2514_v56 }
 0x1a4   :  { %v2554_v62 = vpop.f32.mrf.mxu0 }
 0x1a5   :  { %v2555_v15 = vadd.f32 %v2554_v62, %v2506_v2 }
 0x1a6   :  { %v3255_v59 = vpop.f32.mrf.mxu0 }
 0x1a7   :  { %v2566_v20 = vadd.f32 %v3255_v59, %v2517_v63 }
 0x1a8   :  { %v2557_v49 = vpop.f32.mrf.mxu0 }
 0x1a9   :  { %v2558_v17 = vadd.f32 %v2557_v49, %v2509_v4 }
 0x1ab   :  { %v2569_v22 = vadd.f32 %v2558_v17, %v2555_v15 }
 0x1ad   :  { %v2570_v38 = vadd.f32 %v2569_v22, %v2563_v60 }
 0x1af   :  { %v2571_v51 = vadd.f32 %v2570_v38, %v2566_v20 }
 0x1b1   :  { %v2572_v19 = vrot.slane %v2571_v51, 4 }
 0x1b3   :  { %v2573_v1 = vadd.f32 %v2572_v19, %v2571_v51 }
 0x1b5   :  { %v2574_v3 = vrot.slane %v2573_v1, 2 }
 0x1b7   :  { %v2575_v24 = vadd.f32 %v2574_v3, %v2573_v1 }
 0x1b9   :  { %v2576_v58 = vrot.slane %v2575_v24, 1 }
 0x1bb   :  { %v2577_v6 = vadd.f32 %v2576_v58, %v2575_v24 }
 0x1bd   :  { %v2578_v9 = vmul.f32 0.03125, %v2577_v6 }
 0x1bf   :  { %v2579_v29 = vsub.f32 %v2555_v15, %v2578_v9  ;;  %v2580_v31 = vsub.f32 %v2558_v17, %v2578_v9  ;;  %v2581_v5 = vsub.f32 %v2563_v60, %v2578_v9  ;;  %v2582_v8 = vsub.f32 %v2566_v20, %v2578_v9 }
 0x1c1   :  { %v2583_v33 = vmul.f32 %v2579_v29, %v2579_v29  ;;  %v2584_v11 = vmul.f32 %v2580_v31, %v2580_v31  ;;  %v2585_v35 = vmul.f32 %v2581_v5, %v2581_v5  ;;  %v2586_v27 = vmul.f32 %v2582_v8, %v2582_v8 }
 0x1c3   :  { %v2587_v26 = vadd.f32 %v2584_v11, %v2583_v33 }
 0x1c5   :  { %v2588_v28 = vadd.f32 %v2587_v26, %v2585_v35 }
 0x1c7   :  { %v2589_v30 = vadd.f32 %v2588_v28, %v2586_v27 }
 0x1c9   :  { %v2590_v7 = vrot.slane %v2589_v30, 4 }
 0x1cb   :  { %v2591_v18 = vadd.f32 %v2590_v7, %v2589_v30 }
 0x1cd   :  { %v2592_v32 = vrot.slane %v2591_v18, 2 }
 0x1cf   :  { %v2593_v23 = vadd.f32 %v2592_v32, %v2591_v18 }
 0x1d1   :  { %v2594_v34 = vrot.slane %v2593_v23, 1 }
 0x1d3   :  { %v2595_v37 = vadd.f32 %v2594_v34, %v2593_v23 }
 0x1d5   :  { %v2596_v21 = vmul.f32 0.03125, %v2595_v37 }
 0x1d7   :  { %v2597_v39 = vadd.f32 1e-05, %v2596_v21 }
 0x1d9   :  { %3530 = vrsqrt.f32 %v2597_v39 }
 0x1e6   :  { %v3531_v41 = vpop.eup %3530 }
 0x1e7   :  { %v2599_v43 = vmul.f32 %v3531_v41, %v2579_v29  ;;  %v2600_v45 = vmul.f32 %v3531_v41, %v2580_v31  ;;  %v2601_v40 = vmul.f32 %v3531_v41, %v2581_v5  ;;  %v2602_v42 = vmul.f32 %v3531_v41, %v2582_v8 }
 0x1e9   :  { %v2610_v44 = vmul.f32 %v2888_v25, %v2599_v43  ;;  %v2611_v46 = vmul.f32 %v2888_v25, %v2600_v45  ;;  %v2612_v10 = vmul.f32 %v2888_v25, %v2601_v40  ;;  %v2613_v14 = vmul.f32 %v2888_v25, %v2602_v42 }
 0x1eb   :  { %v2621_v48 = vadd.f32 %v2889_v47, %v2610_v44  ;;  %v2622_v12 = vadd.f32 %v2889_v47, %v2611_v46  ;;  %v2623_v50 = vadd.f32 %v2889_v47, %v2612_v10  ;;  %v2624_v53 = vadd.f32 %v2889_v47, %v2613_v14 }
 0x1ed   :  { %v2625_v52 = vmax.f32 %v2621_v48, 0.0  ;;  %v2626_v54 = vmax.f32 %v2622_v12, 0.0  ;;  %v2627_v13 = vmax.f32 %v2623_v50, 0.0  ;;  %v2628_v16 = vmax.f32 %v2624_v53, 0.0 }
 0x1ef   :  { %2629 = vst [vmem:[%s4518_s5] sm:$0xff] %v2625_v52  ;;  %2630 = vst [vmem:[%s4518_s5 + $0x8] sm:$0xff] %v2626_v54 }
 0x1f0   :  { %2631 = vst [vmem:[%s4518_s5 + $0x10] sm:$0xff] %v2627_v13  ;;  %2632 = vst [vmem:[%s4518_s5 + $0x18] sm:$0xff] %v2628_v16 }

</bundles_post_ra>
